<compile_context>
chip_gen: v7x
topology: tpu7x:2x2x1
jax: 0.10.0
libtpu: 0.0.40
codegen_flags: <defaults>
</compile_context>

<pallas_src>
import math

import jax
import jax.numpy as jnp
from jax.experimental import pallas as pl
from jax.experimental.pallas import tpu as pltpu

# ----------------------------- small hyper-params -----------------------------
B = 2             # batch
NQ = 4            # n_q codebooks
T = 8             # time steps per call
CARD = 64         # codebook cardinality
DIM = 32          # transformer dim
NHEADS = 4
HEAD_DIM = DIM // NHEADS
NLAYERS = 2
HIDDEN = 4 * DIM          # hidden_scale = 4
HALF = DIM // 2
MAX_PERIOD = 10000.0
PAST_CONTEXT = 1000
EPS = 1e-5                # LayerNorm eps (PyTorch default)
EMB_PAD = 128             # per-codebook one-hot width (card+1=65 padded to 128)
CARD_PAD = 128            # per-codebook output-head lane padding
S_MAX = 128               # fixed K/V cache capacity (past + current), lane/sublane aligned


def _layernorm(x, w, b):
    mu = jnp.mean(x, axis=-1, keepdims=True)
    var = jnp.mean((x - mu) ** 2, axis=-1, keepdims=True)
    return (x - mu) * jax.lax.rsqrt(var + EPS) * w + b


def _gelu_tanh(x):
    # tanh-approx GELU (tanh lives on the EUP slot).
    # TODO(synk): PyTorch F.gelu defaults to the exact erf form (~1e-3 deviation).
    c = math.sqrt(2.0 / math.pi)
    return 0.5 * x * (1.0 + jnp.tanh(c * (x + 0.044715 * x * x * x)))


# ------------------------------ fused forward kernel ------------------------------
def _fused_kernel(scal_ref, idx_ref, emb_ref, nin_ref,
                  wqkv_ref, bqkv_ref, wout_ref,
                  w1_ref, b1_ref, w2_ref, ln_ref,
                  hw_ref, hb_ref, kvc_ref,
                  probs_ref, kvout_ref):
    cache_len = scal_ref[0]                       # valid past rows in the cache
    off_f = scal_ref[1].astype(jnp.float32)       # absolute offset of the first new token
    scale = 1.0 / math.sqrt(HEAD_DIM)

    # -- 0. carry the resident K/V cache forward (output aliases the input HBM
    #       buffer; write the full slab once, new rows are overwritten below) --
    kvout_ref[...] = kvc_ref[...]

    # -- 1. embedding sum: lane-aligned one-hot, ONE MXU matmul -----------------
    col = jax.lax.broadcasted_iota(jnp.int32, (B * T, NQ * EMB_PAD), 1)
    onehot = jnp.zeros((B * T, NQ * EMB_PAD), jnp.float32)
    for k in range(NQ):
        onehot = onehot + (col == (idx_ref[:, k:k + 1] + k * EMB_PAD)).astype(jnp.float32)
    x2d = jnp.dot(onehot, emb_ref[...], preferred_element_type=jnp.float32)   # [B*T, DIM]

    # -- 2. norm_in + sinusoidal positional embedding (built in-kernel) ---------
    x2d = _layernorm(x2d, nin_ref[0], nin_ref[1])
    t3 = jax.lax.broadcasted_iota(jnp.int32, (B, T, DIM), 1).reshape(B * T, DIM)
    coli = jax.lax.broadcasted_iota(jnp.int32, (B * T, DIM), 1)
    tpos = t3.astype(jnp.float32) + off_f
    adim = jnp.where(coli < HALF, coli, coli - HALF).astype(jnp.float32)
    inv_freq = jnp.exp(adim * (-math.log(MAX_PERIOD) / (HALF - 1)))
    phase = tpos * inv_freq
    x2d = x2d + jnp.where(coli < HALF, jnp.cos(phase), jnp.sin(phase))

    # -- 3. additive attention mask, built once, hoisted over all layers --------
    r_i = jax.lax.broadcasted_iota(jnp.int32, (T, S_MAX), 1)   # key row
    q_i = jax.lax.broadcasted_iota(jnp.int32, (T, S_MAX), 0)   # query index
    delta = q_i + cache_len - r_i
    valid = (r_i < cache_len + T) & (delta >= 0) & (delta <= PAST_CONTEXT)
    maskb = jnp.where(valid, 0.0, -1e9)[None, :, :]            # f32 kernel -> -1e9 is safe

    # -- 4. NLAYERS streaming encoder layers (post-norm MHA + GELU MLP) ---------
    for li in range(NLAYERS):
        x_res = x2d
        attn2d = jnp.zeros((B * T, DIM), jnp.float32)
        for h in range(NHEADS):
            # per-head projections of ONLY the new T tokens (weights pre-split on host)
            q_h = (jnp.dot(x2d, wqkv_ref[li, 0, h], preferred_element_type=jnp.float32)
                   + bqkv_ref[li, 0, h])
            k_h = (jnp.dot(x2d, wqkv_ref[li, 1, h], preferred_element_type=jnp.float32)
                   + bqkv_ref[li, 1, h])
            v_h = (jnp.dot(x2d, wqkv_ref[li, 2, h], preferred_element_type=jnp.float32)
                   + bqkv_ref[li, 2, h])
            # append this step's K/V rows to the resident cache
            for b in range(B):
                kvout_ref[li, 0, h, b, pl.ds(cache_len, T), :] = k_h[b * T:(b + 1) * T, :]
                kvout_ref[li, 1, h, b, pl.ds(cache_len, T), :] = v_h[b * T:(b + 1) * T, :]
            k_all = kvout_ref[li, 0, h]            # [B, S_MAX, HEAD_DIM]
            v_all = kvout_ref[li, 1, h]

            sc = jnp.einsum('btd,bsd->bts', q_h.reshape(B, T, HEAD_DIM), k_all,
                            preferred_element_type=jnp.float32) * scale + maskb
            m = jnp.max(sc, axis=-1, keepdims=True)
            e = jnp.exp(sc - m)
            p = e * pl.reciprocal(jnp.sum(e, axis=-1, keepdims=True), approx=True)
            o_h = jnp.einsum('bts,bsd->btd', p, v_all,
                             preferred_element_type=jnp.float32)        # [B, T, HEAD_DIM]
            # output projection as a sum of per-head matmuls (no concat needed)
            attn2d = attn2d + jnp.dot(o_h.reshape(B * T, HEAD_DIM), wout_ref[li, h],
                                      preferred_element_type=jnp.float32)
        attn2d = attn2d + ln_ref[li, 0]            # out_proj bias

        # post-norm (norm_first=False): x = norm1(x + sa(x)); x = norm2(x + ff(x))
        y2d = _layernorm(x_res + attn2d, ln_ref[li, 1], ln_ref[li, 2])
        h1 = jnp.dot(y2d, w1_ref[li], preferred_element_type=jnp.float32) + b1_ref[li]
        ff = (jnp.dot(_gelu_tanh(h1), w2_ref[li], preferred_element_type=jnp.float32)
              + ln_ref[li, 5])
        x2d = _layernorm(y2d + ff, ln_ref[li, 3], ln_ref[li, 4])

    # -- 5. all NQ heads: one lane-dense matmul + 128-lane-aligned softmaxes ----
    logits = jnp.dot(x2d, hw_ref[...], preferred_element_type=jnp.float32) + hb_ref[...]
    for k in range(NQ):
        lg = logits[:, k * CARD_PAD:(k + 1) * CARD_PAD]
        m = jnp.max(lg, axis=-1, keepdims=True)
        e = jnp.exp(lg - m)
        # exact divide for the FINAL softmax (correctness review)
        probs_ref[:, k * CARD_PAD:(k + 1) * CARD_PAD] = e / jnp.sum(e, axis=-1, keepdims=True)


@jax.jit
def fused_forward(scal, idx_bt, params, kv_cache):
    args = (scal, idx_bt, params["emb"], params["nin"],
            params["wqkv"], params["bqkv"], params["wout"],
            params["w1"], params["b1"], params["w2"], params["ln"],
            params["hw"], params["hb"], kv_cache)
    vmem = pl.BlockSpec(memory_space=pltpu.MemorySpace.VMEM)
    smem = pl.BlockSpec(memory_space=pltpu.MemorySpace.SMEM)
    return pl.pallas_call(
        _fused_kernel,
        out_shape=(jax.ShapeDtypeStruct((B * T, NQ * CARD_PAD), jnp.float32),
                   jax.ShapeDtypeStruct(kv_cache.shape, jnp.float32)),
        in_specs=[smem] + [vmem] * (len(args) - 1),
        out_specs=(vmem, vmem),
        input_output_aliases={len(args) - 1: 1},   # K/V cache stays resident
    )(*args)


# ------------------------------------ params / state ------------------------------------
def init_params(key):
    """Parameters generated directly in the kernel's fused/per-head layout."""
    ks = jax.random.split(key, 10)
    s_in = 1.0 / math.sqrt(DIM)

    emb = 0.02 * jax.random.normal(ks[0], (NQ, CARD + 1, DIM), jnp.float32)
    emb_pad = (jnp.zeros((NQ, EMB_PAD, DIM), jnp.float32)
               .at[:, :CARD + 1, :].set(emb).reshape(NQ * EMB_PAD, DIM))

    nin = jnp.zeros((2, 1, DIM), jnp.float32).at[0].set(1.0)   # norm_in: weight=1, bias=0

    wqkv = s_in * jax.random.normal(ks[1], (NLAYERS, 3, NHEADS, DIM, HEAD_DIM), jnp.float32)
    bqkv = 0.02 * jax.random.normal(ks[2], (NLAYERS, 3, NHEADS, 1, HEAD_DIM), jnp.float32)
    wout = s_in * jax.random.normal(ks[3], (NLAYERS, NHEADS, HEAD_DIM, DIM), jnp.float32)
    w1 = s_in * jax.random.normal(ks[4], (NLAYERS, DIM, HIDDEN), jnp.float32)
    b1 = 0.02 * jax.random.normal(ks[5], (NLAYERS, 1, HIDDEN), jnp.float32)
    w2 = (1.0 / math.sqrt(HIDDEN)) * jax.random.normal(ks[6], (NLAYERS, HIDDEN, DIM), jnp.float32)

    # packed per-layer DIM-vectors: [b_out, ln1_w, ln1_b, ln2_w, ln2_b, b2]
    ln = jnp.zeros((NLAYERS, 6, 1, DIM), jnp.float32)
    ln = ln.at[:, 1].set(1.0).at[:, 3].set(1.0)
    ln = ln.at[:, 0].set(0.02 * jax.random.normal(ks[7], (NLAYERS, 1, DIM), jnp.float32))
    ln = ln.at[:, 5].set(0.02 * jax.random.normal(ks[8], (NLAYERS, 1, DIM), jnp.float32))

    # output heads, padded per codebook to 128 lanes; pad-lane bias = -1e9
    hw_real = s_in * jax.random.normal(ks[9], (DIM, NQ, CARD), jnp.float32)
    hw = (jnp.zeros((DIM, NQ, CARD_PAD), jnp.float32)
          .at[:, :, :CARD].set(hw_real).reshape(DIM, NQ * CARD_PAD))
    hb = (jnp.full((1, NQ, CARD_PAD), -1e9, jnp.float32)
          .at[:, :, :CARD].set(0.0).reshape(1, NQ * CARD_PAD))

    return dict(emb=emb_pad, nin=nin, wqkv=wqkv, bqkv=bqkv, wout=wout,
                w1=w1, b1=b1, w2=w2, ln=ln, hw=hw, hb=hb)


def init_state(params):
    """Fresh streaming state: K/V of the single zero 'past' token the reference
    module starts with (its key/value are exactly the k/v projection biases)."""
    kv = jnp.zeros((NLAYERS, 2, NHEADS, B, S_MAX, HEAD_DIM), jnp.float32)
    bkv = params["bqkv"][:, 1:3, :, 0, :]                       # [NLAYERS, 2, NHEADS, HEAD_DIM]
    kv = kv.at[:, :, :, :, 0, :].set(
        jnp.broadcast_to(bkv[:, :, :, None, :], (NLAYERS, 2, NHEADS, B, HEAD_DIM)))
    return kv, 1                                                # (cache, valid past rows)


def lm_model_forward(params, indices, state=None, offset=0):
    """indices: [B, n_q, T] int32 (0 = missing, 1+idx otherwise).
    Returns (probs [B, card, n_q, T], new_state, new_offset)."""
    if state is None:
        state = init_state(params)
    kv_cache, cache_len = state
    if cache_len + T > S_MAX:
        # TODO(synk): ring-buffer eviction for streams longer than the fixed S_MAX
        # cache (the reference keeps a PAST_CONTEXT=1000 sliding window).
        raise ValueError("K/V cache capacity exceeded")

    scal = jnp.array([cache_len, offset], jnp.int32)
    idx_bt = jnp.transpose(indices.astype(jnp.int32), (0, 2, 1)).reshape(B * T, NQ)
    probs_pad, kv_new = fused_forward(scal, idx_bt, params, kv_cache)

    probs = probs_pad.reshape(B, T, NQ, CARD_PAD)[..., :CARD].transpose(0, 3, 2, 1)
    return probs, (kv_new, cache_len + T), offset + T


# ------------------------------ pure-JAX reference ------------------------------
def _mm(a, b):
    return jnp.matmul(a, b, precision=jax.lax.Precision.HIGHEST)


def reference_forward(params, indices, states, offset):
    """Mirror of the PyTorch LMModel (layer-input streaming state, full
    re-projection every call) used as a numerical check of the fused kernel."""
    hi = jax.lax.Precision.HIGHEST
    emb = params["emb"].reshape(NQ, EMB_PAD, DIM)
    x = jnp.zeros((B, T, DIM), jnp.float32)
    for k in range(NQ):
        x = x + emb[k][indices[:, k]]
    x = _layernorm(x, params["nin"][0], params["nin"][1])
    positions = (jnp.arange(T, dtype=jnp.float32) + offset).reshape(1, T, 1)
    adim = jnp.arange(HALF, dtype=jnp.float32).reshape(1, 1, HALF)
    phase = positions / (MAX_PERIOD ** (adim / (HALF - 1)))
    x = x + jnp.concatenate([jnp.cos(phase), jnp.sin(phase)], axis=-1)

    new_states = []
    for li in range(NLAYERS):
        x_past = states[li]
        hp = x_past.shape[1]
        sa_input = x
        keys_in = jnp.concatenate([x_past, x], axis=1)
        wq, wk, wv = [jnp.transpose(params["wqkv"][li, j], (1, 0, 2)).reshape(DIM, DIM)
                      for j in range(3)]
        bq, bk, bv = [params["bqkv"][li, j, :, 0, :].reshape(DIM) for j in range(3)]
        q = _mm(x, wq) + bq
        kk = _mm(keys_in, wk) + bk
        vv = _mm(keys_in, wv) + bv
        S = hp + T
        qh = q.reshape(B, T, NHEADS, HEAD_DIM)
        kh = kk.reshape(B, S, NHEADS, HEAD_DIM)
        vh = vv.reshape(B, S, NHEADS, HEAD_DIM)
        sc = jnp.einsum('bthd,bshd->bhts', qh, kh, precision=hi) / math.sqrt(HEAD_DIM)
        qpos = jnp.arange(hp, hp + T).reshape(-1, 1)
        kpos = jnp.arange(S).reshape(1, -1)
        d = qpos - kpos
        ok = (d >= 0) & (d <= PAST_CONTEXT)
        sc = jnp.where(ok[None, None], sc, -jnp.inf)
        p = jax.nn.softmax(sc, axis=-1)
        oh = jnp.einsum('bhts,bshd->bthd', p, vh, precision=hi).reshape(B, T, DIM)
        attn = _mm(oh, params["wout"][li].reshape(DIM, DIM)) + params["ln"][li, 0]
        y = _layernorm(x + attn, params["ln"][li, 1], params["ln"][li, 2])
        ff = _mm(_gelu_tanh(_mm(y, params["w1"][li]) + params["b1"][li]),
                 params["w2"][li]) + params["ln"][li, 5]
        x = _layernorm(y + ff, params["ln"][li, 3], params["ln"][li, 4])
        new_states.append(jnp.concatenate([x_past, sa_input], axis=1)[:, -PAST_CONTEXT:])

    hw = params["hw"].reshape(DIM, NQ, CARD_PAD)[:, :, :CARD]
    hb = params["hb"].reshape(NQ, CARD_PAD)[:, :CARD]
    logits = jnp.einsum('btd,dkc->bckt', x, hw, precision=hi) + hb.T[None, :, :, None]
    probs = jax.nn.softmax(logits, axis=1)
    return probs, new_states, offset + T


# ------------------------------------ demo / self-test ------------------------------------
if __name__ == "__main__":
    key = jax.random.PRNGKey(0)
    kp, k1, k2 = jax.random.split(key, 3)
    params = init_params(kp)

    idx1 = jax.random.randint(k1, (B, NQ, T), 0, CARD + 1, dtype=jnp.int32)
    idx2 = jax.random.randint(k2, (B, NQ, T), 0, CARD + 1, dtype=jnp.int32)

    # two streaming steps (second step exercises the resident K/V cache path)
    probs1, st, off = lm_model_forward(params, idx1, state=None, offset=0)
    probs2, st, off = lm_model_forward(params, idx2, state=st, offset=off)
    probs2 = jax.block_until_ready(probs2)

    assert probs1.shape == (B, CARD, NQ, T), probs1.shape
    assert probs2.shape == (B, CARD, NQ, T), probs2.shape
    assert off == 2 * T
    s1 = float(jnp.max(jnp.abs(jnp.sum(probs1, axis=1) - 1.0)))
    s2 = float(jnp.max(jnp.abs(jnp.sum(probs2, axis=1) - 1.0)))
    assert s1 < 1e-4 and s2 < 1e-4, (s1, s2)

    # compare against a pure-JAX reference with the original (layer-input) streaming state
    rstates = [jnp.zeros((B, 1, DIM), jnp.float32) for _ in range(NLAYERS)]
    ref1, rstates, roff = reference_forward(params, idx1, rstates, 0)
    ref2, rstates, roff = reference_forward(params, idx2, rstates, roff)
    e1 = float(jnp.max(jnp.abs(probs1 - ref1)))
    e2 = float(jnp.max(jnp.abs(probs2 - ref2)))
    assert e1 < 3e-3 and e2 < 3e-3, (e1, e2)

    print("KERNEL_OK")
</pallas_src>

<mosaic_0001>
module attributes {stable_mosaic.version = 11 : i64} {
  func.func @_fused_kernel(%arg0: memref<2xi32, #tpu.memory_space<smem>>, %arg1: memref<16x4xi32, #tpu.memory_space<vmem>>, %arg2: memref<512x32xf32, #tpu.memory_space<vmem>>, %arg3: memref<2x1x32xf32, #tpu.memory_space<vmem>>, %arg4: memref<2x3x4x32x8xf32, #tpu.memory_space<vmem>>, %arg5: memref<2x3x4x1x8xf32, #tpu.memory_space<vmem>>, %arg6: memref<2x4x8x32xf32, #tpu.memory_space<vmem>>, %arg7: memref<2x32x128xf32, #tpu.memory_space<vmem>>, %arg8: memref<2x1x128xf32, #tpu.memory_space<vmem>>, %arg9: memref<2x128x32xf32, #tpu.memory_space<vmem>>, %arg10: memref<2x6x1x32xf32, #tpu.memory_space<vmem>>, %arg11: memref<32x512xf32, #tpu.memory_space<vmem>>, %arg12: memref<1x512xf32, #tpu.memory_space<vmem>>, %arg13: memref<2x2x4x2x128x8xf32, #tpu.memory_space<vmem>>, %arg14: memref<16x512xf32, #tpu.memory_space<vmem>>, %arg15: memref<2x2x4x2x128x8xf32, #tpu.memory_space<vmem>>) attributes {dimension_semantics = [], scalar_prefetch = 0 : i64, scratch_operands = 0 : i64, tpu.core_type = #tpu.core_type<tc>} {
    %c0 = arith.constant 0 : index
    %0 = memref.load %arg0[%c0] : memref<2xi32, #tpu.memory_space<smem>>
    %c1 = arith.constant 1 : index
    %1 = memref.load %arg0[%c1] : memref<2xi32, #tpu.memory_space<smem>>
    %2 = arith.sitofp %1 : i32 to f32
    %c0_0 = arith.constant 0 : index
    %c0_1 = arith.constant 0 : index
    %c0_2 = arith.constant 0 : index
    %c0_3 = arith.constant 0 : index
    %c0_4 = arith.constant 0 : index
    %c0_5 = arith.constant 0 : index
    %3 = vector.load %arg13[%c0_0, %c0_1, %c0_2, %c0_3, %c0_4, %c0_5] : memref<2x2x4x2x128x8xf32, #tpu.memory_space<vmem>>, vector<2x2x4x2x128x8xf32>
    %c0_6 = arith.constant 0 : index
    %c0_7 = arith.constant 0 : index
    %c0_8 = arith.constant 0 : index
    %c0_9 = arith.constant 0 : index
    %c0_10 = arith.constant 0 : index
    %c0_11 = arith.constant 0 : index
    %4 = vector.load %arg15[%c0_6, %c0_7, %c0_8, %c0_9, %c0_10, %c0_11] : memref<2x2x4x2x128x8xf32, #tpu.memory_space<vmem>>, vector<2x2x4x2x128x8xf32>
    tpu.vector_store %arg15[%c0_6, %c0_7, %c0_8, %c0_9, %c0_10, %c0_11], %3 {strides = array<i32>} : memref<2x2x4x2x128x8xf32, #tpu.memory_space<vmem>>, vector<2x2x4x2x128x8xf32>,
    %5 = tpu.iota {dimensions = array<i32: 1>} : vector<16x512xi32>
    %cst = arith.constant 0.000000e+00 : f32
    %6 = vector.broadcast %cst : f32 to vector<16x512xf32>
    %c0_12 = arith.constant 0 : index
    %c0_13 = arith.constant 0 : index
    %7 = vector.load %arg1[%c0_12, %c0_13] : memref<16x4xi32, #tpu.memory_space<vmem>>, vector<16x1xi32>
    %c0_i32 = arith.constant 0 : i32
    %8 = vector.broadcast %c0_i32 : i32 to vector<16x1xi32>
    %9 = arith.addi %7, %8 : vector<16x1xi32>
    %10 = vector.broadcast %9 : vector<16x1xi32> to vector<16x512xi32>
    %11 = arith.cmpi eq, %5, %10 : vector<16x512xi32>
    %12 = arith.extui %11 : vector<16x512xi1> to vector<16x512xi32>
    %13 = arith.sitofp %12 : vector<16x512xi32> to vector<16x512xf32>
    %14 = arith.addf %6, %13 : vector<16x512xf32>
    %c0_14 = arith.constant 0 : index
    %c1_15 = arith.constant 1 : index
    %15 = vector.load %arg1[%c0_14, %c1_15] : memref<16x4xi32, #tpu.memory_space<vmem>>, vector<16x1xi32>
    %c128_i32 = arith.constant 128 : i32
    %16 = vector.broadcast %c128_i32 : i32 to vector<16x1xi32>
    %17 = arith.addi %15, %16 : vector<16x1xi32>
    %18 = vector.broadcast %17 : vector<16x1xi32> to vector<16x512xi32>
    %19 = arith.cmpi eq, %5, %18 : vector<16x512xi32>
    %20 = arith.extui %19 : vector<16x512xi1> to vector<16x512xi32>
    %21 = arith.sitofp %20 : vector<16x512xi32> to vector<16x512xf32>
    %22 = arith.addf %14, %21 : vector<16x512xf32>
    %c0_16 = arith.constant 0 : index
    %c2 = arith.constant 2 : index
    %23 = vector.load %arg1[%c0_16, %c2] : memref<16x4xi32, #tpu.memory_space<vmem>>, vector<16x1xi32>
    %c256_i32 = arith.constant 256 : i32
    %24 = vector.broadcast %c256_i32 : i32 to vector<16x1xi32>
    %25 = arith.addi %23, %24 : vector<16x1xi32>
    %26 = vector.broadcast %25 : vector<16x1xi32> to vector<16x512xi32>
    %27 = arith.cmpi eq, %5, %26 : vector<16x512xi32>
    %28 = arith.extui %27 : vector<16x512xi1> to vector<16x512xi32>
    %29 = arith.sitofp %28 : vector<16x512xi32> to vector<16x512xf32>
    %30 = arith.addf %22, %29 : vector<16x512xf32>
    %c0_17 = arith.constant 0 : index
    %c3 = arith.constant 3 : index
    %31 = vector.load %arg1[%c0_17, %c3] : memref<16x4xi32, #tpu.memory_space<vmem>>, vector<16x1xi32>
    %c384_i32 = arith.constant 384 : i32
    %32 = vector.broadcast %c384_i32 : i32 to vector<16x1xi32>
    %33 = arith.addi %31, %32 : vector<16x1xi32>
    %34 = vector.broadcast %33 : vector<16x1xi32> to vector<16x512xi32>
    %35 = arith.cmpi eq, %5, %34 : vector<16x512xi32>
    %36 = arith.extui %35 : vector<16x512xi1> to vector<16x512xi32>
    %37 = arith.sitofp %36 : vector<16x512xi32> to vector<16x512xf32>
    %38 = arith.addf %30, %37 : vector<16x512xf32>
    %c0_18 = arith.constant 0 : index
    %c0_19 = arith.constant 0 : index
    %39 = vector.load %arg2[%c0_18, %c0_19] : memref<512x32xf32, #tpu.memory_space<vmem>>, vector<512x32xf32>
    %cst_20 = arith.constant dense<0.000000e+00> : vector<16x32xf32>
    %40 = tpu.matmul %38, %39, %cst_20 {dimension_numbers = #tpu.dot_dimension_numbers<[1], [0], [0], [1], [0, 0, 1, 1], [], []>} : vector<16x512xf32>, vector<512x32xf32>, vector<16x32xf32> -> vector<16x32xf32>
    %c0_21 = arith.constant 0 : index
    %c0_22 = arith.constant 0 : index
    %c0_23 = arith.constant 0 : index
    %41 = vector.load %arg3[%c0_21, %c0_22, %c0_23] : memref<2x1x32xf32, #tpu.memory_space<vmem>>, vector<1x1x32xf32>
    %42 = vector.shape_cast %41 : vector<1x1x32xf32> to vector<1x32xf32>
    %c1_24 = arith.constant 1 : index
    %c0_25 = arith.constant 0 : index
    %c0_26 = arith.constant 0 : index
    %43 = vector.load %arg3[%c1_24, %c0_25, %c0_26] : memref<2x1x32xf32, #tpu.memory_space<vmem>>, vector<1x1x32xf32>
    %44 = vector.shape_cast %43 : vector<1x1x32xf32> to vector<1x32xf32>
    %cst_27 = arith.constant dense<0.000000e+00> : vector<16xf32>
    %45 = vector.multi_reduction <add>, %40, %cst_27 [1] : vector<16x32xf32> to vector<16xf32>
    %46 = vector.shape_cast %45 : vector<16xf32> to vector<16x1xf32>
    %cst_28 = arith.constant 3.200000e+01 : f32
    %47 = vector.broadcast %cst_28 : f32 to vector<16x1xf32>
    %48 = arith.divf %46, %47 : vector<16x1xf32>
    %49 = vector.broadcast %48 : vector<16x1xf32> to vector<16x32xf32>
    %50 = arith.subf %40, %49 : vector<16x32xf32>
    %51 = arith.mulf %50, %50 : vector<16x32xf32>
    %cst_29 = arith.constant dense<0.000000e+00> : vector<16xf32>
    %52 = vector.multi_reduction <add>, %51, %cst_29 [1] : vector<16x32xf32> to vector<16xf32>
    %53 = vector.shape_cast %52 : vector<16xf32> to vector<16x1xf32>
    %cst_30 = arith.constant 3.200000e+01 : f32
    %54 = vector.broadcast %cst_30 : f32 to vector<16x1xf32>
    %55 = arith.divf %53, %54 : vector<16x1xf32>
    %56 = vector.broadcast %48 : vector<16x1xf32> to vector<16x32xf32>
    %57 = arith.subf %40, %56 : vector<16x32xf32>
    %cst_31 = arith.constant 9.99999974E-6 : f32
    %58 = vector.broadcast %cst_31 : f32 to vector<16x1xf32>
    %59 = arith.addf %55, %58 : vector<16x1xf32>
    %60 = math.rsqrt %59 : vector<16x1xf32>
    %61 = vector.broadcast %60 : vector<16x1xf32> to vector<16x32xf32>
    %62 = arith.mulf %57, %61 : vector<16x32xf32>
    %63 = vector.broadcast %42 : vector<1x32xf32> to vector<16x32xf32>
    %64 = arith.mulf %62, %63 : vector<16x32xf32>
    %65 = vector.broadcast %44 : vector<1x32xf32> to vector<16x32xf32>
    %66 = arith.addf %64, %65 : vector<16x32xf32>
    %67 = tpu.iota {dimensions = array<i32: 1>} : vector<2x8x32xi32>
    %68 = vector.shape_cast %67 : vector<2x8x32xi32> to vector<16x32xi32>
    %69 = tpu.iota {dimensions = array<i32: 1>} : vector<16x32xi32>
    %70 = arith.sitofp %68 : vector<16x32xi32> to vector<16x32xf32>
    %71 = vector.broadcast %2 : f32 to vector<16x32xf32>
    %72 = arith.addf %70, %71 : vector<16x32xf32>
    %c16_i32 = arith.constant 16 : i32
    %73 = vector.broadcast %c16_i32 : i32 to vector<16x32xi32>
    %74 = arith.cmpi slt, %69, %73 : vector<16x32xi32>
    %c16_i32_32 = arith.constant 16 : i32
    %75 = vector.broadcast %c16_i32_32 : i32 to vector<16x32xi32>
    %76 = arith.subi %69, %75 : vector<16x32xi32>
    %77 = arith.select %74, %69, %76 : vector<16x32xi1>, vector<16x32xi32>
    %78 = arith.sitofp %77 : vector<16x32xi32> to vector<16x32xf32>
    %cst_33 = arith.constant -0.614022672 : f32
    %79 = vector.broadcast %cst_33 : f32 to vector<16x32xf32>
    %80 = arith.mulf %78, %79 : vector<16x32xf32>
    %81 = math.exp %80 : vector<16x32xf32>
    %82 = arith.mulf %72, %81 : vector<16x32xf32>
    %c16_i32_34 = arith.constant 16 : i32
    %83 = vector.broadcast %c16_i32_34 : i32 to vector<16x32xi32>
    %84 = arith.cmpi slt, %69, %83 : vector<16x32xi32>
    %85 = math.cos %82 : vector<16x32xf32>
    %86 = math.sin %82 : vector<16x32xf32>
    %87 = arith.select %84, %85, %86 : vector<16x32xi1>, vector<16x32xf32>
    %88 = arith.addf %66, %87 : vector<16x32xf32>
    %89 = tpu.iota {dimensions = array<i32: 1>} : vector<8x128xi32>
    %90 = tpu.iota {dimensions = array<i32: 0>} : vector<8x128xi32>
    %91 = vector.broadcast %0 : i32 to vector<8x128xi32>
    %92 = arith.addi %90, %91 : vector<8x128xi32>
    %93 = arith.subi %92, %89 : vector<8x128xi32>
    %c8_i32 = arith.constant 8 : i32
    %94 = arith.addi %0, %c8_i32 : i32
    %95 = vector.broadcast %94 : i32 to vector<8x128xi32>
    %96 = arith.cmpi slt, %89, %95 : vector<8x128xi32>
    %c0_i32_35 = arith.constant 0 : i32
    %97 = vector.broadcast %c0_i32_35 : i32 to vector<8x128xi32>
    %98 = arith.cmpi sge, %93, %97 : vector<8x128xi32>
    %99 = arith.andi %96, %98 : vector<8x128xi1>
    %c1000_i32 = arith.constant 1000 : i32
    %100 = vector.broadcast %c1000_i32 : i32 to vector<8x128xi32>
    %101 = arith.cmpi sle, %93, %100 : vector<8x128xi32>
    %102 = arith.andi %99, %101 : vector<8x128xi1>
    %cst_36 = arith.constant 0.000000e+00 : f32
    %cst_37 = arith.constant -1.000000e+09 : f32
    %103 = vector.broadcast %cst_36 : f32 to vector<8x128xf32>
    %104 = vector.broadcast %cst_37 : f32 to vector<8x128xf32>
    %105 = arith.select %102, %103, %104 : vector<8x128xi1>, vector<8x128xf32>
    %106 = vector.shape_cast %105 : vector<8x128xf32> to vector<1x8x128xf32>
    %cst_38 = arith.constant 0.000000e+00 : f32
    %107 = vector.broadcast %cst_38 : f32 to vector<16x32xf32>
    %c0_39 = arith.constant 0 : index
    %c0_40 = arith.constant 0 : index
    %c0_41 = arith.constant 0 : index
    %c0_42 = arith.constant 0 : index
    %c0_43 = arith.constant 0 : index
    %108 = vector.load %arg4[%c0_39, %c0_40, %c0_41, %c0_42, %c0_43] : memref<2x3x4x32x8xf32, #tpu.memory_space<vmem>>, vector<1x1x1x32x8xf32>
    %109 = vector.shape_cast %108 : vector<1x1x1x32x8xf32> to vector<32x8xf32>
    %cst_44 = arith.constant dense<0.000000e+00> : vector<16x8xf32>
    %110 = tpu.matmul %88, %109, %cst_44 {dimension_numbers = #tpu.dot_dimension_numbers<[1], [0], [0], [1], [0, 0, 1, 1], [], []>} : vector<16x32xf32>, vector<32x8xf32>, vector<16x8xf32> -> vector<16x8xf32>
    %c0_45 = arith.constant 0 : index
    %c0_46 = arith.constant 0 : index
    %c0_47 = arith.constant 0 : index
    %c0_48 = arith.constant 0 : index
    %c0_49 = arith.constant 0 : index
    %111 = vector.load %arg5[%c0_45, %c0_46, %c0_47, %c0_48, %c0_49] : memref<2x3x4x1x8xf32, #tpu.memory_space<vmem>>, vector<1x1x1x1x8xf32>
    %112 = vector.shape_cast %111 : vector<1x1x1x1x8xf32> to vector<1x8xf32>
    %113 = vector.broadcast %112 : vector<1x8xf32> to vector<16x8xf32>
    %114 = arith.addf %110, %113 : vector<16x8xf32>
    %c0_50 = arith.constant 0 : index
    %c1_51 = arith.constant 1 : index
    %c0_52 = arith.constant 0 : index
    %c0_53 = arith.constant 0 : index
    %c0_54 = arith.constant 0 : index
    %115 = vector.load %arg4[%c0_50, %c1_51, %c0_52, %c0_53, %c0_54] : memref<2x3x4x32x8xf32, #tpu.memory_space<vmem>>, vector<1x1x1x32x8xf32>
    %116 = vector.shape_cast %115 : vector<1x1x1x32x8xf32> to vector<32x8xf32>
    %cst_55 = arith.constant dense<0.000000e+00> : vector<16x8xf32>
    %117 = tpu.matmul %88, %116, %cst_55 {dimension_numbers = #tpu.dot_dimension_numbers<[1], [0], [0], [1], [0, 0, 1, 1], [], []>} : vector<16x32xf32>, vector<32x8xf32>, vector<16x8xf32> -> vector<16x8xf32>
    %c0_56 = arith.constant 0 : index
    %c1_57 = arith.constant 1 : index
    %c0_58 = arith.constant 0 : index
    %c0_59 = arith.constant 0 : index
    %c0_60 = arith.constant 0 : index
    %118 = vector.load %arg5[%c0_56, %c1_57, %c0_58, %c0_59, %c0_60] : memref<2x3x4x1x8xf32, #tpu.memory_space<vmem>>, vector<1x1x1x1x8xf32>
    %119 = vector.shape_cast %118 : vector<1x1x1x1x8xf32> to vector<1x8xf32>
    %120 = vector.broadcast %119 : vector<1x8xf32> to vector<16x8xf32>
    %121 = arith.addf %117, %120 : vector<16x8xf32>
    %c0_61 = arith.constant 0 : index
    %c2_62 = arith.constant 2 : index
    %c0_63 = arith.constant 0 : index
    %c0_64 = arith.constant 0 : index
    %c0_65 = arith.constant 0 : index
    %122 = vector.load %arg4[%c0_61, %c2_62, %c0_63, %c0_64, %c0_65] : memref<2x3x4x32x8xf32, #tpu.memory_space<vmem>>, vector<1x1x1x32x8xf32>
    %123 = vector.shape_cast %122 : vector<1x1x1x32x8xf32> to vector<32x8xf32>
    %cst_66 = arith.constant dense<0.000000e+00> : vector<16x8xf32>
    %124 = tpu.matmul %88, %123, %cst_66 {dimension_numbers = #tpu.dot_dimension_numbers<[1], [0], [0], [1], [0, 0, 1, 1], [], []>} : vector<16x32xf32>, vector<32x8xf32>, vector<16x8xf32> -> vector<16x8xf32>
    %c0_67 = arith.constant 0 : index
    %c2_68 = arith.constant 2 : index
    %c0_69 = arith.constant 0 : index
    %c0_70 = arith.constant 0 : index
    %c0_71 = arith.constant 0 : index
    %125 = vector.load %arg5[%c0_67, %c2_68, %c0_69, %c0_70, %c0_71] : memref<2x3x4x1x8xf32, #tpu.memory_space<vmem>>, vector<1x1x1x1x8xf32>
    %126 = vector.shape_cast %125 : vector<1x1x1x1x8xf32> to vector<1x8xf32>
    %127 = vector.broadcast %126 : vector<1x8xf32> to vector<16x8xf32>
    %128 = arith.addf %124, %127 : vector<16x8xf32>
    %129 = vector.extract_strided_slice %121 {offsets = [0, 0], sizes = [8, 8], strides = [1, 1]} : vector<16x8xf32> to vector<8x8xf32>
    %c0_72 = arith.constant 0 : index
    %c0_73 = arith.constant 0 : index
    %c0_74 = arith.constant 0 : index
    %c0_75 = arith.constant 0 : index
    %130 = arith.index_cast %0 : i32 to index
    %c0_76 = arith.constant 0 : index
    %131 = vector.load %arg15[%c0_72, %c0_73, %c0_74, %c0_75, %130, %c0_76] : memref<2x2x4x2x128x8xf32, #tpu.memory_space<vmem>>, vector<1x1x1x1x8x8xf32>
    %132 = vector.shape_cast %131 : vector<1x1x1x1x8x8xf32> to vector<8x8xf32>
    %133 = vector.shape_cast %129 : vector<8x8xf32> to vector<1x1x1x1x8x8xf32>
    tpu.vector_store %arg15[%c0_72, %c0_73, %c0_74, %c0_75, %130, %c0_76], %133 {strides = array<i32>} : memref<2x2x4x2x128x8xf32, #tpu.memory_space<vmem>>, vector<1x1x1x1x8x8xf32>,
    %134 = vector.extract_strided_slice %128 {offsets = [0, 0], sizes = [8, 8], strides = [1, 1]} : vector<16x8xf32> to vector<8x8xf32>
    %c0_77 = arith.constant 0 : index
    %c1_78 = arith.constant 1 : index
    %c0_79 = arith.constant 0 : index
    %c0_80 = arith.constant 0 : index
    %135 = arith.index_cast %0 : i32 to index
    %c0_81 = arith.constant 0 : index
    %136 = vector.load %arg15[%c0_77, %c1_78, %c0_79, %c0_80, %135, %c0_81] : memref<2x2x4x2x128x8xf32, #tpu.memory_space<vmem>>, vector<1x1x1x1x8x8xf32>
    %137 = vector.shape_cast %136 : vector<1x1x1x1x8x8xf32> to vector<8x8xf32>
    %138 = vector.shape_cast %134 : vector<8x8xf32> to vector<1x1x1x1x8x8xf32>
    tpu.vector_store %arg15[%c0_77, %c1_78, %c0_79, %c0_80, %135, %c0_81], %138 {strides = array<i32>} : memref<2x2x4x2x128x8xf32, #tpu.memory_space<vmem>>, vector<1x1x1x1x8x8xf32>,
    %139 = vector.extract_strided_slice %121 {offsets = [8, 0], sizes = [8, 8], strides = [1, 1]} : vector<16x8xf32> to vector<8x8xf32>
    %c0_82 = arith.constant 0 : index
    %c0_83 = arith.constant 0 : index
    %c0_84 = arith.constant 0 : index
    %c1_85 = arith.constant 1 : index
    %140 = arith.index_cast %0 : i32 to index
    %c0_86 = arith.constant 0 : index
    %141 = vector.load %arg15[%c0_82, %c0_83, %c0_84, %c1_85, %140, %c0_86] : memref<2x2x4x2x128x8xf32, #tpu.memory_space<vmem>>, vector<1x1x1x1x8x8xf32>
    %142 = vector.shape_cast %141 : vector<1x1x1x1x8x8xf32> to vector<8x8xf32>
    %143 = vector.shape_cast %139 : vector<8x8xf32> to vector<1x1x1x1x8x8xf32>
    tpu.vector_store %arg15[%c0_82, %c0_83, %c0_84, %c1_85, %140, %c0_86], %143 {strides = array<i32>} : memref<2x2x4x2x128x8xf32, #tpu.memory_space<vmem>>, vector<1x1x1x1x8x8xf32>,
    %144 = vector.extract_strided_slice %128 {offsets = [8, 0], sizes = [8, 8], strides = [1, 1]} : vector<16x8xf32> to vector<8x8xf32>
    %c0_87 = arith.constant 0 : index
    %c1_88 = arith.constant 1 : index
    %c0_89 = arith.constant 0 : index
    %c1_90 = arith.constant 1 : index
    %145 = arith.index_cast %0 : i32 to index
    %c0_91 = arith.constant 0 : index
    %146 = vector.load %arg15[%c0_87, %c1_88, %c0_89, %c1_90, %145, %c0_91] : memref<2x2x4x2x128x8xf32, #tpu.memory_space<vmem>>, vector<1x1x1x1x8x8xf32>
    %147 = vector.shape_cast %146 : vector<1x1x1x1x8x8xf32> to vector<8x8xf32>
    %148 = vector.shape_cast %144 : vector<8x8xf32> to vector<1x1x1x1x8x8xf32>
    tpu.vector_store %arg15[%c0_87, %c1_88, %c0_89, %c1_90, %145, %c0_91], %148 {strides = array<i32>} : memref<2x2x4x2x128x8xf32, #tpu.memory_space<vmem>>, vector<1x1x1x1x8x8xf32>,
    %c0_92 = arith.constant 0 : index
    %c0_93 = arith.constant 0 : index
    %c0_94 = arith.constant 0 : index
    %c0_95 = arith.constant 0 : index
    %c0_96 = arith.constant 0 : index
    %c0_97 = arith.constant 0 : index
    %149 = vector.load %arg15[%c0_92, %c0_93, %c0_94, %c0_95, %c0_96, %c0_97] : memref<2x2x4x2x128x8xf32, #tpu.memory_space<vmem>>, vector<1x1x1x2x128x8xf32>
    %150 = vector.shape_cast %149 : vector<1x1x1x2x128x8xf32> to vector<2x128x8xf32>
    %c0_98 = arith.constant 0 : index
    %c1_99 = arith.constant 1 : index
    %c0_100 = arith.constant 0 : index
    %c0_101 = arith.constant 0 : index
    %c0_102 = arith.constant 0 : index
    %c0_103 = arith.constant 0 : index
    %151 = vector.load %arg15[%c0_98, %c1_99, %c0_100, %c0_101, %c0_102, %c0_103] : memref<2x2x4x2x128x8xf32, #tpu.memory_space<vmem>>, vector<1x1x1x2x128x8xf32>
    %152 = vector.shape_cast %151 : vector<1x1x1x2x128x8xf32> to vector<2x128x8xf32>
    %153 = vector.shape_cast %114 : vector<16x8xf32> to vector<2x8x8xf32>
    "tpu.trace_start"() <{level = 10 : i32, message = "btd,bsd->bts"}> : () -> ()
    %cst_104 = arith.constant dense<0.000000e+00> : vector<2x8x128xf32>
    %154 = tpu.matmul %153, %150, %cst_104 {dimension_numbers = #tpu.dot_dimension_numbers<[2], [2], [1], [1], [0, 0, 0, 1, 1, 1], [0], [0]>} : vector<2x8x8xf32>, vector<2x128x8xf32>, vector<2x8x128xf32> -> vector<2x8x128xf32>
    "tpu.trace_stop"() : () -> ()
    %cst_105 = arith.constant 0.353553385 : f32
    %155 = vector.broadcast %cst_105 : f32 to vector<2x8x128xf32>
    %156 = arith.mulf %154, %155 : vector<2x8x128xf32>
    %157 = vector.broadcast %106 : vector<1x8x128xf32> to vector<2x8x128xf32>
    %158 = arith.addf %156, %157 : vector<2x8x128xf32>
    %cst_106 = arith.constant dense<0xFF800000> : vector<2x8xf32>
    %159 = vector.multi_reduction <maximumf>, %158, %cst_106 [2] : vector<2x8x128xf32> to vector<2x8xf32>
    %160 = vector.shape_cast %159 : vector<2x8xf32> to vector<2x8x1xf32>
    %161 = vector.broadcast %160 : vector<2x8x1xf32> to vector<2x8x128xf32>
    %162 = arith.subf %158, %161 : vector<2x8x128xf32>
    %163 = math.exp %162 : vector<2x8x128xf32>
    %cst_107 = arith.constant dense<0.000000e+00> : vector<2x8xf32>
    %164 = vector.multi_reduction <add>, %163, %cst_107 [2] : vector<2x8x128xf32> to vector<2x8xf32>
    %165 = vector.shape_cast %164 : vector<2x8xf32> to vector<2x8x1xf32>
    %166 = tpu.reciprocal %165 {approx = true} : vector<2x8x1xf32> -> vector<2x8x1xf32>
    %167 = vector.broadcast %166 : vector<2x8x1xf32> to vector<2x8x128xf32>
    %168 = arith.mulf %163, %167 : vector<2x8x128xf32>
    "tpu.trace_start"() <{level = 10 : i32, message = "bts,bsd->btd"}> : () -> ()
    %cst_108 = arith.constant dense<0.000000e+00> : vector<2x8x8xf32>
    %169 = tpu.matmul %168, %152, %cst_108 {dimension_numbers = #tpu.dot_dimension_numbers<[2], [1], [1], [2], [0, 0, 0, 1, 1, 2], [0], [0]>} : vector<2x8x128xf32>, vector<2x128x8xf32>, vector<2x8x8xf32> -> vector<2x8x8xf32>
    "tpu.trace_stop"() : () -> ()
    %170 = vector.shape_cast %169 : vector<2x8x8xf32> to vector<16x8xf32>
    %c0_109 = arith.constant 0 : index
    %c0_110 = arith.constant 0 : index
    %c0_111 = arith.constant 0 : index
    %c0_112 = arith.constant 0 : index
    %171 = vector.load %arg6[%c0_109, %c0_110, %c0_111, %c0_112] : memref<2x4x8x32xf32, #tpu.memory_space<vmem>>, vector<1x1x8x32xf32>
    %172 = vector.shape_cast %171 : vector<1x1x8x32xf32> to vector<8x32xf32>
    %cst_113 = arith.constant dense<0.000000e+00> : vector<16x32xf32>
    %173 = tpu.matmul %170, %172, %cst_113 {dimension_numbers = #tpu.dot_dimension_numbers<[1], [0], [0], [1], [0, 0, 1, 1], [], []>} : vector<16x8xf32>, vector<8x32xf32>, vector<16x32xf32> -> vector<16x32xf32>
    %174 = arith.addf %107, %173 : vector<16x32xf32>
    %c0_114 = arith.constant 0 : index
    %c0_115 = arith.constant 0 : index
    %c1_116 = arith.constant 1 : index
    %c0_117 = arith.constant 0 : index
    %c0_118 = arith.constant 0 : index
    %175 = vector.load %arg4[%c0_114, %c0_115, %c1_116, %c0_117, %c0_118] : memref<2x3x4x32x8xf32, #tpu.memory_space<vmem>>, vector<1x1x1x32x8xf32>
    %176 = vector.shape_cast %175 : vector<1x1x1x32x8xf32> to vector<32x8xf32>
    %cst_119 = arith.constant dense<0.000000e+00> : vector<16x8xf32>
    %177 = tpu.matmul %88, %176, %cst_119 {dimension_numbers = #tpu.dot_dimension_numbers<[1], [0], [0], [1], [0, 0, 1, 1], [], []>} : vector<16x32xf32>, vector<32x8xf32>, vector<16x8xf32> -> vector<16x8xf32>
    %c0_120 = arith.constant 0 : index
    %c0_121 = arith.constant 0 : index
    %c1_122 = arith.constant 1 : index
    %c0_123 = arith.constant 0 : index
    %c0_124 = arith.constant 0 : index
    %178 = vector.load %arg5[%c0_120, %c0_121, %c1_122, %c0_123, %c0_124] : memref<2x3x4x1x8xf32, #tpu.memory_space<vmem>>, vector<1x1x1x1x8xf32>
    %179 = vector.shape_cast %178 : vector<1x1x1x1x8xf32> to vector<1x8xf32>
    %180 = vector.broadcast %179 : vector<1x8xf32> to vector<16x8xf32>
    %181 = arith.addf %177, %180 : vector<16x8xf32>
    %c0_125 = arith.constant 0 : index
    %c1_126 = arith.constant 1 : index
    %c1_127 = arith.constant 1 : index
    %c0_128 = arith.constant 0 : index
    %c0_129 = arith.constant 0 : index
    %182 = vector.load %arg4[%c0_125, %c1_126, %c1_127, %c0_128, %c0_129] : memref<2x3x4x32x8xf32, #tpu.memory_space<vmem>>, vector<1x1x1x32x8xf32>
    %183 = vector.shape_cast %182 : vector<1x1x1x32x8xf32> to vector<32x8xf32>
    %cst_130 = arith.constant dense<0.000000e+00> : vector<16x8xf32>
    %184 = tpu.matmul %88, %183, %cst_130 {dimension_numbers = #tpu.dot_dimension_numbers<[1], [0], [0], [1], [0, 0, 1, 1], [], []>} : vector<16x32xf32>, vector<32x8xf32>, vector<16x8xf32> -> vector<16x8xf32>
    %c0_131 = arith.constant 0 : index
    %c1_132 = arith.constant 1 : index
    %c1_133 = arith.constant 1 : index
    %c0_134 = arith.constant 0 : index
    %c0_135 = arith.constant 0 : index
    %185 = vector.load %arg5[%c0_131, %c1_132, %c1_133, %c0_134, %c0_135] : memref<2x3x4x1x8xf32, #tpu.memory_space<vmem>>, vector<1x1x1x1x8xf32>
    %186 = vector.shape_cast %185 : vector<1x1x1x1x8xf32> to vector<1x8xf32>
    %187 = vector.broadcast %186 : vector<1x8xf32> to vector<16x8xf32>
    %188 = arith.addf %184, %187 : vector<16x8xf32>
    %c0_136 = arith.constant 0 : index
    %c2_137 = arith.constant 2 : index
    %c1_138 = arith.constant 1 : index
    %c0_139 = arith.constant 0 : index
    %c0_140 = arith.constant 0 : index
    %189 = vector.load %arg4[%c0_136, %c2_137, %c1_138, %c0_139, %c0_140] : memref<2x3x4x32x8xf32, #tpu.memory_space<vmem>>, vector<1x1x1x32x8xf32>
    %190 = vector.shape_cast %189 : vector<1x1x1x32x8xf32> to vector<32x8xf32>
    %cst_141 = arith.constant dense<0.000000e+00> : vector<16x8xf32>
    %191 = tpu.matmul %88, %190, %cst_141 {dimension_numbers = #tpu.dot_dimension_numbers<[1], [0], [0], [1], [0, 0, 1, 1], [], []>} : vector<16x32xf32>, vector<32x8xf32>, vector<16x8xf32> -> vector<16x8xf32>
    %c0_142 = arith.constant 0 : index
    %c2_143 = arith.constant 2 : index
    %c1_144 = arith.constant 1 : index
    %c0_145 = arith.constant 0 : index
    %c0_146 = arith.constant 0 : index
    %192 = vector.load %arg5[%c0_142, %c2_143, %c1_144, %c0_145, %c0_146] : memref<2x3x4x1x8xf32, #tpu.memory_space<vmem>>, vector<1x1x1x1x8xf32>
    %193 = vector.shape_cast %192 : vector<1x1x1x1x8xf32> to vector<1x8xf32>
    %194 = vector.broadcast %193 : vector<1x8xf32> to vector<16x8xf32>
    %195 = arith.addf %191, %194 : vector<16x8xf32>
    %196 = vector.extract_strided_slice %188 {offsets = [0, 0], sizes = [8, 8], strides = [1, 1]} : vector<16x8xf32> to vector<8x8xf32>
    %c0_147 = arith.constant 0 : index
    %c0_148 = arith.constant 0 : index
    %c1_149 = arith.constant 1 : index
    %c0_150 = arith.constant 0 : index
    %197 = arith.index_cast %0 : i32 to index
    %c0_151 = arith.constant 0 : index
    %198 = vector.load %arg15[%c0_147, %c0_148, %c1_149, %c0_150, %197, %c0_151] : memref<2x2x4x2x128x8xf32, #tpu.memory_space<vmem>>, vector<1x1x1x1x8x8xf32>
    %199 = vector.shape_cast %198 : vector<1x1x1x1x8x8xf32> to vector<8x8xf32>
    %200 = vector.shape_cast %196 : vector<8x8xf32> to vector<1x1x1x1x8x8xf32>
    tpu.vector_store %arg15[%c0_147, %c0_148, %c1_149, %c0_150, %197, %c0_151], %200 {strides = array<i32>} : memref<2x2x4x2x128x8xf32, #tpu.memory_space<vmem>>, vector<1x1x1x1x8x8xf32>,
    %201 = vector.extract_strided_slice %195 {offsets = [0, 0], sizes = [8, 8], strides = [1, 1]} : vector<16x8xf32> to vector<8x8xf32>
    %c0_152 = arith.constant 0 : index
    %c1_153 = arith.constant 1 : index
    %c1_154 = arith.constant 1 : index
    %c0_155 = arith.constant 0 : index
    %202 = arith.index_cast %0 : i32 to index
    %c0_156 = arith.constant 0 : index
    %203 = vector.load %arg15[%c0_152, %c1_153, %c1_154, %c0_155, %202, %c0_156] : memref<2x2x4x2x128x8xf32, #tpu.memory_space<vmem>>, vector<1x1x1x1x8x8xf32>
    %204 = vector.shape_cast %203 : vector<1x1x1x1x8x8xf32> to vector<8x8xf32>
    %205 = vector.shape_cast %201 : vector<8x8xf32> to vector<1x1x1x1x8x8xf32>
    tpu.vector_store %arg15[%c0_152, %c1_153, %c1_154, %c0_155, %202, %c0_156], %205 {strides = array<i32>} : memref<2x2x4x2x128x8xf32, #tpu.memory_space<vmem>>, vector<1x1x1x1x8x8xf32>,
    %206 = vector.extract_strided_slice %188 {offsets = [8, 0], sizes = [8, 8], strides = [1, 1]} : vector<16x8xf32> to vector<8x8xf32>
    %c0_157 = arith.constant 0 : index
    %c0_158 = arith.constant 0 : index
    %c1_159 = arith.constant 1 : index
    %c1_160 = arith.constant 1 : index
    %207 = arith.index_cast %0 : i32 to index
    %c0_161 = arith.constant 0 : index
    %208 = vector.load %arg15[%c0_157, %c0_158, %c1_159, %c1_160, %207, %c0_161] : memref<2x2x4x2x128x8xf32, #tpu.memory_space<vmem>>, vector<1x1x1x1x8x8xf32>
    %209 = vector.shape_cast %208 : vector<1x1x1x1x8x8xf32> to vector<8x8xf32>
    %210 = vector.shape_cast %206 : vector<8x8xf32> to vector<1x1x1x1x8x8xf32>
    tpu.vector_store %arg15[%c0_157, %c0_158, %c1_159, %c1_160, %207, %c0_161], %210 {strides = array<i32>} : memref<2x2x4x2x128x8xf32, #tpu.memory_space<vmem>>, vector<1x1x1x1x8x8xf32>,
    %211 = vector.extract_strided_slice %195 {offsets = [8, 0], sizes = [8, 8], strides = [1, 1]} : vector<16x8xf32> to vector<8x8xf32>
    %c0_162 = arith.constant 0 : index
    %c1_163 = arith.constant 1 : index
    %c1_164 = arith.constant 1 : index
    %c1_165 = arith.constant 1 : index
    %212 = arith.index_cast %0 : i32 to index
    %c0_166 = arith.constant 0 : index
    %213 = vector.load %arg15[%c0_162, %c1_163, %c1_164, %c1_165, %212, %c0_166] : memref<2x2x4x2x128x8xf32, #tpu.memory_space<vmem>>, vector<1x1x1x1x8x8xf32>
    %214 = vector.shape_cast %213 : vector<1x1x1x1x8x8xf32> to vector<8x8xf32>
    %215 = vector.shape_cast %211 : vector<8x8xf32> to vector<1x1x1x1x8x8xf32>
    tpu.vector_store %arg15[%c0_162, %c1_163, %c1_164, %c1_165, %212, %c0_166], %215 {strides = array<i32>} : memref<2x2x4x2x128x8xf32, #tpu.memory_space<vmem>>, vector<1x1x1x1x8x8xf32>,
    %c0_167 = arith.constant 0 : index
    %c0_168 = arith.constant 0 : index
    %c1_169 = arith.constant 1 : index
    %c0_170 = arith.constant 0 : index
    %c0_171 = arith.constant 0 : index
    %c0_172 = arith.constant 0 : index
    %216 = vector.load %arg15[%c0_167, %c0_168, %c1_169, %c0_170, %c0_171, %c0_172] : memref<2x2x4x2x128x8xf32, #tpu.memory_space<vmem>>, vector<1x1x1x2x128x8xf32>
    %217 = vector.shape_cast %216 : vector<1x1x1x2x128x8xf32> to vector<2x128x8xf32>
    %c0_173 = arith.constant 0 : index
    %c1_174 = arith.constant 1 : index
    %c1_175 = arith.constant 1 : index
    %c0_176 = arith.constant 0 : index
    %c0_177 = arith.constant 0 : index
    %c0_178 = arith.constant 0 : index
    %218 = vector.load %arg15[%c0_173, %c1_174, %c1_175, %c0_176, %c0_177, %c0_178] : memref<2x2x4x2x128x8xf32, #tpu.memory_space<vmem>>, vector<1x1x1x2x128x8xf32>
    %219 = vector.shape_cast %218 : vector<1x1x1x2x128x8xf32> to vector<2x128x8xf32>
    %220 = vector.shape_cast %181 : vector<16x8xf32> to vector<2x8x8xf32>
    "tpu.trace_start"() <{level = 10 : i32, message = "btd,bsd->bts"}> : () -> ()
    %cst_179 = arith.constant dense<0.000000e+00> : vector<2x8x128xf32>
    %221 = tpu.matmul %220, %217, %cst_179 {dimension_numbers = #tpu.dot_dimension_numbers<[2], [2], [1], [1], [0, 0, 0, 1, 1, 1], [0], [0]>} : vector<2x8x8xf32>, vector<2x128x8xf32>, vector<2x8x128xf32> -> vector<2x8x128xf32>
    "tpu.trace_stop"() : () -> ()
    %cst_180 = arith.constant 0.353553385 : f32
    %222 = vector.broadcast %cst_180 : f32 to vector<2x8x128xf32>
    %223 = arith.mulf %221, %222 : vector<2x8x128xf32>
    %224 = vector.broadcast %106 : vector<1x8x128xf32> to vector<2x8x128xf32>
    %225 = arith.addf %223, %224 : vector<2x8x128xf32>
    %cst_181 = arith.constant dense<0xFF800000> : vector<2x8xf32>
    %226 = vector.multi_reduction <maximumf>, %225, %cst_181 [2] : vector<2x8x128xf32> to vector<2x8xf32>
    %227 = vector.shape_cast %226 : vector<2x8xf32> to vector<2x8x1xf32>
    %228 = vector.broadcast %227 : vector<2x8x1xf32> to vector<2x8x128xf32>
    %229 = arith.subf %225, %228 : vector<2x8x128xf32>
    %230 = math.exp %229 : vector<2x8x128xf32>
    %cst_182 = arith.constant dense<0.000000e+00> : vector<2x8xf32>
    %231 = vector.multi_reduction <add>, %230, %cst_182 [2] : vector<2x8x128xf32> to vector<2x8xf32>
    %232 = vector.shape_cast %231 : vector<2x8xf32> to vector<2x8x1xf32>
    %233 = tpu.reciprocal %232 {approx = true} : vector<2x8x1xf32> -> vector<2x8x1xf32>
    %234 = vector.broadcast %233 : vector<2x8x1xf32> to vector<2x8x128xf32>
    %235 = arith.mulf %230, %234 : vector<2x8x128xf32>
    "tpu.trace_start"() <{level = 10 : i32, message = "bts,bsd->btd"}> : () -> ()
    %cst_183 = arith.constant dense<0.000000e+00> : vector<2x8x8xf32>
    %236 = tpu.matmul %235, %219, %cst_183 {dimension_numbers = #tpu.dot_dimension_numbers<[2], [1], [1], [2], [0, 0, 0, 1, 1, 2], [0], [0]>} : vector<2x8x128xf32>, vector<2x128x8xf32>, vector<2x8x8xf32> -> vector<2x8x8xf32>
    "tpu.trace_stop"() : () -> ()
    %237 = vector.shape_cast %236 : vector<2x8x8xf32> to vector<16x8xf32>
    %c0_184 = arith.constant 0 : index
    %c1_185 = arith.constant 1 : index
    %c0_186 = arith.constant 0 : index
    %c0_187 = arith.constant 0 : index
    %238 = vector.load %arg6[%c0_184, %c1_185, %c0_186, %c0_187] : memref<2x4x8x32xf32, #tpu.memory_space<vmem>>, vector<1x1x8x32xf32>
    %239 = vector.shape_cast %238 : vector<1x1x8x32xf32> to vector<8x32xf32>
    %cst_188 = arith.constant dense<0.000000e+00> : vector<16x32xf32>
    %240 = tpu.matmul %237, %239, %cst_188 {dimension_numbers = #tpu.dot_dimension_numbers<[1], [0], [0], [1], [0, 0, 1, 1], [], []>} : vector<16x8xf32>, vector<8x32xf32>, vector<16x32xf32> -> vector<16x32xf32>
    %241 = arith.addf %174, %240 : vector<16x32xf32>
    %c0_189 = arith.constant 0 : index
    %c0_190 = arith.constant 0 : index
    %c2_191 = arith.constant 2 : index
    %c0_192 = arith.constant 0 : index
    %c0_193 = arith.constant 0 : index
    %242 = vector.load %arg4[%c0_189, %c0_190, %c2_191, %c0_192, %c0_193] : memref<2x3x4x32x8xf32, #tpu.memory_space<vmem>>, vector<1x1x1x32x8xf32>
    %243 = vector.shape_cast %242 : vector<1x1x1x32x8xf32> to vector<32x8xf32>
    %cst_194 = arith.constant dense<0.000000e+00> : vector<16x8xf32>
    %244 = tpu.matmul %88, %243, %cst_194 {dimension_numbers = #tpu.dot_dimension_numbers<[1], [0], [0], [1], [0, 0, 1, 1], [], []>} : vector<16x32xf32>, vector<32x8xf32>, vector<16x8xf32> -> vector<16x8xf32>
    %c0_195 = arith.constant 0 : index
    %c0_196 = arith.constant 0 : index
    %c2_197 = arith.constant 2 : index
    %c0_198 = arith.constant 0 : index
    %c0_199 = arith.constant 0 : index
    %245 = vector.load %arg5[%c0_195, %c0_196, %c2_197, %c0_198, %c0_199] : memref<2x3x4x1x8xf32, #tpu.memory_space<vmem>>, vector<1x1x1x1x8xf32>
    %246 = vector.shape_cast %245 : vector<1x1x1x1x8xf32> to vector<1x8xf32>
    %247 = vector.broadcast %246 : vector<1x8xf32> to vector<16x8xf32>
    %248 = arith.addf %244, %247 : vector<16x8xf32>
    %c0_200 = arith.constant 0 : index
    %c1_201 = arith.constant 1 : index
    %c2_202 = arith.constant 2 : index
    %c0_203 = arith.constant 0 : index
    %c0_204 = arith.constant 0 : index
    %249 = vector.load %arg4[%c0_200, %c1_201, %c2_202, %c0_203, %c0_204] : memref<2x3x4x32x8xf32, #tpu.memory_space<vmem>>, vector<1x1x1x32x8xf32>
    %250 = vector.shape_cast %249 : vector<1x1x1x32x8xf32> to vector<32x8xf32>
    %cst_205 = arith.constant dense<0.000000e+00> : vector<16x8xf32>
    %251 = tpu.matmul %88, %250, %cst_205 {dimension_numbers = #tpu.dot_dimension_numbers<[1], [0], [0], [1], [0, 0, 1, 1], [], []>} : vector<16x32xf32>, vector<32x8xf32>, vector<16x8xf32> -> vector<16x8xf32>
    %c0_206 = arith.constant 0 : index
    %c1_207 = arith.constant 1 : index
    %c2_208 = arith.constant 2 : index
    %c0_209 = arith.constant 0 : index
    %c0_210 = arith.constant 0 : index
    %252 = vector.load %arg5[%c0_206, %c1_207, %c2_208, %c0_209, %c0_210] : memref<2x3x4x1x8xf32, #tpu.memory_space<vmem>>, vector<1x1x1x1x8xf32>
    %253 = vector.shape_cast %252 : vector<1x1x1x1x8xf32> to vector<1x8xf32>
    %254 = vector.broadcast %253 : vector<1x8xf32> to vector<16x8xf32>
    %255 = arith.addf %251, %254 : vector<16x8xf32>
    %c0_211 = arith.constant 0 : index
    %c2_212 = arith.constant 2 : index
    %c2_213 = arith.constant 2 : index
    %c0_214 = arith.constant 0 : index
    %c0_215 = arith.constant 0 : index
    %256 = vector.load %arg4[%c0_211, %c2_212, %c2_213, %c0_214, %c0_215] : memref<2x3x4x32x8xf32, #tpu.memory_space<vmem>>, vector<1x1x1x32x8xf32>
    %257 = vector.shape_cast %256 : vector<1x1x1x32x8xf32> to vector<32x8xf32>
    %cst_216 = arith.constant dense<0.000000e+00> : vector<16x8xf32>
    %258 = tpu.matmul %88, %257, %cst_216 {dimension_numbers = #tpu.dot_dimension_numbers<[1], [0], [0], [1], [0, 0, 1, 1], [], []>} : vector<16x32xf32>, vector<32x8xf32>, vector<16x8xf32> -> vector<16x8xf32>
    %c0_217 = arith.constant 0 : index
    %c2_218 = arith.constant 2 : index
    %c2_219 = arith.constant 2 : index
    %c0_220 = arith.constant 0 : index
    %c0_221 = arith.constant 0 : index
    %259 = vector.load %arg5[%c0_217, %c2_218, %c2_219, %c0_220, %c0_221] : memref<2x3x4x1x8xf32, #tpu.memory_space<vmem>>, vector<1x1x1x1x8xf32>
    %260 = vector.shape_cast %259 : vector<1x1x1x1x8xf32> to vector<1x8xf32>
    %261 = vector.broadcast %260 : vector<1x8xf32> to vector<16x8xf32>
    %262 = arith.addf %258, %261 : vector<16x8xf32>
    %263 = vector.extract_strided_slice %255 {offsets = [0, 0], sizes = [8, 8], strides = [1, 1]} : vector<16x8xf32> to vector<8x8xf32>
    %c0_222 = arith.constant 0 : index
    %c0_223 = arith.constant 0 : index
    %c2_224 = arith.constant 2 : index
    %c0_225 = arith.constant 0 : index
    %264 = arith.index_cast %0 : i32 to index
    %c0_226 = arith.constant 0 : index
    %265 = vector.load %arg15[%c0_222, %c0_223, %c2_224, %c0_225, %264, %c0_226] : memref<2x2x4x2x128x8xf32, #tpu.memory_space<vmem>>, vector<1x1x1x1x8x8xf32>
    %266 = vector.shape_cast %265 : vector<1x1x1x1x8x8xf32> to vector<8x8xf32>
    %267 = vector.shape_cast %263 : vector<8x8xf32> to vector<1x1x1x1x8x8xf32>
    tpu.vector_store %arg15[%c0_222, %c0_223, %c2_224, %c0_225, %264, %c0_226], %267 {strides = array<i32>} : memref<2x2x4x2x128x8xf32, #tpu.memory_space<vmem>>, vector<1x1x1x1x8x8xf32>,
    %268 = vector.extract_strided_slice %262 {offsets = [0, 0], sizes = [8, 8], strides = [1, 1]} : vector<16x8xf32> to vector<8x8xf32>
    %c0_227 = arith.constant 0 : index
    %c1_228 = arith.constant 1 : index
    %c2_229 = arith.constant 2 : index
    %c0_230 = arith.constant 0 : index
    %269 = arith.index_cast %0 : i32 to index
    %c0_231 = arith.constant 0 : index
    %270 = vector.load %arg15[%c0_227, %c1_228, %c2_229, %c0_230, %269, %c0_231] : memref<2x2x4x2x128x8xf32, #tpu.memory_space<vmem>>, vector<1x1x1x1x8x8xf32>
    %271 = vector.shape_cast %270 : vector<1x1x1x1x8x8xf32> to vector<8x8xf32>
    %272 = vector.shape_cast %268 : vector<8x8xf32> to vector<1x1x1x1x8x8xf32>
    tpu.vector_store %arg15[%c0_227, %c1_228, %c2_229, %c0_230, %269, %c0_231], %272 {strides = array<i32>} : memref<2x2x4x2x128x8xf32, #tpu.memory_space<vmem>>, vector<1x1x1x1x8x8xf32>,
    %273 = vector.extract_strided_slice %255 {offsets = [8, 0], sizes = [8, 8], strides = [1, 1]} : vector<16x8xf32> to vector<8x8xf32>
    %c0_232 = arith.constant 0 : index
    %c0_233 = arith.constant 0 : index
    %c2_234 = arith.constant 2 : index
    %c1_235 = arith.constant 1 : index
    %274 = arith.index_cast %0 : i32 to index
    %c0_236 = arith.constant 0 : index
    %275 = vector.load %arg15[%c0_232, %c0_233, %c2_234, %c1_235, %274, %c0_236] : memref<2x2x4x2x128x8xf32, #tpu.memory_space<vmem>>, vector<1x1x1x1x8x8xf32>
    %276 = vector.shape_cast %275 : vector<1x1x1x1x8x8xf32> to vector<8x8xf32>
    %277 = vector.shape_cast %273 : vector<8x8xf32> to vector<1x1x1x1x8x8xf32>
    tpu.vector_store %arg15[%c0_232, %c0_233, %c2_234, %c1_235, %274, %c0_236], %277 {strides = array<i32>} : memref<2x2x4x2x128x8xf32, #tpu.memory_space<vmem>>, vector<1x1x1x1x8x8xf32>,
    %278 = vector.extract_strided_slice %262 {offsets = [8, 0], sizes = [8, 8], strides = [1, 1]} : vector<16x8xf32> to vector<8x8xf32>
    %c0_237 = arith.constant 0 : index
    %c1_238 = arith.constant 1 : index
    %c2_239 = arith.constant 2 : index
    %c1_240 = arith.constant 1 : index
    %279 = arith.index_cast %0 : i32 to index
    %c0_241 = arith.constant 0 : index
    %280 = vector.load %arg15[%c0_237, %c1_238, %c2_239, %c1_240, %279, %c0_241] : memref<2x2x4x2x128x8xf32, #tpu.memory_space<vmem>>, vector<1x1x1x1x8x8xf32>
    %281 = vector.shape_cast %280 : vector<1x1x1x1x8x8xf32> to vector<8x8xf32>
    %282 = vector.shape_cast %278 : vector<8x8xf32> to vector<1x1x1x1x8x8xf32>
    tpu.vector_store %arg15[%c0_237, %c1_238, %c2_239, %c1_240, %279, %c0_241], %282 {strides = array<i32>} : memref<2x2x4x2x128x8xf32, #tpu.memory_space<vmem>>, vector<1x1x1x1x8x8xf32>,
    %c0_242 = arith.constant 0 : index
    %c0_243 = arith.constant 0 : index
    %c2_244 = arith.constant 2 : index
    %c0_245 = arith.constant 0 : index
    %c0_246 = arith.constant 0 : index
    %c0_247 = arith.constant 0 : index
    %283 = vector.load %arg15[%c0_242, %c0_243, %c2_244, %c0_245, %c0_246, %c0_247] : memref<2x2x4x2x128x8xf32, #tpu.memory_space<vmem>>, vector<1x1x1x2x128x8xf32>
    %284 = vector.shape_cast %283 : vector<1x1x1x2x128x8xf32> to vector<2x128x8xf32>
    %c0_248 = arith.constant 0 : index
    %c1_249 = arith.constant 1 : index
    %c2_250 = arith.constant 2 : index
    %c0_251 = arith.constant 0 : index
    %c0_252 = arith.constant 0 : index
    %c0_253 = arith.constant 0 : index
    %285 = vector.load %arg15[%c0_248, %c1_249, %c2_250, %c0_251, %c0_252, %c0_253] : memref<2x2x4x2x128x8xf32, #tpu.memory_space<vmem>>, vector<1x1x1x2x128x8xf32>
    %286 = vector.shape_cast %285 : vector<1x1x1x2x128x8xf32> to vector<2x128x8xf32>
    %287 = vector.shape_cast %248 : vector<16x8xf32> to vector<2x8x8xf32>
    "tpu.trace_start"() <{level = 10 : i32, message = "btd,bsd->bts"}> : () -> ()
    %cst_254 = arith.constant dense<0.000000e+00> : vector<2x8x128xf32>
    %288 = tpu.matmul %287, %284, %cst_254 {dimension_numbers = #tpu.dot_dimension_numbers<[2], [2], [1], [1], [0, 0, 0, 1, 1, 1], [0], [0]>} : vector<2x8x8xf32>, vector<2x128x8xf32>, vector<2x8x128xf32> -> vector<2x8x128xf32>
    "tpu.trace_stop"() : () -> ()
    %cst_255 = arith.constant 0.353553385 : f32
    %289 = vector.broadcast %cst_255 : f32 to vector<2x8x128xf32>
    %290 = arith.mulf %288, %289 : vector<2x8x128xf32>
    %291 = vector.broadcast %106 : vector<1x8x128xf32> to vector<2x8x128xf32>
    %292 = arith.addf %290, %291 : vector<2x8x128xf32>
    %cst_256 = arith.constant dense<0xFF800000> : vector<2x8xf32>
    %293 = vector.multi_reduction <maximumf>, %292, %cst_256 [2] : vector<2x8x128xf32> to vector<2x8xf32>
    %294 = vector.shape_cast %293 : vector<2x8xf32> to vector<2x8x1xf32>
    %295 = vector.broadcast %294 : vector<2x8x1xf32> to vector<2x8x128xf32>
    %296 = arith.subf %292, %295 : vector<2x8x128xf32>
    %297 = math.exp %296 : vector<2x8x128xf32>
    %cst_257 = arith.constant dense<0.000000e+00> : vector<2x8xf32>
    %298 = vector.multi_reduction <add>, %297, %cst_257 [2] : vector<2x8x128xf32> to vector<2x8xf32>
    %299 = vector.shape_cast %298 : vector<2x8xf32> to vector<2x8x1xf32>
    %300 = tpu.reciprocal %299 {approx = true} : vector<2x8x1xf32> -> vector<2x8x1xf32>
    %301 = vector.broadcast %300 : vector<2x8x1xf32> to vector<2x8x128xf32>
    %302 = arith.mulf %297, %301 : vector<2x8x128xf32>
    "tpu.trace_start"() <{level = 10 : i32, message = "bts,bsd->btd"}> : () -> ()
    %cst_258 = arith.constant dense<0.000000e+00> : vector<2x8x8xf32>
    %303 = tpu.matmul %302, %286, %cst_258 {dimension_numbers = #tpu.dot_dimension_numbers<[2], [1], [1], [2], [0, 0, 0, 1, 1, 2], [0], [0]>} : vector<2x8x128xf32>, vector<2x128x8xf32>, vector<2x8x8xf32> -> vector<2x8x8xf32>
    "tpu.trace_stop"() : () -> ()
    %304 = vector.shape_cast %303 : vector<2x8x8xf32> to vector<16x8xf32>
    %c0_259 = arith.constant 0 : index
    %c2_260 = arith.constant 2 : index
    %c0_261 = arith.constant 0 : index
    %c0_262 = arith.constant 0 : index
    %305 = vector.load %arg6[%c0_259, %c2_260, %c0_261, %c0_262] : memref<2x4x8x32xf32, #tpu.memory_space<vmem>>, vector<1x1x8x32xf32>
    %306 = vector.shape_cast %305 : vector<1x1x8x32xf32> to vector<8x32xf32>
    %cst_263 = arith.constant dense<0.000000e+00> : vector<16x32xf32>
    %307 = tpu.matmul %304, %306, %cst_263 {dimension_numbers = #tpu.dot_dimension_numbers<[1], [0], [0], [1], [0, 0, 1, 1], [], []>} : vector<16x8xf32>, vector<8x32xf32>, vector<16x32xf32> -> vector<16x32xf32>
    %308 = arith.addf %241, %307 : vector<16x32xf32>
    %c0_264 = arith.constant 0 : index
    %c0_265 = arith.constant 0 : index
    %c3_266 = arith.constant 3 : index
    %c0_267 = arith.constant 0 : index
    %c0_268 = arith.constant 0 : index
    %309 = vector.load %arg4[%c0_264, %c0_265, %c3_266, %c0_267, %c0_268] : memref<2x3x4x32x8xf32, #tpu.memory_space<vmem>>, vector<1x1x1x32x8xf32>
    %310 = vector.shape_cast %309 : vector<1x1x1x32x8xf32> to vector<32x8xf32>
    %cst_269 = arith.constant dense<0.000000e+00> : vector<16x8xf32>
    %311 = tpu.matmul %88, %310, %cst_269 {dimension_numbers = #tpu.dot_dimension_numbers<[1], [0], [0], [1], [0, 0, 1, 1], [], []>} : vector<16x32xf32>, vector<32x8xf32>, vector<16x8xf32> -> vector<16x8xf32>
    %c0_270 = arith.constant 0 : index
    %c0_271 = arith.constant 0 : index
    %c3_272 = arith.constant 3 : index
    %c0_273 = arith.constant 0 : index
    %c0_274 = arith.constant 0 : index
    %312 = vector.load %arg5[%c0_270, %c0_271, %c3_272, %c0_273, %c0_274] : memref<2x3x4x1x8xf32, #tpu.memory_space<vmem>>, vector<1x1x1x1x8xf32>
    %313 = vector.shape_cast %312 : vector<1x1x1x1x8xf32> to vector<1x8xf32>
    %314 = vector.broadcast %313 : vector<1x8xf32> to vector<16x8xf32>
    %315 = arith.addf %311, %314 : vector<16x8xf32>
    %c0_275 = arith.constant 0 : index
    %c1_276 = arith.constant 1 : index
    %c3_277 = arith.constant 3 : index
    %c0_278 = arith.constant 0 : index
    %c0_279 = arith.constant 0 : index
    %316 = vector.load %arg4[%c0_275, %c1_276, %c3_277, %c0_278, %c0_279] : memref<2x3x4x32x8xf32, #tpu.memory_space<vmem>>, vector<1x1x1x32x8xf32>
    %317 = vector.shape_cast %316 : vector<1x1x1x32x8xf32> to vector<32x8xf32>
    %cst_280 = arith.constant dense<0.000000e+00> : vector<16x8xf32>
    %318 = tpu.matmul %88, %317, %cst_280 {dimension_numbers = #tpu.dot_dimension_numbers<[1], [0], [0], [1], [0, 0, 1, 1], [], []>} : vector<16x32xf32>, vector<32x8xf32>, vector<16x8xf32> -> vector<16x8xf32>
    %c0_281 = arith.constant 0 : index
    %c1_282 = arith.constant 1 : index
    %c3_283 = arith.constant 3 : index
    %c0_284 = arith.constant 0 : index
    %c0_285 = arith.constant 0 : index
    %319 = vector.load %arg5[%c0_281, %c1_282, %c3_283, %c0_284, %c0_285] : memref<2x3x4x1x8xf32, #tpu.memory_space<vmem>>, vector<1x1x1x1x8xf32>
    %320 = vector.shape_cast %319 : vector<1x1x1x1x8xf32> to vector<1x8xf32>
    %321 = vector.broadcast %320 : vector<1x8xf32> to vector<16x8xf32>
    %322 = arith.addf %318, %321 : vector<16x8xf32>
    %c0_286 = arith.constant 0 : index
    %c2_287 = arith.constant 2 : index
    %c3_288 = arith.constant 3 : index
    %c0_289 = arith.constant 0 : index
    %c0_290 = arith.constant 0 : index
    %323 = vector.load %arg4[%c0_286, %c2_287, %c3_288, %c0_289, %c0_290] : memref<2x3x4x32x8xf32, #tpu.memory_space<vmem>>, vector<1x1x1x32x8xf32>
    %324 = vector.shape_cast %323 : vector<1x1x1x32x8xf32> to vector<32x8xf32>
    %cst_291 = arith.constant dense<0.000000e+00> : vector<16x8xf32>
    %325 = tpu.matmul %88, %324, %cst_291 {dimension_numbers = #tpu.dot_dimension_numbers<[1], [0], [0], [1], [0, 0, 1, 1], [], []>} : vector<16x32xf32>, vector<32x8xf32>, vector<16x8xf32> -> vector<16x8xf32>
    %c0_292 = arith.constant 0 : index
    %c2_293 = arith.constant 2 : index
    %c3_294 = arith.constant 3 : index
    %c0_295 = arith.constant 0 : index
    %c0_296 = arith.constant 0 : index
    %326 = vector.load %arg5[%c0_292, %c2_293, %c3_294, %c0_295, %c0_296] : memref<2x3x4x1x8xf32, #tpu.memory_space<vmem>>, vector<1x1x1x1x8xf32>
    %327 = vector.shape_cast %326 : vector<1x1x1x1x8xf32> to vector<1x8xf32>
    %328 = vector.broadcast %327 : vector<1x8xf32> to vector<16x8xf32>
    %329 = arith.addf %325, %328 : vector<16x8xf32>
    %330 = vector.extract_strided_slice %322 {offsets = [0, 0], sizes = [8, 8], strides = [1, 1]} : vector<16x8xf32> to vector<8x8xf32>
    %c0_297 = arith.constant 0 : index
    %c0_298 = arith.constant 0 : index
    %c3_299 = arith.constant 3 : index
    %c0_300 = arith.constant 0 : index
    %331 = arith.index_cast %0 : i32 to index
    %c0_301 = arith.constant 0 : index
    %332 = vector.load %arg15[%c0_297, %c0_298, %c3_299, %c0_300, %331, %c0_301] : memref<2x2x4x2x128x8xf32, #tpu.memory_space<vmem>>, vector<1x1x1x1x8x8xf32>
    %333 = vector.shape_cast %332 : vector<1x1x1x1x8x8xf32> to vector<8x8xf32>
    %334 = vector.shape_cast %330 : vector<8x8xf32> to vector<1x1x1x1x8x8xf32>
    tpu.vector_store %arg15[%c0_297, %c0_298, %c3_299, %c0_300, %331, %c0_301], %334 {strides = array<i32>} : memref<2x2x4x2x128x8xf32, #tpu.memory_space<vmem>>, vector<1x1x1x1x8x8xf32>,
    %335 = vector.extract_strided_slice %329 {offsets = [0, 0], sizes = [8, 8], strides = [1, 1]} : vector<16x8xf32> to vector<8x8xf32>
    %c0_302 = arith.constant 0 : index
    %c1_303 = arith.constant 1 : index
    %c3_304 = arith.constant 3 : index
    %c0_305 = arith.constant 0 : index
    %336 = arith.index_cast %0 : i32 to index
    %c0_306 = arith.constant 0 : index
    %337 = vector.load %arg15[%c0_302, %c1_303, %c3_304, %c0_305, %336, %c0_306] : memref<2x2x4x2x128x8xf32, #tpu.memory_space<vmem>>, vector<1x1x1x1x8x8xf32>
    %338 = vector.shape_cast %337 : vector<1x1x1x1x8x8xf32> to vector<8x8xf32>
    %339 = vector.shape_cast %335 : vector<8x8xf32> to vector<1x1x1x1x8x8xf32>
    tpu.vector_store %arg15[%c0_302, %c1_303, %c3_304, %c0_305, %336, %c0_306], %339 {strides = array<i32>} : memref<2x2x4x2x128x8xf32, #tpu.memory_space<vmem>>, vector<1x1x1x1x8x8xf32>,
    %340 = vector.extract_strided_slice %322 {offsets = [8, 0], sizes = [8, 8], strides = [1, 1]} : vector<16x8xf32> to vector<8x8xf32>
    %c0_307 = arith.constant 0 : index
    %c0_308 = arith.constant 0 : index
    %c3_309 = arith.constant 3 : index
    %c1_310 = arith.constant 1 : index
    %341 = arith.index_cast %0 : i32 to index
    %c0_311 = arith.constant 0 : index
    %342 = vector.load %arg15[%c0_307, %c0_308, %c3_309, %c1_310, %341, %c0_311] : memref<2x2x4x2x128x8xf32, #tpu.memory_space<vmem>>, vector<1x1x1x1x8x8xf32>
    %343 = vector.shape_cast %342 : vector<1x1x1x1x8x8xf32> to vector<8x8xf32>
    %344 = vector.shape_cast %340 : vector<8x8xf32> to vector<1x1x1x1x8x8xf32>
    tpu.vector_store %arg15[%c0_307, %c0_308, %c3_309, %c1_310, %341, %c0_311], %344 {strides = array<i32>} : memref<2x2x4x2x128x8xf32, #tpu.memory_space<vmem>>, vector<1x1x1x1x8x8xf32>,
    %345 = vector.extract_strided_slice %329 {offsets = [8, 0], sizes = [8, 8], strides = [1, 1]} : vector<16x8xf32> to vector<8x8xf32>
    %c0_312 = arith.constant 0 : index
    %c1_313 = arith.constant 1 : index
    %c3_314 = arith.constant 3 : index
    %c1_315 = arith.constant 1 : index
    %346 = arith.index_cast %0 : i32 to index
    %c0_316 = arith.constant 0 : index
    %347 = vector.load %arg15[%c0_312, %c1_313, %c3_314, %c1_315, %346, %c0_316] : memref<2x2x4x2x128x8xf32, #tpu.memory_space<vmem>>, vector<1x1x1x1x8x8xf32>
    %348 = vector.shape_cast %347 : vector<1x1x1x1x8x8xf32> to vector<8x8xf32>
    %349 = vector.shape_cast %345 : vector<8x8xf32> to vector<1x1x1x1x8x8xf32>
    tpu.vector_store %arg15[%c0_312, %c1_313, %c3_314, %c1_315, %346, %c0_316], %349 {strides = array<i32>} : memref<2x2x4x2x128x8xf32, #tpu.memory_space<vmem>>, vector<1x1x1x1x8x8xf32>,
    %c0_317 = arith.constant 0 : index
    %c0_318 = arith.constant 0 : index
    %c3_319 = arith.constant 3 : index
    %c0_320 = arith.constant 0 : index
    %c0_321 = arith.constant 0 : index
    %c0_322 = arith.constant 0 : index
    %350 = vector.load %arg15[%c0_317, %c0_318, %c3_319, %c0_320, %c0_321, %c0_322] : memref<2x2x4x2x128x8xf32, #tpu.memory_space<vmem>>, vector<1x1x1x2x128x8xf32>
    %351 = vector.shape_cast %350 : vector<1x1x1x2x128x8xf32> to vector<2x128x8xf32>
    %c0_323 = arith.constant 0 : index
    %c1_324 = arith.constant 1 : index
    %c3_325 = arith.constant 3 : index
    %c0_326 = arith.constant 0 : index
    %c0_327 = arith.constant 0 : index
    %c0_328 = arith.constant 0 : index
    %352 = vector.load %arg15[%c0_323, %c1_324, %c3_325, %c0_326, %c0_327, %c0_328] : memref<2x2x4x2x128x8xf32, #tpu.memory_space<vmem>>, vector<1x1x1x2x128x8xf32>
    %353 = vector.shape_cast %352 : vector<1x1x1x2x128x8xf32> to vector<2x128x8xf32>
    %354 = vector.shape_cast %315 : vector<16x8xf32> to vector<2x8x8xf32>
    "tpu.trace_start"() <{level = 10 : i32, message = "btd,bsd->bts"}> : () -> ()
    %cst_329 = arith.constant dense<0.000000e+00> : vector<2x8x128xf32>
    %355 = tpu.matmul %354, %351, %cst_329 {dimension_numbers = #tpu.dot_dimension_numbers<[2], [2], [1], [1], [0, 0, 0, 1, 1, 1], [0], [0]>} : vector<2x8x8xf32>, vector<2x128x8xf32>, vector<2x8x128xf32> -> vector<2x8x128xf32>
    "tpu.trace_stop"() : () -> ()
    %cst_330 = arith.constant 0.353553385 : f32
    %356 = vector.broadcast %cst_330 : f32 to vector<2x8x128xf32>
    %357 = arith.mulf %355, %356 : vector<2x8x128xf32>
    %358 = vector.broadcast %106 : vector<1x8x128xf32> to vector<2x8x128xf32>
    %359 = arith.addf %357, %358 : vector<2x8x128xf32>
    %cst_331 = arith.constant dense<0xFF800000> : vector<2x8xf32>
    %360 = vector.multi_reduction <maximumf>, %359, %cst_331 [2] : vector<2x8x128xf32> to vector<2x8xf32>
    %361 = vector.shape_cast %360 : vector<2x8xf32> to vector<2x8x1xf32>
    %362 = vector.broadcast %361 : vector<2x8x1xf32> to vector<2x8x128xf32>
    %363 = arith.subf %359, %362 : vector<2x8x128xf32>
    %364 = math.exp %363 : vector<2x8x128xf32>
    %cst_332 = arith.constant dense<0.000000e+00> : vector<2x8xf32>
    %365 = vector.multi_reduction <add>, %364, %cst_332 [2] : vector<2x8x128xf32> to vector<2x8xf32>
    %366 = vector.shape_cast %365 : vector<2x8xf32> to vector<2x8x1xf32>
    %367 = tpu.reciprocal %366 {approx = true} : vector<2x8x1xf32> -> vector<2x8x1xf32>
    %368 = vector.broadcast %367 : vector<2x8x1xf32> to vector<2x8x128xf32>
    %369 = arith.mulf %364, %368 : vector<2x8x128xf32>
    "tpu.trace_start"() <{level = 10 : i32, message = "bts,bsd->btd"}> : () -> ()
    %cst_333 = arith.constant dense<0.000000e+00> : vector<2x8x8xf32>
    %370 = tpu.matmul %369, %353, %cst_333 {dimension_numbers = #tpu.dot_dimension_numbers<[2], [1], [1], [2], [0, 0, 0, 1, 1, 2], [0], [0]>} : vector<2x8x128xf32>, vector<2x128x8xf32>, vector<2x8x8xf32> -> vector<2x8x8xf32>
    "tpu.trace_stop"() : () -> ()
    %371 = vector.shape_cast %370 : vector<2x8x8xf32> to vector<16x8xf32>
    %c0_334 = arith.constant 0 : index
    %c3_335 = arith.constant 3 : index
    %c0_336 = arith.constant 0 : index
    %c0_337 = arith.constant 0 : index
    %372 = vector.load %arg6[%c0_334, %c3_335, %c0_336, %c0_337] : memref<2x4x8x32xf32, #tpu.memory_space<vmem>>, vector<1x1x8x32xf32>
    %373 = vector.shape_cast %372 : vector<1x1x8x32xf32> to vector<8x32xf32>
    %cst_338 = arith.constant dense<0.000000e+00> : vector<16x32xf32>
    %374 = tpu.matmul %371, %373, %cst_338 {dimension_numbers = #tpu.dot_dimension_numbers<[1], [0], [0], [1], [0, 0, 1, 1], [], []>} : vector<16x8xf32>, vector<8x32xf32>, vector<16x32xf32> -> vector<16x32xf32>
    %375 = arith.addf %308, %374 : vector<16x32xf32>
    %c0_339 = arith.constant 0 : index
    %c0_340 = arith.constant 0 : index
    %c0_341 = arith.constant 0 : index
    %c0_342 = arith.constant 0 : index
    %376 = vector.load %arg10[%c0_339, %c0_340, %c0_341, %c0_342] : memref<2x6x1x32xf32, #tpu.memory_space<vmem>>, vector<1x1x1x32xf32>
    %377 = vector.shape_cast %376 : vector<1x1x1x32xf32> to vector<1x32xf32>
    %378 = vector.broadcast %377 : vector<1x32xf32> to vector<16x32xf32>
    %379 = arith.addf %375, %378 : vector<16x32xf32>
    %380 = arith.addf %88, %379 : vector<16x32xf32>
    %c0_343 = arith.constant 0 : index
    %c1_344 = arith.constant 1 : index
    %c0_345 = arith.constant 0 : index
    %c0_346 = arith.constant 0 : index
    %381 = vector.load %arg10[%c0_343, %c1_344, %c0_345, %c0_346] : memref<2x6x1x32xf32, #tpu.memory_space<vmem>>, vector<1x1x1x32xf32>
    %382 = vector.shape_cast %381 : vector<1x1x1x32xf32> to vector<1x32xf32>
    %c0_347 = arith.constant 0 : index
    %c2_348 = arith.constant 2 : index
    %c0_349 = arith.constant 0 : index
    %c0_350 = arith.constant 0 : index
    %383 = vector.load %arg10[%c0_347, %c2_348, %c0_349, %c0_350] : memref<2x6x1x32xf32, #tpu.memory_space<vmem>>, vector<1x1x1x32xf32>
    %384 = vector.shape_cast %383 : vector<1x1x1x32xf32> to vector<1x32xf32>
    %cst_351 = arith.constant dense<0.000000e+00> : vector<16xf32>
    %385 = vector.multi_reduction <add>, %380, %cst_351 [1] : vector<16x32xf32> to vector<16xf32>
    %386 = vector.shape_cast %385 : vector<16xf32> to vector<16x1xf32>
    %cst_352 = arith.constant 3.200000e+01 : f32
    %387 = vector.broadcast %cst_352 : f32 to vector<16x1xf32>
    %388 = arith.divf %386, %387 : vector<16x1xf32>
    %389 = vector.broadcast %388 : vector<16x1xf32> to vector<16x32xf32>
    %390 = arith.subf %380, %389 : vector<16x32xf32>
    %391 = arith.mulf %390, %390 : vector<16x32xf32>
    %cst_353 = arith.constant dense<0.000000e+00> : vector<16xf32>
    %392 = vector.multi_reduction <add>, %391, %cst_353 [1] : vector<16x32xf32> to vector<16xf32>
    %393 = vector.shape_cast %392 : vector<16xf32> to vector<16x1xf32>
    %cst_354 = arith.constant 3.200000e+01 : f32
    %394 = vector.broadcast %cst_354 : f32 to vector<16x1xf32>
    %395 = arith.divf %393, %394 : vector<16x1xf32>
    %396 = vector.broadcast %388 : vector<16x1xf32> to vector<16x32xf32>
    %397 = arith.subf %380, %396 : vector<16x32xf32>
    %cst_355 = arith.constant 9.99999974E-6 : f32
    %398 = vector.broadcast %cst_355 : f32 to vector<16x1xf32>
    %399 = arith.addf %395, %398 : vector<16x1xf32>
    %400 = math.rsqrt %399 : vector<16x1xf32>
    %401 = vector.broadcast %400 : vector<16x1xf32> to vector<16x32xf32>
    %402 = arith.mulf %397, %401 : vector<16x32xf32>
    %403 = vector.broadcast %382 : vector<1x32xf32> to vector<16x32xf32>
    %404 = arith.mulf %402, %403 : vector<16x32xf32>
    %405 = vector.broadcast %384 : vector<1x32xf32> to vector<16x32xf32>
    %406 = arith.addf %404, %405 : vector<16x32xf32>
    %c0_356 = arith.constant 0 : index
    %c0_357 = arith.constant 0 : index
    %c0_358 = arith.constant 0 : index
    %407 = vector.load %arg7[%c0_356, %c0_357, %c0_358] : memref<2x32x128xf32, #tpu.memory_space<vmem>>, vector<1x32x128xf32>
    %408 = vector.shape_cast %407 : vector<1x32x128xf32> to vector<32x128xf32>
    %cst_359 = arith.constant dense<0.000000e+00> : vector<16x128xf32>
    %409 = tpu.matmul %406, %408, %cst_359 {dimension_numbers = #tpu.dot_dimension_numbers<[1], [0], [0], [1], [0, 0, 1, 1], [], []>} : vector<16x32xf32>, vector<32x128xf32>, vector<16x128xf32> -> vector<16x128xf32>
    %c0_360 = arith.constant 0 : index
    %c0_361 = arith.constant 0 : index
    %c0_362 = arith.constant 0 : index
    %410 = vector.load %arg8[%c0_360, %c0_361, %c0_362] : memref<2x1x128xf32, #tpu.memory_space<vmem>>, vector<1x1x128xf32>
    %411 = vector.shape_cast %410 : vector<1x1x128xf32> to vector<1x128xf32>
    %412 = vector.broadcast %411 : vector<1x128xf32> to vector<16x128xf32>
    %413 = arith.addf %409, %412 : vector<16x128xf32>
    %cst_363 = arith.constant 5.000000e-01 : f32
    %414 = vector.broadcast %cst_363 : f32 to vector<16x128xf32>
    %415 = arith.mulf %414, %413 : vector<16x128xf32>
    %cst_364 = arith.constant 4.471500e-02 : f32
    %416 = vector.broadcast %cst_364 : f32 to vector<16x128xf32>
    %417 = arith.mulf %416, %413 : vector<16x128xf32>
    %418 = arith.mulf %417, %413 : vector<16x128xf32>
    %419 = arith.mulf %418, %413 : vector<16x128xf32>
    %420 = arith.addf %413, %419 : vector<16x128xf32>
    %cst_365 = arith.constant 0.797884583 : f32
    %421 = vector.broadcast %cst_365 : f32 to vector<16x128xf32>
    %422 = arith.mulf %421, %420 : vector<16x128xf32>
    %423 = math.tanh %422 : vector<16x128xf32>
    %cst_366 = arith.constant 1.000000e+00 : f32
    %424 = vector.broadcast %cst_366 : f32 to vector<16x128xf32>
    %425 = arith.addf %424, %423 : vector<16x128xf32>
    %426 = arith.mulf %415, %425 : vector<16x128xf32>
    %c0_367 = arith.constant 0 : index
    %c0_368 = arith.constant 0 : index
    %c0_369 = arith.constant 0 : index
    %427 = vector.load %arg9[%c0_367, %c0_368, %c0_369] : memref<2x128x32xf32, #tpu.memory_space<vmem>>, vector<1x128x32xf32>
    %428 = vector.shape_cast %427 : vector<1x128x32xf32> to vector<128x32xf32>
    %cst_370 = arith.constant dense<0.000000e+00> : vector<16x32xf32>
    %429 = tpu.matmul %426, %428, %cst_370 {dimension_numbers = #tpu.dot_dimension_numbers<[1], [0], [0], [1], [0, 0, 1, 1], [], []>} : vector<16x128xf32>, vector<128x32xf32>, vector<16x32xf32> -> vector<16x32xf32>
    %c0_371 = arith.constant 0 : index
    %c5 = arith.constant 5 : index
    %c0_372 = arith.constant 0 : index
    %c0_373 = arith.constant 0 : index
    %430 = vector.load %arg10[%c0_371, %c5, %c0_372, %c0_373] : memref<2x6x1x32xf32, #tpu.memory_space<vmem>>, vector<1x1x1x32xf32>
    %431 = vector.shape_cast %430 : vector<1x1x1x32xf32> to vector<1x32xf32>
    %432 = vector.broadcast %431 : vector<1x32xf32> to vector<16x32xf32>
    %433 = arith.addf %429, %432 : vector<16x32xf32>
    %434 = arith.addf %406, %433 : vector<16x32xf32>
    %c0_374 = arith.constant 0 : index
    %c3_375 = arith.constant 3 : index
    %c0_376 = arith.constant 0 : index
    %c0_377 = arith.constant 0 : index
    %435 = vector.load %arg10[%c0_374, %c3_375, %c0_376, %c0_377] : memref<2x6x1x32xf32, #tpu.memory_space<vmem>>, vector<1x1x1x32xf32>
    %436 = vector.shape_cast %435 : vector<1x1x1x32xf32> to vector<1x32xf32>
    %c0_378 = arith.constant 0 : index
    %c4 = arith.constant 4 : index
    %c0_379 = arith.constant 0 : index
    %c0_380 = arith.constant 0 : index
    %437 = vector.load %arg10[%c0_378, %c4, %c0_379, %c0_380] : memref<2x6x1x32xf32, #tpu.memory_space<vmem>>, vector<1x1x1x32xf32>
    %438 = vector.shape_cast %437 : vector<1x1x1x32xf32> to vector<1x32xf32>
    %cst_381 = arith.constant dense<0.000000e+00> : vector<16xf32>
    %439 = vector.multi_reduction <add>, %434, %cst_381 [1] : vector<16x32xf32> to vector<16xf32>
    %440 = vector.shape_cast %439 : vector<16xf32> to vector<16x1xf32>
    %cst_382 = arith.constant 3.200000e+01 : f32
    %441 = vector.broadcast %cst_382 : f32 to vector<16x1xf32>
    %442 = arith.divf %440, %441 : vector<16x1xf32>
    %443 = vector.broadcast %442 : vector<16x1xf32> to vector<16x32xf32>
    %444 = arith.subf %434, %443 : vector<16x32xf32>
    %445 = arith.mulf %444, %444 : vector<16x32xf32>
    %cst_383 = arith.constant dense<0.000000e+00> : vector<16xf32>
    %446 = vector.multi_reduction <add>, %445, %cst_383 [1] : vector<16x32xf32> to vector<16xf32>
    %447 = vector.shape_cast %446 : vector<16xf32> to vector<16x1xf32>
    %cst_384 = arith.constant 3.200000e+01 : f32
    %448 = vector.broadcast %cst_384 : f32 to vector<16x1xf32>
    %449 = arith.divf %447, %448 : vector<16x1xf32>
    %450 = vector.broadcast %442 : vector<16x1xf32> to vector<16x32xf32>
    %451 = arith.subf %434, %450 : vector<16x32xf32>
    %cst_385 = arith.constant 9.99999974E-6 : f32
    %452 = vector.broadcast %cst_385 : f32 to vector<16x1xf32>
    %453 = arith.addf %449, %452 : vector<16x1xf32>
    %454 = math.rsqrt %453 : vector<16x1xf32>
    %455 = vector.broadcast %454 : vector<16x1xf32> to vector<16x32xf32>
    %456 = arith.mulf %451, %455 : vector<16x32xf32>
    %457 = vector.broadcast %436 : vector<1x32xf32> to vector<16x32xf32>
    %458 = arith.mulf %456, %457 : vector<16x32xf32>
    %459 = vector.broadcast %438 : vector<1x32xf32> to vector<16x32xf32>
    %460 = arith.addf %458, %459 : vector<16x32xf32>
    %cst_386 = arith.constant 0.000000e+00 : f32
    %461 = vector.broadcast %cst_386 : f32 to vector<16x32xf32>
    %c1_387 = arith.constant 1 : index
    %c0_388 = arith.constant 0 : index
    %c0_389 = arith.constant 0 : index
    %c0_390 = arith.constant 0 : index
    %c0_391 = arith.constant 0 : index
    %462 = vector.load %arg4[%c1_387, %c0_388, %c0_389, %c0_390, %c0_391] : memref<2x3x4x32x8xf32, #tpu.memory_space<vmem>>, vector<1x1x1x32x8xf32>
    %463 = vector.shape_cast %462 : vector<1x1x1x32x8xf32> to vector<32x8xf32>
    %cst_392 = arith.constant dense<0.000000e+00> : vector<16x8xf32>
    %464 = tpu.matmul %460, %463, %cst_392 {dimension_numbers = #tpu.dot_dimension_numbers<[1], [0], [0], [1], [0, 0, 1, 1], [], []>} : vector<16x32xf32>, vector<32x8xf32>, vector<16x8xf32> -> vector<16x8xf32>
    %c1_393 = arith.constant 1 : index
    %c0_394 = arith.constant 0 : index
    %c0_395 = arith.constant 0 : index
    %c0_396 = arith.constant 0 : index
    %c0_397 = arith.constant 0 : index
    %465 = vector.load %arg5[%c1_393, %c0_394, %c0_395, %c0_396, %c0_397] : memref<2x3x4x1x8xf32, #tpu.memory_space<vmem>>, vector<1x1x1x1x8xf32>
    %466 = vector.shape_cast %465 : vector<1x1x1x1x8xf32> to vector<1x8xf32>
    %467 = vector.broadcast %466 : vector<1x8xf32> to vector<16x8xf32>
    %468 = arith.addf %464, %467 : vector<16x8xf32>
    %c1_398 = arith.constant 1 : index
    %c1_399 = arith.constant 1 : index
    %c0_400 = arith.constant 0 : index
    %c0_401 = arith.constant 0 : index
    %c0_402 = arith.constant 0 : index
    %469 = vector.load %arg4[%c1_398, %c1_399, %c0_400, %c0_401, %c0_402] : memref<2x3x4x32x8xf32, #tpu.memory_space<vmem>>, vector<1x1x1x32x8xf32>
    %470 = vector.shape_cast %469 : vector<1x1x1x32x8xf32> to vector<32x8xf32>
    %cst_403 = arith.constant dense<0.000000e+00> : vector<16x8xf32>
    %471 = tpu.matmul %460, %470, %cst_403 {dimension_numbers = #tpu.dot_dimension_numbers<[1], [0], [0], [1], [0, 0, 1, 1], [], []>} : vector<16x32xf32>, vector<32x8xf32>, vector<16x8xf32> -> vector<16x8xf32>
    %c1_404 = arith.constant 1 : index
    %c1_405 = arith.constant 1 : index
    %c0_406 = arith.constant 0 : index
    %c0_407 = arith.constant 0 : index
    %c0_408 = arith.constant 0 : index
    %472 = vector.load %arg5[%c1_404, %c1_405, %c0_406, %c0_407, %c0_408] : memref<2x3x4x1x8xf32, #tpu.memory_space<vmem>>, vector<1x1x1x1x8xf32>
    %473 = vector.shape_cast %472 : vector<1x1x1x1x8xf32> to vector<1x8xf32>
    %474 = vector.broadcast %473 : vector<1x8xf32> to vector<16x8xf32>
    %475 = arith.addf %471, %474 : vector<16x8xf32>
    %c1_409 = arith.constant 1 : index
    %c2_410 = arith.constant 2 : index
    %c0_411 = arith.constant 0 : index
    %c0_412 = arith.constant 0 : index
    %c0_413 = arith.constant 0 : index
    %476 = vector.load %arg4[%c1_409, %c2_410, %c0_411, %c0_412, %c0_413] : memref<2x3x4x32x8xf32, #tpu.memory_space<vmem>>, vector<1x1x1x32x8xf32>
    %477 = vector.shape_cast %476 : vector<1x1x1x32x8xf32> to vector<32x8xf32>
    %cst_414 = arith.constant dense<0.000000e+00> : vector<16x8xf32>
    %478 = tpu.matmul %460, %477, %cst_414 {dimension_numbers = #tpu.dot_dimension_numbers<[1], [0], [0], [1], [0, 0, 1, 1], [], []>} : vector<16x32xf32>, vector<32x8xf32>, vector<16x8xf32> -> vector<16x8xf32>
    %c1_415 = arith.constant 1 : index
    %c2_416 = arith.constant 2 : index
    %c0_417 = arith.constant 0 : index
    %c0_418 = arith.constant 0 : index
    %c0_419 = arith.constant 0 : index
    %479 = vector.load %arg5[%c1_415, %c2_416, %c0_417, %c0_418, %c0_419] : memref<2x3x4x1x8xf32, #tpu.memory_space<vmem>>, vector<1x1x1x1x8xf32>
    %480 = vector.shape_cast %479 : vector<1x1x1x1x8xf32> to vector<1x8xf32>
    %481 = vector.broadcast %480 : vector<1x8xf32> to vector<16x8xf32>
    %482 = arith.addf %478, %481 : vector<16x8xf32>
    %483 = vector.extract_strided_slice %475 {offsets = [0, 0], sizes = [8, 8], strides = [1, 1]} : vector<16x8xf32> to vector<8x8xf32>
    %c1_420 = arith.constant 1 : index
    %c0_421 = arith.constant 0 : index
    %c0_422 = arith.constant 0 : index
    %c0_423 = arith.constant 0 : index
    %484 = arith.index_cast %0 : i32 to index
    %c0_424 = arith.constant 0 : index
    %485 = vector.load %arg15[%c1_420, %c0_421, %c0_422, %c0_423, %484, %c0_424] : memref<2x2x4x2x128x8xf32, #tpu.memory_space<vmem>>, vector<1x1x1x1x8x8xf32>
    %486 = vector.shape_cast %485 : vector<1x1x1x1x8x8xf32> to vector<8x8xf32>
    %487 = vector.shape_cast %483 : vector<8x8xf32> to vector<1x1x1x1x8x8xf32>
    tpu.vector_store %arg15[%c1_420, %c0_421, %c0_422, %c0_423, %484, %c0_424], %487 {strides = array<i32>} : memref<2x2x4x2x128x8xf32, #tpu.memory_space<vmem>>, vector<1x1x1x1x8x8xf32>,
    %488 = vector.extract_strided_slice %482 {offsets = [0, 0], sizes = [8, 8], strides = [1, 1]} : vector<16x8xf32> to vector<8x8xf32>
    %c1_425 = arith.constant 1 : index
    %c1_426 = arith.constant 1 : index
    %c0_427 = arith.constant 0 : index
    %c0_428 = arith.constant 0 : index
    %489 = arith.index_cast %0 : i32 to index
    %c0_429 = arith.constant 0 : index
    %490 = vector.load %arg15[%c1_425, %c1_426, %c0_427, %c0_428, %489, %c0_429] : memref<2x2x4x2x128x8xf32, #tpu.memory_space<vmem>>, vector<1x1x1x1x8x8xf32>
    %491 = vector.shape_cast %490 : vector<1x1x1x1x8x8xf32> to vector<8x8xf32>
    %492 = vector.shape_cast %488 : vector<8x8xf32> to vector<1x1x1x1x8x8xf32>
    tpu.vector_store %arg15[%c1_425, %c1_426, %c0_427, %c0_428, %489, %c0_429], %492 {strides = array<i32>} : memref<2x2x4x2x128x8xf32, #tpu.memory_space<vmem>>, vector<1x1x1x1x8x8xf32>,
    %493 = vector.extract_strided_slice %475 {offsets = [8, 0], sizes = [8, 8], strides = [1, 1]} : vector<16x8xf32> to vector<8x8xf32>
    %c1_430 = arith.constant 1 : index
    %c0_431 = arith.constant 0 : index
    %c0_432 = arith.constant 0 : index
    %c1_433 = arith.constant 1 : index
    %494 = arith.index_cast %0 : i32 to index
    %c0_434 = arith.constant 0 : index
    %495 = vector.load %arg15[%c1_430, %c0_431, %c0_432, %c1_433, %494, %c0_434] : memref<2x2x4x2x128x8xf32, #tpu.memory_space<vmem>>, vector<1x1x1x1x8x8xf32>
    %496 = vector.shape_cast %495 : vector<1x1x1x1x8x8xf32> to vector<8x8xf32>
    %497 = vector.shape_cast %493 : vector<8x8xf32> to vector<1x1x1x1x8x8xf32>
    tpu.vector_store %arg15[%c1_430, %c0_431, %c0_432, %c1_433, %494, %c0_434], %497 {strides = array<i32>} : memref<2x2x4x2x128x8xf32, #tpu.memory_space<vmem>>, vector<1x1x1x1x8x8xf32>,
    %498 = vector.extract_strided_slice %482 {offsets = [8, 0], sizes = [8, 8], strides = [1, 1]} : vector<16x8xf32> to vector<8x8xf32>
    %c1_435 = arith.constant 1 : index
    %c1_436 = arith.constant 1 : index
    %c0_437 = arith.constant 0 : index
    %c1_438 = arith.constant 1 : index
    %499 = arith.index_cast %0 : i32 to index
    %c0_439 = arith.constant 0 : index
    %500 = vector.load %arg15[%c1_435, %c1_436, %c0_437, %c1_438, %499, %c0_439] : memref<2x2x4x2x128x8xf32, #tpu.memory_space<vmem>>, vector<1x1x1x1x8x8xf32>
    %501 = vector.shape_cast %500 : vector<1x1x1x1x8x8xf32> to vector<8x8xf32>
    %502 = vector.shape_cast %498 : vector<8x8xf32> to vector<1x1x1x1x8x8xf32>
    tpu.vector_store %arg15[%c1_435, %c1_436, %c0_437, %c1_438, %499, %c0_439], %502 {strides = array<i32>} : memref<2x2x4x2x128x8xf32, #tpu.memory_space<vmem>>, vector<1x1x1x1x8x8xf32>,
    %c1_440 = arith.constant 1 : index
    %c0_441 = arith.constant 0 : index
    %c0_442 = arith.constant 0 : index
    %c0_443 = arith.constant 0 : index
    %c0_444 = arith.constant 0 : index
    %c0_445 = arith.constant 0 : index
    %503 = vector.load %arg15[%c1_440, %c0_441, %c0_442, %c0_443, %c0_444, %c0_445] : memref<2x2x4x2x128x8xf32, #tpu.memory_space<vmem>>, vector<1x1x1x2x128x8xf32>
    %504 = vector.shape_cast %503 : vector<1x1x1x2x128x8xf32> to vector<2x128x8xf32>
    %c1_446 = arith.constant 1 : index
    %c1_447 = arith.constant 1 : index
    %c0_448 = arith.constant 0 : index
    %c0_449 = arith.constant 0 : index
    %c0_450 = arith.constant 0 : index
    %c0_451 = arith.constant 0 : index
    %505 = vector.load %arg15[%c1_446, %c1_447, %c0_448, %c0_449, %c0_450, %c0_451] : memref<2x2x4x2x128x8xf32, #tpu.memory_space<vmem>>, vector<1x1x1x2x128x8xf32>
    %506 = vector.shape_cast %505 : vector<1x1x1x2x128x8xf32> to vector<2x128x8xf32>
    %507 = vector.shape_cast %468 : vector<16x8xf32> to vector<2x8x8xf32>
    "tpu.trace_start"() <{level = 10 : i32, message = "btd,bsd->bts"}> : () -> ()
    %cst_452 = arith.constant dense<0.000000e+00> : vector<2x8x128xf32>
    %508 = tpu.matmul %507, %504, %cst_452 {dimension_numbers = #tpu.dot_dimension_numbers<[2], [2], [1], [1], [0, 0, 0, 1, 1, 1], [0], [0]>} : vector<2x8x8xf32>, vector<2x128x8xf32>, vector<2x8x128xf32> -> vector<2x8x128xf32>
    "tpu.trace_stop"() : () -> ()
    %cst_453 = arith.constant 0.353553385 : f32
    %509 = vector.broadcast %cst_453 : f32 to vector<2x8x128xf32>
    %510 = arith.mulf %508, %509 : vector<2x8x128xf32>
    %511 = vector.broadcast %106 : vector<1x8x128xf32> to vector<2x8x128xf32>
    %512 = arith.addf %510, %511 : vector<2x8x128xf32>
    %cst_454 = arith.constant dense<0xFF800000> : vector<2x8xf32>
    %513 = vector.multi_reduction <maximumf>, %512, %cst_454 [2] : vector<2x8x128xf32> to vector<2x8xf32>
    %514 = vector.shape_cast %513 : vector<2x8xf32> to vector<2x8x1xf32>
    %515 = vector.broadcast %514 : vector<2x8x1xf32> to vector<2x8x128xf32>
    %516 = arith.subf %512, %515 : vector<2x8x128xf32>
    %517 = math.exp %516 : vector<2x8x128xf32>
    %cst_455 = arith.constant dense<0.000000e+00> : vector<2x8xf32>
    %518 = vector.multi_reduction <add>, %517, %cst_455 [2] : vector<2x8x128xf32> to vector<2x8xf32>
    %519 = vector.shape_cast %518 : vector<2x8xf32> to vector<2x8x1xf32>
    %520 = tpu.reciprocal %519 {approx = true} : vector<2x8x1xf32> -> vector<2x8x1xf32>
    %521 = vector.broadcast %520 : vector<2x8x1xf32> to vector<2x8x128xf32>
    %522 = arith.mulf %517, %521 : vector<2x8x128xf32>
    "tpu.trace_start"() <{level = 10 : i32, message = "bts,bsd->btd"}> : () -> ()
    %cst_456 = arith.constant dense<0.000000e+00> : vector<2x8x8xf32>
    %523 = tpu.matmul %522, %506, %cst_456 {dimension_numbers = #tpu.dot_dimension_numbers<[2], [1], [1], [2], [0, 0, 0, 1, 1, 2], [0], [0]>} : vector<2x8x128xf32>, vector<2x128x8xf32>, vector<2x8x8xf32> -> vector<2x8x8xf32>
    "tpu.trace_stop"() : () -> ()
    %524 = vector.shape_cast %523 : vector<2x8x8xf32> to vector<16x8xf32>
    %c1_457 = arith.constant 1 : index
    %c0_458 = arith.constant 0 : index
    %c0_459 = arith.constant 0 : index
    %c0_460 = arith.constant 0 : index
    %525 = vector.load %arg6[%c1_457, %c0_458, %c0_459, %c0_460] : memref<2x4x8x32xf32, #tpu.memory_space<vmem>>, vector<1x1x8x32xf32>
    %526 = vector.shape_cast %525 : vector<1x1x8x32xf32> to vector<8x32xf32>
    %cst_461 = arith.constant dense<0.000000e+00> : vector<16x32xf32>
    %527 = tpu.matmul %524, %526, %cst_461 {dimension_numbers = #tpu.dot_dimension_numbers<[1], [0], [0], [1], [0, 0, 1, 1], [], []>} : vector<16x8xf32>, vector<8x32xf32>, vector<16x32xf32> -> vector<16x32xf32>
    %528 = arith.addf %461, %527 : vector<16x32xf32>
    %c1_462 = arith.constant 1 : index
    %c0_463 = arith.constant 0 : index
    %c1_464 = arith.constant 1 : index
    %c0_465 = arith.constant 0 : index
    %c0_466 = arith.constant 0 : index
    %529 = vector.load %arg4[%c1_462, %c0_463, %c1_464, %c0_465, %c0_466] : memref<2x3x4x32x8xf32, #tpu.memory_space<vmem>>, vector<1x1x1x32x8xf32>
    %530 = vector.shape_cast %529 : vector<1x1x1x32x8xf32> to vector<32x8xf32>
    %cst_467 = arith.constant dense<0.000000e+00> : vector<16x8xf32>
    %531 = tpu.matmul %460, %530, %cst_467 {dimension_numbers = #tpu.dot_dimension_numbers<[1], [0], [0], [1], [0, 0, 1, 1], [], []>} : vector<16x32xf32>, vector<32x8xf32>, vector<16x8xf32> -> vector<16x8xf32>
    %c1_468 = arith.constant 1 : index
    %c0_469 = arith.constant 0 : index
    %c1_470 = arith.constant 1 : index
    %c0_471 = arith.constant 0 : index
    %c0_472 = arith.constant 0 : index
    %532 = vector.load %arg5[%c1_468, %c0_469, %c1_470, %c0_471, %c0_472] : memref<2x3x4x1x8xf32, #tpu.memory_space<vmem>>, vector<1x1x1x1x8xf32>
    %533 = vector.shape_cast %532 : vector<1x1x1x1x8xf32> to vector<1x8xf32>
    %534 = vector.broadcast %533 : vector<1x8xf32> to vector<16x8xf32>
    %535 = arith.addf %531, %534 : vector<16x8xf32>
    %c1_473 = arith.constant 1 : index
    %c1_474 = arith.constant 1 : index
    %c1_475 = arith.constant 1 : index
    %c0_476 = arith.constant 0 : index
    %c0_477 = arith.constant 0 : index
    %536 = vector.load %arg4[%c1_473, %c1_474, %c1_475, %c0_476, %c0_477] : memref<2x3x4x32x8xf32, #tpu.memory_space<vmem>>, vector<1x1x1x32x8xf32>
    %537 = vector.shape_cast %536 : vector<1x1x1x32x8xf32> to vector<32x8xf32>
    %cst_478 = arith.constant dense<0.000000e+00> : vector<16x8xf32>
    %538 = tpu.matmul %460, %537, %cst_478 {dimension_numbers = #tpu.dot_dimension_numbers<[1], [0], [0], [1], [0, 0, 1, 1], [], []>} : vector<16x32xf32>, vector<32x8xf32>, vector<16x8xf32> -> vector<16x8xf32>
    %c1_479 = arith.constant 1 : index
    %c1_480 = arith.constant 1 : index
    %c1_481 = arith.constant 1 : index
    %c0_482 = arith.constant 0 : index
    %c0_483 = arith.constant 0 : index
    %539 = vector.load %arg5[%c1_479, %c1_480, %c1_481, %c0_482, %c0_483] : memref<2x3x4x1x8xf32, #tpu.memory_space<vmem>>, vector<1x1x1x1x8xf32>
    %540 = vector.shape_cast %539 : vector<1x1x1x1x8xf32> to vector<1x8xf32>
    %541 = vector.broadcast %540 : vector<1x8xf32> to vector<16x8xf32>
    %542 = arith.addf %538, %541 : vector<16x8xf32>
    %c1_484 = arith.constant 1 : index
    %c2_485 = arith.constant 2 : index
    %c1_486 = arith.constant 1 : index
    %c0_487 = arith.constant 0 : index
    %c0_488 = arith.constant 0 : index
    %543 = vector.load %arg4[%c1_484, %c2_485, %c1_486, %c0_487, %c0_488] : memref<2x3x4x32x8xf32, #tpu.memory_space<vmem>>, vector<1x1x1x32x8xf32>
    %544 = vector.shape_cast %543 : vector<1x1x1x32x8xf32> to vector<32x8xf32>
    %cst_489 = arith.constant dense<0.000000e+00> : vector<16x8xf32>
    %545 = tpu.matmul %460, %544, %cst_489 {dimension_numbers = #tpu.dot_dimension_numbers<[1], [0], [0], [1], [0, 0, 1, 1], [], []>} : vector<16x32xf32>, vector<32x8xf32>, vector<16x8xf32> -> vector<16x8xf32>
    %c1_490 = arith.constant 1 : index
    %c2_491 = arith.constant 2 : index
    %c1_492 = arith.constant 1 : index
    %c0_493 = arith.constant 0 : index
    %c0_494 = arith.constant 0 : index
    %546 = vector.load %arg5[%c1_490, %c2_491, %c1_492, %c0_493, %c0_494] : memref<2x3x4x1x8xf32, #tpu.memory_space<vmem>>, vector<1x1x1x1x8xf32>
    %547 = vector.shape_cast %546 : vector<1x1x1x1x8xf32> to vector<1x8xf32>
    %548 = vector.broadcast %547 : vector<1x8xf32> to vector<16x8xf32>
    %549 = arith.addf %545, %548 : vector<16x8xf32>
    %550 = vector.extract_strided_slice %542 {offsets = [0, 0], sizes = [8, 8], strides = [1, 1]} : vector<16x8xf32> to vector<8x8xf32>
    %c1_495 = arith.constant 1 : index
    %c0_496 = arith.constant 0 : index
    %c1_497 = arith.constant 1 : index
    %c0_498 = arith.constant 0 : index
    %551 = arith.index_cast %0 : i32 to index
    %c0_499 = arith.constant 0 : index
    %552 = vector.load %arg15[%c1_495, %c0_496, %c1_497, %c0_498, %551, %c0_499] : memref<2x2x4x2x128x8xf32, #tpu.memory_space<vmem>>, vector<1x1x1x1x8x8xf32>
    %553 = vector.shape_cast %552 : vector<1x1x1x1x8x8xf32> to vector<8x8xf32>
    %554 = vector.shape_cast %550 : vector<8x8xf32> to vector<1x1x1x1x8x8xf32>
    tpu.vector_store %arg15[%c1_495, %c0_496, %c1_497, %c0_498, %551, %c0_499], %554 {strides = array<i32>} : memref<2x2x4x2x128x8xf32, #tpu.memory_space<vmem>>, vector<1x1x1x1x8x8xf32>,
    %555 = vector.extract_strided_slice %549 {offsets = [0, 0], sizes = [8, 8], strides = [1, 1]} : vector<16x8xf32> to vector<8x8xf32>
    %c1_500 = arith.constant 1 : index
    %c1_501 = arith.constant 1 : index
    %c1_502 = arith.constant 1 : index
    %c0_503 = arith.constant 0 : index
    %556 = arith.index_cast %0 : i32 to index
    %c0_504 = arith.constant 0 : index
    %557 = vector.load %arg15[%c1_500, %c1_501, %c1_502, %c0_503, %556, %c0_504] : memref<2x2x4x2x128x8xf32, #tpu.memory_space<vmem>>, vector<1x1x1x1x8x8xf32>
    %558 = vector.shape_cast %557 : vector<1x1x1x1x8x8xf32> to vector<8x8xf32>
    %559 = vector.shape_cast %555 : vector<8x8xf32> to vector<1x1x1x1x8x8xf32>
    tpu.vector_store %arg15[%c1_500, %c1_501, %c1_502, %c0_503, %556, %c0_504], %559 {strides = array<i32>} : memref<2x2x4x2x128x8xf32, #tpu.memory_space<vmem>>, vector<1x1x1x1x8x8xf32>,
    %560 = vector.extract_strided_slice %542 {offsets = [8, 0], sizes = [8, 8], strides = [1, 1]} : vector<16x8xf32> to vector<8x8xf32>
    %c1_505 = arith.constant 1 : index
    %c0_506 = arith.constant 0 : index
    %c1_507 = arith.constant 1 : index
    %c1_508 = arith.constant 1 : index
    %561 = arith.index_cast %0 : i32 to index
    %c0_509 = arith.constant 0 : index
    %562 = vector.load %arg15[%c1_505, %c0_506, %c1_507, %c1_508, %561, %c0_509] : memref<2x2x4x2x128x8xf32, #tpu.memory_space<vmem>>, vector<1x1x1x1x8x8xf32>
    %563 = vector.shape_cast %562 : vector<1x1x1x1x8x8xf32> to vector<8x8xf32>
    %564 = vector.shape_cast %560 : vector<8x8xf32> to vector<1x1x1x1x8x8xf32>
    tpu.vector_store %arg15[%c1_505, %c0_506, %c1_507, %c1_508, %561, %c0_509], %564 {strides = array<i32>} : memref<2x2x4x2x128x8xf32, #tpu.memory_space<vmem>>, vector<1x1x1x1x8x8xf32>,
    %565 = vector.extract_strided_slice %549 {offsets = [8, 0], sizes = [8, 8], strides = [1, 1]} : vector<16x8xf32> to vector<8x8xf32>
    %c1_510 = arith.constant 1 : index
    %c1_511 = arith.constant 1 : index
    %c1_512 = arith.constant 1 : index
    %c1_513 = arith.constant 1 : index
    %566 = arith.index_cast %0 : i32 to index
    %c0_514 = arith.constant 0 : index
    %567 = vector.load %arg15[%c1_510, %c1_511, %c1_512, %c1_513, %566, %c0_514] : memref<2x2x4x2x128x8xf32, #tpu.memory_space<vmem>>, vector<1x1x1x1x8x8xf32>
    %568 = vector.shape_cast %567 : vector<1x1x1x1x8x8xf32> to vector<8x8xf32>
    %569 = vector.shape_cast %565 : vector<8x8xf32> to vector<1x1x1x1x8x8xf32>
    tpu.vector_store %arg15[%c1_510, %c1_511, %c1_512, %c1_513, %566, %c0_514], %569 {strides = array<i32>} : memref<2x2x4x2x128x8xf32, #tpu.memory_space<vmem>>, vector<1x1x1x1x8x8xf32>,
    %c1_515 = arith.constant 1 : index
    %c0_516 = arith.constant 0 : index
    %c1_517 = arith.constant 1 : index
    %c0_518 = arith.constant 0 : index
    %c0_519 = arith.constant 0 : index
    %c0_520 = arith.constant 0 : index
    %570 = vector.load %arg15[%c1_515, %c0_516, %c1_517, %c0_518, %c0_519, %c0_520] : memref<2x2x4x2x128x8xf32, #tpu.memory_space<vmem>>, vector<1x1x1x2x128x8xf32>
    %571 = vector.shape_cast %570 : vector<1x1x1x2x128x8xf32> to vector<2x128x8xf32>
    %c1_521 = arith.constant 1 : index
    %c1_522 = arith.constant 1 : index
    %c1_523 = arith.constant 1 : index
    %c0_524 = arith.constant 0 : index
    %c0_525 = arith.constant 0 : index
    %c0_526 = arith.constant 0 : index
    %572 = vector.load %arg15[%c1_521, %c1_522, %c1_523, %c0_524, %c0_525, %c0_526] : memref<2x2x4x2x128x8xf32, #tpu.memory_space<vmem>>, vector<1x1x1x2x128x8xf32>
    %573 = vector.shape_cast %572 : vector<1x1x1x2x128x8xf32> to vector<2x128x8xf32>
    %574 = vector.shape_cast %535 : vector<16x8xf32> to vector<2x8x8xf32>
    "tpu.trace_start"() <{level = 10 : i32, message = "btd,bsd->bts"}> : () -> ()
    %cst_527 = arith.constant dense<0.000000e+00> : vector<2x8x128xf32>
    %575 = tpu.matmul %574, %571, %cst_527 {dimension_numbers = #tpu.dot_dimension_numbers<[2], [2], [1], [1], [0, 0, 0, 1, 1, 1], [0], [0]>} : vector<2x8x8xf32>, vector<2x128x8xf32>, vector<2x8x128xf32> -> vector<2x8x128xf32>
    "tpu.trace_stop"() : () -> ()
    %cst_528 = arith.constant 0.353553385 : f32
    %576 = vector.broadcast %cst_528 : f32 to vector<2x8x128xf32>
    %577 = arith.mulf %575, %576 : vector<2x8x128xf32>
    %578 = vector.broadcast %106 : vector<1x8x128xf32> to vector<2x8x128xf32>
    %579 = arith.addf %577, %578 : vector<2x8x128xf32>
    %cst_529 = arith.constant dense<0xFF800000> : vector<2x8xf32>
    %580 = vector.multi_reduction <maximumf>, %579, %cst_529 [2] : vector<2x8x128xf32> to vector<2x8xf32>
    %581 = vector.shape_cast %580 : vector<2x8xf32> to vector<2x8x1xf32>
    %582 = vector.broadcast %581 : vector<2x8x1xf32> to vector<2x8x128xf32>
    %583 = arith.subf %579, %582 : vector<2x8x128xf32>
    %584 = math.exp %583 : vector<2x8x128xf32>
    %cst_530 = arith.constant dense<0.000000e+00> : vector<2x8xf32>
    %585 = vector.multi_reduction <add>, %584, %cst_530 [2] : vector<2x8x128xf32> to vector<2x8xf32>
    %586 = vector.shape_cast %585 : vector<2x8xf32> to vector<2x8x1xf32>
    %587 = tpu.reciprocal %586 {approx = true} : vector<2x8x1xf32> -> vector<2x8x1xf32>
    %588 = vector.broadcast %587 : vector<2x8x1xf32> to vector<2x8x128xf32>
    %589 = arith.mulf %584, %588 : vector<2x8x128xf32>
    "tpu.trace_start"() <{level = 10 : i32, message = "bts,bsd->btd"}> : () -> ()
    %cst_531 = arith.constant dense<0.000000e+00> : vector<2x8x8xf32>
    %590 = tpu.matmul %589, %573, %cst_531 {dimension_numbers = #tpu.dot_dimension_numbers<[2], [1], [1], [2], [0, 0, 0, 1, 1, 2], [0], [0]>} : vector<2x8x128xf32>, vector<2x128x8xf32>, vector<2x8x8xf32> -> vector<2x8x8xf32>
    "tpu.trace_stop"() : () -> ()
    %591 = vector.shape_cast %590 : vector<2x8x8xf32> to vector<16x8xf32>
    %c1_532 = arith.constant 1 : index
    %c1_533 = arith.constant 1 : index
    %c0_534 = arith.constant 0 : index
    %c0_535 = arith.constant 0 : index
    %592 = vector.load %arg6[%c1_532, %c1_533, %c0_534, %c0_535] : memref<2x4x8x32xf32, #tpu.memory_space<vmem>>, vector<1x1x8x32xf32>
    %593 = vector.shape_cast %592 : vector<1x1x8x32xf32> to vector<8x32xf32>
    %cst_536 = arith.constant dense<0.000000e+00> : vector<16x32xf32>
    %594 = tpu.matmul %591, %593, %cst_536 {dimension_numbers = #tpu.dot_dimension_numbers<[1], [0], [0], [1], [0, 0, 1, 1], [], []>} : vector<16x8xf32>, vector<8x32xf32>, vector<16x32xf32> -> vector<16x32xf32>
    %595 = arith.addf %528, %594 : vector<16x32xf32>
    %c1_537 = arith.constant 1 : index
    %c0_538 = arith.constant 0 : index
    %c2_539 = arith.constant 2 : index
    %c0_540 = arith.constant 0 : index
    %c0_541 = arith.constant 0 : index
    %596 = vector.load %arg4[%c1_537, %c0_538, %c2_539, %c0_540, %c0_541] : memref<2x3x4x32x8xf32, #tpu.memory_space<vmem>>, vector<1x1x1x32x8xf32>
    %597 = vector.shape_cast %596 : vector<1x1x1x32x8xf32> to vector<32x8xf32>
    %cst_542 = arith.constant dense<0.000000e+00> : vector<16x8xf32>
    %598 = tpu.matmul %460, %597, %cst_542 {dimension_numbers = #tpu.dot_dimension_numbers<[1], [0], [0], [1], [0, 0, 1, 1], [], []>} : vector<16x32xf32>, vector<32x8xf32>, vector<16x8xf32> -> vector<16x8xf32>
    %c1_543 = arith.constant 1 : index
    %c0_544 = arith.constant 0 : index
    %c2_545 = arith.constant 2 : index
    %c0_546 = arith.constant 0 : index
    %c0_547 = arith.constant 0 : index
    %599 = vector.load %arg5[%c1_543, %c0_544, %c2_545, %c0_546, %c0_547] : memref<2x3x4x1x8xf32, #tpu.memory_space<vmem>>, vector<1x1x1x1x8xf32>
    %600 = vector.shape_cast %599 : vector<1x1x1x1x8xf32> to vector<1x8xf32>
    %601 = vector.broadcast %600 : vector<1x8xf32> to vector<16x8xf32>
    %602 = arith.addf %598, %601 : vector<16x8xf32>
    %c1_548 = arith.constant 1 : index
    %c1_549 = arith.constant 1 : index
    %c2_550 = arith.constant 2 : index
    %c0_551 = arith.constant 0 : index
    %c0_552 = arith.constant 0 : index
    %603 = vector.load %arg4[%c1_548, %c1_549, %c2_550, %c0_551, %c0_552] : memref<2x3x4x32x8xf32, #tpu.memory_space<vmem>>, vector<1x1x1x32x8xf32>
    %604 = vector.shape_cast %603 : vector<1x1x1x32x8xf32> to vector<32x8xf32>
    %cst_553 = arith.constant dense<0.000000e+00> : vector<16x8xf32>
    %605 = tpu.matmul %460, %604, %cst_553 {dimension_numbers = #tpu.dot_dimension_numbers<[1], [0], [0], [1], [0, 0, 1, 1], [], []>} : vector<16x32xf32>, vector<32x8xf32>, vector<16x8xf32> -> vector<16x8xf32>
    %c1_554 = arith.constant 1 : index
    %c1_555 = arith.constant 1 : index
    %c2_556 = arith.constant 2 : index
    %c0_557 = arith.constant 0 : index
    %c0_558 = arith.constant 0 : index
    %606 = vector.load %arg5[%c1_554, %c1_555, %c2_556, %c0_557, %c0_558] : memref<2x3x4x1x8xf32, #tpu.memory_space<vmem>>, vector<1x1x1x1x8xf32>
    %607 = vector.shape_cast %606 : vector<1x1x1x1x8xf32> to vector<1x8xf32>
    %608 = vector.broadcast %607 : vector<1x8xf32> to vector<16x8xf32>
    %609 = arith.addf %605, %608 : vector<16x8xf32>
    %c1_559 = arith.constant 1 : index
    %c2_560 = arith.constant 2 : index
    %c2_561 = arith.constant 2 : index
    %c0_562 = arith.constant 0 : index
    %c0_563 = arith.constant 0 : index
    %610 = vector.load %arg4[%c1_559, %c2_560, %c2_561, %c0_562, %c0_563] : memref<2x3x4x32x8xf32, #tpu.memory_space<vmem>>, vector<1x1x1x32x8xf32>
    %611 = vector.shape_cast %610 : vector<1x1x1x32x8xf32> to vector<32x8xf32>
    %cst_564 = arith.constant dense<0.000000e+00> : vector<16x8xf32>
    %612 = tpu.matmul %460, %611, %cst_564 {dimension_numbers = #tpu.dot_dimension_numbers<[1], [0], [0], [1], [0, 0, 1, 1], [], []>} : vector<16x32xf32>, vector<32x8xf32>, vector<16x8xf32> -> vector<16x8xf32>
    %c1_565 = arith.constant 1 : index
    %c2_566 = arith.constant 2 : index
    %c2_567 = arith.constant 2 : index
    %c0_568 = arith.constant 0 : index
    %c0_569 = arith.constant 0 : index
    %613 = vector.load %arg5[%c1_565, %c2_566, %c2_567, %c0_568, %c0_569] : memref<2x3x4x1x8xf32, #tpu.memory_space<vmem>>, vector<1x1x1x1x8xf32>
    %614 = vector.shape_cast %613 : vector<1x1x1x1x8xf32> to vector<1x8xf32>
    %615 = vector.broadcast %614 : vector<1x8xf32> to vector<16x8xf32>
    %616 = arith.addf %612, %615 : vector<16x8xf32>
    %617 = vector.extract_strided_slice %609 {offsets = [0, 0], sizes = [8, 8], strides = [1, 1]} : vector<16x8xf32> to vector<8x8xf32>
    %c1_570 = arith.constant 1 : index
    %c0_571 = arith.constant 0 : index
    %c2_572 = arith.constant 2 : index
    %c0_573 = arith.constant 0 : index
    %618 = arith.index_cast %0 : i32 to index
    %c0_574 = arith.constant 0 : index
    %619 = vector.load %arg15[%c1_570, %c0_571, %c2_572, %c0_573, %618, %c0_574] : memref<2x2x4x2x128x8xf32, #tpu.memory_space<vmem>>, vector<1x1x1x1x8x8xf32>
    %620 = vector.shape_cast %619 : vector<1x1x1x1x8x8xf32> to vector<8x8xf32>
    %621 = vector.shape_cast %617 : vector<8x8xf32> to vector<1x1x1x1x8x8xf32>
    tpu.vector_store %arg15[%c1_570, %c0_571, %c2_572, %c0_573, %618, %c0_574], %621 {strides = array<i32>} : memref<2x2x4x2x128x8xf32, #tpu.memory_space<vmem>>, vector<1x1x1x1x8x8xf32>,
    %622 = vector.extract_strided_slice %616 {offsets = [0, 0], sizes = [8, 8], strides = [1, 1]} : vector<16x8xf32> to vector<8x8xf32>
    %c1_575 = arith.constant 1 : index
    %c1_576 = arith.constant 1 : index
    %c2_577 = arith.constant 2 : index
    %c0_578 = arith.constant 0 : index
    %623 = arith.index_cast %0 : i32 to index
    %c0_579 = arith.constant 0 : index
    %624 = vector.load %arg15[%c1_575, %c1_576, %c2_577, %c0_578, %623, %c0_579] : memref<2x2x4x2x128x8xf32, #tpu.memory_space<vmem>>, vector<1x1x1x1x8x8xf32>
    %625 = vector.shape_cast %624 : vector<1x1x1x1x8x8xf32> to vector<8x8xf32>
    %626 = vector.shape_cast %622 : vector<8x8xf32> to vector<1x1x1x1x8x8xf32>
    tpu.vector_store %arg15[%c1_575, %c1_576, %c2_577, %c0_578, %623, %c0_579], %626 {strides = array<i32>} : memref<2x2x4x2x128x8xf32, #tpu.memory_space<vmem>>, vector<1x1x1x1x8x8xf32>,
    %627 = vector.extract_strided_slice %609 {offsets = [8, 0], sizes = [8, 8], strides = [1, 1]} : vector<16x8xf32> to vector<8x8xf32>
    %c1_580 = arith.constant 1 : index
    %c0_581 = arith.constant 0 : index
    %c2_582 = arith.constant 2 : index
    %c1_583 = arith.constant 1 : index
    %628 = arith.index_cast %0 : i32 to index
    %c0_584 = arith.constant 0 : index
    %629 = vector.load %arg15[%c1_580, %c0_581, %c2_582, %c1_583, %628, %c0_584] : memref<2x2x4x2x128x8xf32, #tpu.memory_space<vmem>>, vector<1x1x1x1x8x8xf32>
    %630 = vector.shape_cast %629 : vector<1x1x1x1x8x8xf32> to vector<8x8xf32>
    %631 = vector.shape_cast %627 : vector<8x8xf32> to vector<1x1x1x1x8x8xf32>
    tpu.vector_store %arg15[%c1_580, %c0_581, %c2_582, %c1_583, %628, %c0_584], %631 {strides = array<i32>} : memref<2x2x4x2x128x8xf32, #tpu.memory_space<vmem>>, vector<1x1x1x1x8x8xf32>,
    %632 = vector.extract_strided_slice %616 {offsets = [8, 0], sizes = [8, 8], strides = [1, 1]} : vector<16x8xf32> to vector<8x8xf32>
    %c1_585 = arith.constant 1 : index
    %c1_586 = arith.constant 1 : index
    %c2_587 = arith.constant 2 : index
    %c1_588 = arith.constant 1 : index
    %633 = arith.index_cast %0 : i32 to index
    %c0_589 = arith.constant 0 : index
    %634 = vector.load %arg15[%c1_585, %c1_586, %c2_587, %c1_588, %633, %c0_589] : memref<2x2x4x2x128x8xf32, #tpu.memory_space<vmem>>, vector<1x1x1x1x8x8xf32>
    %635 = vector.shape_cast %634 : vector<1x1x1x1x8x8xf32> to vector<8x8xf32>
    %636 = vector.shape_cast %632 : vector<8x8xf32> to vector<1x1x1x1x8x8xf32>
    tpu.vector_store %arg15[%c1_585, %c1_586, %c2_587, %c1_588, %633, %c0_589], %636 {strides = array<i32>} : memref<2x2x4x2x128x8xf32, #tpu.memory_space<vmem>>, vector<1x1x1x1x8x8xf32>,
    %c1_590 = arith.constant 1 : index
    %c0_591 = arith.constant 0 : index
    %c2_592 = arith.constant 2 : index
    %c0_593 = arith.constant 0 : index
    %c0_594 = arith.constant 0 : index
    %c0_595 = arith.constant 0 : index
    %637 = vector.load %arg15[%c1_590, %c0_591, %c2_592, %c0_593, %c0_594, %c0_595] : memref<2x2x4x2x128x8xf32, #tpu.memory_space<vmem>>, vector<1x1x1x2x128x8xf32>
    %638 = vector.shape_cast %637 : vector<1x1x1x2x128x8xf32> to vector<2x128x8xf32>
    %c1_596 = arith.constant 1 : index
    %c1_597 = arith.constant 1 : index
    %c2_598 = arith.constant 2 : index
    %c0_599 = arith.constant 0 : index
    %c0_600 = arith.constant 0 : index
    %c0_601 = arith.constant 0 : index
    %639 = vector.load %arg15[%c1_596, %c1_597, %c2_598, %c0_599, %c0_600, %c0_601] : memref<2x2x4x2x128x8xf32, #tpu.memory_space<vmem>>, vector<1x1x1x2x128x8xf32>
    %640 = vector.shape_cast %639 : vector<1x1x1x2x128x8xf32> to vector<2x128x8xf32>
    %641 = vector.shape_cast %602 : vector<16x8xf32> to vector<2x8x8xf32>
    "tpu.trace_start"() <{level = 10 : i32, message = "btd,bsd->bts"}> : () -> ()
    %cst_602 = arith.constant dense<0.000000e+00> : vector<2x8x128xf32>
    %642 = tpu.matmul %641, %638, %cst_602 {dimension_numbers = #tpu.dot_dimension_numbers<[2], [2], [1], [1], [0, 0, 0, 1, 1, 1], [0], [0]>} : vector<2x8x8xf32>, vector<2x128x8xf32>, vector<2x8x128xf32> -> vector<2x8x128xf32>
    "tpu.trace_stop"() : () -> ()
    %cst_603 = arith.constant 0.353553385 : f32
    %643 = vector.broadcast %cst_603 : f32 to vector<2x8x128xf32>
    %644 = arith.mulf %642, %643 : vector<2x8x128xf32>
    %645 = vector.broadcast %106 : vector<1x8x128xf32> to vector<2x8x128xf32>
    %646 = arith.addf %644, %645 : vector<2x8x128xf32>
    %cst_604 = arith.constant dense<0xFF800000> : vector<2x8xf32>
    %647 = vector.multi_reduction <maximumf>, %646, %cst_604 [2] : vector<2x8x128xf32> to vector<2x8xf32>
    %648 = vector.shape_cast %647 : vector<2x8xf32> to vector<2x8x1xf32>
    %649 = vector.broadcast %648 : vector<2x8x1xf32> to vector<2x8x128xf32>
    %650 = arith.subf %646, %649 : vector<2x8x128xf32>
    %651 = math.exp %650 : vector<2x8x128xf32>
    %cst_605 = arith.constant dense<0.000000e+00> : vector<2x8xf32>
    %652 = vector.multi_reduction <add>, %651, %cst_605 [2] : vector<2x8x128xf32> to vector<2x8xf32>
    %653 = vector.shape_cast %652 : vector<2x8xf32> to vector<2x8x1xf32>
    %654 = tpu.reciprocal %653 {approx = true} : vector<2x8x1xf32> -> vector<2x8x1xf32>
    %655 = vector.broadcast %654 : vector<2x8x1xf32> to vector<2x8x128xf32>
    %656 = arith.mulf %651, %655 : vector<2x8x128xf32>
    "tpu.trace_start"() <{level = 10 : i32, message = "bts,bsd->btd"}> : () -> ()
    %cst_606 = arith.constant dense<0.000000e+00> : vector<2x8x8xf32>
    %657 = tpu.matmul %656, %640, %cst_606 {dimension_numbers = #tpu.dot_dimension_numbers<[2], [1], [1], [2], [0, 0, 0, 1, 1, 2], [0], [0]>} : vector<2x8x128xf32>, vector<2x128x8xf32>, vector<2x8x8xf32> -> vector<2x8x8xf32>
    "tpu.trace_stop"() : () -> ()
    %658 = vector.shape_cast %657 : vector<2x8x8xf32> to vector<16x8xf32>
    %c1_607 = arith.constant 1 : index
    %c2_608 = arith.constant 2 : index
    %c0_609 = arith.constant 0 : index
    %c0_610 = arith.constant 0 : index
    %659 = vector.load %arg6[%c1_607, %c2_608, %c0_609, %c0_610] : memref<2x4x8x32xf32, #tpu.memory_space<vmem>>, vector<1x1x8x32xf32>
    %660 = vector.shape_cast %659 : vector<1x1x8x32xf32> to vector<8x32xf32>
    %cst_611 = arith.constant dense<0.000000e+00> : vector<16x32xf32>
    %661 = tpu.matmul %658, %660, %cst_611 {dimension_numbers = #tpu.dot_dimension_numbers<[1], [0], [0], [1], [0, 0, 1, 1], [], []>} : vector<16x8xf32>, vector<8x32xf32>, vector<16x32xf32> -> vector<16x32xf32>
    %662 = arith.addf %595, %661 : vector<16x32xf32>
    %c1_612 = arith.constant 1 : index
    %c0_613 = arith.constant 0 : index
    %c3_614 = arith.constant 3 : index
    %c0_615 = arith.constant 0 : index
    %c0_616 = arith.constant 0 : index
    %663 = vector.load %arg4[%c1_612, %c0_613, %c3_614, %c0_615, %c0_616] : memref<2x3x4x32x8xf32, #tpu.memory_space<vmem>>, vector<1x1x1x32x8xf32>
    %664 = vector.shape_cast %663 : vector<1x1x1x32x8xf32> to vector<32x8xf32>
    %cst_617 = arith.constant dense<0.000000e+00> : vector<16x8xf32>
    %665 = tpu.matmul %460, %664, %cst_617 {dimension_numbers = #tpu.dot_dimension_numbers<[1], [0], [0], [1], [0, 0, 1, 1], [], []>} : vector<16x32xf32>, vector<32x8xf32>, vector<16x8xf32> -> vector<16x8xf32>
    %c1_618 = arith.constant 1 : index
    %c0_619 = arith.constant 0 : index
    %c3_620 = arith.constant 3 : index
    %c0_621 = arith.constant 0 : index
    %c0_622 = arith.constant 0 : index
    %666 = vector.load %arg5[%c1_618, %c0_619, %c3_620, %c0_621, %c0_622] : memref<2x3x4x1x8xf32, #tpu.memory_space<vmem>>, vector<1x1x1x1x8xf32>
    %667 = vector.shape_cast %666 : vector<1x1x1x1x8xf32> to vector<1x8xf32>
    %668 = vector.broadcast %667 : vector<1x8xf32> to vector<16x8xf32>
    %669 = arith.addf %665, %668 : vector<16x8xf32>
    %c1_623 = arith.constant 1 : index
    %c1_624 = arith.constant 1 : index
    %c3_625 = arith.constant 3 : index
    %c0_626 = arith.constant 0 : index
    %c0_627 = arith.constant 0 : index
    %670 = vector.load %arg4[%c1_623, %c1_624, %c3_625, %c0_626, %c0_627] : memref<2x3x4x32x8xf32, #tpu.memory_space<vmem>>, vector<1x1x1x32x8xf32>
    %671 = vector.shape_cast %670 : vector<1x1x1x32x8xf32> to vector<32x8xf32>
    %cst_628 = arith.constant dense<0.000000e+00> : vector<16x8xf32>
    %672 = tpu.matmul %460, %671, %cst_628 {dimension_numbers = #tpu.dot_dimension_numbers<[1], [0], [0], [1], [0, 0, 1, 1], [], []>} : vector<16x32xf32>, vector<32x8xf32>, vector<16x8xf32> -> vector<16x8xf32>
    %c1_629 = arith.constant 1 : index
    %c1_630 = arith.constant 1 : index
    %c3_631 = arith.constant 3 : index
    %c0_632 = arith.constant 0 : index
    %c0_633 = arith.constant 0 : index
    %673 = vector.load %arg5[%c1_629, %c1_630, %c3_631, %c0_632, %c0_633] : memref<2x3x4x1x8xf32, #tpu.memory_space<vmem>>, vector<1x1x1x1x8xf32>
    %674 = vector.shape_cast %673 : vector<1x1x1x1x8xf32> to vector<1x8xf32>
    %675 = vector.broadcast %674 : vector<1x8xf32> to vector<16x8xf32>
    %676 = arith.addf %672, %675 : vector<16x8xf32>
    %c1_634 = arith.constant 1 : index
    %c2_635 = arith.constant 2 : index
    %c3_636 = arith.constant 3 : index
    %c0_637 = arith.constant 0 : index
    %c0_638 = arith.constant 0 : index
    %677 = vector.load %arg4[%c1_634, %c2_635, %c3_636, %c0_637, %c0_638] : memref<2x3x4x32x8xf32, #tpu.memory_space<vmem>>, vector<1x1x1x32x8xf32>
    %678 = vector.shape_cast %677 : vector<1x1x1x32x8xf32> to vector<32x8xf32>
    %cst_639 = arith.constant dense<0.000000e+00> : vector<16x8xf32>
    %679 = tpu.matmul %460, %678, %cst_639 {dimension_numbers = #tpu.dot_dimension_numbers<[1], [0], [0], [1], [0, 0, 1, 1], [], []>} : vector<16x32xf32>, vector<32x8xf32>, vector<16x8xf32> -> vector<16x8xf32>
    %c1_640 = arith.constant 1 : index
    %c2_641 = arith.constant 2 : index
    %c3_642 = arith.constant 3 : index
    %c0_643 = arith.constant 0 : index
    %c0_644 = arith.constant 0 : index
    %680 = vector.load %arg5[%c1_640, %c2_641, %c3_642, %c0_643, %c0_644] : memref<2x3x4x1x8xf32, #tpu.memory_space<vmem>>, vector<1x1x1x1x8xf32>
    %681 = vector.shape_cast %680 : vector<1x1x1x1x8xf32> to vector<1x8xf32>
    %682 = vector.broadcast %681 : vector<1x8xf32> to vector<16x8xf32>
    %683 = arith.addf %679, %682 : vector<16x8xf32>
    %684 = vector.extract_strided_slice %676 {offsets = [0, 0], sizes = [8, 8], strides = [1, 1]} : vector<16x8xf32> to vector<8x8xf32>
    %c1_645 = arith.constant 1 : index
    %c0_646 = arith.constant 0 : index
    %c3_647 = arith.constant 3 : index
    %c0_648 = arith.constant 0 : index
    %685 = arith.index_cast %0 : i32 to index
    %c0_649 = arith.constant 0 : index
    %686 = vector.load %arg15[%c1_645, %c0_646, %c3_647, %c0_648, %685, %c0_649] : memref<2x2x4x2x128x8xf32, #tpu.memory_space<vmem>>, vector<1x1x1x1x8x8xf32>
    %687 = vector.shape_cast %686 : vector<1x1x1x1x8x8xf32> to vector<8x8xf32>
    %688 = vector.shape_cast %684 : vector<8x8xf32> to vector<1x1x1x1x8x8xf32>
    tpu.vector_store %arg15[%c1_645, %c0_646, %c3_647, %c0_648, %685, %c0_649], %688 {strides = array<i32>} : memref<2x2x4x2x128x8xf32, #tpu.memory_space<vmem>>, vector<1x1x1x1x8x8xf32>,
    %689 = vector.extract_strided_slice %683 {offsets = [0, 0], sizes = [8, 8], strides = [1, 1]} : vector<16x8xf32> to vector<8x8xf32>
    %c1_650 = arith.constant 1 : index
    %c1_651 = arith.constant 1 : index
    %c3_652 = arith.constant 3 : index
    %c0_653 = arith.constant 0 : index
    %690 = arith.index_cast %0 : i32 to index
    %c0_654 = arith.constant 0 : index
    %691 = vector.load %arg15[%c1_650, %c1_651, %c3_652, %c0_653, %690, %c0_654] : memref<2x2x4x2x128x8xf32, #tpu.memory_space<vmem>>, vector<1x1x1x1x8x8xf32>
    %692 = vector.shape_cast %691 : vector<1x1x1x1x8x8xf32> to vector<8x8xf32>
    %693 = vector.shape_cast %689 : vector<8x8xf32> to vector<1x1x1x1x8x8xf32>
    tpu.vector_store %arg15[%c1_650, %c1_651, %c3_652, %c0_653, %690, %c0_654], %693 {strides = array<i32>} : memref<2x2x4x2x128x8xf32, #tpu.memory_space<vmem>>, vector<1x1x1x1x8x8xf32>,
    %694 = vector.extract_strided_slice %676 {offsets = [8, 0], sizes = [8, 8], strides = [1, 1]} : vector<16x8xf32> to vector<8x8xf32>
    %c1_655 = arith.constant 1 : index
    %c0_656 = arith.constant 0 : index
    %c3_657 = arith.constant 3 : index
    %c1_658 = arith.constant 1 : index
    %695 = arith.index_cast %0 : i32 to index
    %c0_659 = arith.constant 0 : index
    %696 = vector.load %arg15[%c1_655, %c0_656, %c3_657, %c1_658, %695, %c0_659] : memref<2x2x4x2x128x8xf32, #tpu.memory_space<vmem>>, vector<1x1x1x1x8x8xf32>
    %697 = vector.shape_cast %696 : vector<1x1x1x1x8x8xf32> to vector<8x8xf32>
    %698 = vector.shape_cast %694 : vector<8x8xf32> to vector<1x1x1x1x8x8xf32>
    tpu.vector_store %arg15[%c1_655, %c0_656, %c3_657, %c1_658, %695, %c0_659], %698 {strides = array<i32>} : memref<2x2x4x2x128x8xf32, #tpu.memory_space<vmem>>, vector<1x1x1x1x8x8xf32>,
    %699 = vector.extract_strided_slice %683 {offsets = [8, 0], sizes = [8, 8], strides = [1, 1]} : vector<16x8xf32> to vector<8x8xf32>
    %c1_660 = arith.constant 1 : index
    %c1_661 = arith.constant 1 : index
    %c3_662 = arith.constant 3 : index
    %c1_663 = arith.constant 1 : index
    %700 = arith.index_cast %0 : i32 to index
    %c0_664 = arith.constant 0 : index
    %701 = vector.load %arg15[%c1_660, %c1_661, %c3_662, %c1_663, %700, %c0_664] : memref<2x2x4x2x128x8xf32, #tpu.memory_space<vmem>>, vector<1x1x1x1x8x8xf32>
    %702 = vector.shape_cast %701 : vector<1x1x1x1x8x8xf32> to vector<8x8xf32>
    %703 = vector.shape_cast %699 : vector<8x8xf32> to vector<1x1x1x1x8x8xf32>
    tpu.vector_store %arg15[%c1_660, %c1_661, %c3_662, %c1_663, %700, %c0_664], %703 {strides = array<i32>} : memref<2x2x4x2x128x8xf32, #tpu.memory_space<vmem>>, vector<1x1x1x1x8x8xf32>,
    %c1_665 = arith.constant 1 : index
    %c0_666 = arith.constant 0 : index
    %c3_667 = arith.constant 3 : index
    %c0_668 = arith.constant 0 : index
    %c0_669 = arith.constant 0 : index
    %c0_670 = arith.constant 0 : index
    %704 = vector.load %arg15[%c1_665, %c0_666, %c3_667, %c0_668, %c0_669, %c0_670] : memref<2x2x4x2x128x8xf32, #tpu.memory_space<vmem>>, vector<1x1x1x2x128x8xf32>
    %705 = vector.shape_cast %704 : vector<1x1x1x2x128x8xf32> to vector<2x128x8xf32>
    %c1_671 = arith.constant 1 : index
    %c1_672 = arith.constant 1 : index
    %c3_673 = arith.constant 3 : index
    %c0_674 = arith.constant 0 : index
    %c0_675 = arith.constant 0 : index
    %c0_676 = arith.constant 0 : index
    %706 = vector.load %arg15[%c1_671, %c1_672, %c3_673, %c0_674, %c0_675, %c0_676] : memref<2x2x4x2x128x8xf32, #tpu.memory_space<vmem>>, vector<1x1x1x2x128x8xf32>
    %707 = vector.shape_cast %706 : vector<1x1x1x2x128x8xf32> to vector<2x128x8xf32>
    %708 = vector.shape_cast %669 : vector<16x8xf32> to vector<2x8x8xf32>
    "tpu.trace_start"() <{level = 10 : i32, message = "btd,bsd->bts"}> : () -> ()
    %cst_677 = arith.constant dense<0.000000e+00> : vector<2x8x128xf32>
    %709 = tpu.matmul %708, %705, %cst_677 {dimension_numbers = #tpu.dot_dimension_numbers<[2], [2], [1], [1], [0, 0, 0, 1, 1, 1], [0], [0]>} : vector<2x8x8xf32>, vector<2x128x8xf32>, vector<2x8x128xf32> -> vector<2x8x128xf32>
    "tpu.trace_stop"() : () -> ()
    %cst_678 = arith.constant 0.353553385 : f32
    %710 = vector.broadcast %cst_678 : f32 to vector<2x8x128xf32>
    %711 = arith.mulf %709, %710 : vector<2x8x128xf32>
    %712 = vector.broadcast %106 : vector<1x8x128xf32> to vector<2x8x128xf32>
    %713 = arith.addf %711, %712 : vector<2x8x128xf32>
    %cst_679 = arith.constant dense<0xFF800000> : vector<2x8xf32>
    %714 = vector.multi_reduction <maximumf>, %713, %cst_679 [2] : vector<2x8x128xf32> to vector<2x8xf32>
    %715 = vector.shape_cast %714 : vector<2x8xf32> to vector<2x8x1xf32>
    %716 = vector.broadcast %715 : vector<2x8x1xf32> to vector<2x8x128xf32>
    %717 = arith.subf %713, %716 : vector<2x8x128xf32>
    %718 = math.exp %717 : vector<2x8x128xf32>
    %cst_680 = arith.constant dense<0.000000e+00> : vector<2x8xf32>
    %719 = vector.multi_reduction <add>, %718, %cst_680 [2] : vector<2x8x128xf32> to vector<2x8xf32>
    %720 = vector.shape_cast %719 : vector<2x8xf32> to vector<2x8x1xf32>
    %721 = tpu.reciprocal %720 {approx = true} : vector<2x8x1xf32> -> vector<2x8x1xf32>
    %722 = vector.broadcast %721 : vector<2x8x1xf32> to vector<2x8x128xf32>
    %723 = arith.mulf %718, %722 : vector<2x8x128xf32>
    "tpu.trace_start"() <{level = 10 : i32, message = "bts,bsd->btd"}> : () -> ()
    %cst_681 = arith.constant dense<0.000000e+00> : vector<2x8x8xf32>
    %724 = tpu.matmul %723, %707, %cst_681 {dimension_numbers = #tpu.dot_dimension_numbers<[2], [1], [1], [2], [0, 0, 0, 1, 1, 2], [0], [0]>} : vector<2x8x128xf32>, vector<2x128x8xf32>, vector<2x8x8xf32> -> vector<2x8x8xf32>
    "tpu.trace_stop"() : () -> ()
    %725 = vector.shape_cast %724 : vector<2x8x8xf32> to vector<16x8xf32>
    %c1_682 = arith.constant 1 : index
    %c3_683 = arith.constant 3 : index
    %c0_684 = arith.constant 0 : index
    %c0_685 = arith.constant 0 : index
    %726 = vector.load %arg6[%c1_682, %c3_683, %c0_684, %c0_685] : memref<2x4x8x32xf32, #tpu.memory_space<vmem>>, vector<1x1x8x32xf32>
    %727 = vector.shape_cast %726 : vector<1x1x8x32xf32> to vector<8x32xf32>
    %cst_686 = arith.constant dense<0.000000e+00> : vector<16x32xf32>
    %728 = tpu.matmul %725, %727, %cst_686 {dimension_numbers = #tpu.dot_dimension_numbers<[1], [0], [0], [1], [0, 0, 1, 1], [], []>} : vector<16x8xf32>, vector<8x32xf32>, vector<16x32xf32> -> vector<16x32xf32>
    %729 = arith.addf %662, %728 : vector<16x32xf32>
    %c1_687 = arith.constant 1 : index
    %c0_688 = arith.constant 0 : index
    %c0_689 = arith.constant 0 : index
    %c0_690 = arith.constant 0 : index
    %730 = vector.load %arg10[%c1_687, %c0_688, %c0_689, %c0_690] : memref<2x6x1x32xf32, #tpu.memory_space<vmem>>, vector<1x1x1x32xf32>
    %731 = vector.shape_cast %730 : vector<1x1x1x32xf32> to vector<1x32xf32>
    %732 = vector.broadcast %731 : vector<1x32xf32> to vector<16x32xf32>
    %733 = arith.addf %729, %732 : vector<16x32xf32>
    %734 = arith.addf %460, %733 : vector<16x32xf32>
    %c1_691 = arith.constant 1 : index
    %c1_692 = arith.constant 1 : index
    %c0_693 = arith.constant 0 : index
    %c0_694 = arith.constant 0 : index
    %735 = vector.load %arg10[%c1_691, %c1_692, %c0_693, %c0_694] : memref<2x6x1x32xf32, #tpu.memory_space<vmem>>, vector<1x1x1x32xf32>
    %736 = vector.shape_cast %735 : vector<1x1x1x32xf32> to vector<1x32xf32>
    %c1_695 = arith.constant 1 : index
    %c2_696 = arith.constant 2 : index
    %c0_697 = arith.constant 0 : index
    %c0_698 = arith.constant 0 : index
    %737 = vector.load %arg10[%c1_695, %c2_696, %c0_697, %c0_698] : memref<2x6x1x32xf32, #tpu.memory_space<vmem>>, vector<1x1x1x32xf32>
    %738 = vector.shape_cast %737 : vector<1x1x1x32xf32> to vector<1x32xf32>
    %cst_699 = arith.constant dense<0.000000e+00> : vector<16xf32>
    %739 = vector.multi_reduction <add>, %734, %cst_699 [1] : vector<16x32xf32> to vector<16xf32>
    %740 = vector.shape_cast %739 : vector<16xf32> to vector<16x1xf32>
    %cst_700 = arith.constant 3.200000e+01 : f32
    %741 = vector.broadcast %cst_700 : f32 to vector<16x1xf32>
    %742 = arith.divf %740, %741 : vector<16x1xf32>
    %743 = vector.broadcast %742 : vector<16x1xf32> to vector<16x32xf32>
    %744 = arith.subf %734, %743 : vector<16x32xf32>
    %745 = arith.mulf %744, %744 : vector<16x32xf32>
    %cst_701 = arith.constant dense<0.000000e+00> : vector<16xf32>
    %746 = vector.multi_reduction <add>, %745, %cst_701 [1] : vector<16x32xf32> to vector<16xf32>
    %747 = vector.shape_cast %746 : vector<16xf32> to vector<16x1xf32>
    %cst_702 = arith.constant 3.200000e+01 : f32
    %748 = vector.broadcast %cst_702 : f32 to vector<16x1xf32>
    %749 = arith.divf %747, %748 : vector<16x1xf32>
    %750 = vector.broadcast %742 : vector<16x1xf32> to vector<16x32xf32>
    %751 = arith.subf %734, %750 : vector<16x32xf32>
    %cst_703 = arith.constant 9.99999974E-6 : f32
    %752 = vector.broadcast %cst_703 : f32 to vector<16x1xf32>
    %753 = arith.addf %749, %752 : vector<16x1xf32>
    %754 = math.rsqrt %753 : vector<16x1xf32>
    %755 = vector.broadcast %754 : vector<16x1xf32> to vector<16x32xf32>
    %756 = arith.mulf %751, %755 : vector<16x32xf32>
    %757 = vector.broadcast %736 : vector<1x32xf32> to vector<16x32xf32>
    %758 = arith.mulf %756, %757 : vector<16x32xf32>
    %759 = vector.broadcast %738 : vector<1x32xf32> to vector<16x32xf32>
    %760 = arith.addf %758, %759 : vector<16x32xf32>
    %c1_704 = arith.constant 1 : index
    %c0_705 = arith.constant 0 : index
    %c0_706 = arith.constant 0 : index
    %761 = vector.load %arg7[%c1_704, %c0_705, %c0_706] : memref<2x32x128xf32, #tpu.memory_space<vmem>>, vector<1x32x128xf32>
    %762 = vector.shape_cast %761 : vector<1x32x128xf32> to vector<32x128xf32>
    %cst_707 = arith.constant dense<0.000000e+00> : vector<16x128xf32>
    %763 = tpu.matmul %760, %762, %cst_707 {dimension_numbers = #tpu.dot_dimension_numbers<[1], [0], [0], [1], [0, 0, 1, 1], [], []>} : vector<16x32xf32>, vector<32x128xf32>, vector<16x128xf32> -> vector<16x128xf32>
    %c1_708 = arith.constant 1 : index
    %c0_709 = arith.constant 0 : index
    %c0_710 = arith.constant 0 : index
    %764 = vector.load %arg8[%c1_708, %c0_709, %c0_710] : memref<2x1x128xf32, #tpu.memory_space<vmem>>, vector<1x1x128xf32>
    %765 = vector.shape_cast %764 : vector<1x1x128xf32> to vector<1x128xf32>
    %766 = vector.broadcast %765 : vector<1x128xf32> to vector<16x128xf32>
    %767 = arith.addf %763, %766 : vector<16x128xf32>
    %cst_711 = arith.constant 5.000000e-01 : f32
    %768 = vector.broadcast %cst_711 : f32 to vector<16x128xf32>
    %769 = arith.mulf %768, %767 : vector<16x128xf32>
    %cst_712 = arith.constant 4.471500e-02 : f32
    %770 = vector.broadcast %cst_712 : f32 to vector<16x128xf32>
    %771 = arith.mulf %770, %767 : vector<16x128xf32>
    %772 = arith.mulf %771, %767 : vector<16x128xf32>
    %773 = arith.mulf %772, %767 : vector<16x128xf32>
    %774 = arith.addf %767, %773 : vector<16x128xf32>
    %cst_713 = arith.constant 0.797884583 : f32
    %775 = vector.broadcast %cst_713 : f32 to vector<16x128xf32>
    %776 = arith.mulf %775, %774 : vector<16x128xf32>
    %777 = math.tanh %776 : vector<16x128xf32>
    %cst_714 = arith.constant 1.000000e+00 : f32
    %778 = vector.broadcast %cst_714 : f32 to vector<16x128xf32>
    %779 = arith.addf %778, %777 : vector<16x128xf32>
    %780 = arith.mulf %769, %779 : vector<16x128xf32>
    %c1_715 = arith.constant 1 : index
    %c0_716 = arith.constant 0 : index
    %c0_717 = arith.constant 0 : index
    %781 = vector.load %arg9[%c1_715, %c0_716, %c0_717] : memref<2x128x32xf32, #tpu.memory_space<vmem>>, vector<1x128x32xf32>
    %782 = vector.shape_cast %781 : vector<1x128x32xf32> to vector<128x32xf32>
    %cst_718 = arith.constant dense<0.000000e+00> : vector<16x32xf32>
    %783 = tpu.matmul %780, %782, %cst_718 {dimension_numbers = #tpu.dot_dimension_numbers<[1], [0], [0], [1], [0, 0, 1, 1], [], []>} : vector<16x128xf32>, vector<128x32xf32>, vector<16x32xf32> -> vector<16x32xf32>
    %c1_719 = arith.constant 1 : index
    %c5_720 = arith.constant 5 : index
    %c0_721 = arith.constant 0 : index
    %c0_722 = arith.constant 0 : index
    %784 = vector.load %arg10[%c1_719, %c5_720, %c0_721, %c0_722] : memref<2x6x1x32xf32, #tpu.memory_space<vmem>>, vector<1x1x1x32xf32>
    %785 = vector.shape_cast %784 : vector<1x1x1x32xf32> to vector<1x32xf32>
    %786 = vector.broadcast %785 : vector<1x32xf32> to vector<16x32xf32>
    %787 = arith.addf %783, %786 : vector<16x32xf32>
    %788 = arith.addf %760, %787 : vector<16x32xf32>
    %c1_723 = arith.constant 1 : index
    %c3_724 = arith.constant 3 : index
    %c0_725 = arith.constant 0 : index
    %c0_726 = arith.constant 0 : index
    %789 = vector.load %arg10[%c1_723, %c3_724, %c0_725, %c0_726] : memref<2x6x1x32xf32, #tpu.memory_space<vmem>>, vector<1x1x1x32xf32>
    %790 = vector.shape_cast %789 : vector<1x1x1x32xf32> to vector<1x32xf32>
    %c1_727 = arith.constant 1 : index
    %c4_728 = arith.constant 4 : index
    %c0_729 = arith.constant 0 : index
    %c0_730 = arith.constant 0 : index
    %791 = vector.load %arg10[%c1_727, %c4_728, %c0_729, %c0_730] : memref<2x6x1x32xf32, #tpu.memory_space<vmem>>, vector<1x1x1x32xf32>
    %792 = vector.shape_cast %791 : vector<1x1x1x32xf32> to vector<1x32xf32>
    %cst_731 = arith.constant dense<0.000000e+00> : vector<16xf32>
    %793 = vector.multi_reduction <add>, %788, %cst_731 [1] : vector<16x32xf32> to vector<16xf32>
    %794 = vector.shape_cast %793 : vector<16xf32> to vector<16x1xf32>
    %cst_732 = arith.constant 3.200000e+01 : f32
    %795 = vector.broadcast %cst_732 : f32 to vector<16x1xf32>
    %796 = arith.divf %794, %795 : vector<16x1xf32>
    %797 = vector.broadcast %796 : vector<16x1xf32> to vector<16x32xf32>
    %798 = arith.subf %788, %797 : vector<16x32xf32>
    %799 = arith.mulf %798, %798 : vector<16x32xf32>
    %cst_733 = arith.constant dense<0.000000e+00> : vector<16xf32>
    %800 = vector.multi_reduction <add>, %799, %cst_733 [1] : vector<16x32xf32> to vector<16xf32>
    %801 = vector.shape_cast %800 : vector<16xf32> to vector<16x1xf32>
    %cst_734 = arith.constant 3.200000e+01 : f32
    %802 = vector.broadcast %cst_734 : f32 to vector<16x1xf32>
    %803 = arith.divf %801, %802 : vector<16x1xf32>
    %804 = vector.broadcast %796 : vector<16x1xf32> to vector<16x32xf32>
    %805 = arith.subf %788, %804 : vector<16x32xf32>
    %cst_735 = arith.constant 9.99999974E-6 : f32
    %806 = vector.broadcast %cst_735 : f32 to vector<16x1xf32>
    %807 = arith.addf %803, %806 : vector<16x1xf32>
    %808 = math.rsqrt %807 : vector<16x1xf32>
    %809 = vector.broadcast %808 : vector<16x1xf32> to vector<16x32xf32>
    %810 = arith.mulf %805, %809 : vector<16x32xf32>
    %811 = vector.broadcast %790 : vector<1x32xf32> to vector<16x32xf32>
    %812 = arith.mulf %810, %811 : vector<16x32xf32>
    %813 = vector.broadcast %792 : vector<1x32xf32> to vector<16x32xf32>
    %814 = arith.addf %812, %813 : vector<16x32xf32>
    %c0_736 = arith.constant 0 : index
    %c0_737 = arith.constant 0 : index
    %815 = vector.load %arg11[%c0_736, %c0_737] : memref<32x512xf32, #tpu.memory_space<vmem>>, vector<32x512xf32>
    %cst_738 = arith.constant dense<0.000000e+00> : vector<16x512xf32>
    %816 = tpu.matmul %814, %815, %cst_738 {dimension_numbers = #tpu.dot_dimension_numbers<[1], [0], [0], [1], [0, 0, 1, 1], [], []>} : vector<16x32xf32>, vector<32x512xf32>, vector<16x512xf32> -> vector<16x512xf32>
    %c0_739 = arith.constant 0 : index
    %c0_740 = arith.constant 0 : index
    %817 = vector.load %arg12[%c0_739, %c0_740] : memref<1x512xf32, #tpu.memory_space<vmem>>, vector<1x512xf32>
    %818 = vector.broadcast %817 : vector<1x512xf32> to vector<16x512xf32>
    %819 = arith.addf %816, %818 : vector<16x512xf32>
    %820 = vector.extract_strided_slice %819 {offsets = [0, 0], sizes = [16, 128], strides = [1, 1]} : vector<16x512xf32> to vector<16x128xf32>
    %cst_741 = arith.constant dense<0xFF800000> : vector<16xf32>
    %821 = vector.multi_reduction <maximumf>, %820, %cst_741 [1] : vector<16x128xf32> to vector<16xf32>
    %822 = vector.shape_cast %821 : vector<16xf32> to vector<16x1xf32>
    %823 = vector.broadcast %822 : vector<16x1xf32> to vector<16x128xf32>
    %824 = arith.subf %820, %823 : vector<16x128xf32>
    %825 = math.exp %824 : vector<16x128xf32>
    %cst_742 = arith.constant dense<0.000000e+00> : vector<16xf32>
    %826 = vector.multi_reduction <add>, %825, %cst_742 [1] : vector<16x128xf32> to vector<16xf32>
    %827 = vector.shape_cast %826 : vector<16xf32> to vector<16x1xf32>
    %828 = vector.broadcast %827 : vector<16x1xf32> to vector<16x128xf32>
    %829 = arith.divf %825, %828 : vector<16x128xf32>
    %c0_743 = arith.constant 0 : index
    %c0_744 = arith.constant 0 : index
    %830 = vector.load %arg14[%c0_743, %c0_744] : memref<16x512xf32, #tpu.memory_space<vmem>>, vector<16x128xf32>
    tpu.vector_store %arg14[%c0_743, %c0_744], %829 {strides = array<i32>} : memref<16x512xf32, #tpu.memory_space<vmem>>, vector<16x128xf32>,
    %831 = vector.extract_strided_slice %819 {offsets = [0, 128], sizes = [16, 128], strides = [1, 1]} : vector<16x512xf32> to vector<16x128xf32>
    %cst_745 = arith.constant dense<0xFF800000> : vector<16xf32>
    %832 = vector.multi_reduction <maximumf>, %831, %cst_745 [1] : vector<16x128xf32> to vector<16xf32>
    %833 = vector.shape_cast %832 : vector<16xf32> to vector<16x1xf32>
    %834 = vector.broadcast %833 : vector<16x1xf32> to vector<16x128xf32>
    %835 = arith.subf %831, %834 : vector<16x128xf32>
    %836 = math.exp %835 : vector<16x128xf32>
    %cst_746 = arith.constant dense<0.000000e+00> : vector<16xf32>
    %837 = vector.multi_reduction <add>, %836, %cst_746 [1] : vector<16x128xf32> to vector<16xf32>
    %838 = vector.shape_cast %837 : vector<16xf32> to vector<16x1xf32>
    %839 = vector.broadcast %838 : vector<16x1xf32> to vector<16x128xf32>
    %840 = arith.divf %836, %839 : vector<16x128xf32>
    %c0_747 = arith.constant 0 : index
    %c128 = arith.constant 128 : index
    %841 = vector.load %arg14[%c0_747, %c128] : memref<16x512xf32, #tpu.memory_space<vmem>>, vector<16x128xf32>
    tpu.vector_store %arg14[%c0_747, %c128], %840 {strides = array<i32>} : memref<16x512xf32, #tpu.memory_space<vmem>>, vector<16x128xf32>,
    %842 = vector.extract_strided_slice %819 {offsets = [0, 256], sizes = [16, 128], strides = [1, 1]} : vector<16x512xf32> to vector<16x128xf32>
    %cst_748 = arith.constant dense<0xFF800000> : vector<16xf32>
    %843 = vector.multi_reduction <maximumf>, %842, %cst_748 [1] : vector<16x128xf32> to vector<16xf32>
    %844 = vector.shape_cast %843 : vector<16xf32> to vector<16x1xf32>
    %845 = vector.broadcast %844 : vector<16x1xf32> to vector<16x128xf32>
    %846 = arith.subf %842, %845 : vector<16x128xf32>
    %847 = math.exp %846 : vector<16x128xf32>
    %cst_749 = arith.constant dense<0.000000e+00> : vector<16xf32>
    %848 = vector.multi_reduction <add>, %847, %cst_749 [1] : vector<16x128xf32> to vector<16xf32>
    %849 = vector.shape_cast %848 : vector<16xf32> to vector<16x1xf32>
    %850 = vector.broadcast %849 : vector<16x1xf32> to vector<16x128xf32>
    %851 = arith.divf %847, %850 : vector<16x128xf32>
    %c0_750 = arith.constant 0 : index
    %c256 = arith.constant 256 : index
    %852 = vector.load %arg14[%c0_750, %c256] : memref<16x512xf32, #tpu.memory_space<vmem>>, vector<16x128xf32>
    tpu.vector_store %arg14[%c0_750, %c256], %851 {strides = array<i32>} : memref<16x512xf32, #tpu.memory_space<vmem>>, vector<16x128xf32>,
    %853 = vector.extract_strided_slice %819 {offsets = [0, 384], sizes = [16, 128], strides = [1, 1]} : vector<16x512xf32> to vector<16x128xf32>
    %cst_751 = arith.constant dense<0xFF800000> : vector<16xf32>
    %854 = vector.multi_reduction <maximumf>, %853, %cst_751 [1] : vector<16x128xf32> to vector<16xf32>
    %855 = vector.shape_cast %854 : vector<16xf32> to vector<16x1xf32>
    %856 = vector.broadcast %855 : vector<16x1xf32> to vector<16x128xf32>
    %857 = arith.subf %853, %856 : vector<16x128xf32>
    %858 = math.exp %857 : vector<16x128xf32>
    %cst_752 = arith.constant dense<0.000000e+00> : vector<16xf32>
    %859 = vector.multi_reduction <add>, %858, %cst_752 [1] : vector<16x128xf32> to vector<16xf32>
    %860 = vector.shape_cast %859 : vector<16xf32> to vector<16x1xf32>
    %861 = vector.broadcast %860 : vector<16x1xf32> to vector<16x128xf32>
    %862 = arith.divf %858, %861 : vector<16x128xf32>
    %c0_753 = arith.constant 0 : index
    %c384 = arith.constant 384 : index
    %863 = vector.load %arg14[%c0_753, %c384] : memref<16x512xf32, #tpu.memory_space<vmem>>, vector<16x128xf32>
    tpu.vector_store %arg14[%c0_753, %c384], %862 {strides = array<i32>} : memref<16x512xf32, #tpu.memory_space<vmem>>, vector<16x128xf32>,
    return
  }
}

</mosaic_0001>

<bundles_post_ra>
// kernel: fused_forward.1
= control target key start
LH: loop header
LB: loop body
LE: loop exit
PB: predicated region body
PF: predicated region fallthrough
CT: control target
= control target key end

     0   :  { %21 = vsyncpa [#allocation4], 0  ;;  %s21830_s0 = inlined_call_operand.vmem [shape: s32[2], index: 0, kind: input, shape index: {}]   ;;  %s21831_s1 = inlined_call_operand.vmem [shape: s32[16,4], index: 1, kind: input, shape index: {}]   ;;  %s21832_s2 = inlined_call_operand.vmem [shape: f32[512,32], index: 2, kind: input, shape index: {}]   ;;  %s21833_s3 = inlined_call_operand.vmem [shape: f32[2,1,32], index: 3, kind: input, shape index: {}]   ;;  %s21834_s4 = inlined_call_operand.vmem [shape: f32[2,3,4,32,8], index: 4, kind: input, shape index: {}]   ;;  %s21835_s5 = inlined_call_operand.vmem [shape: f32[2,3,4,1,8], index: 5, kind: input, shape index: {}]   ;;  %s21836_s6 = inlined_call_operand.vmem [shape: f32[2,4,8,32], index: 6, kind: input, shape index: {}]   ;;  %s21837_s7 = inlined_call_operand.vmem [shape: f32[2,32,128], index: 7, kind: input, shape index: {}]   ;;  %s21838_s8 = inlined_call_operand.vmem [shape: f32[2,1,128], index: 8, kind: input, shape index: {}]   ;;  %s21839_s9 = inlined_call_operand.vmem [shape: f32[2,128,32], index: 9, kind: input, shape index: {}]   ;;  %s21840_s10 = inlined_call_operand.vmem [shape: f32[2,6,1,32], index: 10, kind: input, shape index: {}]   ;;  %s21841_s11 = inlined_call_operand.vmem [shape: f32[32,512], index: 11, kind: input, shape index: {}]   ;;  %s21842_s12 = inlined_call_operand.vmem [shape: f32[1,512], index: 12, kind: input, shape index: {}]   ;;  %s21843_s13 = inlined_call_operand.vmem [shape: f32[2,2,4,2,128,8], index: 13, kind: input, shape index: {}, may-alias: {13,15}]   ;;  %s21844_s14 = inlined_call_operand.hbm [shape: f32[16,512], index: 14, kind: output, shape index: {0}]   ;;  %s21845_s15 = inlined_call_operand.vmem [shape: f32[2,2,4,2,128,8], index: 15, kind: output, shape index: {1}, may-alias: {13,15}]  }
   0x1   :  { %22 = vsyncpa [#allocation3], 0  ;;  %s29_s20 = sshll.u32 %s21830_s0, 4  ;;  %s30_s20 = int_to_ptr.vmem [resolvable:$true] %s29_s20 }
   0x2   :  { %s14256_s21 = scalar_lea.vmem %s30_s20, 16  ;;  %p14261_p1 = scmp.lt.s32.totalorder %s30_s20, %s30_s20 }
   0x3   :  { %p14257_p0 = scmp.ne.s32.totalorder %s30_s20, %s14256_s21  ;;  %p14262_p2 = scmp.lt.s32.totalorder %s14256_s21, %s14256_s21 }
   0x5   :  { %p14263_p3 = por %p14262_p2, %p14261_p1 }
   0x7   :  { %p14264_p4 = pnand %p14263_p3, %p14257_p0 }
   0x9   :  { %14267 = shalt.err (!%p14264_p4)
}
   0xa   :  { %s14294_s22 = smov [#allocation2]  }
   0xb   :  { %32 = dma.vmem_to_smem %s30_s20, 16, %s14294_s22, [#allocation4]  }
   0xc   :  { %14290 = dma.done.wait [#allocation4], 16  }
   0xd   :  { %14291 = vsyncadd [#allocation4], 4294967280 }
   0xe   :  { %62 = sfence }
   0xf   :  { %v1096_v0 = vld [vmem:[%s21831_s1] sm:$0xff]  ;;  %v14295_v1 = vmov 0   ;;  %v14296_v2 = vmov 2   ;;  %v1273_v5 = vld [vmem:[%s21832_s2 + $0x88] sm:$0xff]  ;;  %v1274_v18 = vld [vmem:[%s21832_s2 + $0x90] sm:$0xff]  ;;  %v14297_v25 = vmov 1  }
  0x10   :  { %14118 = vset.pattern.permute.xlu0 %v14295_v1  ;;  %14120 = vset.pattern.permute.xlu1 %v14296_v2  ;;  %v1176_v3 = vadd.s32 256, %v1096_v0  ;;  %v1272_v4 = vld [vmem:[%s21832_s2 + $0x80] sm:$0xff]  ;;  %v1305_v8 = vld [vmem:[%s21832_s2 + $0x188] sm:$0xff]  ;;  %v1136_v10 = vadd.s32 128, %v1096_v0  ;;  %v1275_v19 = vld [vmem:[%s21832_s2 + $0x98] sm:$0xff]  ;;  %v1216_v34 = vadd.s32 384, %v1096_v0 }
  0x11   :  { %1099 = vperm.xlu0 %14118, %v1096_v0   ;;  %v12836_v6 = vpack.c.bf16 %v1273_v5, %v1272_v4  ;;  %v1304_v7 = vld [vmem:[%s21832_s2 + $0x180] sm:$0xff]  ;;  %v14417_v11 = vld [vmem:[%s21831_s1 + $0x8] sm:$0xff]  ;;  %v1306_v20 = vld [vmem:[%s21832_s2 + $0x190] sm:$0xff]  ;;  %v12840_v21 = vpack.c.bf16 %v1275_v19, %v1274_v18  ;;  %v14298_v46 = vmov 3   ;;  %s18596_s16 = sld [smem:[#allocation2]] }
  0x12   :  { %v1256_v9 = vld [vmem:[%s21832_s2] sm:$0xff]  ;;  %1179 = vperm.xlu1 %14120, %v1176_v3   ;;  %v12868_v12 = vpack.c.bf16 %v1305_v8, %v1304_v7  ;;  %v1257_v13 = vld [vmem:[%s21832_s2 + $0x8] sm:$0xff]  ;;  %v1307_v22 = vld [vmem:[%s21832_s2 + $0x198] sm:$0xff]  ;;  %v1137_v38 = vadd.s32 128, %v14417_v11  ;;  %v1177_v55 = vadd.s32 256, %v14417_v11  ;;  %v1217_v7 = vadd.s32 384, %v14417_v11 }
  0x13   :  { %v1288_v14 = vld [vmem:[%s21832_s2 + $0x100] sm:$0xff]  ;;  %v1289_v15 = vld [vmem:[%s21832_s2 + $0x108] sm:$0xff]  ;;  %12837 = vmatprep.subr.bf16.mxu0 %v12836_v6  ;;  %v12838_v16 = vpack.c.bf16 %v1257_v13, %v1256_v9  ;;  %v1258_v23 = vld [vmem:[%s21832_s2 + $0x10] sm:$0xff]  ;;  %v12872_v26 = vpack.c.bf16 %v1307_v22, %v1306_v20 }
  0x14   :  { %v12870_v17 = vpack.c.bf16 %v1289_v15, %v1288_v14  ;;  %12869 = vmatprep.subr.bf16.mxu1 %v12868_v12  ;;  %v1259_v24 = vld [vmem:[%s21832_s2 + $0x18] sm:$0xff]  ;;  %v1290_v28 = vld [vmem:[%s21832_s2 + $0x110] sm:$0xff]  ;;  %v1276_v30 = vld [vmem:[%s21832_s2 + $0xa0] sm:$0xff] }
  0x15   :  { %14119 = vset.pattern.permute.xlu0 %v14297_v25  ;;  %12839 = vmatpush3.bf16.msra.mxu0 %v12838_v16  ;;  %v12842_v27 = vpack.c.bf16 %v1259_v24, %v1258_v23  ;;  %v1291_v29 = vld [vmem:[%s21832_s2 + $0x118] sm:$0xff]  ;;  %v1277_v31 = vld [vmem:[%s21832_s2 + $0xa8] sm:$0xff]  ;;  %v1308_v32 = vld [vmem:[%s21832_s2 + $0x1a0] sm:$0xff] }
  0x16   :  { %14121 = vset.pattern.permute.xlu1 %v14295_v1  ;;  %1139 = vperm.xlu0 %14119, %v1136_v10   ;;  %v1309_v33 = vld [vmem:[%s21832_s2 + $0x1a8] sm:$0xff]  ;;  %v12844_v35 = vpack.c.bf16 %v1277_v31, %v1276_v30  ;;  %v1260_v36 = vld [vmem:[%s21832_s2 + $0x20] sm:$0xff]  ;;  %v12874_v39 = vpack.c.bf16 %v1291_v29, %v1290_v28  ;;  %v1278_v40 = vld [vmem:[%s21832_s2 + $0xb0] sm:$0xff] }
  0x17   :  { %1102 = vperm.xlu1 %14121, %v14417_v11   ;;  %12871 = vmatpush3.bf16.msra.mxu1 %v12870_v17  ;;  %v1261_v37 = vld [vmem:[%s21832_s2 + $0x28] sm:$0xff]  ;;  %v1279_v41 = vld [vmem:[%s21832_s2 + $0xb8] sm:$0xff]  ;;  %v12876_v42 = vpack.c.bf16 %v1309_v33, %v1308_v32  ;;  %v1292_v44 = vld [vmem:[%s21832_s2 + $0x120] sm:$0xff]  ;;  %s18801_s22 = scalar_lea.vmem %s21845_s15, %s18596_s16  ;;  %s1743_s26 = sadd.s32 8, %s18596_s16 }
  0x18   :  { %12841 = vmatprep.subr.bf16.mxu0 %v12840_v21  ;;  %12873 = vmatprep.subr.bf16.mxu1 %v12872_v26  ;;  %v12846_v43 = vpack.c.bf16 %v1261_v37, %v1260_v36  ;;  %v1293_v45 = vld [vmem:[%s21832_s2 + $0x128] sm:$0xff]  ;;  %v12848_v47 = vpack.c.bf16 %v1279_v41, %v1278_v40  ;;  %v1310_v48 = vld [vmem:[%s21832_s2 + $0x1b0] sm:$0xff]  ;;  %v1311_v49 = vld [vmem:[%s21832_s2 + $0x1b8] sm:$0xff] }
  0x19   :  { %12843 = vmatpush3.bf16.msra.mxu0 %v12842_v27  ;;  %v1262_v50 = vld [vmem:[%s21832_s2 + $0x30] sm:$0xff]  ;;  %v1263_v51 = vld [vmem:[%s21832_s2 + $0x38] sm:$0xff]  ;;  %v12878_v52 = vpack.c.bf16 %v1293_v45, %v1292_v44  ;;  %v1280_v53 = vld [vmem:[%s21832_s2 + $0xc0] sm:$0xff]  ;;  %v12880_v56 = vpack.c.bf16 %v1311_v49, %v1310_v48  ;;  %v1091_v44 = vlaneseq }
  0x1a   :  { %14123 = vset.pattern.permute.xlu0 %v14298_v46  ;;  %12845 = vmatprep.subr.bf16.mxu0 %v12844_v35  ;;  %v1281_v54 = vld [vmem:[%s21832_s2 + $0xc8] sm:$0xff]  ;;  %v1294_v57 = vld [vmem:[%s21832_s2 + $0x130] sm:$0xff]  ;;  %v1295_v58 = vld [vmem:[%s21832_s2 + $0x138] sm:$0xff]  ;;  %v12850_v59 = vpack.c.bf16 %v1263_v51, %v1262_v50  ;;  %v21848_v51 = vmov 0.0  }
  0x1b   :  { %14122 = vset.pattern.permute.xlu1 %v14297_v25  ;;  %1219 = vperm.xlu0 %14123, %v1216_v34   ;;  %v1312_v60 = vld [vmem:[%s21832_s2 + $0x1c0] sm:$0xff]  ;;  %v1313_v61 = vld [vmem:[%s21832_s2 + $0x1c8] sm:$0xff]  ;;  %v12852_v62 = vpack.c.bf16 %v1281_v54, %v1280_v53  ;;  %v12882_v1 = vpack.c.bf16 %v1295_v58, %v1294_v57  ;;  %v1282_v3 = vld [vmem:[%s21832_s2 + $0xd0] sm:$0xff]  ;;  %v14602_v45 = vand.u32 127, %v1091_v44 }
  0x1c   :  { %1142 = vperm.xlu1 %14122, %v1137_v38   ;;  %12875 = vmatpush3.bf16.msra.mxu1 %v12874_v39  ;;  %v1264_v63 = vld [vmem:[%s21832_s2 + $0x40] sm:$0xff]  ;;  %v1265_v0 = vld [vmem:[%s21832_s2 + $0x48] sm:$0xff]  ;;  %v1283_v4 = vld [vmem:[%s21832_s2 + $0xd8] sm:$0xff]  ;;  %v12884_v5 = vpack.c.bf16 %v1313_v61, %v1312_v60 }
  0x1d   :  { %12877 = vmatprep.subr.bf16.mxu1 %v12876_v42  ;;  %12847 = vmatpush3.bf16.msra.mxu0 %v12846_v43  ;;  %v1296_v6 = vld [vmem:[%s21832_s2 + $0x140] sm:$0xff]  ;;  %v12854_v8 = vpack.c.bf16 %v1265_v0, %v1264_v63  ;;  %v1314_v9 = vld [vmem:[%s21832_s2 + $0x1d0] sm:$0xff]  ;;  %v1315_v10 = vld [vmem:[%s21832_s2 + $0x1d8] sm:$0xff]  ;;  %v12856_v12 = vpack.c.bf16 %v1283_v4, %v1282_v3  ;;  %21858 = vst [vmem:[#allocation8_spill] sm:$0xff] %v14602_v45  ;;  %v14611_v49 = vadd.s32 384, %v14602_v45 }
  0x1e   :  { %12849 = vmatprep.subr.bf16.mxu0 %v12848_v47  ;;  %v1266_v13 = vld [vmem:[%s21832_s2 + $0x50] sm:$0xff]  ;;  %v1267_v11 = vld [vmem:[%s21832_s2 + $0x58] sm:$0xff]  ;;  %v1284_v15 = vld [vmem:[%s21832_s2 + $0xe0] sm:$0xff]  ;;  %v12888_v17 = vpack.c.bf16 %v1315_v10, %v1314_v9  ;;  %v14608_v47 = vadd.s32 128, %v14602_v45 }
  0x1f   :  { %v1285_v16 = vld [vmem:[%s21832_s2 + $0xe8] sm:$0xff]  ;;  %v1298_v18 = vld [vmem:[%s21832_s2 + $0x150] sm:$0xff]  ;;  %v1299_v19 = vld [vmem:[%s21832_s2 + $0x158] sm:$0xff]  ;;  %v12858_v20 = vpack.c.bf16 %v1267_v11, %v1266_v13 }
  0x20   :  { %14124 = vset.pattern.permute.xlu1 %v14296_v2  ;;  %12879 = vmatpush3.bf16.msra.mxu1 %v12878_v52  ;;  %v1297_v2 = vld [vmem:[%s21832_s2 + $0x148] sm:$0xff]  ;;  %v1316_v21 = vld [vmem:[%s21832_s2 + $0x1e0] sm:$0xff]  ;;  %v12860_v23 = vpack.c.bf16 %v1285_v16, %v1284_v15  ;;  %v12890_v26 = vpack.c.bf16 %v1299_v19, %v1298_v18  ;;  %v1286_v27 = vld [vmem:[%s21832_s2 + $0xf0] sm:$0xff] }
  0x21   :  { %1182 = vperm.xlu1 %14124, %v1177_v55   ;;  %12881 = vmatprep.subr.bf16.mxu1 %v12880_v56  ;;  %v12886_v14 = vpack.c.bf16 %v1297_v2, %v1296_v6  ;;  %v1317_v22 = vld [vmem:[%s21832_s2 + $0x1e8] sm:$0xff]  ;;  %v1268_v24 = vld [vmem:[%s21832_s2 + $0x60] sm:$0xff]  ;;  %v1287_v28 = vld [vmem:[%s21832_s2 + $0xf8] sm:$0xff] }
  0x22   :  { %12851 = vmatpush3.bf16.msra.mxu0 %v12850_v59  ;;  %v1269_v25 = vld [vmem:[%s21832_s2 + $0x68] sm:$0xff]  ;;  %v12892_v29 = vpack.c.bf16 %v1317_v22, %v1316_v21  ;;  %v1300_v30 = vld [vmem:[%s21832_s2 + $0x160] sm:$0xff]  ;;  %v1318_v33 = vld [vmem:[%s21832_s2 + $0x1f0] sm:$0xff]  ;;  %v12864_v35 = vpack.c.bf16 %v1287_v28, %v1286_v27 }
  0x23   :  { %12853 = vmatprep.subr.bf16.mxu0 %v12852_v62  ;;  %v1301_v31 = vld [vmem:[%s21832_s2 + $0x168] sm:$0xff]  ;;  %v12862_v32 = vpack.c.bf16 %v1269_v25, %v1268_v24  ;;  %v1319_v34 = vld [vmem:[%s21832_s2 + $0x1f8] sm:$0xff]  ;;  %v1270_v36 = vld [vmem:[%s21832_s2 + $0x70] sm:$0xff] }
  0x24   :  { %12883 = vmatpush3.bf16.msra.mxu1 %v12882_v1  ;;  %v1271_v37 = vld [vmem:[%s21832_s2 + $0x78] sm:$0xff]  ;;  %v12894_v38 = vpack.c.bf16 %v1301_v31, %v1300_v30  ;;  %v12896_v39 = vpack.c.bf16 %v1319_v34, %v1318_v33  ;;  %v1302_v40 = vld [vmem:[%s21832_s2 + $0x170] sm:$0xff] }
  0x25   :  { %14125 = vset.pattern.permute.xlu1 %v14298_v46  ;;  %12885 = vmatprep.subr.bf16.mxu1 %v12884_v5  ;;  %v1303_v41 = vld [vmem:[%s21832_s2 + $0x178] sm:$0xff]  ;;  %v12866_v42 = vpack.c.bf16 %v1271_v37, %v1270_v36  ;;  %v14605_v46 = vadd.s32 256, %v14602_v45  ;;  %s9392_s2 = sld [smem:[#allocation2 + $0x1]] }
  0x26   :  { %1222 = vperm.xlu1 %14125, %v1217_v7   ;;  %12855 = vmatpush3.bf16.msra.mxu0 %v12854_v8  ;;  %v12898_v43 = vpack.c.bf16 %v1303_v41, %v1302_v40 }
  0x27   :  { %12857 = vmatprep.subr.bf16.mxu0 %v12856_v12 }
  0x28   :  { %12887 = vmatpush3.bf16.msra.mxu1 %v12886_v14 }
  0x29   :  { %12889 = vmatprep.subr.bf16.mxu1 %v12888_v17 }
  0x2a   :  { %12859 = vmatpush3.bf16.msra.mxu0 %v12858_v20 }
  0x2b   :  { %12861 = vmatprep.subr.bf16.mxu0 %v12860_v23  ;;  %s65_s20 = scvt.s32.f32 %s9392_s2 }
  0x2c   :  { %12891 = vmatpush3.bf16.msra.mxu1 %v12890_v26 }
  0x2d   :  { %12893 = vmatprep.subr.bf16.mxu1 %v12892_v29 }
  0x2e   :  { %12863 = vmatpush3.bf16.msra.mxu0 %v12862_v32 }
  0x2f   :  { %12865 = vmatprep.subr.bf16.mxu0 %v12864_v35 }
  0x30   :  { %12895 = vmatpush3.bf16.msra.mxu1 %v12894_v38 }
  0x31   :  { %12897 = vmatprep.subr.bf16.mxu1 %v12896_v39 }
  0x32   :  { %12867 = vmatpush3.bf16.msra.mxu0 %v12866_v42 }
  0x34   :  { %12899 = vmatpush3.bf16.msra.mxu1 %v12898_v43 }
  0x90   :  { %v1100_v48 = vpop.permute.xlu0 %1099 }
  0x91   :  { %vm1104_vm0 = vcmp.eq.s32.totalorder %v14602_v45, %v1100_v48  ;;  %vm1106_vm1 = vcmp.eq.s32.totalorder %v14605_v46, %v1100_v48  ;;  %v1180_v50 = vpop.permute.xlu1 %1179  ;;  %vm1105_vm2 = vcmp.eq.s32.totalorder %v14608_v47, %v1100_v48  ;;  %vm1107_vm3 = vcmp.eq.s32.totalorder %v14611_v49, %v1100_v48 }
  0x92   :  { %vm1184_vm4 = vcmp.eq.s32.totalorder %v14602_v45, %v1180_v50  ;;  %vm1186_vm5 = vcmp.eq.s32.totalorder %v14605_v46, %v1180_v50  ;;  %vm1185_vm6 = vcmp.eq.s32.totalorder %v14608_v47, %v1180_v50  ;;  %v9393_v52 = vsel %vm1104_vm0, 1.0, %v21848_v51 }
  0x93   :  { %v9395_v53 = vsel %vm1106_vm1, 1.0, %v21848_v51  ;;  %v9409_v54 = vsel %vm1184_vm4, 1.0, %v21848_v51  ;;  %v9411_v55 = vsel %vm1186_vm5, 1.0, %v21848_v51  ;;  %v9394_v57 = vsel %vm1105_vm2, 1.0, %v21848_v51 }
  0x94   :  { %v9410_v58 = vsel %vm1185_vm6, 1.0, %v21848_v51  ;;  %v9396_v59 = vsel %vm1107_vm3, 1.0, %v21848_v51  ;;  %vm1187_vm7 = vcmp.eq.s32.totalorder %v14611_v49, %v1180_v50 }
  0x95   :  { %v1140_v56 = vpop.permute.xlu0 %1139  ;;  %v9412_v0 = vsel %vm1187_vm7, 1.0, %v21848_v51 }
  0x96   :  { %vm1144_vm8 = vcmp.eq.s32.totalorder %v14602_v45, %v1140_v56  ;;  %vm1145_vm9 = vcmp.eq.s32.totalorder %v14608_v47, %v1140_v56  ;;  %vm1146_vm10 = vcmp.eq.s32.totalorder %v14605_v46, %v1140_v56  ;;  %vm1147_vm11 = vcmp.eq.s32.totalorder %v14611_v49, %v1140_v56  ;;  %v1103_v60 = vpop.permute.xlu1 %1102 }
  0x97   :  { %v9401_v61 = vsel %vm1144_vm8, 1.0, %v21848_v51  ;;  %v9403_v62 = vsel %vm1146_vm10, 1.0, %v21848_v51  ;;  %vm1108_vm12 = vcmp.eq.s32.totalorder %v14602_v45, %v1103_v60  ;;  %vm1109_vm13 = vcmp.eq.s32.totalorder %v14608_v47, %v1103_v60 }
  0x98   :  { %v1168_v63 = vadd.f32 %v9401_v61, %v9393_v52  ;;  %vm1110_vm14 = vcmp.eq.s32.totalorder %v14605_v46, %v1103_v60  ;;  %vm1111_vm15 = vcmp.eq.s32.totalorder %v14611_v49, %v1103_v60  ;;  %v1170_v1 = vadd.f32 %v9403_v62, %v9395_v53 }
  0x99   :  { %v9397_v3 = vsel %vm1108_vm12, 1.0, %v21848_v51  ;;  %v9398_v4 = vsel %vm1109_vm13, 1.0, %v21848_v51  ;;  %v9399_v5 = vsel %vm1110_vm14, 1.0, %v21848_v51  ;;  %v9400_v6 = vsel %vm1111_vm15, 1.0, %v21848_v51 }
  0x9a   :  { %v1220_v2 = vpop.permute.xlu0 %1219  ;;  %v9402_v7 = vsel %vm1145_vm9, 1.0, %v21848_v51  ;;  %v9404_v8 = vsel %vm1147_vm11, 1.0, %v21848_v51  ;;  %v1208_v9 = vadd.f32 %v9409_v54, %v1168_v63  ;;  %v1210_v19 = vadd.f32 %v9411_v55, %v1170_v1 }
  0x9b   :  { %vm1224_vm0 = vcmp.eq.s32.totalorder %v14602_v45, %v1220_v2  ;;  %vm1226_vm1 = vcmp.eq.s32.totalorder %v14605_v46, %v1220_v2  ;;  %v1143_v10 = vpop.permute.xlu1 %1142  ;;  %v1169_v12 = vadd.f32 %v9402_v7, %v9394_v57  ;;  %vm1225_vm2 = vcmp.eq.s32.totalorder %v14608_v47, %v1220_v2 }
  0x9c   :  { %vm1148_vm3 = vcmp.eq.s32.totalorder %v14602_v45, %v1143_v10  ;;  %vm1149_vm4 = vcmp.eq.s32.totalorder %v14608_v47, %v1143_v10  ;;  %vm1150_vm5 = vcmp.eq.s32.totalorder %v14605_v46, %v1143_v10  ;;  %vm1151_vm6 = vcmp.eq.s32.totalorder %v14611_v49, %v1143_v10 }
  0x9d   :  { %v9405_v13 = vsel %vm1148_vm3, 1.0, %v21848_v51  ;;  %v9406_v11 = vsel %vm1149_vm4, 1.0, %v21848_v51  ;;  %v9407_v14 = vsel %vm1150_vm5, 1.0, %v21848_v51  ;;  %v9408_v15 = vsel %vm1151_vm6, 1.0, %v21848_v51 }
  0x9e   :  { %v1172_v16 = vadd.f32 %v9405_v13, %v9397_v3  ;;  %v1173_v17 = vadd.f32 %v9406_v11, %v9398_v4  ;;  %v1174_v18 = vadd.f32 %v9407_v14, %v9399_v5  ;;  %v1209_v20 = vadd.f32 %v9410_v58, %v1169_v12 }
  0x9f   :  { %v9418_v21 = vsel %vm1225_vm2, 1.0, %v21848_v51  ;;  %v1171_v22 = vadd.f32 %v9404_v8, %v9396_v59  ;;  %vm1227_vm7 = vcmp.eq.s32.totalorder %v14611_v49, %v1220_v2  ;;  %v1175_v23 = vadd.f32 %v9408_v15, %v9400_v6 }
  0xa0   :  { %v9420_v24 = vsel %vm1227_vm7, 1.0, %v21848_v51  ;;  %v1183_v25 = vpop.permute.xlu1 %1182  ;;  %v9417_v26 = vsel %vm1224_vm0, 1.0, %v21848_v51  ;;  %v9419_v27 = vsel %vm1226_vm1, 1.0, %v21848_v51  ;;  %v1249_v28 = vadd.f32 %v9418_v21, %v1209_v20 }
  0xa1   :  { %v1211_v29 = vadd.f32 %v9412_v0, %v1171_v22  ;;  %vm1188_vm8 = vcmp.eq.s32.totalorder %v14602_v45, %v1183_v25  ;;  %vm1189_vm9 = vcmp.eq.s32.totalorder %v14608_v47, %v1183_v25  ;;  %vm1190_vm10 = vcmp.eq.s32.totalorder %v14605_v46, %v1183_v25 }
  0xa2   :  { %vm1191_vm11 = vcmp.eq.s32.totalorder %v14611_v49, %v1183_v25  ;;  %v9413_v30 = vsel %vm1188_vm8, 1.0, %v21848_v51  ;;  %v9414_v31 = vsel %vm1189_vm9, 1.0, %v21848_v51  ;;  %1384 = vmatprep.mubr.f32.mxu0 %v1249_v28  ;;  %v9415_v33 = vsel %vm1190_vm10, 1.0, %v21848_v51 }
  0xa3   :  { %v1251_v32 = vadd.f32 %v9420_v24, %v1211_v29  ;;  %v9416_v34 = vsel %vm1191_vm11, 1.0, %v21848_v51  ;;  %v1248_v35 = vadd.f32 %v9417_v26, %v1208_v9  ;;  %v1250_v36 = vadd.f32 %v9419_v27, %v1210_v19 }
  0xa4   :  { %v1213_v37 = vadd.f32 %v9414_v31, %v1173_v17  ;;  %v1215_v39 = vadd.f32 %v9416_v34, %v1175_v23  ;;  %v1212_v40 = vadd.f32 %v9413_v30, %v1172_v16  ;;  %v1214_v41 = vadd.f32 %v9415_v33, %v1174_v18 }
  0xa5   :  { %1459 = vmatprep.mubr.f32.mxu1 %v1251_v32  ;;  %1385 = vmatmul.mubr.f32.vlgmr.msra.gmra.mrb[0].mxu0 %v1248_v35  ;;  %v1223_v38 = vpop.permute.xlu1 %1222  ;;  %vm1473_vm0 = vcmask 261120   ;;  %v9428_v6 = vadd.s32 4294967280, %v14602_v45  ;;  %vm1522_vm1 = vcmp.lt.s32.totalorder %v14602_v45, 16  ;;  %v14693_v10 = vshrl.u32 %v1091_v44, 7 }
  0xa6   :  { %1460 = vmatmul.mubr.f32.vlgmr.msra.gmra.mrb[0].mxu1 %v1250_v36  ;;  %vm1228_vm12 = vcmp.eq.s32.totalorder %v14602_v45, %v1223_v38  ;;  %vm1229_vm13 = vcmp.eq.s32.totalorder %v14608_v47, %v1223_v38  ;;  %vm1230_vm14 = vcmp.eq.s32.totalorder %v14605_v46, %v1223_v38  ;;  %vm1231_vm15 = vcmp.eq.s32.totalorder %v14611_v49, %v1223_v38 }
  0xa7   :  { %v9422_v42 = vsel %vm1229_vm13, 1.0, %v21848_v51  ;;  %v9424_v43 = vsel %vm1231_vm15, 1.0, %v21848_v51  ;;  %v9421_v48 = vsel %vm1228_vm12, 1.0, %v21848_v51  ;;  %v9423_v50 = vsel %vm1230_vm14, 1.0, %v21848_v51  ;;  %21859 = vst [vmem:[#allocation9_spill] sm:$0xff] %v14693_v10  ;;  %v15123_v51 = vld [vmem:[%s21843_s13 + $0x1d8] sm:$0xff] }
  0xa8   :  { %v1253_v52 = vadd.f32 %v9422_v42, %v1213_v37  ;;  %v1255_v53 = vadd.f32 %v9424_v43, %v1215_v39  ;;  %v1252_v54 = vadd.f32 %v9421_v48, %v1212_v40  ;;  %v1254_v55 = vadd.f32 %v9423_v50, %v1214_v41  ;;  %21862 = vst [vmem:[#allocation12_spill] sm:$0xff] %v15123_v51  ;;  %v15148_v51 = vld [vmem:[%s21843_s13 + $0x200] sm:$0xff] }
  0xa9   :  { %v1524_v2 = vsel %vm1522_vm1, %v14602_v45, %v9428_v6  ;;  %v1519_v12 = vcvt.s32.f32 %v14693_v10  ;;  %v1520_v13 = vstv %s65_s20  ;;  %v14300_v32 = vmov 2102212464   ;;  %v15138_v45 = vld [vmem:[%s21843_s13 + $0x1f0] sm:$0xff]  ;;  %v15143_v10 = vld [vmem:[%s21843_s13 + $0x1f8] sm:$0xff]  ;;  %21867 = vst [vmem:[#allocation17_spill] sm:$0xff] %v15148_v51  ;;  %v15173_v51 = vld [vmem:[%s21843_s13 + $0x228] sm:$0xff] }
  0xaa   :  { %1389 = vmatprep.mubr.f32.mxu0 %v1253_v52  ;;  %1464 = vmatprep.mubr.f32.mxu1 %v1255_v53  ;;  %v1525_v7 = vcvt.s32.f32 %v1524_v2  ;;  %v14301_v34 = vmov 920167782   ;;  %v14302_v39 = vmov 1326507024   ;;  %v14303_v41 = vmov 683565275  }
  0xab   :  { %1390 = vmatmul.mubr.f32.gmra.mrb[2].mxu0 %v1252_v54  ;;  %1465 = vmatmul.mubr.f32.gmra.mrb[2].mxu1 %v1254_v55  ;;  %v1521_v11 = vadd.f32 %v1520_v13, %v1519_v12  ;;  %v14304_v43 = vmov 2475754826   ;;  %v14305_v52 = vmov 2131351028   ;;  %v9448_v2 = vld [vmem:[%s21834_s4 + $0x100] sm:$0xff]  ;;  %v1753_v13 = vld [vmem:[%s21834_s4 + $0x10] sm:$0xff] }
  0xac   :  { %v1526_v8 = vmul.f32 -0.6140227, %v1525_v7  ;;  %v9449_v7 = vld [vmem:[%s21834_s4 + $0x108] sm:$0xff]  ;;  %21865 = vst [vmem:[#allocation15_spill] sm:$0xff] %v15138_v45  ;;  %21866 = vst [vmem:[#allocation16_spill] sm:$0xff] %v15143_v10  ;;  %v15163_v45 = vld [vmem:[%s21843_s13 + $0x218] sm:$0xff] }
  0xad   :  { %21870 = vst [vmem:[#allocation20_spill] sm:$0xff] %v15163_v45  ;;  %v15168_v10 = vld [vmem:[%s21843_s13 + $0x220] sm:$0xff]  ;;  %21872 = vst [vmem:[#allocation22_spill] sm:$0xff] %v15173_v51  ;;  %v15198_v51 = vld [vmem:[%s21843_s13 + $0x250] sm:$0xff] }
  0xae   :  { %v1527_v9 = vmul.f32 1.442695, %v1526_v8  ;;  %21871 = vst [vmem:[#allocation21_spill] sm:$0xff] %v15168_v10  ;;  %v15188_v45 = vld [vmem:[%s21843_s13 + $0x240] sm:$0xff]  ;;  %v15193_v10 = vld [vmem:[%s21843_s13 + $0x248] sm:$0xff]  ;;  %21877 = vst [vmem:[#allocation27_spill] sm:$0xff] %v15198_v51 }
  0xaf   :  { %21875 = vst [vmem:[#allocation25_spill] sm:$0xff] %v15188_v45  ;;  %21876 = vst [vmem:[#allocation26_spill] sm:$0xff] %v15193_v10  ;;  %v15213_v45 = vld [vmem:[%s21843_s13 + $0x268] sm:$0xff]  ;;  %v15218_v10 = vld [vmem:[%s21843_s13 + $0x270] sm:$0xff] }
  0xb0   :  { %14126 = vpow2.f32 %v1527_v9  ;;  %v12916_v9 = vpack.c.bf16 %v9449_v7, %v9448_v2  ;;  %21880 = vst [vmem:[#allocation30_spill] sm:$0xff] %v15213_v45  ;;  %21881 = vst [vmem:[#allocation31_spill] sm:$0xff] %v15218_v10  ;;  %v15223_v51 = vld [vmem:[%s21843_s13 + $0x278] sm:$0xff]  ;;  %v15238_v45 = vld [vmem:[%s21843_s13 + $0x290] sm:$0xff] }
  0xb1   :  { %21882 = vst [vmem:[#allocation32_spill] sm:$0xff] %v15223_v51  ;;  %21885 = vst [vmem:[#allocation35_spill] sm:$0xff] %v15238_v45  ;;  %v15243_v10 = vld [vmem:[%s21843_s13 + $0x298] sm:$0xff]  ;;  %v15248_v51 = vld [vmem:[%s21843_s13 + $0x2a0] sm:$0xff] }
  0xb2   :  { %12917 = vmatprep.subr.bf16.mxu0 %v12916_v9  ;;  %21886 = vst [vmem:[#allocation36_spill] sm:$0xff] %v15243_v10  ;;  %21887 = vst [vmem:[#allocation37_spill] sm:$0xff] %v15248_v51  ;;  %v15263_v45 = vld [vmem:[%s21843_s13 + $0x2b8] sm:$0xff]  ;;  %v15268_v10 = vld [vmem:[%s21843_s13 + $0x2c0] sm:$0xff] }
  0xb3   :  { %12919 = vmatpush3.bf16.msra.mxu0 %v12916_v9  ;;  %21890 = vst [vmem:[#allocation40_spill] sm:$0xff] %v15263_v45  ;;  %21891 = vst [vmem:[#allocation41_spill] sm:$0xff] %v15268_v10  ;;  %v15273_v51 = vld [vmem:[%s21843_s13 + $0x2c8] sm:$0xff]  ;;  %v15288_v45 = vld [vmem:[%s21843_s13 + $0x2e0] sm:$0xff] }
  0xb4   :  { %21892 = vst [vmem:[#allocation42_spill] sm:$0xff] %v15273_v51  ;;  %21895 = vst [vmem:[#allocation45_spill] sm:$0xff] %v15288_v45  ;;  %v15293_v10 = vld [vmem:[%s21843_s13 + $0x2e8] sm:$0xff]  ;;  %v15298_v51 = vld [vmem:[%s21843_s13 + $0x2f0] sm:$0xff] }
  0xb5   :  { %21896 = vst [vmem:[#allocation46_spill] sm:$0xff] %v15293_v10  ;;  %21897 = vst [vmem:[#allocation47_spill] sm:$0xff] %v15298_v51  ;;  %v15313_v45 = vld [vmem:[%s21843_s13 + $0x308] sm:$0xff]  ;;  %v15318_v10 = vld [vmem:[%s21843_s13 + $0x310] sm:$0xff] }
  0xb6   :  { %21900 = vst [vmem:[#allocation50_spill] sm:$0xff] %v15313_v45  ;;  %21901 = vst [vmem:[#allocation51_spill] sm:$0xff] %v15318_v10  ;;  %v15323_v51 = vld [vmem:[%s21843_s13 + $0x318] sm:$0xff]  ;;  %v15338_v45 = vld [vmem:[%s21843_s13 + $0x330] sm:$0xff] }
  0xb7   :  { %21902 = vst [vmem:[#allocation52_spill] sm:$0xff] %v15323_v51  ;;  %21905 = vst [vmem:[#allocation55_spill] sm:$0xff] %v15338_v45  ;;  %v15343_v10 = vld [vmem:[%s21843_s13 + $0x338] sm:$0xff]  ;;  %v15348_v51 = vld [vmem:[%s21843_s13 + $0x340] sm:$0xff] }
  0xb8   :  { %21906 = vst [vmem:[#allocation56_spill] sm:$0xff] %v15343_v10  ;;  %21907 = vst [vmem:[#allocation57_spill] sm:$0xff] %v15348_v51  ;;  %v15363_v45 = vld [vmem:[%s21843_s13 + $0x358] sm:$0xff]  ;;  %v15368_v10 = vld [vmem:[%s21843_s13 + $0x360] sm:$0xff] }
  0xb9   :  { %21910 = vst [vmem:[#allocation60_spill] sm:$0xff] %v15363_v45  ;;  %21911 = vst [vmem:[#allocation61_spill] sm:$0xff] %v15368_v10  ;;  %v15373_v51 = vld [vmem:[%s21843_s13 + $0x368] sm:$0xff]  ;;  %v15388_v45 = vld [vmem:[%s21843_s13 + $0x380] sm:$0xff] }
  0xba   :  { %v14127_v14 = vpop.eup %14126  ;;  %21912 = vst [vmem:[#allocation62_spill] sm:$0xff] %v15373_v51  ;;  %21915 = vst [vmem:[#allocation65_spill] sm:$0xff] %v15388_v45  ;;  %v15393_v10 = vld [vmem:[%s21843_s13 + $0x388] sm:$0xff]  ;;  %v15398_v51 = vld [vmem:[%s21843_s13 + $0x390] sm:$0xff] }
  0xbb   :  { %v14696_v15 = vmul.f32 %v14127_v14, %v1521_v11  ;;  %v1754_v11 = vld [vmem:[%s21834_s4 + $0x18] sm:$0xff]  ;;  %v9450_v14 = vld [vmem:[%s21834_s4 + $0x110] sm:$0xff]  ;;  %21916 = vst [vmem:[#allocation66_spill] sm:$0xff] %v15393_v10  ;;  %21917 = vst [vmem:[#allocation67_spill] sm:$0xff] %v15398_v51 }
  0xbc   :  { %v15413_v45 = vld [vmem:[%s21843_s13 + $0x3a8] sm:$0xff]  ;;  %v15418_v10 = vld [vmem:[%s21843_s13 + $0x3b0] sm:$0xff]  ;;  %v15423_v51 = vld [vmem:[%s21843_s13 + $0x3b8] sm:$0xff] }
  0xbd   :  { %v1533_v19 = vand.u32 2139095040, %v14696_v15  ;;  %v1530_v36 = vand.u32 2147483647, %v14696_v15  ;;  %vm1532_vm9 = vcmp.lt.s32.totalorder %v14696_v15, 0  ;;  %21920 = vst [vmem:[#allocation70_spill] sm:$0xff] %v15413_v45  ;;  %21921 = vst [vmem:[#allocation71_spill] sm:$0xff] %v15418_v10 }
  0xbe   :  { %21922 = vst [vmem:[#allocation72_spill] sm:$0xff] %v15423_v51  ;;  %v15438_v45 = vld [vmem:[%s21843_s13 + $0x3d0] sm:$0xff]  ;;  %v15443_v10 = vld [vmem:[%s21843_s13 + $0x3d8] sm:$0xff]  ;;  %v15448_v51 = vld [vmem:[%s21843_s13 + $0x3e0] sm:$0xff] }
  0xbf   :  { %v1534_v23 = vshrl.u32 %v1533_v19, 23  ;;  %v9440_v19 = vld [vmem:[%s21834_s4 + $0x80] sm:$0xff]  ;;  %vm1531_vm10 = vcmp.le.f32.partialorder %v1530_v36, 0.7853982  ;;  %21925 = vst [vmem:[#allocation75_spill] sm:$0xff] %v15438_v45  ;;  %21926 = vst [vmem:[#allocation76_spill] sm:$0xff] %v15448_v51 }
  0xc0   :  { %v15463_v45 = vld [vmem:[%s21843_s13 + $0x3f8] sm:$0xff]  ;;  %v15468_v51 = vld [vmem:[%s21843_s13 + $0x400] sm:$0xff] }
  0xc1   :  { %v9429_v26 = vadd.s32 4294967169, %v1534_v23 }
  0xc3   :  { %v1540_v28 = vadd.s32 1, %v9429_v26 }
  0xc5   :  { %vm1541_vm2 = vcmp.gt.s32.totalorder %v1540_v28, 0 }
  0xc6   :  { %v1542_v29 = vsel %vm1541_vm2, %v1540_v28, 0 }
  0xc7   :  { %v1544_v30 = vand.u32 31, %v1542_v29  ;;  %v14710_v37 = vshrl.u32 %v1542_v29, 5 }
  0xc9   :  { %v1545_v31 = vsub.s32 32, %v1544_v30  ;;  %v1556_v33 = vshll.u32 %v14300_v32, %v1544_v30  ;;  %v1559_v38 = vshll.u32 %v14301_v34, %v1544_v30  ;;  %v1547_v42 = vshll.u32 %v14303_v41, %v1544_v30 }
  0xca   :  { %v1550_v50 = vshll.u32 %v14304_v43, %v1544_v30  ;;  %v1553_v54 = vshll.u32 %v14305_v52, %v1544_v30  ;;  %vm1565_vm3 = vcmp.lt.s32.totalorder %v14710_v37, 4  ;;  %vm1562_vm4 = vcmp.lt.s32.totalorder %v14710_v37, 1 }
  0xcb   :  { %v1557_v35 = vshrl.u32 %v14301_v34, %v1545_v31  ;;  %v1560_v40 = vshrl.u32 %v14302_v39, %v1545_v31  ;;  %v1548_v48 = vshrl.u32 %v14304_v43, %v1545_v31  ;;  %v1551_v53 = vshrl.u32 %v14305_v52, %v1545_v31 }
  0xcc   :  { %v1554_v55 = vshrl.u32 %v14300_v32, %v1545_v31  ;;  %vm1564_vm5 = vcmp.lt.s32.totalorder %v14710_v37, 3  ;;  %vm1563_vm6 = vcmp.lt.s32.totalorder %v14710_v37, 2 }
 0x178   :  { %v10516_v47 = vpop.f32.mrb[0].mxu0 }
 0x179   :  { %v10554_v46 = vpop.f32.mrb[0].mxu1  ;;  %v10517_v56 = vpop.f32.mrb[1].mxu0 }
 0x17a   :  { %v10518_v49 = vadd.f32 %v10517_v56, %v10516_v47  ;;  %v10555_v57 = vpop.f32.mrb[1].mxu1  ;;  %v1558_v47 = vor.u32 %v1557_v35, %v1556_v33  ;;  %v1561_v56 = vor.u32 %v1560_v40, %v1559_v38 }
 0x17b   :  { %v10556_v58 = vadd.f32 %v10555_v57, %v10554_v46  ;;  %v1537_v46 = vand.u32 8388607, %v1530_v36  ;;  %v1552_v57 = vor.u32 %v1551_v53, %v1550_v50 }
 0x17d   :  { %v1462_v59 = vadd.f32 %v10556_v58, %v10518_v49  ;;  %v1549_v49 = vor.u32 %v1548_v48, %v1547_v42  ;;  %v1555_v58 = vor.u32 %v1554_v55, %v1553_v54 }
 0x17e   :  { %v10519_v60 = vpop.f32.mrb[2].mxu0  ;;  %v10557_v61 = vpop.f32.mrb[2].mxu1 }
 0x17f   :  { %v1474_v62 = vsel %vm1473_vm0, %v1462_v59, 0.0  ;;  %v10520_v63 = vpop.f32.mrb[3].mxu0  ;;  %v10558_v0 = vpop.f32.mrb[3].mxu1  ;;  %v1567_v28 = vsel %vm1565_vm3, %v1555_v58, 2102212464 }
 0x180   :  { %1475 = vadd.xlane.f32.xlu0 %v1474_v62  ;;  %v10521_v1 = vadd.f32 %v10520_v63, %v10519_v60  ;;  %v10559_v3 = vadd.f32 %v10558_v0, %v10557_v61  ;;  %v1538_v60 = vor.u32 8388608, %v1537_v46  ;;  %v1575_v61 = vsel %vm1565_vm3, %v1561_v56, 1326507024 }
 0x181   :  { %v1570_v62 = vsel %vm1562_vm4, %v1549_v49, %v1552_v57  ;;  %v1574_v0 = vsel %vm1562_vm4, %v1552_v57, %v1555_v58  ;;  %v1568_v30 = vsel %vm1564_vm5, %v1552_v57, %v1567_v28 }
 0x182   :  { %v1467_v4 = vadd.f32 %v10559_v3, %v10521_v1  ;;  %v1576_v1 = vsel %vm1564_vm5, %v1558_v47, %v1575_v61  ;;  %v1751_v3 = vld [vmem:[%s21834_s4] sm:$0xff] }
 0x183   :  { %v1577_v12 = vsel %vm1563_vm6, %v1574_v0, %v1576_v1 }
 0x184   :  { %v1477_v5 = vsel %vm1473_vm0, %v1467_v4, 0.0 }
 0x185   :  { %1478 = vadd.xlane.f32.xlu1 %v1477_v5  ;;  %v1578_v5 = vshll.u32 %v1538_v60, 8 }
 0x20d   :  { %v1476_v16 = vpop.xlane.xlu0 %1475 }
 0x20e   :  { %v1481_v17 = vmul.f32 0.03125, %v1476_v16  ;;  %v12904_v16 = vpack.c.bf16 %v1754_v11, %v1753_v13 }
 0x210   :  { %v14698_v18 = vsub.f32 %v1462_v59, %v1481_v17  ;;  %v1571_v59 = vsel %vm1565_vm3, %v1558_v47, 920167782  ;;  %v9451_v17 = vld [vmem:[%s21834_s4 + $0x118] sm:$0xff]  ;;  %vm1622_vm3 = vweird.f32 %v14696_v15 }
 0x211   :  { %v1572_v63 = vsel %vm1564_vm5, %v1555_v58, %v1571_v59 }
 0x212   :  { %v1485_v20 = vmul.f32 %v14698_v18, %v14698_v18  ;;  %v1479_v21 = vpop.xlane.xlu1 %1478  ;;  %v1573_v8 = vsel %vm1563_vm6, %v1570_v62, %v1572_v63 }
 0x213   :  { %v1482_v44 = vmul.f32 0.03125, %v1479_v21 }
 0x214   :  { %v1487_v22 = vsel %vm1473_vm0, %v1485_v20, 0.0  ;;  %v9441_v20 = vld [vmem:[%s21834_s4 + $0x88] sm:$0xff] }
 0x215   :  { %1488 = vadd.xlane.f32.xlu0 %v1487_v22  ;;  %v14704_v24 = vsub.f32 %v1467_v4, %v1482_v44  ;;  %v1752_v4 = vld [vmem:[%s21834_s4 + $0x8] sm:$0xff]  ;;  %v14764_v21 = vmul.u32.u64.low %v1578_v5, %v1573_v8  ;;  %v14765_v44 = vmul.u32.u64.high %v1578_v5, %v1573_v8, %v14764_v21  ;;  %v12920_v22 = vpack.c.bf16 %v9451_v17, %v9450_v14 }
 0x216   :  { %v12900_v6 = vpack.c.bf16 %v1752_v4, %v1751_v3  ;;  %v14767_v23 = vpack.c.bf16 %v9441_v20, %v9440_v19 }
 0x217   :  { %v1486_v25 = vmul.f32 %v14704_v24, %v14704_v24  ;;  %12921 = vmatprep.subr.bf16.mxu0 %v12920_v22  ;;  %v1588_v32 = vadd.s32 1, %v14765_v44 }
 0x218   :  { %12901 = vmatprep.subr.bf16.mxu1 %v12900_v6  ;;  %12923 = vmatpush3.bf16.msra.mxu0 %v12920_v22 }
 0x219   :  { %v1490_v27 = vsel %vm1473_vm0, %v1486_v25, 0.0  ;;  %12903 = vmatpush3.bf16.msra.mxu1 %v12900_v6  ;;  %v1546_v25 = vshrl.u32 %v14303_v41, %v1545_v31 }
 0x21a   :  { %1491 = vadd.xlane.f32.xlu0 %v1490_v27  ;;  %v14769_v26 = vmul.u32.u64.low %v1578_v5, %v1577_v12  ;;  %v14770_v27 = vmul.u32.u64.high %v1578_v5, %v1577_v12, %v14769_v26  ;;  %12905 = vmatprep.subr.bf16.mxu1 %v12904_v16 }
 0x21b   :  { %v1566_v29 = vsel %vm1562_vm4, %v1546_v25, %v1549_v49  ;;  %v9426_v26 = vld [vmem:[%s21833_s3] ss:$0 sm:$0xff]  ;;  %vm14307_vm4 = vmmov 0  }
 0x21c   :  { %v1569_v31 = vsel %vm1563_vm6, %v1566_v29, %v1568_v30  ;;  %vm1587_vm7 = vc.u32 %v14770_v27, %v14764_v21  ;;  %v1586_v53 = vadd.s32 %v14764_v21, %v14770_v27  ;;  %v9427_v30 = vld [vmem:[%s21833_s3 + $0x1] ss:$0 sm:$0xff] }
 0x21d   :  { %12907 = vmatpush3.bf16.msra.mxu1 %v12904_v16  ;;  %v1585_v33 = vmul.u32 %v1578_v5, %v1569_v31  ;;  %v1589_v34 = vsel %vm1587_vm7, %v1588_v32, %v14765_v44 }
 0x21e   :  { %12909 = vmatprep.subr.bf16.mxu1 %v14767_v23 }
 0x21f   :  { %v1590_v35 = vadd.s32 %v1589_v34, %v1585_v33 }
 0x221   :  { %v1591_v38 = vadd.s32 536870912, %v1590_v35 }
 0x223   :  { %v1592_v39 = vshrl.u32 %v1591_v38, 30 }
 0x225   :  { %v1593_v40 = vshll.u32 %v1592_v39, 30  ;;  %v1616_v63 = vsub.s32 4, %v1592_v39 }
 0x227   :  { %v1594_v41 = vsub.s32 %v1590_v35, %v1593_v40  ;;  %v1617_v1 = vsel %vm1532_vm9, %v1616_v63, %v1592_v39  ;;  %v9443_v39 = vld [vmem:[%s21834_s4 + $0x98] sm:$0xff] }
 0x228   :  { %v1619_v3 = vsel %vm1531_vm10, 0, %v1617_v1  ;;  %v14923_v63 = vld [vmem:[%s21843_s13 + $0x98] sm:$0xff]  ;;  %v14933_v1 = vld [vmem:[%s21843_s13 + $0xa8] sm:$0xff] }
 0x229   :  { %v1596_v42 = vsub.s32 0, %v1594_v41  ;;  %v1726_v4 = vadd.s32 3, %v1619_v3  ;;  %v1623_v7 = vand.u32 3, %v1619_v3  ;;  %v14938_v3 = vld [vmem:[%s21843_s13 + $0xb0] sm:$0xff] }
 0x22b   :  { %v9430_v43 = vmin.u32 %v1596_v42, %v1594_v41  ;;  %v1727_v12 = vand.u32 3, %v1726_v4  ;;  %vm1628_vm11 = vcmp.eq.s32.totalorder %v1623_v7, 2  ;;  %vm1625_vm12 = vcmp.eq.s32.totalorder %v1623_v7, 0  ;;  %v14943_v4 = vld [vmem:[%s21843_s13 + $0xb8] sm:$0xff] }
 0x22c   :  { %vm1624_vm15 = vcmp.lt.s32.totalorder %v1623_v7, 2  ;;  %v21846_v42 = vmov 0.0|0.0   ;;  %v14963_v7 = vld [vmem:[%s21843_s13 + $0xd8] sm:$0xff] }
 0x22d   :  { %v1598_v48 = vclz %v9430_v43  ;;  %vm1729_vm13 = vcmp.eq.s32.totalorder %v1727_v12, 0  ;;  %vm1732_vm14 = vcmp.eq.s32.totalorder %v1727_v12, 2  ;;  %vm1728_vm2 = vcmp.lt.s32.totalorder %v1727_v12, 2  ;;  %12956 = vmatprep.subr.bf16.mxu0 %v21846_v42  ;;  %v14828_v43 = vld [vmem:[%s21843_s13] sm:$0xff]  ;;  %v14978_v12 = vld [vmem:[%s21843_s13 + $0xf0] sm:$0xff] }
 0x22f   :  { %v9431_v50 = vadd.s32 4294967294, %v1598_v48  ;;  %v14838_v48 = vld [vmem:[%s21843_s13 + $0x10] sm:$0xff] }
 0x231   :  { %vm9432_vm8 = vcmp.lt.s32.totalorder %v9431_v50, 0 }
 0x232   :  { %v1601_v52 = vsel %vm9432_vm8, 0, %v9431_v50  ;;  %v14843_v50 = vld [vmem:[%s21843_s13 + $0x18] sm:$0xff] }
 0x233   :  { %v1606_v37 = vsub.s32 4294967266, %v1601_v52  ;;  %v1602_v54 = vsub.s32 32, %v1601_v52  ;;  %v1603_v47 = vshll.u32 %v1594_v41, %v1601_v52  ;;  %v14848_v52 = vld [vmem:[%s21843_s13 + $0x20] sm:$0xff] }
 0x235   :  { %v1607_v55 = vadd.s32 127, %v1606_v37  ;;  %v1604_v46 = vshrl.u32 %v1586_v53, %v1602_v54  ;;  %v14853_v37 = vld [vmem:[%s21843_s13 + $0x28] sm:$0xff]  ;;  %v14858_v53 = vld [vmem:[%s21843_s13 + $0x30] sm:$0xff]  ;;  %v14863_v54 = vld [vmem:[%s21843_s13 + $0x38] sm:$0xff] }
 0x237   :  { %v1608_v56 = vshll.u32 %v1607_v55, 23  ;;  %v1605_v49 = vor.u32 %v1604_v46, %v1603_v47  ;;  %v14868_v55 = vld [vmem:[%s21843_s13 + $0x40] sm:$0xff]  ;;  %v14873_v47 = vld [vmem:[%s21843_s13 + $0x48] sm:$0xff]  ;;  %v14878_v46 = vld [vmem:[%s21843_s13 + $0x50] sm:$0xff] }
 0x239   :  { %v1609_v57 = vor.u32 4788187, %v1608_v56  ;;  %v1612_v59 = vcvt.s32.f32 %v1605_v49  ;;  %v14883_v56 = vld [vmem:[%s21843_s13 + $0x58] sm:$0xff]  ;;  %v14888_v49 = vld [vmem:[%s21843_s13 + $0x60] sm:$0xff] }
 0x23b   :  { %v1610_v58 = vand.u32 2147483647, %v1609_v57  ;;  %v14893_v57 = vld [vmem:[%s21843_s13 + $0x68] sm:$0xff] }
 0x23d   :  { %v1613_v60 = vmul.f32 %v1612_v59, %v1610_v58  ;;  %v14898_v58 = vld [vmem:[%s21843_s13 + $0x70] sm:$0xff]  ;;  %v14903_v59 = vld [vmem:[%s21843_s13 + $0x78] sm:$0xff] }
 0x23f   :  { %v1614_v61 = vxor.u32 2147483648, %v1613_v60 }
 0x241   :  { %v1615_v62 = vsel %vm1532_vm9, %v1614_v61, %v1613_v60  ;;  %v14908_v60 = vld [vmem:[%s21843_s13 + $0x80] sm:$0xff]  ;;  %v14913_v61 = vld [vmem:[%s21843_s13 + $0x88] sm:$0xff] }
 0x242   :  { %v1618_v0 = vsel %vm1531_vm10, %v14696_v15, %v1615_v62  ;;  %v14918_v62 = vld [vmem:[%s21843_s13 + $0x90] sm:$0xff] }
 0x243   :  { %14128 = vcosq.f32 %v1618_v0 }
 0x244   :  { %14130 = vsinq.f32 %v1618_v0  ;;  %v14928_v0 = vld [vmem:[%s21843_s13 + $0xa0] sm:$0xff] }
 0x24d   :  { %v14129_v2 = vpop.eup %14128 }
 0x24e   :  { %v14131_v8 = vpop.eup %14130  ;;  %v1629_v13 = vxor.u32 2147483648, %v14129_v2 }
 0x24f   :  { %v1626_v36 = vxor.u32 2147483648, %v14131_v8 }
 0x250   :  { %v1630_v17 = vsel %vm1628_vm11, %v1629_v13, %v14131_v8  ;;  %v1734_v21 = vsel %vm1732_vm14, %v1629_v13, %v14131_v8  ;;  %v14968_v8 = vld [vmem:[%s21843_s13 + $0xe0] sm:$0xff]  ;;  %v14983_v13 = vld [vmem:[%s21843_s13 + $0xf8] sm:$0xff] }
 0x251   :  { %v1627_v19 = vsel %vm1625_vm12, %v14129_v2, %v1626_v36  ;;  %v1731_v20 = vsel %vm1729_vm13, %v14129_v2, %v1626_v36  ;;  %v14958_v2 = vld [vmem:[%s21843_s13 + $0xd0] sm:$0xff]  ;;  %v14993_v36 = vld [vmem:[%s21843_s13 + $0x108] sm:$0xff] }
 0x252   :  { %v1631_v44 = vsel %vm1624_vm15, %v1627_v19, %v1630_v17  ;;  %v1735_v22 = vsel %vm1728_vm2, %v1731_v20, %v1734_v21  ;;  %v15008_v17 = vld [vmem:[%s21843_s13 + $0x120] sm:$0xff]  ;;  %v15013_v19 = vld [vmem:[%s21843_s13 + $0x128] sm:$0xff]  ;;  %v15018_v20 = vld [vmem:[%s21843_s13 + $0x130] sm:$0xff] }
 0x253   :  { %v1632_v28 = vsel %vm1622_vm3, nan, %v1631_v44  ;;  %v1736_v29 = vsel %vm1622_vm3, nan, %v1735_v22  ;;  %v15023_v21 = vld [vmem:[%s21843_s13 + $0x138] sm:$0xff]  ;;  %v15028_v44 = vld [vmem:[%s21843_s13 + $0x140] sm:$0xff]  ;;  %v15033_v22 = vld [vmem:[%s21843_s13 + $0x148] sm:$0xff] }
 0x254   :  { %v1737_v32 = vsel %vm1522_vm1, %v1632_v28, %v1736_v29  ;;  %v15053_v28 = vld [vmem:[%s21843_s13 + $0x168] sm:$0xff]  ;;  %v15058_v29 = vld [vmem:[%s21843_s13 + $0x170] sm:$0xff]  ;;  %vm578_vm1 = vcmask 64512  }
 0x255   :  { %vm18846_vm5 = vmpackc.low %vm578_vm1, %vm578_vm1 }
 0x2a2   :  { %v1489_v5 = vpop.xlane.xlu0 %1488 }
 0x2a3   :  { %v1493_v6 = vmul.f32 0.03125, %v1489_v5  ;;  %v14948_v5 = vld [vmem:[%s21843_s13 + $0xc0] sm:$0xff] }
 0x2a5   :  { %v1495_v9 = vadd.f32 1e-05, %v1493_v6  ;;  %v14953_v6 = vld [vmem:[%s21843_s13 + $0xc8] sm:$0xff] }
 0x2a7   :  { %14132 = vrsqrt.f32 %v1495_v9  ;;  %v1492_v11 = vpop.xlane.xlu0 %1491  ;;  %v14973_v9 = vld [vmem:[%s21843_s13 + $0xe8] sm:$0xff] }
 0x2a8   :  { %v1494_v14 = vmul.f32 0.03125, %v1492_v11  ;;  %v14988_v11 = vld [vmem:[%s21843_s13 + $0x100] sm:$0xff] }
 0x2aa   :  { %v1496_v16 = vadd.f32 1e-05, %v1494_v14  ;;  %v14998_v14 = vld [vmem:[%s21843_s13 + $0x110] sm:$0xff] }
 0x2ac   :  { %14134 = vrsqrt.f32 %v1496_v16  ;;  %v15003_v16 = vld [vmem:[%s21843_s13 + $0x118] sm:$0xff] }
 0x2b1   :  { %v14133_v25 = vpop.eup %14132 }
 0x2b2   :  { %v1499_v27 = vmul.f32 %v14133_v25, %v14698_v18  ;;  %v9442_v18 = vld [vmem:[%s21834_s4 + $0x90] sm:$0xff] }
 0x2b3   :  { %v15038_v25 = vld [vmem:[%s21843_s13 + $0x150] sm:$0xff] }
 0x2b4   :  { %v1507_v31 = vmul.f32 %v9426_v26, %v1499_v27  ;;  %v15048_v27 = vld [vmem:[%s21843_s13 + $0x160] sm:$0xff] }
 0x2b6   :  { %v14135_v15 = vpop.eup %14134  ;;  %v1515_v33 = vadd.f32 %v9427_v30, %v1507_v31  ;;  %v15068_v31 = vld [vmem:[%s21843_s13 + $0x180] sm:$0xff] }
 0x2b7   :  { %v1500_v34 = vmul.f32 %v14135_v15, %v14704_v24  ;;  %v12912_v24 = vpack.c.bf16 %v9443_v39, %v9442_v18  ;;  %v15078_v15 = vld [vmem:[%s21843_s13 + $0x190] sm:$0xff]  ;;  %v15103_v39 = vld [vmem:[%s21843_s13 + $0x1b8] sm:$0xff] }
 0x2b8   :  { %v14800_v35 = vadd.f32 %v1737_v32, %v1515_v33  ;;  %v15083_v33 = vld [vmem:[%s21843_s13 + $0x198] sm:$0xff]  ;;  %v15098_v18 = vld [vmem:[%s21843_s13 + $0x1b0] sm:$0xff] }
 0x2b9   :  { %v1508_v38 = vmul.f32 %v9426_v26, %v1500_v34  ;;  %v15043_v26 = vld [vmem:[%s21843_s13 + $0x158] sm:$0xff]  ;;  %v15088_v34 = vld [vmem:[%s21843_s13 + $0x1a0] sm:$0xff] }
 0x2ba   :  { %21860 = vst [vmem:[#allocation10_spill] sm:$0xff] %v14800_v35  ;;  %11328 = vmatprep.mubr.msk.f32.mxu1 %vm1473_vm0, %v14800_v35  ;;  %11350 = vmatprep.mubr.msk.f32.mxu0 %vm1473_vm0, %v14800_v35 }
 0x2bb   :  { %v1516_v40 = vadd.f32 %v9427_v30, %v1508_v38  ;;  %v15063_v30 = vld [vmem:[%s21843_s13 + $0x178] sm:$0xff]  ;;  %v15093_v38 = vld [vmem:[%s21843_s13 + $0x1a8] sm:$0xff] }
 0x2bd   :  { %v14812_v41 = vadd.f32 %v1737_v32, %v1516_v40  ;;  %v15073_v32 = vld [vmem:[%s21843_s13 + $0x188] sm:$0xff]  ;;  %v15108_v40 = vld [vmem:[%s21843_s13 + $0x1c0] sm:$0xff] }
 0x2bf   :  { %21861 = vst [vmem:[#allocation11_spill] sm:$0xff] %v14812_v41  ;;  %11329 = vmatmul.mubr.msk.f32.vlgmr.msra.gmra.mrb[4].mxu1 %vm1473_vm0, %v14812_v41  ;;  %11351 = vmatmul.mubr.msk.f32.vlgmr.msra.gmra.mrb[4].mxu0 %vm1473_vm0, %v14812_v41 }
 0x2c0   :  { %12911 = vmatpush3.bf16.msra.mxu1 %v14767_v23  ;;  %11339 = vmatprep.mubr.msk.f32.mxu1 %vm1473_vm0, %v14800_v35  ;;  %v14833_v23 = vld [vmem:[%s21843_s13 + $0x8] sm:$0xff] }
 0x2c1   :  { %12913 = vmatprep.subr.bf16.mxu1 %v12912_v24  ;;  %v15133_v35 = vld [vmem:[%s21843_s13 + $0x1e8] sm:$0xff] }
 0x2c2   :  { %21864 = vst [vmem:[#allocation14_spill] sm:$0xff] %v15133_v35  ;;  %v15158_v35 = vld [vmem:[%s21843_s13 + $0x210] sm:$0xff] }
 0x2c3   :  { %21869 = vst [vmem:[#allocation19_spill] sm:$0xff] %v15158_v35  ;;  %v15183_v35 = vld [vmem:[%s21843_s13 + $0x238] sm:$0xff] }
 0x2c4   :  { %12915 = vmatpush3.bf16.msra.mxu1 %v12912_v24  ;;  %v15113_v24 = vld [vmem:[%s21843_s13 + $0x1c8] sm:$0xff]  ;;  %21874 = vst [vmem:[#allocation24_spill] sm:$0xff] %v15183_v35  ;;  %v15208_v35 = vld [vmem:[%s21843_s13 + $0x260] sm:$0xff] }
 0x2c5   :  { %12924 = vmatprep.subr.bf16.mxu1 %v21846_v42  ;;  %v15118_v42 = vld [vmem:[%s21843_s13 + $0x1d0] sm:$0xff]  ;;  %21879 = vst [vmem:[#allocation29_spill] sm:$0xff] %v15208_v35  ;;  %v15233_v35 = vld [vmem:[%s21843_s13 + $0x288] sm:$0xff] }
 0x2c6   :  { %21884 = vst [vmem:[#allocation34_spill] sm:$0xff] %v15233_v35  ;;  %v15258_v35 = vld [vmem:[%s21843_s13 + $0x2b0] sm:$0xff] }
 0x2c7   :  { %11340 = vmatmul.mubr.msk.f32.vlgmr.msra.gmra.mrb[6].mxu1 %vm1473_vm0, %v14812_v41  ;;  %v15128_v41 = vld [vmem:[%s21843_s13 + $0x1e0] sm:$0xff]  ;;  %21889 = vst [vmem:[#allocation39_spill] sm:$0xff] %v15258_v35  ;;  %v15283_v35 = vld [vmem:[%s21843_s13 + $0x2d8] sm:$0xff] }
 0x2c8   :  { %21863 = vst [vmem:[#allocation13_spill] sm:$0xff] %v15128_v41  ;;  %v15153_v41 = vld [vmem:[%s21843_s13 + $0x208] sm:$0xff]  ;;  %21894 = vst [vmem:[#allocation44_spill] sm:$0xff] %v15283_v35  ;;  %v15308_v35 = vld [vmem:[%s21843_s13 + $0x300] sm:$0xff] }
 0x2c9   :  { %21868 = vst [vmem:[#allocation18_spill] sm:$0xff] %v15153_v41  ;;  %v15178_v41 = vld [vmem:[%s21843_s13 + $0x230] sm:$0xff]  ;;  %21899 = vst [vmem:[#allocation49_spill] sm:$0xff] %v15308_v35  ;;  %v15333_v35 = vld [vmem:[%s21843_s13 + $0x328] sm:$0xff] }
 0x2ca   :  { %21873 = vst [vmem:[#allocation23_spill] sm:$0xff] %v15178_v41  ;;  %v15203_v41 = vld [vmem:[%s21843_s13 + $0x258] sm:$0xff]  ;;  %21904 = vst [vmem:[#allocation54_spill] sm:$0xff] %v15333_v35  ;;  %v15358_v35 = vld [vmem:[%s21843_s13 + $0x350] sm:$0xff] }
 0x2cb   :  { %21878 = vst [vmem:[#allocation28_spill] sm:$0xff] %v15203_v41  ;;  %v15228_v41 = vld [vmem:[%s21843_s13 + $0x280] sm:$0xff]  ;;  %21909 = vst [vmem:[#allocation59_spill] sm:$0xff] %v15358_v35  ;;  %v15383_v35 = vld [vmem:[%s21843_s13 + $0x378] sm:$0xff] }
 0x2cc   :  { %21883 = vst [vmem:[#allocation33_spill] sm:$0xff] %v15228_v41  ;;  %v15253_v41 = vld [vmem:[%s21843_s13 + $0x2a8] sm:$0xff]  ;;  %21914 = vst [vmem:[#allocation64_spill] sm:$0xff] %v15383_v35  ;;  %v15408_v35 = vld [vmem:[%s21843_s13 + $0x3a0] sm:$0xff] }
 0x2cd   :  { %21888 = vst [vmem:[#allocation38_spill] sm:$0xff] %v15253_v41  ;;  %v15278_v41 = vld [vmem:[%s21843_s13 + $0x2d0] sm:$0xff]  ;;  %21919 = vst [vmem:[#allocation69_spill] sm:$0xff] %v15408_v35  ;;  %v15433_v35 = vld [vmem:[%s21843_s13 + $0x3c8] sm:$0xff] }
 0x2ce   :  { %21893 = vst [vmem:[#allocation43_spill] sm:$0xff] %v15278_v41  ;;  %v15303_v41 = vld [vmem:[%s21843_s13 + $0x2f8] sm:$0xff]  ;;  %21924 = vst [vmem:[#allocation74_spill] sm:$0xff] %v15433_v35  ;;  %v15458_v35 = vld [vmem:[%s21843_s13 + $0x3f0] sm:$0xff] }
 0x2cf   :  { %21898 = vst [vmem:[#allocation48_spill] sm:$0xff] %v15303_v41  ;;  %v15328_v41 = vld [vmem:[%s21843_s13 + $0x320] sm:$0xff]  ;;  %21928 = vst [vmem:[#allocation78_spill] sm:$0xff] %v15458_v35  ;;  %v15478_v35 = vld [vmem:[%s21843_s13 + $0x410] sm:$0xff] }
 0x2d0   :  { %21903 = vst [vmem:[#allocation53_spill] sm:$0xff] %v15328_v41  ;;  %v15353_v41 = vld [vmem:[%s21843_s13 + $0x348] sm:$0xff] }
 0x2d1   :  { %21908 = vst [vmem:[#allocation58_spill] sm:$0xff] %v15353_v41  ;;  %v15378_v41 = vld [vmem:[%s21843_s13 + $0x370] sm:$0xff] }
 0x2d2   :  { %21913 = vst [vmem:[#allocation63_spill] sm:$0xff] %v15378_v41  ;;  %v15403_v41 = vld [vmem:[%s21843_s13 + $0x398] sm:$0xff] }
 0x2d3   :  { %21918 = vst [vmem:[#allocation68_spill] sm:$0xff] %v15403_v41  ;;  %v15428_v41 = vld [vmem:[%s21843_s13 + $0x3c0] sm:$0xff] }
 0x2d4   :  { %21923 = vst [vmem:[#allocation73_spill] sm:$0xff] %v15428_v41  ;;  %v15453_v41 = vld [vmem:[%s21843_s13 + $0x3e8] sm:$0xff] }
 0x2d5   :  { %21927 = vst [vmem:[#allocation77_spill] sm:$0xff] %v15453_v41  ;;  %v15473_v41 = vld [vmem:[%s21843_s13 + $0x408] sm:$0xff] }
 0x2d6   :  { %579 = vst.msk [vmem:[%s21845_s15] sm:$0xff] %vm578_vm1, %v14828_v43  ;;  %580 = vst.msk [vmem:[%s21845_s15 + $0x8] sm:$0xff] %vm578_vm1, %v14833_v23  ;;  %v21929_v43 = vld [vmem:[#allocation12_spill] sm:$0xff]  ;;  %v21930_v23 = vld [vmem:[#allocation13_spill] sm:$0xff] }
 0x2d7   :  { %581 = vst.msk [vmem:[%s21845_s15 + $0x10] sm:$0xff] %vm578_vm1, %v14838_v48  ;;  %582 = vst.msk [vmem:[%s21845_s15 + $0x18] sm:$0xff] %vm578_vm1, %v14843_v50  ;;  %v21931_v48 = vld [vmem:[#allocation14_spill] sm:$0xff]  ;;  %v21932_v50 = vld [vmem:[#allocation15_spill] sm:$0xff] }
 0x2d8   :  { %583 = vst.msk [vmem:[%s21845_s15 + $0x20] sm:$0xff] %vm578_vm1, %v14848_v52  ;;  %584 = vst.msk [vmem:[%s21845_s15 + $0x28] sm:$0xff] %vm578_vm1, %v14853_v37  ;;  %v21934_v52 = vld [vmem:[#allocation17_spill] sm:$0xff]  ;;  %v21935_v37 = vld [vmem:[#allocation18_spill] sm:$0xff] }
 0x2d9   :  { %585 = vst.msk [vmem:[%s21845_s15 + $0x30] sm:$0xff] %vm578_vm1, %v14858_v53  ;;  %586 = vst.msk [vmem:[%s21845_s15 + $0x38] sm:$0xff] %vm578_vm1, %v14863_v54  ;;  %v21936_v53 = vld [vmem:[#allocation19_spill] sm:$0xff]  ;;  %v21937_v54 = vld [vmem:[#allocation20_spill] sm:$0xff] }
 0x2da   :  { %587 = vst.msk [vmem:[%s21845_s15 + $0x40] sm:$0xff] %vm578_vm1, %v14868_v55  ;;  %588 = vst.msk [vmem:[%s21845_s15 + $0x48] sm:$0xff] %vm578_vm1, %v14873_v47  ;;  %v21938_v55 = vld [vmem:[#allocation21_spill] sm:$0xff]  ;;  %v21939_v47 = vld [vmem:[#allocation22_spill] sm:$0xff] }
 0x2db   :  { %589 = vst.msk [vmem:[%s21845_s15 + $0x50] sm:$0xff] %vm578_vm1, %v14878_v46  ;;  %590 = vst.msk [vmem:[%s21845_s15 + $0x58] sm:$0xff] %vm578_vm1, %v14883_v56  ;;  %v21940_v46 = vld [vmem:[#allocation23_spill] sm:$0xff]  ;;  %v21941_v56 = vld [vmem:[#allocation24_spill] sm:$0xff] }
 0x2dc   :  { %591 = vst.msk [vmem:[%s21845_s15 + $0x60] sm:$0xff] %vm578_vm1, %v14888_v49  ;;  %592 = vst.msk [vmem:[%s21845_s15 + $0x68] sm:$0xff] %vm578_vm1, %v14893_v57  ;;  %v21942_v49 = vld [vmem:[#allocation25_spill] sm:$0xff]  ;;  %v21943_v57 = vld [vmem:[#allocation26_spill] sm:$0xff] }
 0x2dd   :  { %593 = vst.msk [vmem:[%s21845_s15 + $0x70] sm:$0xff] %vm578_vm1, %v14898_v58  ;;  %594 = vst.msk [vmem:[%s21845_s15 + $0x78] sm:$0xff] %vm578_vm1, %v14903_v59  ;;  %v21944_v58 = vld [vmem:[#allocation27_spill] sm:$0xff]  ;;  %v21945_v59 = vld [vmem:[#allocation28_spill] sm:$0xff] }
 0x2de   :  { %595 = vst.msk [vmem:[%s21845_s15 + $0x80] sm:$0xff] %vm578_vm1, %v14908_v60  ;;  %596 = vst.msk [vmem:[%s21845_s15 + $0x88] sm:$0xff] %vm578_vm1, %v14913_v61  ;;  %v21946_v60 = vld [vmem:[#allocation29_spill] sm:$0xff]  ;;  %v21947_v61 = vld [vmem:[#allocation30_spill] sm:$0xff] }
 0x2df   :  { %597 = vst.msk [vmem:[%s21845_s15 + $0x90] sm:$0xff] %vm578_vm1, %v14918_v62  ;;  %598 = vst.msk [vmem:[%s21845_s15 + $0x98] sm:$0xff] %vm578_vm1, %v14923_v63  ;;  %v21948_v62 = vld [vmem:[#allocation31_spill] sm:$0xff]  ;;  %v21949_v63 = vld [vmem:[#allocation32_spill] sm:$0xff] }
 0x2e0   :  { %599 = vst.msk [vmem:[%s21845_s15 + $0xa0] sm:$0xff] %vm578_vm1, %v14928_v0  ;;  %600 = vst.msk [vmem:[%s21845_s15 + $0xa8] sm:$0xff] %vm578_vm1, %v14933_v1  ;;  %v21950_v0 = vld [vmem:[#allocation33_spill] sm:$0xff]  ;;  %v21951_v1 = vld [vmem:[#allocation34_spill] sm:$0xff] }
 0x2e1   :  { %601 = vst.msk [vmem:[%s21845_s15 + $0xb0] sm:$0xff] %vm578_vm1, %v14938_v3  ;;  %602 = vst.msk [vmem:[%s21845_s15 + $0xb8] sm:$0xff] %vm578_vm1, %v14943_v4  ;;  %v21952_v3 = vld [vmem:[#allocation35_spill] sm:$0xff]  ;;  %v21953_v4 = vld [vmem:[#allocation36_spill] sm:$0xff] }
 0x2e2   :  { %603 = vst.msk [vmem:[%s21845_s15 + $0xc0] sm:$0xff] %vm578_vm1, %v14948_v5  ;;  %604 = vst.msk [vmem:[%s21845_s15 + $0xc8] sm:$0xff] %vm578_vm1, %v14953_v6  ;;  %v21954_v5 = vld [vmem:[#allocation37_spill] sm:$0xff]  ;;  %v21955_v6 = vld [vmem:[#allocation38_spill] sm:$0xff] }
 0x2e3   :  { %605 = vst.msk [vmem:[%s21845_s15 + $0xd0] sm:$0xff] %vm578_vm1, %v14958_v2  ;;  %606 = vst.msk [vmem:[%s21845_s15 + $0xd8] sm:$0xff] %vm578_vm1, %v14963_v7  ;;  %v21956_v2 = vld [vmem:[#allocation39_spill] sm:$0xff]  ;;  %v21957_v7 = vld [vmem:[#allocation40_spill] sm:$0xff] }
 0x2e4   :  { %607 = vst.msk [vmem:[%s21845_s15 + $0xe0] sm:$0xff] %vm578_vm1, %v14968_v8  ;;  %608 = vst.msk [vmem:[%s21845_s15 + $0xe8] sm:$0xff] %vm578_vm1, %v14973_v9  ;;  %v21958_v8 = vld [vmem:[#allocation41_spill] sm:$0xff]  ;;  %v21959_v9 = vld [vmem:[#allocation42_spill] sm:$0xff] }
 0x2e5   :  { %609 = vst.msk [vmem:[%s21845_s15 + $0xf0] sm:$0xff] %vm578_vm1, %v14978_v12  ;;  %610 = vst.msk [vmem:[%s21845_s15 + $0xf8] sm:$0xff] %vm578_vm1, %v14983_v13  ;;  %v21960_v12 = vld [vmem:[#allocation43_spill] sm:$0xff]  ;;  %v21961_v13 = vld [vmem:[#allocation44_spill] sm:$0xff] }
 0x2e6   :  { %611 = vst.msk [vmem:[%s21845_s15 + $0x100] sm:$0xff] %vm578_vm1, %v14988_v11  ;;  %612 = vst.msk [vmem:[%s21845_s15 + $0x108] sm:$0xff] %vm578_vm1, %v14993_v36  ;;  %v21962_v11 = vld [vmem:[#allocation45_spill] sm:$0xff]  ;;  %v21963_v36 = vld [vmem:[#allocation46_spill] sm:$0xff] }
 0x2e7   :  { %613 = vst.msk [vmem:[%s21845_s15 + $0x110] sm:$0xff] %vm578_vm1, %v14998_v14  ;;  %614 = vst.msk [vmem:[%s21845_s15 + $0x118] sm:$0xff] %vm578_vm1, %v15003_v16  ;;  %v21964_v14 = vld [vmem:[#allocation47_spill] sm:$0xff]  ;;  %v21965_v16 = vld [vmem:[#allocation48_spill] sm:$0xff] }
 0x2e8   :  { %615 = vst.msk [vmem:[%s21845_s15 + $0x120] sm:$0xff] %vm578_vm1, %v15008_v17  ;;  %616 = vst.msk [vmem:[%s21845_s15 + $0x128] sm:$0xff] %vm578_vm1, %v15013_v19  ;;  %v21966_v17 = vld [vmem:[#allocation49_spill] sm:$0xff]  ;;  %v21967_v19 = vld [vmem:[#allocation50_spill] sm:$0xff] }
 0x2e9   :  { %617 = vst.msk [vmem:[%s21845_s15 + $0x130] sm:$0xff] %vm578_vm1, %v15018_v20  ;;  %618 = vst.msk [vmem:[%s21845_s15 + $0x138] sm:$0xff] %vm578_vm1, %v15023_v21  ;;  %v21968_v20 = vld [vmem:[#allocation51_spill] sm:$0xff]  ;;  %v21969_v21 = vld [vmem:[#allocation52_spill] sm:$0xff] }
 0x2ea   :  { %619 = vst.msk [vmem:[%s21845_s15 + $0x140] sm:$0xff] %vm578_vm1, %v15028_v44  ;;  %620 = vst.msk [vmem:[%s21845_s15 + $0x148] sm:$0xff] %vm578_vm1, %v15033_v22  ;;  %v21970_v44 = vld [vmem:[#allocation53_spill] sm:$0xff]  ;;  %v21971_v22 = vld [vmem:[#allocation54_spill] sm:$0xff] }
 0x2eb   :  { %621 = vst.msk [vmem:[%s21845_s15 + $0x150] sm:$0xff] %vm578_vm1, %v15038_v25  ;;  %622 = vst.msk [vmem:[%s21845_s15 + $0x158] sm:$0xff] %vm578_vm1, %v15043_v26  ;;  %v21972_v25 = vld [vmem:[#allocation55_spill] sm:$0xff]  ;;  %v21973_v26 = vld [vmem:[#allocation56_spill] sm:$0xff] }
 0x2ec   :  { %623 = vst.msk [vmem:[%s21845_s15 + $0x160] sm:$0xff] %vm578_vm1, %v15048_v27  ;;  %624 = vst.msk [vmem:[%s21845_s15 + $0x168] sm:$0xff] %vm578_vm1, %v15053_v28  ;;  %v21974_v27 = vld [vmem:[#allocation57_spill] sm:$0xff]  ;;  %v21975_v28 = vld [vmem:[#allocation58_spill] sm:$0xff] }
 0x2ed   :  { %625 = vst.msk [vmem:[%s21845_s15 + $0x170] sm:$0xff] %vm578_vm1, %v15058_v29  ;;  %626 = vst.msk [vmem:[%s21845_s15 + $0x178] sm:$0xff] %vm578_vm1, %v15063_v30  ;;  %v21976_v29 = vld [vmem:[#allocation59_spill] sm:$0xff]  ;;  %v21977_v30 = vld [vmem:[#allocation60_spill] sm:$0xff] }
 0x2ee   :  { %627 = vst.msk [vmem:[%s21845_s15 + $0x180] sm:$0xff] %vm578_vm1, %v15068_v31  ;;  %628 = vst.msk [vmem:[%s21845_s15 + $0x188] sm:$0xff] %vm578_vm1, %v15073_v32  ;;  %v21978_v31 = vld [vmem:[#allocation61_spill] sm:$0xff]  ;;  %v21979_v32 = vld [vmem:[#allocation62_spill] sm:$0xff] }
 0x2ef   :  { %629 = vst.msk [vmem:[%s21845_s15 + $0x190] sm:$0xff] %vm578_vm1, %v15078_v15  ;;  %630 = vst.msk [vmem:[%s21845_s15 + $0x198] sm:$0xff] %vm578_vm1, %v15083_v33  ;;  %v21980_v15 = vld [vmem:[#allocation63_spill] sm:$0xff]  ;;  %v21981_v33 = vld [vmem:[#allocation64_spill] sm:$0xff] }
 0x2f0   :  { %631 = vst.msk [vmem:[%s21845_s15 + $0x1a0] sm:$0xff] %vm578_vm1, %v15088_v34  ;;  %632 = vst.msk [vmem:[%s21845_s15 + $0x1a8] sm:$0xff] %vm578_vm1, %v15093_v38  ;;  %v21982_v34 = vld [vmem:[#allocation65_spill] sm:$0xff]  ;;  %v21983_v38 = vld [vmem:[#allocation66_spill] sm:$0xff] }
 0x2f1   :  { %633 = vst.msk [vmem:[%s21845_s15 + $0x1b0] sm:$0xff] %vm578_vm1, %v15098_v18  ;;  %634 = vst.msk [vmem:[%s21845_s15 + $0x1b8] sm:$0xff] %vm578_vm1, %v15103_v39  ;;  %v21984_v18 = vld [vmem:[#allocation67_spill] sm:$0xff]  ;;  %v21985_v39 = vld [vmem:[#allocation68_spill] sm:$0xff] }
 0x2f2   :  { %635 = vst.msk [vmem:[%s21845_s15 + $0x1c0] sm:$0xff] %vm578_vm1, %v15108_v40  ;;  %636 = vst.msk [vmem:[%s21845_s15 + $0x1c8] sm:$0xff] %vm578_vm1, %v15113_v24  ;;  %v21986_v40 = vld [vmem:[#allocation69_spill] sm:$0xff]  ;;  %v21987_v24 = vld [vmem:[#allocation70_spill] sm:$0xff] }
 0x2f3   :  { %637 = vst.msk [vmem:[%s21845_s15 + $0x1d0] sm:$0xff] %vm578_vm1, %v15118_v42  ;;  %638 = vst.msk [vmem:[%s21845_s15 + $0x1d8] sm:$0xff] %vm578_vm1, %v21929_v43  ;;  %v21933_v42 = vld [vmem:[#allocation16_spill] sm:$0xff]  ;;  %v21988_v43 = vld [vmem:[#allocation71_spill] sm:$0xff] }
 0x2f4   :  { %639 = vst.msk [vmem:[%s21845_s15 + $0x1e0] sm:$0xff] %vm578_vm1, %v21930_v23  ;;  %640 = vst.msk [vmem:[%s21845_s15 + $0x1e8] sm:$0xff] %vm578_vm1, %v21931_v48  ;;  %v21989_v23 = vld [vmem:[#allocation72_spill] sm:$0xff]  ;;  %v21990_v48 = vld [vmem:[#allocation73_spill] sm:$0xff] }
 0x2f5   :  { %641 = vst.msk [vmem:[%s21845_s15 + $0x1f0] sm:$0xff] %vm578_vm1, %v21932_v50  ;;  %642 = vst.msk [vmem:[%s21845_s15 + $0x1f8] sm:$0xff] %vm578_vm1, %v21933_v42  ;;  %v21991_v50 = vld [vmem:[#allocation74_spill] sm:$0xff]  ;;  %v21992_v42 = vld [vmem:[#allocation75_spill] sm:$0xff] }
 0x2f6   :  { %643 = vst.msk [vmem:[%s21845_s15 + $0x200] sm:$0xff] %vm578_vm1, %v21934_v52  ;;  %644 = vst.msk [vmem:[%s21845_s15 + $0x208] sm:$0xff] %vm578_vm1, %v21935_v37  ;;  %v21993_v52 = vld [vmem:[#allocation76_spill] sm:$0xff]  ;;  %v21994_v37 = vld [vmem:[#allocation77_spill] sm:$0xff] }
 0x2f7   :  { %645 = vst.msk [vmem:[%s21845_s15 + $0x210] sm:$0xff] %vm578_vm1, %v21936_v53  ;;  %646 = vst.msk [vmem:[%s21845_s15 + $0x218] sm:$0xff] %vm578_vm1, %v21937_v54  ;;  %v21995_v53 = vld [vmem:[#allocation78_spill] sm:$0xff] }
 0x2f8   :  { %647 = vst.msk [vmem:[%s21845_s15 + $0x220] sm:$0xff] %vm578_vm1, %v21938_v55  ;;  %648 = vst.msk [vmem:[%s21845_s15 + $0x228] sm:$0xff] %vm578_vm1, %v21939_v47 }
 0x2f9   :  { %649 = vst.msk [vmem:[%s21845_s15 + $0x230] sm:$0xff] %vm578_vm1, %v21940_v46  ;;  %650 = vst.msk [vmem:[%s21845_s15 + $0x238] sm:$0xff] %vm578_vm1, %v21941_v56 }
 0x2fa   :  { %651 = vst.msk [vmem:[%s21845_s15 + $0x240] sm:$0xff] %vm578_vm1, %v21942_v49  ;;  %652 = vst.msk [vmem:[%s21845_s15 + $0x248] sm:$0xff] %vm578_vm1, %v21943_v57 }
 0x2fb   :  { %653 = vst.msk [vmem:[%s21845_s15 + $0x250] sm:$0xff] %vm578_vm1, %v21944_v58  ;;  %654 = vst.msk [vmem:[%s21845_s15 + $0x258] sm:$0xff] %vm578_vm1, %v21945_v59 }
 0x2fc   :  { %655 = vst.msk [vmem:[%s21845_s15 + $0x260] sm:$0xff] %vm578_vm1, %v21946_v60  ;;  %656 = vst.msk [vmem:[%s21845_s15 + $0x268] sm:$0xff] %vm578_vm1, %v21947_v61 }
 0x2fd   :  { %657 = vst.msk [vmem:[%s21845_s15 + $0x270] sm:$0xff] %vm578_vm1, %v21948_v62  ;;  %658 = vst.msk [vmem:[%s21845_s15 + $0x278] sm:$0xff] %vm578_vm1, %v21949_v63 }
 0x2fe   :  { %659 = vst.msk [vmem:[%s21845_s15 + $0x280] sm:$0xff] %vm578_vm1, %v21950_v0  ;;  %660 = vst.msk [vmem:[%s21845_s15 + $0x288] sm:$0xff] %vm578_vm1, %v21951_v1 }
 0x2ff   :  { %661 = vst.msk [vmem:[%s21845_s15 + $0x290] sm:$0xff] %vm578_vm1, %v21952_v3  ;;  %662 = vst.msk [vmem:[%s21845_s15 + $0x298] sm:$0xff] %vm578_vm1, %v21953_v4 }
 0x300   :  { %663 = vst.msk [vmem:[%s21845_s15 + $0x2a0] sm:$0xff] %vm578_vm1, %v21954_v5  ;;  %664 = vst.msk [vmem:[%s21845_s15 + $0x2a8] sm:$0xff] %vm578_vm1, %v21955_v6 }
 0x301   :  { %665 = vst.msk [vmem:[%s21845_s15 + $0x2b0] sm:$0xff] %vm578_vm1, %v21956_v2  ;;  %666 = vst.msk [vmem:[%s21845_s15 + $0x2b8] sm:$0xff] %vm578_vm1, %v21957_v7 }
 0x302   :  { %667 = vst.msk [vmem:[%s21845_s15 + $0x2c0] sm:$0xff] %vm578_vm1, %v21958_v8  ;;  %668 = vst.msk [vmem:[%s21845_s15 + $0x2c8] sm:$0xff] %vm578_vm1, %v21959_v9 }
 0x303   :  { %669 = vst.msk [vmem:[%s21845_s15 + $0x2d0] sm:$0xff] %vm578_vm1, %v21960_v12  ;;  %670 = vst.msk [vmem:[%s21845_s15 + $0x2d8] sm:$0xff] %vm578_vm1, %v21961_v13 }
 0x304   :  { %671 = vst.msk [vmem:[%s21845_s15 + $0x2e0] sm:$0xff] %vm578_vm1, %v21962_v11  ;;  %672 = vst.msk [vmem:[%s21845_s15 + $0x2e8] sm:$0xff] %vm578_vm1, %v21963_v36 }
 0x305   :  { %673 = vst.msk [vmem:[%s21845_s15 + $0x2f0] sm:$0xff] %vm578_vm1, %v21964_v14  ;;  %674 = vst.msk [vmem:[%s21845_s15 + $0x2f8] sm:$0xff] %vm578_vm1, %v21965_v16 }
 0x306   :  { %675 = vst.msk [vmem:[%s21845_s15 + $0x300] sm:$0xff] %vm578_vm1, %v21966_v17  ;;  %676 = vst.msk [vmem:[%s21845_s15 + $0x308] sm:$0xff] %vm578_vm1, %v21967_v19 }
 0x307   :  { %677 = vst.msk [vmem:[%s21845_s15 + $0x310] sm:$0xff] %vm578_vm1, %v21968_v20  ;;  %678 = vst.msk [vmem:[%s21845_s15 + $0x318] sm:$0xff] %vm578_vm1, %v21969_v21 }
 0x308   :  { %679 = vst.msk [vmem:[%s21845_s15 + $0x320] sm:$0xff] %vm578_vm1, %v21970_v44  ;;  %680 = vst.msk [vmem:[%s21845_s15 + $0x328] sm:$0xff] %vm578_vm1, %v21971_v22 }
 0x309   :  { %681 = vst.msk [vmem:[%s21845_s15 + $0x330] sm:$0xff] %vm578_vm1, %v21972_v25  ;;  %682 = vst.msk [vmem:[%s21845_s15 + $0x338] sm:$0xff] %vm578_vm1, %v21973_v26 }
 0x30a   :  { %683 = vst.msk [vmem:[%s21845_s15 + $0x340] sm:$0xff] %vm578_vm1, %v21974_v27  ;;  %684 = vst.msk [vmem:[%s21845_s15 + $0x348] sm:$0xff] %vm578_vm1, %v21975_v28 }
 0x30b   :  { %685 = vst.msk [vmem:[%s21845_s15 + $0x350] sm:$0xff] %vm578_vm1, %v21976_v29  ;;  %686 = vst.msk [vmem:[%s21845_s15 + $0x358] sm:$0xff] %vm578_vm1, %v21977_v30 }
 0x30c   :  { %687 = vst.msk [vmem:[%s21845_s15 + $0x360] sm:$0xff] %vm578_vm1, %v21978_v31  ;;  %688 = vst.msk [vmem:[%s21845_s15 + $0x368] sm:$0xff] %vm578_vm1, %v21979_v32 }
 0x30d   :  { %689 = vst.msk [vmem:[%s21845_s15 + $0x370] sm:$0xff] %vm578_vm1, %v21980_v15  ;;  %690 = vst.msk [vmem:[%s21845_s15 + $0x378] sm:$0xff] %vm578_vm1, %v21981_v33 }
 0x30e   :  { %691 = vst.msk [vmem:[%s21845_s15 + $0x380] sm:$0xff] %vm578_vm1, %v21982_v34  ;;  %692 = vst.msk [vmem:[%s21845_s15 + $0x388] sm:$0xff] %vm578_vm1, %v21983_v38 }
 0x30f   :  { %693 = vst.msk [vmem:[%s21845_s15 + $0x390] sm:$0xff] %vm578_vm1, %v21984_v18  ;;  %694 = vst.msk [vmem:[%s21845_s15 + $0x398] sm:$0xff] %vm578_vm1, %v21985_v39 }
 0x310   :  { %695 = vst.msk [vmem:[%s21845_s15 + $0x3a0] sm:$0xff] %vm578_vm1, %v21986_v40  ;;  %696 = vst.msk [vmem:[%s21845_s15 + $0x3a8] sm:$0xff] %vm578_vm1, %v21987_v24 }
 0x311   :  { %697 = vst.msk [vmem:[%s21845_s15 + $0x3b0] sm:$0xff] %vm578_vm1, %v21988_v43  ;;  %698 = vst.msk [vmem:[%s21845_s15 + $0x3b8] sm:$0xff] %vm578_vm1, %v21989_v23 }
 0x312   :  { %699 = vst.msk [vmem:[%s21845_s15 + $0x3c0] sm:$0xff] %vm578_vm1, %v21990_v48  ;;  %700 = vst.msk [vmem:[%s21845_s15 + $0x3c8] sm:$0xff] %vm578_vm1, %v21991_v50 }
 0x313   :  { %701 = vst.msk [vmem:[%s21845_s15 + $0x3d0] sm:$0xff] %vm578_vm1, %v21992_v42  ;;  %702 = vst.msk [vmem:[%s21845_s15 + $0x3d8] sm:$0xff] %vm578_vm1, %v15443_v10 }
 0x314   :  { %703 = vst.msk [vmem:[%s21845_s15 + $0x3e0] sm:$0xff] %vm578_vm1, %v21993_v52  ;;  %704 = vst.msk [vmem:[%s21845_s15 + $0x3e8] sm:$0xff] %vm578_vm1, %v21994_v37 }
 0x315   :  { %705 = vst.msk [vmem:[%s21845_s15 + $0x3f0] sm:$0xff] %vm578_vm1, %v21995_v53  ;;  %706 = vst.msk [vmem:[%s21845_s15 + $0x3f8] sm:$0xff] %vm578_vm1, %v15463_v45 }
 0x31c   :  { %v197_v10 = vld [vmem:[%s21843_s13 + $0x418] sm:$0xff]  ;;  %v198_v54 = vld [vmem:[%s21843_s13 + $0x420] sm:$0xff]  ;;  %v199_v55 = vld [vmem:[%s21843_s13 + $0x428] sm:$0xff] }
 0x31d   :  { %707 = vst.msk [vmem:[%s21845_s15 + $0x400] sm:$0xff] %vm578_vm1, %v15468_v51  ;;  %708 = vst.msk [vmem:[%s21845_s15 + $0x408] sm:$0xff] %vm578_vm1, %v15473_v41 }
 0x31e   :  { %709 = vst.msk [vmem:[%s21845_s15 + $0x410] sm:$0xff] %vm578_vm1, %v15478_v35 }
 0x325   :  { %v200_v45 = vld [vmem:[%s21843_s13 + $0x430] sm:$0xff]  ;;  %v201_v51 = vld [vmem:[%s21843_s13 + $0x438] sm:$0xff]  ;;  %v202_v47 = vld [vmem:[%s21843_s13 + $0x440] sm:$0xff] }
 0x326   :  { %710 = vst.msk [vmem:[%s21845_s15 + $0x418] sm:$0xff] %vm578_vm1, %v197_v10  ;;  %711 = vst.msk [vmem:[%s21845_s15 + $0x420] sm:$0xff] %vm578_vm1, %v198_v54 }
 0x327   :  { %712 = vst.msk [vmem:[%s21845_s15 + $0x428] sm:$0xff] %vm578_vm1, %v199_v55 }
 0x32e   :  { %v203_v35 = vld [vmem:[%s21843_s13 + $0x448] sm:$0xff]  ;;  %v204_v41 = vld [vmem:[%s21843_s13 + $0x450] sm:$0xff]  ;;  %v205_v46 = vld [vmem:[%s21843_s13 + $0x458] sm:$0xff] }
 0x32f   :  { %713 = vst.msk [vmem:[%s21845_s15 + $0x430] sm:$0xff] %vm578_vm1, %v200_v45  ;;  %714 = vst.msk [vmem:[%s21845_s15 + $0x438] sm:$0xff] %vm578_vm1, %v201_v51 }
 0x330   :  { %715 = vst.msk [vmem:[%s21845_s15 + $0x440] sm:$0xff] %vm578_vm1, %v202_v47 }
 0x337   :  { %v206_v56 = vld [vmem:[%s21843_s13 + $0x460] sm:$0xff]  ;;  %v207_v49 = vld [vmem:[%s21843_s13 + $0x468] sm:$0xff]  ;;  %v208_v57 = vld [vmem:[%s21843_s13 + $0x470] sm:$0xff] }
 0x338   :  { %716 = vst.msk [vmem:[%s21845_s15 + $0x448] sm:$0xff] %vm578_vm1, %v203_v35  ;;  %717 = vst.msk [vmem:[%s21845_s15 + $0x450] sm:$0xff] %vm578_vm1, %v204_v41 }
 0x339   :  { %718 = vst.msk [vmem:[%s21845_s15 + $0x458] sm:$0xff] %vm578_vm1, %v205_v46 }
 0x340   :  { %v209_v58 = vld [vmem:[%s21843_s13 + $0x478] sm:$0xff]  ;;  %v210_v59 = vld [vmem:[%s21843_s13 + $0x480] sm:$0xff]  ;;  %v211_v60 = vld [vmem:[%s21843_s13 + $0x488] sm:$0xff] }
 0x341   :  { %719 = vst.msk [vmem:[%s21845_s15 + $0x460] sm:$0xff] %vm578_vm1, %v206_v56  ;;  %720 = vst.msk [vmem:[%s21845_s15 + $0x468] sm:$0xff] %vm578_vm1, %v207_v49 }
 0x342   :  { %721 = vst.msk [vmem:[%s21845_s15 + $0x470] sm:$0xff] %vm578_vm1, %v208_v57 }
 0x349   :  { %v212_v61 = vld [vmem:[%s21843_s13 + $0x490] sm:$0xff]  ;;  %v213_v62 = vld [vmem:[%s21843_s13 + $0x498] sm:$0xff]  ;;  %v214_v63 = vld [vmem:[%s21843_s13 + $0x4a0] sm:$0xff] }
 0x34a   :  { %722 = vst.msk [vmem:[%s21845_s15 + $0x478] sm:$0xff] %vm578_vm1, %v209_v58  ;;  %723 = vst.msk [vmem:[%s21845_s15 + $0x480] sm:$0xff] %vm578_vm1, %v210_v59 }
 0x34b   :  { %724 = vst.msk [vmem:[%s21845_s15 + $0x488] sm:$0xff] %vm578_vm1, %v211_v60 }
 0x352   :  { %v215_v0 = vld [vmem:[%s21843_s13 + $0x4a8] sm:$0xff]  ;;  %v216_v1 = vld [vmem:[%s21843_s13 + $0x4b0] sm:$0xff]  ;;  %v217_v3 = vld [vmem:[%s21843_s13 + $0x4b8] sm:$0xff] }
 0x353   :  { %725 = vst.msk [vmem:[%s21845_s15 + $0x490] sm:$0xff] %vm578_vm1, %v212_v61  ;;  %726 = vst.msk [vmem:[%s21845_s15 + $0x498] sm:$0xff] %vm578_vm1, %v213_v62 }
 0x354   :  { %727 = vst.msk [vmem:[%s21845_s15 + $0x4a0] sm:$0xff] %vm578_vm1, %v214_v63 }
 0x35b   :  { %v218_v4 = vld [vmem:[%s21843_s13 + $0x4c0] sm:$0xff]  ;;  %v219_v5 = vld [vmem:[%s21843_s13 + $0x4c8] sm:$0xff]  ;;  %v220_v6 = vld [vmem:[%s21843_s13 + $0x4d0] sm:$0xff] }
 0x35c   :  { %728 = vst.msk [vmem:[%s21845_s15 + $0x4a8] sm:$0xff] %vm578_vm1, %v215_v0  ;;  %729 = vst.msk [vmem:[%s21845_s15 + $0x4b0] sm:$0xff] %vm578_vm1, %v216_v1 }
 0x35d   :  { %730 = vst.msk [vmem:[%s21845_s15 + $0x4b8] sm:$0xff] %vm578_vm1, %v217_v3 }
 0x364   :  { %v221_v2 = vld [vmem:[%s21843_s13 + $0x4d8] sm:$0xff]  ;;  %v222_v7 = vld [vmem:[%s21843_s13 + $0x4e0] sm:$0xff]  ;;  %v223_v8 = vld [vmem:[%s21843_s13 + $0x4e8] sm:$0xff] }
 0x365   :  { %731 = vst.msk [vmem:[%s21845_s15 + $0x4c0] sm:$0xff] %vm578_vm1, %v218_v4  ;;  %732 = vst.msk [vmem:[%s21845_s15 + $0x4c8] sm:$0xff] %vm578_vm1, %v219_v5 }
 0x366   :  { %733 = vst.msk [vmem:[%s21845_s15 + $0x4d0] sm:$0xff] %vm578_vm1, %v220_v6 }
 0x36d   :  { %v224_v9 = vld [vmem:[%s21843_s13 + $0x4f0] sm:$0xff]  ;;  %v225_v12 = vld [vmem:[%s21843_s13 + $0x4f8] sm:$0xff]  ;;  %v226_v13 = vld [vmem:[%s21843_s13 + $0x500] sm:$0xff] }
 0x36e   :  { %734 = vst.msk [vmem:[%s21845_s15 + $0x4d8] sm:$0xff] %vm578_vm1, %v221_v2  ;;  %735 = vst.msk [vmem:[%s21845_s15 + $0x4e0] sm:$0xff] %vm578_vm1, %v222_v7 }
 0x36f   :  { %736 = vst.msk [vmem:[%s21845_s15 + $0x4e8] sm:$0xff] %vm578_vm1, %v223_v8 }
 0x376   :  { %v227_v11 = vld [vmem:[%s21843_s13 + $0x508] sm:$0xff]  ;;  %v228_v36 = vld [vmem:[%s21843_s13 + $0x510] sm:$0xff]  ;;  %v229_v14 = vld [vmem:[%s21843_s13 + $0x518] sm:$0xff] }
 0x377   :  { %737 = vst.msk [vmem:[%s21845_s15 + $0x4f0] sm:$0xff] %vm578_vm1, %v224_v9  ;;  %738 = vst.msk [vmem:[%s21845_s15 + $0x4f8] sm:$0xff] %vm578_vm1, %v225_v12 }
 0x378   :  { %739 = vst.msk [vmem:[%s21845_s15 + $0x500] sm:$0xff] %vm578_vm1, %v226_v13 }
 0x37f   :  { %v230_v16 = vld [vmem:[%s21843_s13 + $0x520] sm:$0xff]  ;;  %v231_v17 = vld [vmem:[%s21843_s13 + $0x528] sm:$0xff]  ;;  %v232_v19 = vld [vmem:[%s21843_s13 + $0x530] sm:$0xff] }
 0x380   :  { %740 = vst.msk [vmem:[%s21845_s15 + $0x508] sm:$0xff] %vm578_vm1, %v227_v11  ;;  %741 = vst.msk [vmem:[%s21845_s15 + $0x510] sm:$0xff] %vm578_vm1, %v228_v36 }
 0x381   :  { %742 = vst.msk [vmem:[%s21845_s15 + $0x518] sm:$0xff] %vm578_vm1, %v229_v14 }
 0x388   :  { %v233_v20 = vld [vmem:[%s21843_s13 + $0x538] sm:$0xff]  ;;  %v234_v21 = vld [vmem:[%s21843_s13 + $0x540] sm:$0xff]  ;;  %v235_v44 = vld [vmem:[%s21843_s13 + $0x548] sm:$0xff] }
 0x389   :  { %743 = vst.msk [vmem:[%s21845_s15 + $0x520] sm:$0xff] %vm578_vm1, %v230_v16  ;;  %744 = vst.msk [vmem:[%s21845_s15 + $0x528] sm:$0xff] %vm578_vm1, %v231_v17 }
 0x38a   :  { %745 = vst.msk [vmem:[%s21845_s15 + $0x530] sm:$0xff] %vm578_vm1, %v232_v19 }
 0x391   :  { %v236_v22 = vld [vmem:[%s21843_s13 + $0x550] sm:$0xff]  ;;  %v237_v25 = vld [vmem:[%s21843_s13 + $0x558] sm:$0xff]  ;;  %v238_v26 = vld [vmem:[%s21843_s13 + $0x560] sm:$0xff] }
 0x392   :  { %746 = vst.msk [vmem:[%s21845_s15 + $0x538] sm:$0xff] %vm578_vm1, %v233_v20  ;;  %747 = vst.msk [vmem:[%s21845_s15 + $0x540] sm:$0xff] %vm578_vm1, %v234_v21 }
 0x393   :  { %748 = vst.msk [vmem:[%s21845_s15 + $0x548] sm:$0xff] %vm578_vm1, %v235_v44 }
 0x39a   :  { %v239_v27 = vld [vmem:[%s21843_s13 + $0x568] sm:$0xff]  ;;  %v240_v28 = vld [vmem:[%s21843_s13 + $0x570] sm:$0xff]  ;;  %v241_v29 = vld [vmem:[%s21843_s13 + $0x578] sm:$0xff] }
 0x39b   :  { %749 = vst.msk [vmem:[%s21845_s15 + $0x550] sm:$0xff] %vm578_vm1, %v236_v22  ;;  %750 = vst.msk [vmem:[%s21845_s15 + $0x558] sm:$0xff] %vm578_vm1, %v237_v25 }
 0x39c   :  { %751 = vst.msk [vmem:[%s21845_s15 + $0x560] sm:$0xff] %vm578_vm1, %v238_v26 }
 0x3a3   :  { %v242_v30 = vld [vmem:[%s21843_s13 + $0x580] sm:$0xff]  ;;  %v243_v31 = vld [vmem:[%s21843_s13 + $0x588] sm:$0xff]  ;;  %v244_v32 = vld [vmem:[%s21843_s13 + $0x590] sm:$0xff] }
 0x3a4   :  { %752 = vst.msk [vmem:[%s21845_s15 + $0x568] sm:$0xff] %vm578_vm1, %v239_v27  ;;  %753 = vst.msk [vmem:[%s21845_s15 + $0x570] sm:$0xff] %vm578_vm1, %v240_v28 }
 0x3a5   :  { %754 = vst.msk [vmem:[%s21845_s15 + $0x578] sm:$0xff] %vm578_vm1, %v241_v29 }
 0x3ac   :  { %v245_v15 = vld [vmem:[%s21843_s13 + $0x598] sm:$0xff]  ;;  %v246_v33 = vld [vmem:[%s21843_s13 + $0x5a0] sm:$0xff]  ;;  %v247_v34 = vld [vmem:[%s21843_s13 + $0x5a8] sm:$0xff] }
 0x3ad   :  { %755 = vst.msk [vmem:[%s21845_s15 + $0x580] sm:$0xff] %vm578_vm1, %v242_v30  ;;  %756 = vst.msk [vmem:[%s21845_s15 + $0x588] sm:$0xff] %vm578_vm1, %v243_v31 }
 0x3ae   :  { %757 = vst.msk [vmem:[%s21845_s15 + $0x590] sm:$0xff] %vm578_vm1, %v244_v32 }
 0x3b5   :  { %v248_v38 = vld [vmem:[%s21843_s13 + $0x5b0] sm:$0xff]  ;;  %v249_v18 = vld [vmem:[%s21843_s13 + $0x5b8] sm:$0xff]  ;;  %v250_v39 = vld [vmem:[%s21843_s13 + $0x5c0] sm:$0xff] }
 0x3b6   :  { %758 = vst.msk [vmem:[%s21845_s15 + $0x598] sm:$0xff] %vm578_vm1, %v245_v15  ;;  %759 = vst.msk [vmem:[%s21845_s15 + $0x5a0] sm:$0xff] %vm578_vm1, %v246_v33 }
 0x3b7   :  { %760 = vst.msk [vmem:[%s21845_s15 + $0x5a8] sm:$0xff] %vm578_vm1, %v247_v34 }
 0x3be   :  { %v251_v40 = vld [vmem:[%s21843_s13 + $0x5c8] sm:$0xff]  ;;  %v252_v24 = vld [vmem:[%s21843_s13 + $0x5d0] sm:$0xff]  ;;  %v253_v43 = vld [vmem:[%s21843_s13 + $0x5d8] sm:$0xff] }
 0x3bf   :  { %761 = vst.msk [vmem:[%s21845_s15 + $0x5b0] sm:$0xff] %vm578_vm1, %v248_v38  ;;  %762 = vst.msk [vmem:[%s21845_s15 + $0x5b8] sm:$0xff] %vm578_vm1, %v249_v18 }
 0x3c0   :  { %763 = vst.msk [vmem:[%s21845_s15 + $0x5c0] sm:$0xff] %vm578_vm1, %v250_v39 }
 0x3c7   :  { %v254_v23 = vld [vmem:[%s21843_s13 + $0x5e0] sm:$0xff]  ;;  %v255_v48 = vld [vmem:[%s21843_s13 + $0x5e8] sm:$0xff]  ;;  %v256_v50 = vld [vmem:[%s21843_s13 + $0x5f0] sm:$0xff] }
 0x3c8   :  { %764 = vst.msk [vmem:[%s21845_s15 + $0x5c8] sm:$0xff] %vm578_vm1, %v251_v40  ;;  %765 = vst.msk [vmem:[%s21845_s15 + $0x5d0] sm:$0xff] %vm578_vm1, %v252_v24 }
 0x3c9   :  { %766 = vst.msk [vmem:[%s21845_s15 + $0x5d8] sm:$0xff] %vm578_vm1, %v253_v43 }
 0x3d0   :  { %v257_v42 = vld [vmem:[%s21843_s13 + $0x5f8] sm:$0xff]  ;;  %v258_v52 = vld [vmem:[%s21843_s13 + $0x600] sm:$0xff]  ;;  %v259_v37 = vld [vmem:[%s21843_s13 + $0x608] sm:$0xff] }
 0x3d1   :  { %767 = vst.msk [vmem:[%s21845_s15 + $0x5e0] sm:$0xff] %vm578_vm1, %v254_v23  ;;  %768 = vst.msk [vmem:[%s21845_s15 + $0x5e8] sm:$0xff] %vm578_vm1, %v255_v48 }
 0x3d2   :  { %769 = vst.msk [vmem:[%s21845_s15 + $0x5f0] sm:$0xff] %vm578_vm1, %v256_v50 }
 0x3d9   :  { %v260_v53 = vld [vmem:[%s21843_s13 + $0x610] sm:$0xff]  ;;  %v261_v10 = vld [vmem:[%s21843_s13 + $0x618] sm:$0xff]  ;;  %v262_v54 = vld [vmem:[%s21843_s13 + $0x620] sm:$0xff] }
 0x3da   :  { %770 = vst.msk [vmem:[%s21845_s15 + $0x5f8] sm:$0xff] %vm578_vm1, %v257_v42  ;;  %771 = vst.msk [vmem:[%s21845_s15 + $0x600] sm:$0xff] %vm578_vm1, %v258_v52 }
 0x3db   :  { %772 = vst.msk [vmem:[%s21845_s15 + $0x608] sm:$0xff] %vm578_vm1, %v259_v37 }
 0x3e2   :  { %v263_v55 = vld [vmem:[%s21843_s13 + $0x628] sm:$0xff]  ;;  %v264_v45 = vld [vmem:[%s21843_s13 + $0x630] sm:$0xff]  ;;  %v265_v51 = vld [vmem:[%s21843_s13 + $0x638] sm:$0xff] }
 0x3e3   :  { %773 = vst.msk [vmem:[%s21845_s15 + $0x610] sm:$0xff] %vm578_vm1, %v260_v53  ;;  %774 = vst.msk [vmem:[%s21845_s15 + $0x618] sm:$0xff] %vm578_vm1, %v261_v10 }
 0x3e4   :  { %775 = vst.msk [vmem:[%s21845_s15 + $0x620] sm:$0xff] %vm578_vm1, %v262_v54 }
 0x3eb   :  { %v266_v47 = vld [vmem:[%s21843_s13 + $0x640] sm:$0xff]  ;;  %v267_v35 = vld [vmem:[%s21843_s13 + $0x648] sm:$0xff]  ;;  %v268_v41 = vld [vmem:[%s21843_s13 + $0x650] sm:$0xff] }
 0x3ec   :  { %776 = vst.msk [vmem:[%s21845_s15 + $0x628] sm:$0xff] %vm578_vm1, %v263_v55  ;;  %777 = vst.msk [vmem:[%s21845_s15 + $0x630] sm:$0xff] %vm578_vm1, %v264_v45 }
 0x3ed   :  { %778 = vst.msk [vmem:[%s21845_s15 + $0x638] sm:$0xff] %vm578_vm1, %v265_v51 }
 0x3f4   :  { %v269_v46 = vld [vmem:[%s21843_s13 + $0x658] sm:$0xff]  ;;  %v270_v56 = vld [vmem:[%s21843_s13 + $0x660] sm:$0xff]  ;;  %v271_v49 = vld [vmem:[%s21843_s13 + $0x668] sm:$0xff] }
 0x3f5   :  { %779 = vst.msk [vmem:[%s21845_s15 + $0x640] sm:$0xff] %vm578_vm1, %v266_v47  ;;  %780 = vst.msk [vmem:[%s21845_s15 + $0x648] sm:$0xff] %vm578_vm1, %v267_v35 }
 0x3f6   :  { %781 = vst.msk [vmem:[%s21845_s15 + $0x650] sm:$0xff] %vm578_vm1, %v268_v41 }
 0x3fd   :  { %v272_v57 = vld [vmem:[%s21843_s13 + $0x670] sm:$0xff]  ;;  %v273_v58 = vld [vmem:[%s21843_s13 + $0x678] sm:$0xff]  ;;  %v274_v59 = vld [vmem:[%s21843_s13 + $0x680] sm:$0xff] }
 0x3fe   :  { %782 = vst.msk [vmem:[%s21845_s15 + $0x658] sm:$0xff] %vm578_vm1, %v269_v46  ;;  %783 = vst.msk [vmem:[%s21845_s15 + $0x660] sm:$0xff] %vm578_vm1, %v270_v56 }
 0x3ff   :  { %784 = vst.msk [vmem:[%s21845_s15 + $0x668] sm:$0xff] %vm578_vm1, %v271_v49 }
 0x406   :  { %v275_v60 = vld [vmem:[%s21843_s13 + $0x688] sm:$0xff]  ;;  %v276_v61 = vld [vmem:[%s21843_s13 + $0x690] sm:$0xff]  ;;  %v277_v62 = vld [vmem:[%s21843_s13 + $0x698] sm:$0xff] }
 0x407   :  { %785 = vst.msk [vmem:[%s21845_s15 + $0x670] sm:$0xff] %vm578_vm1, %v272_v57  ;;  %786 = vst.msk [vmem:[%s21845_s15 + $0x678] sm:$0xff] %vm578_vm1, %v273_v58 }
 0x408   :  { %787 = vst.msk [vmem:[%s21845_s15 + $0x680] sm:$0xff] %vm578_vm1, %v274_v59 }
 0x40f   :  { %v278_v63 = vld [vmem:[%s21843_s13 + $0x6a0] sm:$0xff]  ;;  %v279_v0 = vld [vmem:[%s21843_s13 + $0x6a8] sm:$0xff]  ;;  %v280_v1 = vld [vmem:[%s21843_s13 + $0x6b0] sm:$0xff] }
 0x410   :  { %788 = vst.msk [vmem:[%s21845_s15 + $0x688] sm:$0xff] %vm578_vm1, %v275_v60  ;;  %789 = vst.msk [vmem:[%s21845_s15 + $0x690] sm:$0xff] %vm578_vm1, %v276_v61 }
 0x411   :  { %790 = vst.msk [vmem:[%s21845_s15 + $0x698] sm:$0xff] %vm578_vm1, %v277_v62 }
 0x418   :  { %v281_v3 = vld [vmem:[%s21843_s13 + $0x6b8] sm:$0xff]  ;;  %v282_v4 = vld [vmem:[%s21843_s13 + $0x6c0] sm:$0xff]  ;;  %v283_v5 = vld [vmem:[%s21843_s13 + $0x6c8] sm:$0xff] }
 0x419   :  { %791 = vst.msk [vmem:[%s21845_s15 + $0x6a0] sm:$0xff] %vm578_vm1, %v278_v63  ;;  %792 = vst.msk [vmem:[%s21845_s15 + $0x6a8] sm:$0xff] %vm578_vm1, %v279_v0 }
 0x41a   :  { %793 = vst.msk [vmem:[%s21845_s15 + $0x6b0] sm:$0xff] %vm578_vm1, %v280_v1 }
 0x421   :  { %v284_v6 = vld [vmem:[%s21843_s13 + $0x6d0] sm:$0xff]  ;;  %v285_v2 = vld [vmem:[%s21843_s13 + $0x6d8] sm:$0xff]  ;;  %v286_v7 = vld [vmem:[%s21843_s13 + $0x6e0] sm:$0xff] }
 0x422   :  { %794 = vst.msk [vmem:[%s21845_s15 + $0x6b8] sm:$0xff] %vm578_vm1, %v281_v3  ;;  %795 = vst.msk [vmem:[%s21845_s15 + $0x6c0] sm:$0xff] %vm578_vm1, %v282_v4 }
 0x423   :  { %796 = vst.msk [vmem:[%s21845_s15 + $0x6c8] sm:$0xff] %vm578_vm1, %v283_v5 }
 0x42a   :  { %v287_v8 = vld [vmem:[%s21843_s13 + $0x6e8] sm:$0xff]  ;;  %v288_v9 = vld [vmem:[%s21843_s13 + $0x6f0] sm:$0xff]  ;;  %v289_v12 = vld [vmem:[%s21843_s13 + $0x6f8] sm:$0xff] }
 0x42b   :  { %797 = vst.msk [vmem:[%s21845_s15 + $0x6d0] sm:$0xff] %vm578_vm1, %v284_v6  ;;  %798 = vst.msk [vmem:[%s21845_s15 + $0x6d8] sm:$0xff] %vm578_vm1, %v285_v2 }
 0x42c   :  { %799 = vst.msk [vmem:[%s21845_s15 + $0x6e0] sm:$0xff] %vm578_vm1, %v286_v7 }
 0x433   :  { %v290_v13 = vld [vmem:[%s21843_s13 + $0x700] sm:$0xff]  ;;  %v291_v11 = vld [vmem:[%s21843_s13 + $0x708] sm:$0xff]  ;;  %v292_v36 = vld [vmem:[%s21843_s13 + $0x710] sm:$0xff] }
 0x434   :  { %800 = vst.msk [vmem:[%s21845_s15 + $0x6e8] sm:$0xff] %vm578_vm1, %v287_v8  ;;  %801 = vst.msk [vmem:[%s21845_s15 + $0x6f0] sm:$0xff] %vm578_vm1, %v288_v9 }
 0x435   :  { %802 = vst.msk [vmem:[%s21845_s15 + $0x6f8] sm:$0xff] %vm578_vm1, %v289_v12 }
 0x43c   :  { %v293_v14 = vld [vmem:[%s21843_s13 + $0x718] sm:$0xff]  ;;  %v294_v16 = vld [vmem:[%s21843_s13 + $0x720] sm:$0xff]  ;;  %v295_v17 = vld [vmem:[%s21843_s13 + $0x728] sm:$0xff] }
 0x43d   :  { %803 = vst.msk [vmem:[%s21845_s15 + $0x700] sm:$0xff] %vm578_vm1, %v290_v13  ;;  %804 = vst.msk [vmem:[%s21845_s15 + $0x708] sm:$0xff] %vm578_vm1, %v291_v11 }
 0x43e   :  { %805 = vst.msk [vmem:[%s21845_s15 + $0x710] sm:$0xff] %vm578_vm1, %v292_v36 }
 0x445   :  { %v296_v19 = vld [vmem:[%s21843_s13 + $0x730] sm:$0xff]  ;;  %v297_v20 = vld [vmem:[%s21843_s13 + $0x738] sm:$0xff]  ;;  %v298_v21 = vld [vmem:[%s21843_s13 + $0x740] sm:$0xff] }
 0x446   :  { %806 = vst.msk [vmem:[%s21845_s15 + $0x718] sm:$0xff] %vm578_vm1, %v293_v14  ;;  %807 = vst.msk [vmem:[%s21845_s15 + $0x720] sm:$0xff] %vm578_vm1, %v294_v16 }
 0x447   :  { %808 = vst.msk [vmem:[%s21845_s15 + $0x728] sm:$0xff] %vm578_vm1, %v295_v17 }
 0x44e   :  { %v299_v44 = vld [vmem:[%s21843_s13 + $0x748] sm:$0xff]  ;;  %v300_v22 = vld [vmem:[%s21843_s13 + $0x750] sm:$0xff]  ;;  %v301_v25 = vld [vmem:[%s21843_s13 + $0x758] sm:$0xff] }
 0x44f   :  { %809 = vst.msk [vmem:[%s21845_s15 + $0x730] sm:$0xff] %vm578_vm1, %v296_v19  ;;  %810 = vst.msk [vmem:[%s21845_s15 + $0x738] sm:$0xff] %vm578_vm1, %v297_v20 }
 0x450   :  { %811 = vst.msk [vmem:[%s21845_s15 + $0x740] sm:$0xff] %vm578_vm1, %v298_v21 }
 0x457   :  { %v302_v26 = vld [vmem:[%s21843_s13 + $0x760] sm:$0xff]  ;;  %v303_v27 = vld [vmem:[%s21843_s13 + $0x768] sm:$0xff]  ;;  %v304_v28 = vld [vmem:[%s21843_s13 + $0x770] sm:$0xff] }
 0x458   :  { %812 = vst.msk [vmem:[%s21845_s15 + $0x748] sm:$0xff] %vm578_vm1, %v299_v44  ;;  %813 = vst.msk [vmem:[%s21845_s15 + $0x750] sm:$0xff] %vm578_vm1, %v300_v22 }
 0x459   :  { %814 = vst.msk [vmem:[%s21845_s15 + $0x758] sm:$0xff] %vm578_vm1, %v301_v25 }
 0x460   :  { %v305_v29 = vld [vmem:[%s21843_s13 + $0x778] sm:$0xff]  ;;  %v306_v30 = vld [vmem:[%s21843_s13 + $0x780] sm:$0xff]  ;;  %v307_v31 = vld [vmem:[%s21843_s13 + $0x788] sm:$0xff] }
 0x461   :  { %815 = vst.msk [vmem:[%s21845_s15 + $0x760] sm:$0xff] %vm578_vm1, %v302_v26  ;;  %816 = vst.msk [vmem:[%s21845_s15 + $0x768] sm:$0xff] %vm578_vm1, %v303_v27 }
 0x462   :  { %817 = vst.msk [vmem:[%s21845_s15 + $0x770] sm:$0xff] %vm578_vm1, %v304_v28 }
 0x469   :  { %v308_v32 = vld [vmem:[%s21843_s13 + $0x790] sm:$0xff]  ;;  %v309_v15 = vld [vmem:[%s21843_s13 + $0x798] sm:$0xff]  ;;  %v310_v33 = vld [vmem:[%s21843_s13 + $0x7a0] sm:$0xff] }
 0x46a   :  { %818 = vst.msk [vmem:[%s21845_s15 + $0x778] sm:$0xff] %vm578_vm1, %v305_v29  ;;  %819 = vst.msk [vmem:[%s21845_s15 + $0x780] sm:$0xff] %vm578_vm1, %v306_v30 }
 0x46b   :  { %820 = vst.msk [vmem:[%s21845_s15 + $0x788] sm:$0xff] %vm578_vm1, %v307_v31 }
 0x472   :  { %v311_v34 = vld [vmem:[%s21843_s13 + $0x7a8] sm:$0xff]  ;;  %v312_v38 = vld [vmem:[%s21843_s13 + $0x7b0] sm:$0xff]  ;;  %v313_v18 = vld [vmem:[%s21843_s13 + $0x7b8] sm:$0xff] }
 0x473   :  { %821 = vst.msk [vmem:[%s21845_s15 + $0x790] sm:$0xff] %vm578_vm1, %v308_v32  ;;  %822 = vst.msk [vmem:[%s21845_s15 + $0x798] sm:$0xff] %vm578_vm1, %v309_v15 }
 0x474   :  { %823 = vst.msk [vmem:[%s21845_s15 + $0x7a0] sm:$0xff] %vm578_vm1, %v310_v33 }
 0x47b   :  { %v314_v39 = vld [vmem:[%s21843_s13 + $0x7c0] sm:$0xff]  ;;  %v315_v40 = vld [vmem:[%s21843_s13 + $0x7c8] sm:$0xff]  ;;  %v316_v24 = vld [vmem:[%s21843_s13 + $0x7d0] sm:$0xff] }
 0x47c   :  { %824 = vst.msk [vmem:[%s21845_s15 + $0x7a8] sm:$0xff] %vm578_vm1, %v311_v34  ;;  %825 = vst.msk [vmem:[%s21845_s15 + $0x7b0] sm:$0xff] %vm578_vm1, %v312_v38 }
 0x47d   :  { %826 = vst.msk [vmem:[%s21845_s15 + $0x7b8] sm:$0xff] %vm578_vm1, %v313_v18 }
 0x484   :  { %v317_v43 = vld [vmem:[%s21843_s13 + $0x7d8] sm:$0xff]  ;;  %v318_v23 = vld [vmem:[%s21843_s13 + $0x7e0] sm:$0xff]  ;;  %v319_v48 = vld [vmem:[%s21843_s13 + $0x7e8] sm:$0xff] }
 0x485   :  { %827 = vst.msk [vmem:[%s21845_s15 + $0x7c0] sm:$0xff] %vm578_vm1, %v314_v39  ;;  %828 = vst.msk [vmem:[%s21845_s15 + $0x7c8] sm:$0xff] %vm578_vm1, %v315_v40 }
 0x486   :  { %829 = vst.msk [vmem:[%s21845_s15 + $0x7d0] sm:$0xff] %vm578_vm1, %v316_v24 }
 0x48d   :  { %v320_v50 = vld [vmem:[%s21843_s13 + $0x7f0] sm:$0xff]  ;;  %v321_v42 = vld [vmem:[%s21843_s13 + $0x7f8] sm:$0xff]  ;;  %v322_v52 = vld [vmem:[%s21843_s13 + $0x800] sm:$0xff] }
 0x48e   :  { %830 = vst.msk [vmem:[%s21845_s15 + $0x7d8] sm:$0xff] %vm578_vm1, %v317_v43  ;;  %831 = vst.msk [vmem:[%s21845_s15 + $0x7e0] sm:$0xff] %vm578_vm1, %v318_v23 }
 0x48f   :  { %832 = vst.msk [vmem:[%s21845_s15 + $0x7e8] sm:$0xff] %vm578_vm1, %v319_v48 }
 0x496   :  { %v323_v37 = vld [vmem:[%s21843_s13 + $0x808] sm:$0xff]  ;;  %v324_v53 = vld [vmem:[%s21843_s13 + $0x810] sm:$0xff]  ;;  %v325_v10 = vld [vmem:[%s21843_s13 + $0x818] sm:$0xff] }
 0x497   :  { %833 = vst.msk [vmem:[%s21845_s15 + $0x7f0] sm:$0xff] %vm578_vm1, %v320_v50  ;;  %834 = vst.msk [vmem:[%s21845_s15 + $0x7f8] sm:$0xff] %vm578_vm1, %v321_v42 }
 0x498   :  { %835 = vst.msk [vmem:[%s21845_s15 + $0x800] sm:$0xff] %vm578_vm1, %v322_v52 }
 0x49f   :  { %v326_v54 = vld [vmem:[%s21843_s13 + $0x820] sm:$0xff]  ;;  %v327_v55 = vld [vmem:[%s21843_s13 + $0x828] sm:$0xff]  ;;  %v328_v45 = vld [vmem:[%s21843_s13 + $0x830] sm:$0xff] }
 0x4a0   :  { %836 = vst.msk [vmem:[%s21845_s15 + $0x808] sm:$0xff] %vm578_vm1, %v323_v37  ;;  %837 = vst.msk [vmem:[%s21845_s15 + $0x810] sm:$0xff] %vm578_vm1, %v324_v53 }
 0x4a1   :  { %838 = vst.msk [vmem:[%s21845_s15 + $0x818] sm:$0xff] %vm578_vm1, %v325_v10 }
 0x4a8   :  { %v329_v51 = vld [vmem:[%s21843_s13 + $0x838] sm:$0xff]  ;;  %v330_v47 = vld [vmem:[%s21843_s13 + $0x840] sm:$0xff]  ;;  %v331_v35 = vld [vmem:[%s21843_s13 + $0x848] sm:$0xff] }
 0x4a9   :  { %839 = vst.msk [vmem:[%s21845_s15 + $0x820] sm:$0xff] %vm578_vm1, %v326_v54  ;;  %840 = vst.msk [vmem:[%s21845_s15 + $0x828] sm:$0xff] %vm578_vm1, %v327_v55 }
 0x4aa   :  { %841 = vst.msk [vmem:[%s21845_s15 + $0x830] sm:$0xff] %vm578_vm1, %v328_v45 }
 0x4b1   :  { %v332_v41 = vld [vmem:[%s21843_s13 + $0x850] sm:$0xff]  ;;  %v333_v46 = vld [vmem:[%s21843_s13 + $0x858] sm:$0xff]  ;;  %v334_v56 = vld [vmem:[%s21843_s13 + $0x860] sm:$0xff] }
 0x4b2   :  { %842 = vst.msk [vmem:[%s21845_s15 + $0x838] sm:$0xff] %vm578_vm1, %v329_v51  ;;  %843 = vst.msk [vmem:[%s21845_s15 + $0x840] sm:$0xff] %vm578_vm1, %v330_v47 }
 0x4b3   :  { %844 = vst.msk [vmem:[%s21845_s15 + $0x848] sm:$0xff] %vm578_vm1, %v331_v35 }
 0x4ba   :  { %v335_v49 = vld [vmem:[%s21843_s13 + $0x868] sm:$0xff]  ;;  %v336_v57 = vld [vmem:[%s21843_s13 + $0x870] sm:$0xff]  ;;  %v337_v58 = vld [vmem:[%s21843_s13 + $0x878] sm:$0xff] }
 0x4bb   :  { %845 = vst.msk [vmem:[%s21845_s15 + $0x850] sm:$0xff] %vm578_vm1, %v332_v41  ;;  %846 = vst.msk [vmem:[%s21845_s15 + $0x858] sm:$0xff] %vm578_vm1, %v333_v46 }
 0x4bc   :  { %847 = vst.msk [vmem:[%s21845_s15 + $0x860] sm:$0xff] %vm578_vm1, %v334_v56 }
 0x4c3   :  { %v338_v59 = vld [vmem:[%s21843_s13 + $0x880] sm:$0xff]  ;;  %v339_v60 = vld [vmem:[%s21843_s13 + $0x888] sm:$0xff]  ;;  %v340_v61 = vld [vmem:[%s21843_s13 + $0x890] sm:$0xff] }
 0x4c4   :  { %848 = vst.msk [vmem:[%s21845_s15 + $0x868] sm:$0xff] %vm578_vm1, %v335_v49  ;;  %849 = vst.msk [vmem:[%s21845_s15 + $0x870] sm:$0xff] %vm578_vm1, %v336_v57 }
 0x4c5   :  { %850 = vst.msk [vmem:[%s21845_s15 + $0x878] sm:$0xff] %vm578_vm1, %v337_v58 }
 0x4cc   :  { %v341_v62 = vld [vmem:[%s21843_s13 + $0x898] sm:$0xff]  ;;  %v342_v63 = vld [vmem:[%s21843_s13 + $0x8a0] sm:$0xff]  ;;  %v343_v0 = vld [vmem:[%s21843_s13 + $0x8a8] sm:$0xff] }
 0x4cd   :  { %851 = vst.msk [vmem:[%s21845_s15 + $0x880] sm:$0xff] %vm578_vm1, %v338_v59  ;;  %852 = vst.msk [vmem:[%s21845_s15 + $0x888] sm:$0xff] %vm578_vm1, %v339_v60 }
 0x4ce   :  { %853 = vst.msk [vmem:[%s21845_s15 + $0x890] sm:$0xff] %vm578_vm1, %v340_v61  ;;  %v21996_v61 = vmov 0.0  }
 0x4cf   :  { %11385 = vmatprep.mubr.msk.f32.mxu1 %vm14307_vm4, %v21996_v61  ;;  %11420 = vmatprep.mubr.msk.f32.mxu0 %vm14307_vm4, %v21996_v61 }
 0x4d5   :  { %v344_v1 = vld [vmem:[%s21843_s13 + $0x8b0] sm:$0xff]  ;;  %v345_v3 = vld [vmem:[%s21843_s13 + $0x8b8] sm:$0xff]  ;;  %v346_v4 = vld [vmem:[%s21843_s13 + $0x8c0] sm:$0xff] }
 0x4d6   :  { %854 = vst.msk [vmem:[%s21845_s15 + $0x898] sm:$0xff] %vm578_vm1, %v341_v62  ;;  %855 = vst.msk [vmem:[%s21845_s15 + $0x8a0] sm:$0xff] %vm578_vm1, %v342_v63 }
 0x4d7   :  { %856 = vst.msk [vmem:[%s21845_s15 + $0x8a8] sm:$0xff] %vm578_vm1, %v343_v0 }
 0x4de   :  { %v347_v5 = vld [vmem:[%s21843_s13 + $0x8c8] sm:$0xff]  ;;  %v348_v6 = vld [vmem:[%s21843_s13 + $0x8d0] sm:$0xff]  ;;  %v349_v2 = vld [vmem:[%s21843_s13 + $0x8d8] sm:$0xff] }
 0x4df   :  { %857 = vst.msk [vmem:[%s21845_s15 + $0x8b0] sm:$0xff] %vm578_vm1, %v344_v1  ;;  %858 = vst.msk [vmem:[%s21845_s15 + $0x8b8] sm:$0xff] %vm578_vm1, %v345_v3 }
 0x4e0   :  { %859 = vst.msk [vmem:[%s21845_s15 + $0x8c0] sm:$0xff] %vm578_vm1, %v346_v4 }
 0x4e7   :  { %v350_v7 = vld [vmem:[%s21843_s13 + $0x8e0] sm:$0xff]  ;;  %v351_v8 = vld [vmem:[%s21843_s13 + $0x8e8] sm:$0xff]  ;;  %v352_v9 = vld [vmem:[%s21843_s13 + $0x8f0] sm:$0xff] }
 0x4e8   :  { %860 = vst.msk [vmem:[%s21845_s15 + $0x8c8] sm:$0xff] %vm578_vm1, %v347_v5  ;;  %861 = vst.msk [vmem:[%s21845_s15 + $0x8d0] sm:$0xff] %vm578_vm1, %v348_v6 }
 0x4e9   :  { %862 = vst.msk [vmem:[%s21845_s15 + $0x8d8] sm:$0xff] %vm578_vm1, %v349_v2 }
 0x4f0   :  { %v353_v12 = vld [vmem:[%s21843_s13 + $0x8f8] sm:$0xff]  ;;  %v354_v13 = vld [vmem:[%s21843_s13 + $0x900] sm:$0xff]  ;;  %v355_v11 = vld [vmem:[%s21843_s13 + $0x908] sm:$0xff] }
 0x4f1   :  { %863 = vst.msk [vmem:[%s21845_s15 + $0x8e0] sm:$0xff] %vm578_vm1, %v350_v7  ;;  %864 = vst.msk [vmem:[%s21845_s15 + $0x8e8] sm:$0xff] %vm578_vm1, %v351_v8 }
 0x4f2   :  { %865 = vst.msk [vmem:[%s21845_s15 + $0x8f0] sm:$0xff] %vm578_vm1, %v352_v9 }
 0x4f9   :  { %v356_v36 = vld [vmem:[%s21843_s13 + $0x910] sm:$0xff]  ;;  %v357_v14 = vld [vmem:[%s21843_s13 + $0x918] sm:$0xff]  ;;  %v358_v16 = vld [vmem:[%s21843_s13 + $0x920] sm:$0xff] }
 0x4fa   :  { %866 = vst.msk [vmem:[%s21845_s15 + $0x8f8] sm:$0xff] %vm578_vm1, %v353_v12  ;;  %867 = vst.msk [vmem:[%s21845_s15 + $0x900] sm:$0xff] %vm578_vm1, %v354_v13 }
 0x4fb   :  { %868 = vst.msk [vmem:[%s21845_s15 + $0x908] sm:$0xff] %vm578_vm1, %v355_v11 }
 0x502   :  { %v359_v17 = vld [vmem:[%s21843_s13 + $0x928] sm:$0xff]  ;;  %v360_v19 = vld [vmem:[%s21843_s13 + $0x930] sm:$0xff]  ;;  %v361_v20 = vld [vmem:[%s21843_s13 + $0x938] sm:$0xff] }
 0x503   :  { %869 = vst.msk [vmem:[%s21845_s15 + $0x910] sm:$0xff] %vm578_vm1, %v356_v36  ;;  %870 = vst.msk [vmem:[%s21845_s15 + $0x918] sm:$0xff] %vm578_vm1, %v357_v14 }
 0x504   :  { %871 = vst.msk [vmem:[%s21845_s15 + $0x920] sm:$0xff] %vm578_vm1, %v358_v16 }
 0x50b   :  { %v362_v21 = vld [vmem:[%s21843_s13 + $0x940] sm:$0xff]  ;;  %v363_v44 = vld [vmem:[%s21843_s13 + $0x948] sm:$0xff]  ;;  %v364_v22 = vld [vmem:[%s21843_s13 + $0x950] sm:$0xff] }
 0x50c   :  { %872 = vst.msk [vmem:[%s21845_s15 + $0x928] sm:$0xff] %vm578_vm1, %v359_v17  ;;  %873 = vst.msk [vmem:[%s21845_s15 + $0x930] sm:$0xff] %vm578_vm1, %v360_v19 }
 0x50d   :  { %874 = vst.msk [vmem:[%s21845_s15 + $0x938] sm:$0xff] %vm578_vm1, %v361_v20 }
 0x514   :  { %v365_v25 = vld [vmem:[%s21843_s13 + $0x958] sm:$0xff]  ;;  %v366_v26 = vld [vmem:[%s21843_s13 + $0x960] sm:$0xff]  ;;  %v367_v27 = vld [vmem:[%s21843_s13 + $0x968] sm:$0xff] }
 0x515   :  { %875 = vst.msk [vmem:[%s21845_s15 + $0x940] sm:$0xff] %vm578_vm1, %v362_v21  ;;  %876 = vst.msk [vmem:[%s21845_s15 + $0x948] sm:$0xff] %vm578_vm1, %v363_v44  ;;  %v17723_v21 = vpop.f32.mrb[4].mxu1  ;;  %v17725_v44 = vpop.f32.mrb[4].mxu0 }
 0x516   :  { %877 = vst.msk [vmem:[%s21845_s15 + $0x950] sm:$0xff] %vm578_vm1, %v364_v22 }
 0x51d   :  { %v368_v28 = vld [vmem:[%s21843_s13 + $0x970] sm:$0xff]  ;;  %v369_v29 = vld [vmem:[%s21843_s13 + $0x978] sm:$0xff]  ;;  %v370_v30 = vld [vmem:[%s21843_s13 + $0x980] sm:$0xff] }
 0x51e   :  { %878 = vst.msk [vmem:[%s21845_s15 + $0x958] sm:$0xff] %vm578_vm1, %v365_v25  ;;  %879 = vst.msk [vmem:[%s21845_s15 + $0x960] sm:$0xff] %vm578_vm1, %v366_v26 }
 0x51f   :  { %880 = vst.msk [vmem:[%s21845_s15 + $0x968] sm:$0xff] %vm578_vm1, %v367_v27  ;;  %v17748_v27 = vpop.f32.mrb[5].mxu1 }
 0x526   :  { %v371_v31 = vld [vmem:[%s21843_s13 + $0x988] sm:$0xff]  ;;  %v372_v32 = vld [vmem:[%s21843_s13 + $0x990] sm:$0xff]  ;;  %v373_v15 = vld [vmem:[%s21843_s13 + $0x998] sm:$0xff] }
 0x527   :  { %881 = vst.msk [vmem:[%s21845_s15 + $0x970] sm:$0xff] %vm578_vm1, %v368_v28  ;;  %882 = vst.msk [vmem:[%s21845_s15 + $0x978] sm:$0xff] %vm578_vm1, %v369_v29  ;;  %v17750_v28 = vpop.f32.mrb[5].mxu0 }
 0x528   :  { %883 = vst.msk [vmem:[%s21845_s15 + $0x980] sm:$0xff] %vm578_vm1, %v370_v30 }
 0x52f   :  { %v374_v33 = vld [vmem:[%s21843_s13 + $0x9a0] sm:$0xff]  ;;  %v375_v34 = vld [vmem:[%s21843_s13 + $0x9a8] sm:$0xff]  ;;  %v376_v38 = vld [vmem:[%s21843_s13 + $0x9b0] sm:$0xff] }
 0x530   :  { %884 = vst.msk [vmem:[%s21845_s15 + $0x988] sm:$0xff] %vm578_vm1, %v371_v31  ;;  %885 = vst.msk [vmem:[%s21845_s15 + $0x990] sm:$0xff] %vm578_vm1, %v372_v32 }
 0x531   :  { %886 = vst.msk [vmem:[%s21845_s15 + $0x998] sm:$0xff] %vm578_vm1, %v373_v15 }
 0x538   :  { %v377_v18 = vld [vmem:[%s21843_s13 + $0x9b8] sm:$0xff]  ;;  %v378_v39 = vld [vmem:[%s21843_s13 + $0x9c0] sm:$0xff]  ;;  %v379_v40 = vld [vmem:[%s21843_s13 + $0x9c8] sm:$0xff] }
 0x539   :  { %887 = vst.msk [vmem:[%s21845_s15 + $0x9a0] sm:$0xff] %vm578_vm1, %v374_v33  ;;  %888 = vst.msk [vmem:[%s21845_s15 + $0x9a8] sm:$0xff] %vm578_vm1, %v375_v34 }
 0x53a   :  { %889 = vst.msk [vmem:[%s21845_s15 + $0x9b0] sm:$0xff] %vm578_vm1, %v376_v38 }
 0x541   :  { %v380_v24 = vld [vmem:[%s21843_s13 + $0x9d0] sm:$0xff]  ;;  %v381_v43 = vld [vmem:[%s21843_s13 + $0x9d8] sm:$0xff]  ;;  %v382_v23 = vld [vmem:[%s21843_s13 + $0x9e0] sm:$0xff] }
 0x542   :  { %890 = vst.msk [vmem:[%s21845_s15 + $0x9b8] sm:$0xff] %vm578_vm1, %v377_v18  ;;  %891 = vst.msk [vmem:[%s21845_s15 + $0x9c0] sm:$0xff] %vm578_vm1, %v378_v39 }
 0x543   :  { %892 = vst.msk [vmem:[%s21845_s15 + $0x9c8] sm:$0xff] %vm578_vm1, %v379_v40 }
 0x54a   :  { %v383_v48 = vld [vmem:[%s21843_s13 + $0x9e8] sm:$0xff]  ;;  %v384_v50 = vld [vmem:[%s21843_s13 + $0x9f0] sm:$0xff]  ;;  %v385_v42 = vld [vmem:[%s21843_s13 + $0x9f8] sm:$0xff] }
 0x54b   :  { %893 = vst.msk [vmem:[%s21845_s15 + $0x9d0] sm:$0xff] %vm578_vm1, %v380_v24  ;;  %894 = vst.msk [vmem:[%s21845_s15 + $0x9d8] sm:$0xff] %vm578_vm1, %v381_v43 }
 0x54c   :  { %895 = vst.msk [vmem:[%s21845_s15 + $0x9e0] sm:$0xff] %vm578_vm1, %v382_v23 }
 0x553   :  { %v386_v52 = vld [vmem:[%s21843_s13 + $0xa00] sm:$0xff]  ;;  %v387_v37 = vld [vmem:[%s21843_s13 + $0xa08] sm:$0xff]  ;;  %v388_v53 = vld [vmem:[%s21843_s13 + $0xa10] sm:$0xff] }
 0x554   :  { %896 = vst.msk [vmem:[%s21845_s15 + $0x9e8] sm:$0xff] %vm578_vm1, %v383_v48  ;;  %897 = vst.msk [vmem:[%s21845_s15 + $0x9f0] sm:$0xff] %vm578_vm1, %v384_v50 }
 0x555   :  { %898 = vst.msk [vmem:[%s21845_s15 + $0x9f8] sm:$0xff] %vm578_vm1, %v385_v42 }
 0x55c   :  { %v389_v10 = vld [vmem:[%s21843_s13 + $0xa18] sm:$0xff]  ;;  %v390_v54 = vld [vmem:[%s21843_s13 + $0xa20] sm:$0xff]  ;;  %v391_v55 = vld [vmem:[%s21843_s13 + $0xa28] sm:$0xff] }
 0x55d   :  { %899 = vst.msk [vmem:[%s21845_s15 + $0xa00] sm:$0xff] %vm578_vm1, %v386_v52  ;;  %900 = vst.msk [vmem:[%s21845_s15 + $0xa08] sm:$0xff] %vm578_vm1, %v387_v37 }
 0x55e   :  { %901 = vst.msk [vmem:[%s21845_s15 + $0xa10] sm:$0xff] %vm578_vm1, %v388_v53 }
 0x565   :  { %v392_v45 = vld [vmem:[%s21843_s13 + $0xa30] sm:$0xff]  ;;  %v393_v51 = vld [vmem:[%s21843_s13 + $0xa38] sm:$0xff]  ;;  %v394_v47 = vld [vmem:[%s21843_s13 + $0xa40] sm:$0xff] }
 0x566   :  { %902 = vst.msk [vmem:[%s21845_s15 + $0xa18] sm:$0xff] %vm578_vm1, %v389_v10  ;;  %903 = vst.msk [vmem:[%s21845_s15 + $0xa20] sm:$0xff] %vm578_vm1, %v390_v54  ;;  %v17899_v54 = vpop.f32.mrb[6].mxu1 }
 0x567   :  { %904 = vst.msk [vmem:[%s21845_s15 + $0xa28] sm:$0xff] %vm578_vm1, %v391_v55 }
 0x56e   :  { %v395_v35 = vld [vmem:[%s21843_s13 + $0xa48] sm:$0xff]  ;;  %v396_v41 = vld [vmem:[%s21843_s13 + $0xa50] sm:$0xff]  ;;  %v397_v46 = vld [vmem:[%s21843_s13 + $0xa58] sm:$0xff] }
 0x56f   :  { %905 = vst.msk [vmem:[%s21845_s15 + $0xa30] sm:$0xff] %vm578_vm1, %v392_v45  ;;  %906 = vst.msk [vmem:[%s21845_s15 + $0xa38] sm:$0xff] %vm578_vm1, %v393_v51 }
 0x570   :  { %907 = vst.msk [vmem:[%s21845_s15 + $0xa40] sm:$0xff] %vm578_vm1, %v394_v47  ;;  %v17922_v47 = vpop.f32.mrb[7].mxu1 }
 0x577   :  { %v398_v56 = vld [vmem:[%s21843_s13 + $0xa60] sm:$0xff]  ;;  %v399_v49 = vld [vmem:[%s21843_s13 + $0xa68] sm:$0xff]  ;;  %v400_v57 = vld [vmem:[%s21843_s13 + $0xa70] sm:$0xff] }
 0x578   :  { %908 = vst.msk [vmem:[%s21845_s15 + $0xa48] sm:$0xff] %vm578_vm1, %v395_v35  ;;  %909 = vst.msk [vmem:[%s21845_s15 + $0xa50] sm:$0xff] %vm578_vm1, %v396_v41 }
 0x579   :  { %910 = vst.msk [vmem:[%s21845_s15 + $0xa58] sm:$0xff] %vm578_vm1, %v397_v46 }
 0x580   :  { %v401_v58 = vld [vmem:[%s21843_s13 + $0xa78] sm:$0xff]  ;;  %v402_v59 = vld [vmem:[%s21843_s13 + $0xa80] sm:$0xff]  ;;  %v403_v60 = vld [vmem:[%s21843_s13 + $0xa88] sm:$0xff] }
 0x581   :  { %911 = vst.msk [vmem:[%s21845_s15 + $0xa60] sm:$0xff] %vm578_vm1, %v398_v56  ;;  %912 = vst.msk [vmem:[%s21845_s15 + $0xa68] sm:$0xff] %vm578_vm1, %v399_v49 }
 0x582   :  { %913 = vst.msk [vmem:[%s21845_s15 + $0xa70] sm:$0xff] %vm578_vm1, %v400_v57 }
 0x589   :  { %v404_v62 = vld [vmem:[%s21843_s13 + $0xa90] sm:$0xff]  ;;  %v405_v63 = vld [vmem:[%s21843_s13 + $0xa98] sm:$0xff]  ;;  %v406_v0 = vld [vmem:[%s21843_s13 + $0xaa0] sm:$0xff] }
 0x58a   :  { %914 = vst.msk [vmem:[%s21845_s15 + $0xa78] sm:$0xff] %vm578_vm1, %v401_v58  ;;  %915 = vst.msk [vmem:[%s21845_s15 + $0xa80] sm:$0xff] %vm578_vm1, %v402_v59 }
 0x58b   :  { %916 = vst.msk [vmem:[%s21845_s15 + $0xa88] sm:$0xff] %vm578_vm1, %v403_v60 }
 0x592   :  { %v407_v1 = vld [vmem:[%s21843_s13 + $0xaa8] sm:$0xff]  ;;  %v408_v3 = vld [vmem:[%s21843_s13 + $0xab0] sm:$0xff]  ;;  %v409_v4 = vld [vmem:[%s21843_s13 + $0xab8] sm:$0xff] }
 0x593   :  { %917 = vst.msk [vmem:[%s21845_s15 + $0xa90] sm:$0xff] %vm578_vm1, %v404_v62  ;;  %918 = vst.msk [vmem:[%s21845_s15 + $0xa98] sm:$0xff] %vm578_vm1, %v405_v63 }
 0x594   :  { %919 = vst.msk [vmem:[%s21845_s15 + $0xaa0] sm:$0xff] %vm578_vm1, %v406_v0 }
 0x59b   :  { %v410_v5 = vld [vmem:[%s21843_s13 + $0xac0] sm:$0xff]  ;;  %v411_v6 = vld [vmem:[%s21843_s13 + $0xac8] sm:$0xff]  ;;  %v412_v2 = vld [vmem:[%s21843_s13 + $0xad0] sm:$0xff] }
 0x59c   :  { %920 = vst.msk [vmem:[%s21845_s15 + $0xaa8] sm:$0xff] %vm578_vm1, %v407_v1  ;;  %921 = vst.msk [vmem:[%s21845_s15 + $0xab0] sm:$0xff] %vm578_vm1, %v408_v3 }
 0x59d   :  { %922 = vst.msk [vmem:[%s21845_s15 + $0xab8] sm:$0xff] %vm578_vm1, %v409_v4 }
 0x5a4   :  { %v413_v7 = vld [vmem:[%s21843_s13 + $0xad8] sm:$0xff]  ;;  %v414_v8 = vld [vmem:[%s21843_s13 + $0xae0] sm:$0xff]  ;;  %v415_v9 = vld [vmem:[%s21843_s13 + $0xae8] sm:$0xff] }
 0x5a5   :  { %923 = vst.msk [vmem:[%s21845_s15 + $0xac0] sm:$0xff] %vm578_vm1, %v410_v5  ;;  %924 = vst.msk [vmem:[%s21845_s15 + $0xac8] sm:$0xff] %vm578_vm1, %v411_v6 }
 0x5a6   :  { %925 = vst.msk [vmem:[%s21845_s15 + $0xad0] sm:$0xff] %vm578_vm1, %v412_v2 }
 0x5ad   :  { %v416_v12 = vld [vmem:[%s21843_s13 + $0xaf0] sm:$0xff]  ;;  %v417_v13 = vld [vmem:[%s21843_s13 + $0xaf8] sm:$0xff]  ;;  %v418_v11 = vld [vmem:[%s21843_s13 + $0xb00] sm:$0xff] }
 0x5ae   :  { %926 = vst.msk [vmem:[%s21845_s15 + $0xad8] sm:$0xff] %vm578_vm1, %v413_v7  ;;  %927 = vst.msk [vmem:[%s21845_s15 + $0xae0] sm:$0xff] %vm578_vm1, %v414_v8 }
 0x5af   :  { %928 = vst.msk [vmem:[%s21845_s15 + $0xae8] sm:$0xff] %vm578_vm1, %v415_v9 }
 0x5b6   :  { %v419_v36 = vld [vmem:[%s21843_s13 + $0xb08] sm:$0xff]  ;;  %v420_v14 = vld [vmem:[%s21843_s13 + $0xb10] sm:$0xff]  ;;  %v421_v16 = vld [vmem:[%s21843_s13 + $0xb18] sm:$0xff] }
 0x5b7   :  { %929 = vst.msk [vmem:[%s21845_s15 + $0xaf0] sm:$0xff] %vm578_vm1, %v416_v12  ;;  %930 = vst.msk [vmem:[%s21845_s15 + $0xaf8] sm:$0xff] %vm578_vm1, %v417_v13 }
 0x5b8   :  { %931 = vst.msk [vmem:[%s21845_s15 + $0xb00] sm:$0xff] %vm578_vm1, %v418_v11 }
 0x5bf   :  { %v422_v17 = vld [vmem:[%s21843_s13 + $0xb20] sm:$0xff]  ;;  %v423_v19 = vld [vmem:[%s21843_s13 + $0xb28] sm:$0xff]  ;;  %v424_v20 = vld [vmem:[%s21843_s13 + $0xb30] sm:$0xff] }
 0x5c0   :  { %932 = vst.msk [vmem:[%s21845_s15 + $0xb08] sm:$0xff] %vm578_vm1, %v419_v36  ;;  %933 = vst.msk [vmem:[%s21845_s15 + $0xb10] sm:$0xff] %vm578_vm1, %v420_v14 }
 0x5c1   :  { %934 = vst.msk [vmem:[%s21845_s15 + $0xb18] sm:$0xff] %vm578_vm1, %v421_v16 }
 0x5c8   :  { %v425_v22 = vld [vmem:[%s21843_s13 + $0xb38] sm:$0xff]  ;;  %v426_v25 = vld [vmem:[%s21843_s13 + $0xb40] sm:$0xff]  ;;  %v427_v26 = vld [vmem:[%s21843_s13 + $0xb48] sm:$0xff] }
 0x5c9   :  { %935 = vst.msk [vmem:[%s21845_s15 + $0xb20] sm:$0xff] %vm578_vm1, %v422_v17  ;;  %936 = vst.msk [vmem:[%s21845_s15 + $0xb28] sm:$0xff] %vm578_vm1, %v423_v19 }
 0x5ca   :  { %937 = vst.msk [vmem:[%s21845_s15 + $0xb30] sm:$0xff] %vm578_vm1, %v424_v20 }
 0x5d1   :  { %v428_v29 = vld [vmem:[%s21843_s13 + $0xb50] sm:$0xff]  ;;  %v429_v30 = vld [vmem:[%s21843_s13 + $0xb58] sm:$0xff]  ;;  %v430_v31 = vld [vmem:[%s21843_s13 + $0xb60] sm:$0xff] }
 0x5d2   :  { %938 = vst.msk [vmem:[%s21845_s15 + $0xb38] sm:$0xff] %vm578_vm1, %v425_v22  ;;  %939 = vst.msk [vmem:[%s21845_s15 + $0xb40] sm:$0xff] %vm578_vm1, %v426_v25 }
 0x5d3   :  { %940 = vst.msk [vmem:[%s21845_s15 + $0xb48] sm:$0xff] %vm578_vm1, %v427_v26 }
 0x5da   :  { %v431_v32 = vld [vmem:[%s21843_s13 + $0xb68] sm:$0xff]  ;;  %v432_v15 = vld [vmem:[%s21843_s13 + $0xb70] sm:$0xff]  ;;  %v433_v33 = vld [vmem:[%s21843_s13 + $0xb78] sm:$0xff] }
 0x5db   :  { %941 = vst.msk [vmem:[%s21845_s15 + $0xb50] sm:$0xff] %vm578_vm1, %v428_v29  ;;  %942 = vst.msk [vmem:[%s21845_s15 + $0xb58] sm:$0xff] %vm578_vm1, %v429_v30 }
 0x5dc   :  { %943 = vst.msk [vmem:[%s21845_s15 + $0xb60] sm:$0xff] %vm578_vm1, %v430_v31 }
 0x5e3   :  { %v434_v34 = vld [vmem:[%s21843_s13 + $0xb80] sm:$0xff]  ;;  %v435_v38 = vld [vmem:[%s21843_s13 + $0xb88] sm:$0xff]  ;;  %v436_v18 = vld [vmem:[%s21843_s13 + $0xb90] sm:$0xff] }
 0x5e4   :  { %944 = vst.msk [vmem:[%s21845_s15 + $0xb68] sm:$0xff] %vm578_vm1, %v431_v32  ;;  %945 = vst.msk [vmem:[%s21845_s15 + $0xb70] sm:$0xff] %vm578_vm1, %v432_v15 }
 0x5e5   :  { %946 = vst.msk [vmem:[%s21845_s15 + $0xb78] sm:$0xff] %vm578_vm1, %v433_v33 }
 0x5ec   :  { %v437_v39 = vld [vmem:[%s21843_s13 + $0xb98] sm:$0xff]  ;;  %v438_v40 = vld [vmem:[%s21843_s13 + $0xba0] sm:$0xff]  ;;  %v439_v24 = vld [vmem:[%s21843_s13 + $0xba8] sm:$0xff] }
 0x5ed   :  { %947 = vst.msk [vmem:[%s21845_s15 + $0xb80] sm:$0xff] %vm578_vm1, %v434_v34  ;;  %948 = vst.msk [vmem:[%s21845_s15 + $0xb88] sm:$0xff] %vm578_vm1, %v435_v38 }
 0x5ee   :  { %949 = vst.msk [vmem:[%s21845_s15 + $0xb90] sm:$0xff] %vm578_vm1, %v436_v18 }
 0x5f5   :  { %v440_v43 = vld [vmem:[%s21843_s13 + $0xbb0] sm:$0xff]  ;;  %v441_v23 = vld [vmem:[%s21843_s13 + $0xbb8] sm:$0xff]  ;;  %v442_v48 = vld [vmem:[%s21843_s13 + $0xbc0] sm:$0xff] }
 0x5f6   :  { %950 = vst.msk [vmem:[%s21845_s15 + $0xb98] sm:$0xff] %vm578_vm1, %v437_v39  ;;  %951 = vst.msk [vmem:[%s21845_s15 + $0xba0] sm:$0xff] %vm578_vm1, %v438_v40 }
 0x5f7   :  { %952 = vst.msk [vmem:[%s21845_s15 + $0xba8] sm:$0xff] %vm578_vm1, %v439_v24 }
 0x5fe   :  { %v443_v50 = vld [vmem:[%s21843_s13 + $0xbc8] sm:$0xff]  ;;  %v444_v42 = vld [vmem:[%s21843_s13 + $0xbd0] sm:$0xff]  ;;  %v445_v52 = vld [vmem:[%s21843_s13 + $0xbd8] sm:$0xff] }
 0x5ff   :  { %953 = vst.msk [vmem:[%s21845_s15 + $0xbb0] sm:$0xff] %vm578_vm1, %v440_v43  ;;  %954 = vst.msk [vmem:[%s21845_s15 + $0xbb8] sm:$0xff] %vm578_vm1, %v441_v23 }
 0x600   :  { %955 = vst.msk [vmem:[%s21845_s15 + $0xbc0] sm:$0xff] %vm578_vm1, %v442_v48 }
 0x607   :  { %v446_v37 = vld [vmem:[%s21843_s13 + $0xbe0] sm:$0xff]  ;;  %v447_v53 = vld [vmem:[%s21843_s13 + $0xbe8] sm:$0xff]  ;;  %v448_v10 = vld [vmem:[%s21843_s13 + $0xbf0] sm:$0xff] }
 0x608   :  { %956 = vst.msk [vmem:[%s21845_s15 + $0xbc8] sm:$0xff] %vm578_vm1, %v443_v50  ;;  %957 = vst.msk [vmem:[%s21845_s15 + $0xbd0] sm:$0xff] %vm578_vm1, %v444_v42 }
 0x609   :  { %958 = vst.msk [vmem:[%s21845_s15 + $0xbd8] sm:$0xff] %vm578_vm1, %v445_v52 }
 0x610   :  { %v449_v55 = vld [vmem:[%s21843_s13 + $0xbf8] sm:$0xff]  ;;  %v450_v45 = vld [vmem:[%s21843_s13 + $0xc00] sm:$0xff]  ;;  %v451_v51 = vld [vmem:[%s21843_s13 + $0xc08] sm:$0xff] }
 0x611   :  { %959 = vst.msk [vmem:[%s21845_s15 + $0xbe0] sm:$0xff] %vm578_vm1, %v446_v37  ;;  %960 = vst.msk [vmem:[%s21845_s15 + $0xbe8] sm:$0xff] %vm578_vm1, %v447_v53 }
 0x612   :  { %961 = vst.msk [vmem:[%s21845_s15 + $0xbf0] sm:$0xff] %vm578_vm1, %v448_v10 }
 0x619   :  { %v452_v35 = vld [vmem:[%s21843_s13 + $0xc10] sm:$0xff]  ;;  %v453_v41 = vld [vmem:[%s21843_s13 + $0xc18] sm:$0xff]  ;;  %v454_v46 = vld [vmem:[%s21843_s13 + $0xc20] sm:$0xff] }
 0x61a   :  { %962 = vst.msk [vmem:[%s21845_s15 + $0xbf8] sm:$0xff] %vm578_vm1, %v449_v55  ;;  %963 = vst.msk [vmem:[%s21845_s15 + $0xc00] sm:$0xff] %vm578_vm1, %v450_v45 }
 0x61b   :  { %964 = vst.msk [vmem:[%s21845_s15 + $0xc08] sm:$0xff] %vm578_vm1, %v451_v51 }
 0x622   :  { %v455_v56 = vld [vmem:[%s21843_s13 + $0xc28] sm:$0xff]  ;;  %v456_v49 = vld [vmem:[%s21843_s13 + $0xc30] sm:$0xff]  ;;  %v457_v57 = vld [vmem:[%s21843_s13 + $0xc38] sm:$0xff] }
 0x623   :  { %965 = vst.msk [vmem:[%s21845_s15 + $0xc10] sm:$0xff] %vm578_vm1, %v452_v35  ;;  %966 = vst.msk [vmem:[%s21845_s15 + $0xc18] sm:$0xff] %vm578_vm1, %v453_v41 }
 0x624   :  { %967 = vst.msk [vmem:[%s21845_s15 + $0xc20] sm:$0xff] %vm578_vm1, %v454_v46 }
 0x62b   :  { %v458_v58 = vld [vmem:[%s21843_s13 + $0xc40] sm:$0xff]  ;;  %v459_v59 = vld [vmem:[%s21843_s13 + $0xc48] sm:$0xff]  ;;  %v460_v60 = vld [vmem:[%s21843_s13 + $0xc50] sm:$0xff] }
 0x62c   :  { %968 = vst.msk [vmem:[%s21845_s15 + $0xc28] sm:$0xff] %vm578_vm1, %v455_v56  ;;  %969 = vst.msk [vmem:[%s21845_s15 + $0xc30] sm:$0xff] %vm578_vm1, %v456_v49 }
 0x62d   :  { %970 = vst.msk [vmem:[%s21845_s15 + $0xc38] sm:$0xff] %vm578_vm1, %v457_v57 }
 0x634   :  { %v461_v62 = vld [vmem:[%s21843_s13 + $0xc58] sm:$0xff]  ;;  %v462_v63 = vld [vmem:[%s21843_s13 + $0xc60] sm:$0xff]  ;;  %v463_v0 = vld [vmem:[%s21843_s13 + $0xc68] sm:$0xff] }
 0x635   :  { %971 = vst.msk [vmem:[%s21845_s15 + $0xc40] sm:$0xff] %vm578_vm1, %v458_v58  ;;  %972 = vst.msk [vmem:[%s21845_s15 + $0xc48] sm:$0xff] %vm578_vm1, %v459_v59 }
 0x636   :  { %973 = vst.msk [vmem:[%s21845_s15 + $0xc50] sm:$0xff] %vm578_vm1, %v460_v60 }
 0x63d   :  { %v464_v1 = vld [vmem:[%s21843_s13 + $0xc70] sm:$0xff]  ;;  %v465_v3 = vld [vmem:[%s21843_s13 + $0xc78] sm:$0xff]  ;;  %v466_v4 = vld [vmem:[%s21843_s13 + $0xc80] sm:$0xff] }
 0x63e   :  { %974 = vst.msk [vmem:[%s21845_s15 + $0xc58] sm:$0xff] %vm578_vm1, %v461_v62  ;;  %975 = vst.msk [vmem:[%s21845_s15 + $0xc60] sm:$0xff] %vm578_vm1, %v462_v63 }
 0x63f   :  { %976 = vst.msk [vmem:[%s21845_s15 + $0xc68] sm:$0xff] %vm578_vm1, %v463_v0 }
 0x646   :  { %v467_v5 = vld [vmem:[%s21843_s13 + $0xc88] sm:$0xff]  ;;  %v468_v6 = vld [vmem:[%s21843_s13 + $0xc90] sm:$0xff]  ;;  %v469_v2 = vld [vmem:[%s21843_s13 + $0xc98] sm:$0xff] }
 0x647   :  { %977 = vst.msk [vmem:[%s21845_s15 + $0xc70] sm:$0xff] %vm578_vm1, %v464_v1  ;;  %978 = vst.msk [vmem:[%s21845_s15 + $0xc78] sm:$0xff] %vm578_vm1, %v465_v3 }
 0x648   :  { %979 = vst.msk [vmem:[%s21845_s15 + $0xc80] sm:$0xff] %vm578_vm1, %v466_v4 }
 0x64f   :  { %v470_v7 = vld [vmem:[%s21843_s13 + $0xca0] sm:$0xff]  ;;  %v471_v8 = vld [vmem:[%s21843_s13 + $0xca8] sm:$0xff]  ;;  %v472_v9 = vld [vmem:[%s21843_s13 + $0xcb0] sm:$0xff] }
 0x650   :  { %980 = vst.msk [vmem:[%s21845_s15 + $0xc88] sm:$0xff] %vm578_vm1, %v467_v5  ;;  %981 = vst.msk [vmem:[%s21845_s15 + $0xc90] sm:$0xff] %vm578_vm1, %v468_v6 }
 0x651   :  { %982 = vst.msk [vmem:[%s21845_s15 + $0xc98] sm:$0xff] %vm578_vm1, %v469_v2 }
 0x658   :  { %v473_v12 = vld [vmem:[%s21843_s13 + $0xcb8] sm:$0xff]  ;;  %v474_v13 = vld [vmem:[%s21843_s13 + $0xcc0] sm:$0xff]  ;;  %v475_v11 = vld [vmem:[%s21843_s13 + $0xcc8] sm:$0xff] }
 0x659   :  { %983 = vst.msk [vmem:[%s21845_s15 + $0xca0] sm:$0xff] %vm578_vm1, %v470_v7  ;;  %984 = vst.msk [vmem:[%s21845_s15 + $0xca8] sm:$0xff] %vm578_vm1, %v471_v8 }
 0x65a   :  { %985 = vst.msk [vmem:[%s21845_s15 + $0xcb0] sm:$0xff] %vm578_vm1, %v472_v9 }
 0x661   :  { %v476_v36 = vld [vmem:[%s21843_s13 + $0xcd0] sm:$0xff]  ;;  %v477_v14 = vld [vmem:[%s21843_s13 + $0xcd8] sm:$0xff]  ;;  %v478_v16 = vld [vmem:[%s21843_s13 + $0xce0] sm:$0xff] }
 0x662   :  { %986 = vst.msk [vmem:[%s21845_s15 + $0xcb8] sm:$0xff] %vm578_vm1, %v473_v12  ;;  %987 = vst.msk [vmem:[%s21845_s15 + $0xcc0] sm:$0xff] %vm578_vm1, %v474_v13 }
 0x663   :  { %988 = vst.msk [vmem:[%s21845_s15 + $0xcc8] sm:$0xff] %vm578_vm1, %v475_v11 }
 0x66a   :  { %v479_v17 = vld [vmem:[%s21843_s13 + $0xce8] sm:$0xff]  ;;  %v480_v19 = vld [vmem:[%s21843_s13 + $0xcf0] sm:$0xff]  ;;  %v481_v20 = vld [vmem:[%s21843_s13 + $0xcf8] sm:$0xff] }
 0x66b   :  { %989 = vst.msk [vmem:[%s21845_s15 + $0xcd0] sm:$0xff] %vm578_vm1, %v476_v36  ;;  %990 = vst.msk [vmem:[%s21845_s15 + $0xcd8] sm:$0xff] %vm578_vm1, %v477_v14 }
 0x66c   :  { %991 = vst.msk [vmem:[%s21845_s15 + $0xce0] sm:$0xff] %vm578_vm1, %v478_v16 }
 0x673   :  { %v482_v22 = vld [vmem:[%s21843_s13 + $0xd00] sm:$0xff]  ;;  %v483_v25 = vld [vmem:[%s21843_s13 + $0xd08] sm:$0xff]  ;;  %v484_v26 = vld [vmem:[%s21843_s13 + $0xd10] sm:$0xff] }
 0x674   :  { %992 = vst.msk [vmem:[%s21845_s15 + $0xce8] sm:$0xff] %vm578_vm1, %v479_v17  ;;  %993 = vst.msk [vmem:[%s21845_s15 + $0xcf0] sm:$0xff] %vm578_vm1, %v480_v19 }
 0x675   :  { %994 = vst.msk [vmem:[%s21845_s15 + $0xcf8] sm:$0xff] %vm578_vm1, %v481_v20 }
 0x67c   :  { %v485_v29 = vld [vmem:[%s21843_s13 + $0xd18] sm:$0xff]  ;;  %v486_v30 = vld [vmem:[%s21843_s13 + $0xd20] sm:$0xff]  ;;  %v487_v31 = vld [vmem:[%s21843_s13 + $0xd28] sm:$0xff] }
 0x67d   :  { %995 = vst.msk [vmem:[%s21845_s15 + $0xd00] sm:$0xff] %vm578_vm1, %v482_v22  ;;  %996 = vst.msk [vmem:[%s21845_s15 + $0xd08] sm:$0xff] %vm578_vm1, %v483_v25 }
 0x67e   :  { %997 = vst.msk [vmem:[%s21845_s15 + $0xd10] sm:$0xff] %vm578_vm1, %v484_v26 }
 0x685   :  { %v488_v32 = vld [vmem:[%s21843_s13 + $0xd30] sm:$0xff]  ;;  %v489_v15 = vld [vmem:[%s21843_s13 + $0xd38] sm:$0xff]  ;;  %v490_v33 = vld [vmem:[%s21843_s13 + $0xd40] sm:$0xff] }
 0x686   :  { %998 = vst.msk [vmem:[%s21845_s15 + $0xd18] sm:$0xff] %vm578_vm1, %v485_v29  ;;  %999 = vst.msk [vmem:[%s21845_s15 + $0xd20] sm:$0xff] %vm578_vm1, %v486_v30 }
 0x687   :  { %1000 = vst.msk [vmem:[%s21845_s15 + $0xd28] sm:$0xff] %vm578_vm1, %v487_v31 }
 0x68e   :  { %v491_v34 = vld [vmem:[%s21843_s13 + $0xd48] sm:$0xff]  ;;  %v492_v38 = vld [vmem:[%s21843_s13 + $0xd50] sm:$0xff]  ;;  %v493_v18 = vld [vmem:[%s21843_s13 + $0xd58] sm:$0xff] }
 0x68f   :  { %1001 = vst.msk [vmem:[%s21845_s15 + $0xd30] sm:$0xff] %vm578_vm1, %v488_v32  ;;  %1002 = vst.msk [vmem:[%s21845_s15 + $0xd38] sm:$0xff] %vm578_vm1, %v489_v15 }
 0x690   :  { %1003 = vst.msk [vmem:[%s21845_s15 + $0xd40] sm:$0xff] %vm578_vm1, %v490_v33 }
 0x697   :  { %v494_v39 = vld [vmem:[%s21843_s13 + $0xd60] sm:$0xff]  ;;  %v495_v40 = vld [vmem:[%s21843_s13 + $0xd68] sm:$0xff]  ;;  %v496_v24 = vld [vmem:[%s21843_s13 + $0xd70] sm:$0xff] }
 0x698   :  { %1004 = vst.msk [vmem:[%s21845_s15 + $0xd48] sm:$0xff] %vm578_vm1, %v491_v34  ;;  %1005 = vst.msk [vmem:[%s21845_s15 + $0xd50] sm:$0xff] %vm578_vm1, %v492_v38 }
 0x699   :  { %1006 = vst.msk [vmem:[%s21845_s15 + $0xd58] sm:$0xff] %vm578_vm1, %v493_v18 }
 0x6a0   :  { %v497_v43 = vld [vmem:[%s21843_s13 + $0xd78] sm:$0xff]  ;;  %v498_v23 = vld [vmem:[%s21843_s13 + $0xd80] sm:$0xff]  ;;  %v499_v48 = vld [vmem:[%s21843_s13 + $0xd88] sm:$0xff] }
 0x6a1   :  { %1007 = vst.msk [vmem:[%s21845_s15 + $0xd60] sm:$0xff] %vm578_vm1, %v494_v39  ;;  %1008 = vst.msk [vmem:[%s21845_s15 + $0xd68] sm:$0xff] %vm578_vm1, %v495_v40 }
 0x6a2   :  { %1009 = vst.msk [vmem:[%s21845_s15 + $0xd70] sm:$0xff] %vm578_vm1, %v496_v24 }
 0x6a9   :  { %v500_v50 = vld [vmem:[%s21843_s13 + $0xd90] sm:$0xff]  ;;  %v501_v42 = vld [vmem:[%s21843_s13 + $0xd98] sm:$0xff]  ;;  %v502_v52 = vld [vmem:[%s21843_s13 + $0xda0] sm:$0xff] }
 0x6aa   :  { %1010 = vst.msk [vmem:[%s21845_s15 + $0xd78] sm:$0xff] %vm578_vm1, %v497_v43  ;;  %1011 = vst.msk [vmem:[%s21845_s15 + $0xd80] sm:$0xff] %vm578_vm1, %v498_v23  ;;  %v9453_v43 = vld [vmem:[%s21835_s5 + $0x8] ss:$0 sm:$0xff]  ;;  %v9445_v23 = vld [vmem:[%s21835_s5 + $0x4] ss:$0 sm:$0xff] }
 0x6ab   :  { %1012 = vst.msk [vmem:[%s21845_s15 + $0xd88] sm:$0xff] %vm578_vm1, %v499_v48 }
 0x6b2   :  { %v503_v37 = vld [vmem:[%s21843_s13 + $0xda8] sm:$0xff]  ;;  %v504_v53 = vld [vmem:[%s21843_s13 + $0xdb0] sm:$0xff]  ;;  %v505_v10 = vld [vmem:[%s21843_s13 + $0xdb8] sm:$0xff] }
 0x6b3   :  { %1013 = vst.msk [vmem:[%s21845_s15 + $0xd90] sm:$0xff] %vm578_vm1, %v500_v50  ;;  %1014 = vst.msk [vmem:[%s21845_s15 + $0xd98] sm:$0xff] %vm578_vm1, %v501_v42 }
 0x6b4   :  { %1015 = vst.msk [vmem:[%s21845_s15 + $0xda0] sm:$0xff] %vm578_vm1, %v502_v52 }
 0x6bb   :  { %v506_v55 = vld [vmem:[%s21843_s13 + $0xdc0] sm:$0xff]  ;;  %v507_v45 = vld [vmem:[%s21843_s13 + $0xdc8] sm:$0xff]  ;;  %v508_v51 = vld [vmem:[%s21843_s13 + $0xdd0] sm:$0xff] }
 0x6bc   :  { %1016 = vst.msk [vmem:[%s21845_s15 + $0xda8] sm:$0xff] %vm578_vm1, %v503_v37  ;;  %1017 = vst.msk [vmem:[%s21845_s15 + $0xdb0] sm:$0xff] %vm578_vm1, %v504_v53 }
 0x6bd   :  { %1018 = vst.msk [vmem:[%s21845_s15 + $0xdb8] sm:$0xff] %vm578_vm1, %v505_v10 }
 0x6c4   :  { %v509_v35 = vld [vmem:[%s21843_s13 + $0xdd8] sm:$0xff]  ;;  %v510_v41 = vld [vmem:[%s21843_s13 + $0xde0] sm:$0xff]  ;;  %v511_v46 = vld [vmem:[%s21843_s13 + $0xde8] sm:$0xff] }
 0x6c5   :  { %1019 = vst.msk [vmem:[%s21845_s15 + $0xdc0] sm:$0xff] %vm578_vm1, %v506_v55  ;;  %1020 = vst.msk [vmem:[%s21845_s15 + $0xdc8] sm:$0xff] %vm578_vm1, %v507_v45 }
 0x6c6   :  { %1021 = vst.msk [vmem:[%s21845_s15 + $0xdd0] sm:$0xff] %vm578_vm1, %v508_v51 }
 0x6cd   :  { %v512_v56 = vld [vmem:[%s21843_s13 + $0xdf0] sm:$0xff]  ;;  %v513_v49 = vld [vmem:[%s21843_s13 + $0xdf8] sm:$0xff]  ;;  %v514_v57 = vld [vmem:[%s21843_s13 + $0xe00] sm:$0xff] }
 0x6ce   :  { %1022 = vst.msk [vmem:[%s21845_s15 + $0xdd8] sm:$0xff] %vm578_vm1, %v509_v35  ;;  %1023 = vst.msk [vmem:[%s21845_s15 + $0xde0] sm:$0xff] %vm578_vm1, %v510_v41 }
 0x6cf   :  { %1024 = vst.msk [vmem:[%s21845_s15 + $0xde8] sm:$0xff] %vm578_vm1, %v511_v46 }
 0x6d6   :  { %v515_v58 = vld [vmem:[%s21843_s13 + $0xe08] sm:$0xff]  ;;  %v516_v59 = vld [vmem:[%s21843_s13 + $0xe10] sm:$0xff]  ;;  %v517_v60 = vld [vmem:[%s21843_s13 + $0xe18] sm:$0xff] }
 0x6d7   :  { %1025 = vst.msk [vmem:[%s21845_s15 + $0xdf0] sm:$0xff] %vm578_vm1, %v512_v56  ;;  %1026 = vst.msk [vmem:[%s21845_s15 + $0xdf8] sm:$0xff] %vm578_vm1, %v513_v49 }
 0x6d8   :  { %1027 = vst.msk [vmem:[%s21845_s15 + $0xe00] sm:$0xff] %vm578_vm1, %v514_v57  ;;  %v2016_v57 = vadd.f32 %v17725_v44, %v9453_v43 }
 0x6df   :  { %v518_v62 = vld [vmem:[%s21843_s13 + $0xe20] sm:$0xff]  ;;  %v519_v63 = vld [vmem:[%s21843_s13 + $0xe28] sm:$0xff]  ;;  %v520_v0 = vld [vmem:[%s21843_s13 + $0xe30] sm:$0xff] }
 0x6e0   :  { %1028 = vst.msk [vmem:[%s21845_s15 + $0xe08] sm:$0xff] %vm578_vm1, %v515_v58  ;;  %1029 = vst.msk [vmem:[%s21845_s15 + $0xe10] sm:$0xff] %vm578_vm1, %v516_v59  ;;  %v2011_v58 = vadd.f32 %v9453_v43, %v17750_v28  ;;  %v1928_v59 = vadd.f32 %v17899_v54, %v9445_v23 }
 0x6e1   :  { %1030 = vst.msk [vmem:[%s21845_s15 + $0xe18] sm:$0xff] %vm578_vm1, %v517_v60  ;;  %v1923_v60 = vadd.f32 %v9445_v23, %v17922_v47 }
 0x6e8   :  { %v521_v1 = vld [vmem:[%s21843_s13 + $0xe38] sm:$0xff]  ;;  %v522_v3 = vld [vmem:[%s21843_s13 + $0xe40] sm:$0xff]  ;;  %v523_v4 = vld [vmem:[%s21843_s13 + $0xe48] sm:$0xff] }
 0x6e9   :  { %1031 = vst.msk [vmem:[%s21845_s15 + $0xe20] sm:$0xff] %vm578_vm1, %v518_v62  ;;  %1032 = vst.msk [vmem:[%s21845_s15 + $0xe28] sm:$0xff] %vm578_vm1, %v519_v63 }
 0x6ea   :  { %1033 = vst.msk [vmem:[%s21845_s15 + $0xe30] sm:$0xff] %vm578_vm1, %v520_v0 }
 0x6f1   :  { %v524_v5 = vld [vmem:[%s21843_s13 + $0xe50] sm:$0xff]  ;;  %v525_v6 = vld [vmem:[%s21843_s13 + $0xe58] sm:$0xff]  ;;  %v526_v2 = vld [vmem:[%s21843_s13 + $0xe60] sm:$0xff] }
 0x6f2   :  { %1034 = vst.msk [vmem:[%s21845_s15 + $0xe38] sm:$0xff] %vm578_vm1, %v521_v1  ;;  %1035 = vst.msk [vmem:[%s21845_s15 + $0xe40] sm:$0xff] %vm578_vm1, %v522_v3 }
 0x6f3   :  { %1036 = vst.msk [vmem:[%s21845_s15 + $0xe48] sm:$0xff] %vm578_vm1, %v523_v4 }
 0x6fa   :  { %v527_v7 = vld [vmem:[%s21843_s13 + $0xe68] sm:$0xff]  ;;  %v528_v8 = vld [vmem:[%s21843_s13 + $0xe70] sm:$0xff]  ;;  %v529_v9 = vld [vmem:[%s21843_s13 + $0xe78] sm:$0xff] }
 0x6fb   :  { %1037 = vst.msk [vmem:[%s21845_s15 + $0xe50] sm:$0xff] %vm578_vm1, %v524_v5  ;;  %1038 = vst.msk [vmem:[%s21845_s15 + $0xe58] sm:$0xff] %vm578_vm1, %v525_v6 }
 0x6fc   :  { %1039 = vst.msk [vmem:[%s21845_s15 + $0xe60] sm:$0xff] %vm578_vm1, %v526_v2 }
 0x703   :  { %v530_v12 = vld [vmem:[%s21843_s13 + $0xe80] sm:$0xff]  ;;  %v531_v13 = vld [vmem:[%s21843_s13 + $0xe88] sm:$0xff]  ;;  %v532_v11 = vld [vmem:[%s21843_s13 + $0xe90] sm:$0xff] }
 0x704   :  { %1040 = vst.msk [vmem:[%s21845_s15 + $0xe68] sm:$0xff] %vm578_vm1, %v527_v7  ;;  %1041 = vst.msk [vmem:[%s21845_s15 + $0xe70] sm:$0xff] %vm578_vm1, %v528_v8 }
 0x705   :  { %1042 = vst.msk [vmem:[%s21845_s15 + $0xe78] sm:$0xff] %vm578_vm1, %v529_v9 }
 0x70c   :  { %v533_v36 = vld [vmem:[%s21843_s13 + $0xe98] sm:$0xff]  ;;  %v534_v14 = vld [vmem:[%s21843_s13 + $0xea0] sm:$0xff]  ;;  %v535_v16 = vld [vmem:[%s21843_s13 + $0xea8] sm:$0xff] }
 0x70d   :  { %1043 = vst.msk [vmem:[%s21845_s15 + $0xe80] sm:$0xff] %vm578_vm1, %v530_v12  ;;  %1044 = vst.msk [vmem:[%s21845_s15 + $0xe88] sm:$0xff] %vm578_vm1, %v531_v13  ;;  %v21999_v12 = vmov 0.0|0.0  }
 0x70e   :  { %1045 = vst.msk [vmem:[%s21845_s15 + $0xe90] sm:$0xff] %vm578_vm1, %v532_v11 }
 0x715   :  { %v536_v17 = vld [vmem:[%s21843_s13 + $0xeb0] sm:$0xff]  ;;  %v537_v19 = vld [vmem:[%s21843_s13 + $0xeb8] sm:$0xff]  ;;  %v538_v20 = vld [vmem:[%s21843_s13 + $0xec0] sm:$0xff] }
 0x716   :  { %1046 = vst.msk [vmem:[%s21845_s15 + $0xe98] sm:$0xff] %vm578_vm1, %v533_v36  ;;  %1047 = vst.msk [vmem:[%s21845_s15 + $0xea0] sm:$0xff] %vm578_vm1, %v534_v14 }
 0x717   :  { %1048 = vst.msk [vmem:[%s21845_s15 + $0xea8] sm:$0xff] %vm578_vm1, %v535_v16 }
 0x71e   :  { %v539_v22 = vld [vmem:[%s21843_s13 + $0xec8] sm:$0xff]  ;;  %v540_v25 = vld [vmem:[%s21843_s13 + $0xed0] sm:$0xff]  ;;  %v541_v26 = vld [vmem:[%s21843_s13 + $0xed8] sm:$0xff] }
 0x71f   :  { %1049 = vst.msk [vmem:[%s21845_s15 + $0xeb0] sm:$0xff] %vm578_vm1, %v536_v17  ;;  %1050 = vst.msk [vmem:[%s21845_s15 + $0xeb8] sm:$0xff] %vm578_vm1, %v537_v19 }
 0x720   :  { %1051 = vst.msk [vmem:[%s21845_s15 + $0xec0] sm:$0xff] %vm578_vm1, %v538_v20 }
 0x727   :  { %v542_v29 = vld [vmem:[%s21843_s13 + $0xee0] sm:$0xff]  ;;  %v543_v30 = vld [vmem:[%s21843_s13 + $0xee8] sm:$0xff]  ;;  %v544_v31 = vld [vmem:[%s21843_s13 + $0xef0] sm:$0xff] }
 0x728   :  { %1052 = vst.msk [vmem:[%s21845_s15 + $0xec8] sm:$0xff] %vm578_vm1, %v539_v22  ;;  %1053 = vst.msk [vmem:[%s21845_s15 + $0xed0] sm:$0xff] %vm578_vm1, %v540_v25 }
 0x729   :  { %1054 = vst.msk [vmem:[%s21845_s15 + $0xed8] sm:$0xff] %vm578_vm1, %v541_v26 }
 0x730   :  { %v545_v32 = vld [vmem:[%s21843_s13 + $0xef8] sm:$0xff]  ;;  %v546_v15 = vld [vmem:[%s21843_s13 + $0xf00] sm:$0xff]  ;;  %v547_v33 = vld [vmem:[%s21843_s13 + $0xf08] sm:$0xff] }
 0x731   :  { %1055 = vst.msk [vmem:[%s21845_s15 + $0xee0] sm:$0xff] %vm578_vm1, %v542_v29  ;;  %1056 = vst.msk [vmem:[%s21845_s15 + $0xee8] sm:$0xff] %vm578_vm1, %v543_v30 }
 0x732   :  { %1057 = vst.msk [vmem:[%s21845_s15 + $0xef0] sm:$0xff] %vm578_vm1, %v544_v31 }
 0x739   :  { %v548_v34 = vld [vmem:[%s21843_s13 + $0xf10] sm:$0xff]  ;;  %v549_v38 = vld [vmem:[%s21843_s13 + $0xf18] sm:$0xff]  ;;  %v550_v18 = vld [vmem:[%s21843_s13 + $0xf20] sm:$0xff] }
 0x73a   :  { %1058 = vst.msk [vmem:[%s21845_s15 + $0xef8] sm:$0xff] %vm578_vm1, %v545_v32  ;;  %1059 = vst.msk [vmem:[%s21845_s15 + $0xf00] sm:$0xff] %vm578_vm1, %v546_v15 }
 0x73b   :  { %1060 = vst.msk [vmem:[%s21845_s15 + $0xf08] sm:$0xff] %vm578_vm1, %v547_v33 }
 0x742   :  { %v551_v39 = vld [vmem:[%s21843_s13 + $0xf28] sm:$0xff]  ;;  %v552_v40 = vld [vmem:[%s21843_s13 + $0xf30] sm:$0xff]  ;;  %v553_v24 = vld [vmem:[%s21843_s13 + $0xf38] sm:$0xff] }
 0x743   :  { %1061 = vst.msk [vmem:[%s21845_s15 + $0xf10] sm:$0xff] %vm578_vm1, %v548_v34  ;;  %1062 = vst.msk [vmem:[%s21845_s15 + $0xf18] sm:$0xff] %vm578_vm1, %v549_v38 }
 0x744   :  { %1063 = vst.msk [vmem:[%s21845_s15 + $0xf20] sm:$0xff] %vm578_vm1, %v550_v18 }
 0x74b   :  { %v554_v48 = vld [vmem:[%s21843_s13 + $0xf40] sm:$0xff]  ;;  %v555_v50 = vld [vmem:[%s21843_s13 + $0xf48] sm:$0xff]  ;;  %v556_v42 = vld [vmem:[%s21843_s13 + $0xf50] sm:$0xff] }
 0x74c   :  { %1064 = vst.msk [vmem:[%s21845_s15 + $0xf28] sm:$0xff] %vm578_vm1, %v551_v39  ;;  %1065 = vst.msk [vmem:[%s21845_s15 + $0xf30] sm:$0xff] %vm578_vm1, %v552_v40 }
 0x74d   :  { %1066 = vst.msk [vmem:[%s21845_s15 + $0xf38] sm:$0xff] %vm578_vm1, %v553_v24 }
 0x754   :  { %v557_v52 = vld [vmem:[%s21843_s13 + $0xf58] sm:$0xff]  ;;  %v558_v37 = vld [vmem:[%s21843_s13 + $0xf60] sm:$0xff]  ;;  %v559_v53 = vld [vmem:[%s21843_s13 + $0xf68] sm:$0xff] }
 0x755   :  { %1067 = vst.msk [vmem:[%s21845_s15 + $0xf40] sm:$0xff] %vm578_vm1, %v554_v48  ;;  %1068 = vst.msk [vmem:[%s21845_s15 + $0xf48] sm:$0xff] %vm578_vm1, %v555_v50 }
 0x756   :  { %1069 = vst.msk [vmem:[%s21845_s15 + $0xf50] sm:$0xff] %vm578_vm1, %v556_v42 }
 0x75d   :  { %v560_v10 = vld [vmem:[%s21843_s13 + $0xf70] sm:$0xff]  ;;  %v561_v55 = vld [vmem:[%s21843_s13 + $0xf78] sm:$0xff]  ;;  %v562_v45 = vld [vmem:[%s21843_s13 + $0xf80] sm:$0xff] }
 0x75e   :  { %1070 = vst.msk [vmem:[%s21845_s15 + $0xf58] sm:$0xff] %vm578_vm1, %v557_v52  ;;  %1071 = vst.msk [vmem:[%s21845_s15 + $0xf60] sm:$0xff] %vm578_vm1, %v558_v37 }
 0x75f   :  { %1072 = vst.msk [vmem:[%s21845_s15 + $0xf68] sm:$0xff] %vm578_vm1, %v559_v53 }
 0x766   :  { %v563_v51 = vld [vmem:[%s21843_s13 + $0xf88] sm:$0xff]  ;;  %v564_v35 = vld [vmem:[%s21843_s13 + $0xf90] sm:$0xff]  ;;  %v565_v41 = vld [vmem:[%s21843_s13 + $0xf98] sm:$0xff] }
 0x767   :  { %1073 = vst.msk [vmem:[%s21845_s15 + $0xf70] sm:$0xff] %vm578_vm1, %v560_v10  ;;  %1074 = vst.msk [vmem:[%s21845_s15 + $0xf78] sm:$0xff] %vm578_vm1, %v561_v55 }
 0x768   :  { %1075 = vst.msk [vmem:[%s21845_s15 + $0xf80] sm:$0xff] %vm578_vm1, %v562_v45 }
 0x76f   :  { %v566_v46 = vld [vmem:[%s21843_s13 + $0xfa0] sm:$0xff]  ;;  %v567_v56 = vld [vmem:[%s21843_s13 + $0xfa8] sm:$0xff]  ;;  %v568_v49 = vld [vmem:[%s21843_s13 + $0xfb0] sm:$0xff] }
 0x770   :  { %1076 = vst.msk [vmem:[%s21845_s15 + $0xf88] sm:$0xff] %vm578_vm1, %v563_v51  ;;  %1077 = vst.msk [vmem:[%s21845_s15 + $0xf90] sm:$0xff] %vm578_vm1, %v564_v35 }
 0x771   :  { %1078 = vst.msk [vmem:[%s21845_s15 + $0xf98] sm:$0xff] %vm578_vm1, %v565_v41 }
 0x778   :  { %v569_v62 = vld [vmem:[%s21843_s13 + $0xfb8] sm:$0xff]  ;;  %v570_v63 = vld [vmem:[%s21843_s13 + $0xfc0] sm:$0xff]  ;;  %v571_v0 = vld [vmem:[%s21843_s13 + $0xfc8] sm:$0xff] }
 0x779   :  { %1079 = vst.msk [vmem:[%s21845_s15 + $0xfa0] sm:$0xff] %vm578_vm1, %v566_v46  ;;  %1080 = vst.msk [vmem:[%s21845_s15 + $0xfa8] sm:$0xff] %vm578_vm1, %v567_v56 }
 0x77a   :  { %1081 = vst.msk [vmem:[%s21845_s15 + $0xfb0] sm:$0xff] %vm578_vm1, %v568_v49 }
 0x781   :  { %v572_v44 = vld [vmem:[%s21843_s13 + $0xfd0] sm:$0xff]  ;;  %v573_v28 = vld [vmem:[%s21843_s13 + $0xfd8] sm:$0xff]  ;;  %v574_v54 = vld [vmem:[%s21843_s13 + $0xfe0] sm:$0xff] }
 0x782   :  { %1082 = vst.msk [vmem:[%s21845_s15 + $0xfb8] sm:$0xff] %vm578_vm1, %v569_v62  ;;  %1083 = vst.msk [vmem:[%s21845_s15 + $0xfc0] sm:$0xff] %vm578_vm1, %v570_v63 }
 0x783   :  { %1084 = vst.msk [vmem:[%s21845_s15 + $0xfc8] sm:$0xff] %vm578_vm1, %v571_v0 }
 0x78a   :  { %v575_v47 = vld [vmem:[%s21843_s13 + $0xfe8] sm:$0xff]  ;;  %v576_v1 = vld [vmem:[%s21843_s13 + $0xff0] sm:$0xff]  ;;  %v577_v3 = vld [vmem:[%s21843_s13 + $0xff8] sm:$0xff] }
 0x78b   :  { %1085 = vst.msk [vmem:[%s21845_s15 + $0xfd0] sm:$0xff] %vm578_vm1, %v572_v44  ;;  %1086 = vst.msk [vmem:[%s21845_s15 + $0xfd8] sm:$0xff] %vm578_vm1, %v573_v28 }
 0x78c   :  { %1087 = vst.msk [vmem:[%s21845_s15 + $0xfe0] sm:$0xff] %vm578_vm1, %v574_v54  ;;  %1088 = vst.msk [vmem:[%s21845_s15 + $0xfe8] sm:$0xff] %vm578_vm1, %v575_v47 }
 0x78d   :  { %1089 = vst.msk [vmem:[%s21845_s15 + $0xff0] sm:$0xff] %vm578_vm1, %v576_v1  ;;  %1090 = vst.msk [vmem:[%s21845_s15 + $0xff8] sm:$0xff] %vm578_vm1, %v577_v3 }
 0x78e   :  { %2020 = vst.msk [vmem:[%s18801_s22] sm:$0xff] %vm578_vm1, %v1923_v60  ;;  %9456 = vst.msk [vmem:[%s18801_s22 + $0x400] sm:$0xff] %vm578_vm1, %v2011_v58 }
 0x78f   :  { %9457 = vst.msk [vmem:[%s18801_s22 + $0x80] sm:$0xff] %vm578_vm1, %v1928_v59  ;;  %9458 = vst.msk [vmem:[%s18801_s22 + $0x480] sm:$0xff] %vm578_vm1, %v2016_v57  ;;  %v9437_v59 = vld [vmem:[%s21835_s5] ss:$0 sm:$0xff] }
 0x790   :  { %v1835_v44 = vadd.f32 %v9437_v59, %v17748_v27  ;;  %v1840_v28 = vadd.f32 %v17723_v21, %v9437_v59 }
 0x796   :  { %v2030_v5 = vld [vmem:[%s21845_s15] sm:$0xff]  ;;  %v2031_v6 = vld [vmem:[%s21845_s15 + $0x8] sm:$0xff]  ;;  %v2032_v13 = vld [vmem:[%s21845_s15 + $0x10] sm:$0xff] }
 0x797   :  { %v2046_v2 = vld [vmem:[%s21845_s15 + $0x80] sm:$0xff]  ;;  %v12925_v7 = vpack.c.bf16 %v2031_v6, %v2030_v5  ;;  %v2047_v8 = vld [vmem:[%s21845_s15 + $0x88] sm:$0xff]  ;;  %v2033_v11 = vld [vmem:[%s21845_s15 + $0x18] sm:$0xff] }
 0x798   :  { %v12957_v9 = vpack.c.bf16 %v2047_v8, %v2046_v2  ;;  %v2048_v36 = vld [vmem:[%s21845_s15 + $0x90] sm:$0xff]  ;;  %v2049_v14 = vld [vmem:[%s21845_s15 + $0x98] sm:$0xff]  ;;  %v12929_v16 = vpack.c.bf16 %v2033_v11, %v2032_v13  ;;  %v2034_v19 = vld [vmem:[%s21845_s15 + $0x20] sm:$0xff] }
 0x799   :  { %12927 = vmatpush3.bf16.xpose.msk.msra.mxu1 %vm18846_vm5, %v12925_v7  ;;  %v12961_v17 = vpack.c.bf16 %v2049_v14, %v2048_v36  ;;  %v2035_v20 = vld [vmem:[%s21845_s15 + $0x28] sm:$0xff]  ;;  %v2050_v22 = vld [vmem:[%s21845_s15 + $0xa0] sm:$0xff]  ;;  %v2036_v30 = vld [vmem:[%s21845_s15 + $0x30] sm:$0xff] }
 0x79a   :  { %12959 = vmatpush3.bf16.xpose.msk.msra.mxu0 %vm18846_vm5, %v12957_v9  ;;  %12928 = vmatprep.subr.bf16.mxu1 %v21999_v12  ;;  %v2051_v25 = vld [vmem:[%s21845_s15 + $0xa8] sm:$0xff]  ;;  %v12933_v26 = vpack.c.bf16 %v2035_v20, %v2034_v19  ;;  %v2037_v31 = vld [vmem:[%s21845_s15 + $0x38] sm:$0xff]  ;;  %v2052_v32 = vld [vmem:[%s21845_s15 + $0xb0] sm:$0xff] }
 0x79b   :  { %12960 = vmatprep.subr.bf16.mxu0 %v21999_v12  ;;  %v12965_v29 = vpack.c.bf16 %v2051_v25, %v2050_v22  ;;  %v2053_v15 = vld [vmem:[%s21845_s15 + $0xb8] sm:$0xff]  ;;  %v12937_v33 = vpack.c.bf16 %v2037_v31, %v2036_v30  ;;  %v2038_v38 = vld [vmem:[%s21845_s15 + $0x40] sm:$0xff]  ;;  %v2039_v18 = vld [vmem:[%s21845_s15 + $0x48] sm:$0xff] }
 0x79c   :  { %v12969_v34 = vpack.c.bf16 %v2053_v15, %v2052_v32  ;;  %v2054_v39 = vld [vmem:[%s21845_s15 + $0xc0] sm:$0xff]  ;;  %v2055_v40 = vld [vmem:[%s21845_s15 + $0xc8] sm:$0xff]  ;;  %v12941_v24 = vpack.c.bf16 %v2039_v18, %v2038_v38  ;;  %v2040_v23 = vld [vmem:[%s21845_s15 + $0x50] sm:$0xff] }
 0x79d   :  { %v12973_v43 = vpack.c.bf16 %v2055_v40, %v2054_v39  ;;  %v2041_v48 = vld [vmem:[%s21845_s15 + $0x58] sm:$0xff]  ;;  %v2056_v50 = vld [vmem:[%s21845_s15 + $0xd0] sm:$0xff]  ;;  %v2042_v53 = vld [vmem:[%s21845_s15 + $0x60] sm:$0xff] }
 0x79e   :  { %v2057_v42 = vld [vmem:[%s21845_s15 + $0xd8] sm:$0xff]  ;;  %v12945_v52 = vpack.c.bf16 %v2041_v48, %v2040_v23  ;;  %v2043_v10 = vld [vmem:[%s21845_s15 + $0x68] sm:$0xff]  ;;  %v2058_v55 = vld [vmem:[%s21845_s15 + $0xe0] sm:$0xff] }
 0x79f   :  { %v12977_v37 = vpack.c.bf16 %v2057_v42, %v2056_v50  ;;  %v2059_v45 = vld [vmem:[%s21845_s15 + $0xe8] sm:$0xff]  ;;  %v12949_v51 = vpack.c.bf16 %v2043_v10, %v2042_v53  ;;  %v2044_v41 = vld [vmem:[%s21845_s15 + $0x70] sm:$0xff]  ;;  %v2045_v46 = vld [vmem:[%s21845_s15 + $0x78] sm:$0xff] }
 0x7a0   :  { %v12981_v35 = vpack.c.bf16 %v2059_v45, %v2058_v55  ;;  %v2060_v56 = vld [vmem:[%s21845_s15 + $0xf0] sm:$0xff]  ;;  %v2061_v49 = vld [vmem:[%s21845_s15 + $0xf8] sm:$0xff]  ;;  %v12953_v57 = vpack.c.bf16 %v2045_v46, %v2044_v41  ;;  %v9459_v60 = vld [vmem:[%s21845_s15 + $0x400] sm:$0xff]  ;;  %v1740_v55 = vstv %s18596_s16 }
 0x7a1   :  { %12931 = vmatpush3.bf16.xpose.msk.msra.mxu1 %vm18846_vm5, %v12929_v16  ;;  %v12985_v58 = vpack.c.bf16 %v2061_v49, %v2060_v56  ;;  %v9460_v62 = vld [vmem:[%s21845_s15 + $0x408] sm:$0xff]  ;;  %v9475_v63 = vld [vmem:[%s21845_s15 + $0x480] sm:$0xff]  ;;  %v9461_v1 = vld [vmem:[%s21845_s15 + $0x410] sm:$0xff]  ;;  %v1744_v46 = vstv %s1743_s26  ;;  %v14308_v49 = vmov -1e+09  }
 0x7a2   :  { %12963 = vmatpush3.bf16.xpose.msk.msra.mxu0 %vm18846_vm5, %v12961_v17  ;;  %12932 = vmatprep.subr.bf16.mxu1 %v21999_v12  ;;  %v9476_v0 = vld [vmem:[%s21845_s15 + $0x488] sm:$0xff]  ;;  %v12989_v54 = vpack.c.bf16 %v9460_v62, %v9459_v60  ;;  %v9462_v3 = vld [vmem:[%s21845_s15 + $0x418] sm:$0xff]  ;;  %v9477_v27 = vld [vmem:[%s21845_s15 + $0x490] sm:$0xff] }
 0x7a3   :  { %12964 = vmatprep.subr.bf16.mxu0 %v21999_v12  ;;  %v13013_v47 = vpack.c.bf16 %v9476_v0, %v9475_v63  ;;  %v9478_v21 = vld [vmem:[%s21845_s15 + $0x498] sm:$0xff]  ;;  %v12992_v5 = vpack.c.bf16 %v9462_v3, %v9461_v1  ;;  %v9463_v2 = vld [vmem:[%s21845_s15 + $0x420] sm:$0xff]  ;;  %v9464_v7 = vld [vmem:[%s21845_s15 + $0x428] sm:$0xff] }
 0x7a4   :  { %v13016_v6 = vpack.c.bf16 %v9478_v21, %v9477_v27  ;;  %v9479_v8 = vld [vmem:[%s21845_s15 + $0x4a0] sm:$0xff]  ;;  %v9480_v9 = vld [vmem:[%s21845_s15 + $0x4a8] sm:$0xff]  ;;  %v12995_v13 = vpack.c.bf16 %v9464_v7, %v9463_v2  ;;  %v9465_v36 = vld [vmem:[%s21845_s15 + $0x430] sm:$0xff] }
 0x7a5   :  { %v13019_v11 = vpack.c.bf16 %v9480_v9, %v9479_v8  ;;  %v9466_v14 = vld [vmem:[%s21845_s15 + $0x438] sm:$0xff]  ;;  %v9481_v16 = vld [vmem:[%s21845_s15 + $0x4b0] sm:$0xff]  ;;  %v9467_v22 = vld [vmem:[%s21845_s15 + $0x440] sm:$0xff] }
 0x7a6   :  { %v9482_v17 = vld [vmem:[%s21845_s15 + $0x4b8] sm:$0xff]  ;;  %v12998_v19 = vpack.c.bf16 %v9466_v14, %v9465_v36  ;;  %v9468_v25 = vld [vmem:[%s21845_s15 + $0x448] sm:$0xff]  ;;  %v9469_v32 = vld [vmem:[%s21845_s15 + $0x450] sm:$0xff] }
 0x7a7   :  { %v13022_v20 = vpack.c.bf16 %v9482_v17, %v9481_v16  ;;  %v13001_v30 = vpack.c.bf16 %v9468_v25, %v9467_v22  ;;  %v9470_v15 = vld [vmem:[%s21845_s15 + $0x458] sm:$0xff]  ;;  %v9471_v39 = vld [vmem:[%s21845_s15 + $0x460] sm:$0xff]  ;;  %v9472_v40 = vld [vmem:[%s21845_s15 + $0x468] sm:$0xff] }
 0x7a8   :  { %v13004_v38 = vpack.c.bf16 %v9470_v15, %v9469_v32  ;;  %v13007_v23 = vpack.c.bf16 %v9472_v40, %v9471_v39  ;;  %v9473_v50 = vld [vmem:[%s21845_s15 + $0x470] sm:$0xff]  ;;  %v9474_v42 = vld [vmem:[%s21845_s15 + $0x478] sm:$0xff]  ;;  %v22000_v45 = vld [vmem:[#allocation9_spill] sm:$0xff] }
 0x7a9   :  { %12935 = vmatpush3.bf16.xpose.msk.msra.mxu1 %vm18846_vm5, %v12933_v26  ;;  %v9483_v26 = vld [vmem:[%s21845_s15 + $0x4c0] sm:$0xff]  ;;  %v13010_v53 = vpack.c.bf16 %v9474_v42, %v9473_v50  ;;  %v9526_v2 = vld [vmem:[%s21834_s4 + $0x28] sm:$0xff]  ;;  %v9527_v14 = vld [vmem:[%s21834_s4 + $0x30] sm:$0xff] }
 0x7aa   :  { %12967 = vmatpush3.bf16.xpose.msk.msra.mxu0 %vm18846_vm5, %v12965_v29  ;;  %12936 = vmatprep.subr.bf16.mxu1 %v21999_v12  ;;  %v9484_v29 = vld [vmem:[%s21845_s15 + $0x4c8] sm:$0xff]  ;;  %v9533_v7 = vld [vmem:[%s21834_s4 + $0xa0] sm:$0xff]  ;;  %v9528_v16 = vld [vmem:[%s21834_s4 + $0x38] sm:$0xff] }
 0x7ab   :  { %12968 = vmatprep.subr.bf16.mxu0 %v21999_v12  ;;  %v13025_v31 = vpack.c.bf16 %v9484_v29, %v9483_v26  ;;  %v9534_v9 = vld [vmem:[%s21834_s4 + $0xa8] sm:$0xff]  ;;  %v13040_v29 = vpack.c.bf16 %v9528_v16, %v9527_v14  ;;  %v22002_v15 = vld [vmem:[#allocation10_spill] sm:$0xff]  ;;  %v22003_v39 = vld [vmem:[#allocation11_spill] sm:$0xff] }
 0x7b1   :  { %12939 = vmatpush3.bf16.xpose.msk.msra.mxu1 %vm18846_vm5, %v12937_v33  ;;  %v9485_v33 = vld [vmem:[%s21845_s15 + $0x4d0] sm:$0xff] }
 0x7b2   :  { %12971 = vmatpush3.bf16.xpose.msk.msra.mxu0 %vm18846_vm5, %v12969_v34  ;;  %12940 = vmatprep.subr.bf16.mxu1 %v21999_v12  ;;  %v9486_v34 = vld [vmem:[%s21845_s15 + $0x4d8] sm:$0xff] }
 0x7b3   :  { %12972 = vmatprep.subr.bf16.mxu0 %v21999_v12  ;;  %v13028_v18 = vpack.c.bf16 %v9486_v34, %v9485_v33  ;;  %v9543_v34 = vld [vmem:[%s21834_s4 + $0x130] sm:$0xff] }
 0x7b9   :  { %12943 = vmatpush3.bf16.xpose.msk.msra.mxu1 %vm18846_vm5, %v12941_v24  ;;  %v9487_v24 = vld [vmem:[%s21845_s15 + $0x4e0] sm:$0xff] }
 0x7ba   :  { %12975 = vmatpush3.bf16.xpose.msk.msra.mxu0 %vm18846_vm5, %v12973_v43  ;;  %12944 = vmatprep.subr.bf16.mxu1 %v21999_v12  ;;  %v9488_v43 = vld [vmem:[%s21845_s15 + $0x4e8] sm:$0xff] }
 0x7bb   :  { %12976 = vmatprep.subr.bf16.mxu0 %v21999_v12  ;;  %v13031_v48 = vpack.c.bf16 %v9488_v43, %v9487_v24 }
 0x7c1   :  { %12947 = vmatpush3.bf16.xpose.msk.msra.mxu1 %vm18846_vm5, %v12945_v52  ;;  %v9489_v52 = vld [vmem:[%s21845_s15 + $0x4f0] sm:$0xff] }
 0x7c2   :  { %12979 = vmatpush3.bf16.xpose.msk.msra.mxu0 %vm18846_vm5, %v12977_v37  ;;  %12948 = vmatprep.subr.bf16.mxu1 %v21999_v12  ;;  %v9490_v37 = vld [vmem:[%s21845_s15 + $0x4f8] sm:$0xff] }
 0x7c3   :  { %12980 = vmatprep.subr.bf16.mxu0 %v21999_v12  ;;  %v13034_v10 = vpack.c.bf16 %v9490_v37, %v9489_v52 }
 0x7c9   :  { %12951 = vmatpush3.bf16.xpose.msk.msra.mxu1 %vm18846_vm5, %v12949_v51  ;;  %v1741_v51 = vadd.s32 %v1740_v55, %v22000_v45  ;;  %v9546_v55 = vld [vmem:[%s21835_s5 + $0x9] ss:$0 sm:$0xff] }
 0x7ca   :  { %12983 = vmatpush3.bf16.xpose.msk.msra.mxu0 %vm18846_vm5, %v12981_v35  ;;  %12952 = vmatprep.subr.bf16.mxu1 %v21999_v12  ;;  %v22001_v35 = vld [vmem:[#allocation8_spill] sm:$0xff] }
 0x7cb   :  { %12984 = vmatprep.subr.bf16.mxu0 %v21999_v12  ;;  %v1742_v41 = vsub.s32 %v1741_v51, %v22001_v35  ;;  %vm1745_vm6 = vcmp.lt.s32.totalorder %v22001_v35, %v1744_v46 }
 0x7cd   :  { %vm1746_vm7 = vcmp.ge.s32.totalorder %v1742_v41, 0  ;;  %vm1748_vm9 = vcmp.le.s32.totalorder %v1742_v41, 1000 }
 0x7ce   :  { %vm1747_vm8 = vmand %vm1745_vm6, %vm1746_vm7 }
 0x7cf   :  { %vm1749_vm10 = vmand %vm1747_vm8, %vm1748_vm9 }
 0x7d1   :  { %12955 = vmatpush3.bf16.xpose.msk.msra.mxu1 %vm18846_vm5, %v12953_v57  ;;  %v19120_v57 = vsel %vm1749_vm10, 0.0, %v14308_v49 }
 0x7d2   :  { %12987 = vmatpush3.bf16.xpose.msk.msra.mxu0 %vm18846_vm5, %v12985_v58  ;;  %12988 = vmatprep.subr.bf16.mxu1 %v21999_v12 }
 0x7d3   :  { %13012 = vmatprep.subr.bf16.mxu0 %v21999_v12 }
 0x7d8   :  { %11386 = vmatmul.mubr.msk.f32.vlgmr.msra.gmra.mrb[8].mxu1 %vm578_vm1, %v1835_v44 }
 0x7d9   :  { %11421 = vmatmul.mubr.msk.f32.vlgmr.msra.gmra.mrb[6].mxu0 %vm578_vm1, %v1840_v28  ;;  %12990 = vmatpush3.bf16.msra.mxu1 %v12989_v54 }
 0x7da   :  { %13014 = vmatpush3.bf16.msra.mxu0 %v13013_v47  ;;  %12991 = vmatprep.subr.bf16.mxu1 %v21999_v12 }
 0x7db   :  { %13015 = vmatprep.subr.bf16.mxu0 %v21999_v12  ;;  %11455 = vmatprep.mubr.msk.f32.mxu1 %vm14307_vm4, %v21996_v61 }
 0x7dc   :  { %11490 = vmatprep.mubr.msk.f32.mxu0 %vm14307_vm4, %v21996_v61 }
 0x7dd   :  { %12993 = vmatpush3.bf16.msra.mxu1 %v12992_v5 }
 0x7de   :  { %13017 = vmatpush3.bf16.msra.mxu0 %v13016_v6  ;;  %12994 = vmatprep.subr.bf16.mxu1 %v21999_v12  ;;  %v9525_v6 = vld [vmem:[%s21834_s4 + $0x20] sm:$0xff] }
 0x7df   :  { %13018 = vmatprep.subr.bf16.mxu0 %v21999_v12  ;;  %v13036_v8 = vpack.c.bf16 %v9526_v2, %v9525_v6 }
 0x7e1   :  { %12996 = vmatpush3.bf16.msra.mxu1 %v12995_v13  ;;  %v13044_v13 = vpack.c.bf16 %v9534_v9, %v9533_v7 }
 0x7e2   :  { %13020 = vmatpush3.bf16.msra.mxu0 %v13019_v11  ;;  %12997 = vmatprep.subr.bf16.mxu1 %v21999_v12 }
 0x7e3   :  { %13021 = vmatprep.subr.bf16.mxu0 %v21999_v12 }
 0x7e5   :  { %12999 = vmatpush3.bf16.msra.mxu1 %v12998_v19  ;;  %v9535_v19 = vld [vmem:[%s21834_s4 + $0xb0] sm:$0xff] }
 0x7e6   :  { %13023 = vmatpush3.bf16.msra.mxu0 %v13022_v20  ;;  %13000 = vmatprep.subr.bf16.mxu1 %v21999_v12  ;;  %v9536_v20 = vld [vmem:[%s21834_s4 + $0xb8] sm:$0xff] }
 0x7e7   :  { %13024 = vmatprep.subr.bf16.mxu0 %v21999_v12  ;;  %v13048_v32 = vpack.c.bf16 %v9536_v20, %v9535_v19 }
 0x7e9   :  { %13002 = vmatpush3.bf16.msra.mxu1 %v13001_v30  ;;  %v9541_v30 = vld [vmem:[%s21834_s4 + $0x120] sm:$0xff] }
 0x7ea   :  { %13026 = vmatpush3.bf16.msra.mxu0 %v13025_v31  ;;  %13003 = vmatprep.subr.bf16.mxu1 %v21999_v12  ;;  %v9542_v31 = vld [vmem:[%s21834_s4 + $0x128] sm:$0xff] }
 0x7eb   :  { %13027 = vmatprep.subr.bf16.mxu0 %v21999_v12  ;;  %v13052_v33 = vpack.c.bf16 %v9542_v31, %v9541_v30 }
 0x7ed   :  { %13005 = vmatpush3.bf16.msra.mxu1 %v13004_v38  ;;  %v9544_v38 = vld [vmem:[%s21834_s4 + $0x138] sm:$0xff] }
 0x7ee   :  { %13029 = vmatpush3.bf16.msra.mxu0 %v13028_v18  ;;  %13006 = vmatprep.subr.bf16.mxu1 %v21999_v12  ;;  %v13056_v18 = vpack.c.bf16 %v9544_v38, %v9543_v34 }
 0x7ef   :  { %13030 = vmatprep.subr.bf16.mxu0 %v21999_v12 }
 0x7f1   :  { %13008 = vmatpush3.bf16.msra.mxu1 %v13007_v23 }
 0x7f2   :  { %13032 = vmatpush3.bf16.msra.mxu0 %v13031_v48  ;;  %13009 = vmatprep.subr.bf16.mxu1 %v21999_v12  ;;  %v9538_v48 = vld [vmem:[%s21835_s5 + $0x5] ss:$0 sm:$0xff] }
 0x7f3   :  { %13033 = vmatprep.subr.bf16.mxu0 %v21999_v12 }
 0x7f5   :  { %13011 = vmatpush3.bf16.msra.mxu1 %v13010_v53 }
 0x7f6   :  { %13035 = vmatpush3.bf16.msra.mxu0 %v13034_v10  ;;  %13037 = vmatprep.subr.bf16.mxu1 %v13036_v8 }
 0x7f7   :  { %13045 = vmatprep.subr.bf16.mxu0 %v13044_v13 }
 0x8ab   :  { %v2212_v56 = vpop.f32.mrb[8].mxu1 }
 0x8ac   :  { %v2337_v58 = vmul.f32 0.35355338, %v2212_v56  ;;  %v2333_v59 = vpop.f32.mrb[6].mxu0  ;;  %v11387_v60 = vpop.f32.mrb[9].mxu1 }
 0x8ad   :  { %v2338_v62 = vmul.f32 0.35355338, %v2333_v59  ;;  %v11422_v63 = vpop.f32.mrb[7].mxu0 }
 0x8ae   :  { %v2339_v0 = vadd.f32 %v2337_v58, %v19120_v57 }
 0x8af   :  { %v2340_v44 = vadd.f32 %v2338_v62, %v19120_v57 }
 0x8b0   :  { %2341 = vmax.xlane.f32.xlu1 %v2339_v0 }
 0x8b1   :  { %2343 = vmax.xlane.f32.xlu0 %v2340_v44 }
 0x93d   :  { %v2342_v28 = vpop.xlane.xlu1 %2341 }
 0x93e   :  { %v2344_v54 = vpop.xlane.xlu0 %2343  ;;  %v2345_v47 = vsub.f32 %v2339_v0, %v2342_v28 }
 0x93f   :  { %v2346_v1 = vsub.f32 %v2340_v44, %v2344_v54 }
 0x940   :  { %v2347_v3 = vmul.f32 1.442695, %v2345_v47 }
 0x941   :  { %v2349_v27 = vmul.f32 1.442695, %v2346_v1 }
 0x942   :  { %14136 = vpow2.f32 %v2347_v3 }
 0x943   :  { %14138 = vpow2.f32 %v2349_v27 }
 0x94c   :  { %v14137_v21 = vpop.eup %14136 }
 0x94d   :  { %v14139_v5 = vpop.eup %14138  ;;  %2351 = vadd.xlane.f32.xlu1 %v14137_v21 }
 0x94e   :  { %2353 = vadd.xlane.f32.xlu0 %v14139_v5 }
 0x9da   :  { %v2352_v11 = vpop.xlane.xlu1 %2351 }
 0x9db   :  { %v2354_v36 = vpop.xlane.xlu0 %2353  ;;  %14140 = vrcp.f32 %v2352_v11 }
 0x9dc   :  { %14142 = vrcp.f32 %v2354_v36 }
 0x9e5   :  { %v14141_v17 = vpop.eup %14140 }
 0x9e6   :  { %v14143_v22 = vpop.eup %14142  ;;  %v2357_v25 = vmul.f32 %v14141_v17, %v14137_v21 }
 0x9e7   :  { %v2358_v26 = vmul.f32 %v14143_v22, %v14139_v5 }
 0x9e8   :  { %11456 = vmatmul.mubr.f32.vlgmr.msra.gmra.mrb[10].mxu1 %v2357_v25 }
 0x9e9   :  { %11491 = vmatmul.mubr.f32.vlgmr.msra.gmra.mrb[8].mxu0 %v2358_v26  ;;  %13039 = vmatpush3.bf16.msra.mxu1 %v13036_v8 }
 0x9ea   :  { %13047 = vmatpush3.bf16.msra.mxu0 %v13044_v13  ;;  %11501 = vmatprep.mubr.msk.f32.mxu1 %vm1473_vm0, %v22002_v15 }
 0x9eb   :  { %11512 = vmatprep.mubr.msk.f32.mxu0 %vm1473_vm0, %v22002_v15  ;;  %13041 = vmatprep.subr.bf16.mxu1 %v13040_v29 }
 0x9ec   :  { %13049 = vmatprep.subr.bf16.mxu0 %v13048_v32 }
 0x9ed   :  { %13043 = vmatpush3.bf16.msra.mxu1 %v13040_v29 }
 0x9ee   :  { %13051 = vmatpush3.bf16.msra.mxu0 %v13048_v32  ;;  %13053 = vmatprep.subr.bf16.mxu1 %v13052_v33 }
 0x9ef   :  { %13060 = vmatprep.subr.bf16.mxu0 %v21999_v12 }
 0x9f0   :  { %11502 = vmatmul.mubr.msk.f32.vlgmr.msra.gmra.mrb[12].mxu1 %vm1473_vm0, %v22003_v39 }
 0x9f1   :  { %11513 = vmatmul.mubr.msk.f32.vlgmr.msra.gmra.mrb[10].mxu0 %vm1473_vm0, %v22003_v39  ;;  %13055 = vmatpush3.bf16.msra.mxu1 %v13052_v33 }
 0x9f2   :  { %11523 = vmatprep.mubr.msk.f32.mxu1 %vm1473_vm0, %v22002_v15  ;;  %13057 = vmatprep.subr.bf16.mxu1 %v13056_v18 }
 0x9f3   :  { %11558 = vmatprep.mubr.msk.f32.mxu0 %vm14307_vm4, %v21996_v61 }
 0x9f5   :  { %13059 = vmatpush3.bf16.msra.mxu1 %v13056_v18 }
 0x9f6   :  { %13092 = vmatprep.subr.bf16.mxu1 %v21999_v12 }
 0x9f8   :  { %11524 = vmatmul.mubr.msk.f32.vlgmr.msra.gmra.mrb[14].mxu1 %vm1473_vm0, %v22003_v39 }
 0x9f9   :  { %11593 = vmatprep.mubr.msk.f32.mxu1 %vm14307_vm4, %v21996_v61 }
 0xabb   :  { %v19178_v40 = vpop.f32.mrb[10].mxu1 }
 0xabc   :  { %v19180_v24 = vpop.f32.mrb[8].mxu0  ;;  %v11457_v43 = vpop.f32.mrb[11].mxu1 }
 0xabd   :  { %v11492_v23 = vpop.f32.mrb[9].mxu0 }
 0xac3   :  { %v19185_v50 = vpop.f32.mrb[12].mxu1 }
 0xac4   :  { %v11514_v42 = vpop.f32.mrb[10].mxu0  ;;  %v19187_v52 = vpop.f32.mrb[13].mxu1 }
 0xac5   :  { %v2673_v37 = vadd.f32 %v11514_v42, %v9538_v48  ;;  %v2667_v53 = vpop.f32.mrb[11].mxu0 }
 0xac6   :  { %v2668_v10 = vadd.f32 %v9538_v48, %v2667_v53 }
 0xac7   :  { %9551 = vst.msk [vmem:[%s18801_s22 + $0x180] sm:$0xff] %vm578_vm1, %v2673_v37 }
 0xac8   :  { %9549 = vst.msk [vmem:[%s18801_s22 + $0x100] sm:$0xff] %vm578_vm1, %v2668_v10 }
 0xacb   :  { %v11525_v51 = vpop.f32.mrb[14].mxu1 }
 0xacc   :  { %v2761_v35 = vadd.f32 %v11525_v51, %v9546_v55  ;;  %v2755_v41 = vpop.f32.mrb[15].mxu1 }
 0xacd   :  { %v2756_v46 = vadd.f32 %v9546_v55, %v2755_v41  ;;  %v9530_v55 = vld [vmem:[%s21835_s5 + $0x1] ss:$0 sm:$0xff] }
 0xace   :  { %9552 = vst.msk [vmem:[%s18801_s22 + $0x580] sm:$0xff] %vm578_vm1, %v2761_v35 }
 0xacf   :  { %9550 = vst.msk [vmem:[%s18801_s22 + $0x500] sm:$0xff] %vm578_vm1, %v2756_v46 }
 0xad6   :  { %v9553_v56 = vld [vmem:[%s21845_s15 + $0x100] sm:$0xff]  ;;  %v9554_v49 = vld [vmem:[%s21845_s15 + $0x108] sm:$0xff]  ;;  %v9555_v63 = vld [vmem:[%s21845_s15 + $0x110] sm:$0xff] }
 0xad7   :  { %v9569_v58 = vld [vmem:[%s21845_s15 + $0x180] sm:$0xff]  ;;  %v13061_v59 = vpack.c.bf16 %v9554_v49, %v9553_v56  ;;  %v9570_v60 = vld [vmem:[%s21845_s15 + $0x188] sm:$0xff]  ;;  %v9556_v0 = vld [vmem:[%s21845_s15 + $0x118] sm:$0xff]  ;;  %v2580_v56 = vadd.f32 %v9530_v55, %v19187_v52  ;;  %v2585_v49 = vadd.f32 %v19185_v50, %v9530_v55 }
 0xad8   :  { %v13093_v62 = vpack.c.bf16 %v9570_v60, %v9569_v58  ;;  %v9571_v44 = vld [vmem:[%s21845_s15 + $0x190] sm:$0xff]  ;;  %v9572_v28 = vld [vmem:[%s21845_s15 + $0x198] sm:$0xff]  ;;  %v13065_v54 = vpack.c.bf16 %v9556_v0, %v9555_v63  ;;  %v9557_v1 = vld [vmem:[%s21845_s15 + $0x120] sm:$0xff] }
 0xad9   :  { %13063 = vmatpush3.bf16.xpose.msk.msra.mxu0 %vm18846_vm5, %v13061_v59  ;;  %v13097_v47 = vpack.c.bf16 %v9572_v28, %v9571_v44  ;;  %v9558_v3 = vld [vmem:[%s21845_s15 + $0x128] sm:$0xff]  ;;  %v9573_v27 = vld [vmem:[%s21845_s15 + $0x1a0] sm:$0xff]  ;;  %v9559_v2 = vld [vmem:[%s21845_s15 + $0x130] sm:$0xff] }
 0xada   :  { %13095 = vmatpush3.bf16.xpose.msk.msra.mxu1 %vm18846_vm5, %v13093_v62  ;;  %13064 = vmatprep.subr.bf16.mxu0 %v21999_v12  ;;  %v9574_v21 = vld [vmem:[%s21845_s15 + $0x1a8] sm:$0xff]  ;;  %v13069_v5 = vpack.c.bf16 %v9558_v3, %v9557_v1  ;;  %v9560_v7 = vld [vmem:[%s21845_s15 + $0x138] sm:$0xff]  ;;  %v9575_v8 = vld [vmem:[%s21845_s15 + $0x1b0] sm:$0xff] }
 0xadb   :  { %13096 = vmatprep.subr.bf16.mxu1 %v21999_v12  ;;  %v13101_v6 = vpack.c.bf16 %v9574_v21, %v9573_v27  ;;  %v9576_v9 = vld [vmem:[%s21845_s15 + $0x1b8] sm:$0xff]  ;;  %v13073_v13 = vpack.c.bf16 %v9560_v7, %v9559_v2  ;;  %v9561_v36 = vld [vmem:[%s21845_s15 + $0x140] sm:$0xff]  ;;  %v9562_v14 = vld [vmem:[%s21845_s15 + $0x148] sm:$0xff] }
 0xadc   :  { %v13105_v11 = vpack.c.bf16 %v9576_v9, %v9575_v8  ;;  %v9577_v16 = vld [vmem:[%s21845_s15 + $0x1c0] sm:$0xff]  ;;  %v9578_v17 = vld [vmem:[%s21845_s15 + $0x1c8] sm:$0xff]  ;;  %v13077_v19 = vpack.c.bf16 %v9562_v14, %v9561_v36  ;;  %v9563_v22 = vld [vmem:[%s21845_s15 + $0x150] sm:$0xff] }
 0xadd   :  { %v13109_v20 = vpack.c.bf16 %v9578_v17, %v9577_v16  ;;  %v9564_v25 = vld [vmem:[%s21845_s15 + $0x158] sm:$0xff]  ;;  %v9579_v26 = vld [vmem:[%s21845_s15 + $0x1d0] sm:$0xff]  ;;  %v9565_v32 = vld [vmem:[%s21845_s15 + $0x160] sm:$0xff] }
 0xade   :  { %v9580_v29 = vld [vmem:[%s21845_s15 + $0x1d8] sm:$0xff]  ;;  %v13081_v30 = vpack.c.bf16 %v9564_v25, %v9563_v22  ;;  %v9566_v33 = vld [vmem:[%s21845_s15 + $0x168] sm:$0xff]  ;;  %v9581_v34 = vld [vmem:[%s21845_s15 + $0x1e0] sm:$0xff] }
 0xadf   :  { %v13113_v31 = vpack.c.bf16 %v9580_v29, %v9579_v26  ;;  %v9582_v38 = vld [vmem:[%s21845_s15 + $0x1e8] sm:$0xff]  ;;  %v13085_v18 = vpack.c.bf16 %v9566_v33, %v9565_v32  ;;  %v9567_v23 = vld [vmem:[%s21845_s15 + $0x170] sm:$0xff]  ;;  %v9568_v48 = vld [vmem:[%s21845_s15 + $0x178] sm:$0xff] }
 0xae0   :  { %v13117_v43 = vpack.c.bf16 %v9582_v38, %v9581_v34  ;;  %v9583_v42 = vld [vmem:[%s21845_s15 + $0x1f0] sm:$0xff]  ;;  %v9584_v37 = vld [vmem:[%s21845_s15 + $0x1f8] sm:$0xff]  ;;  %v13089_v53 = vpack.c.bf16 %v9568_v48, %v9567_v23  ;;  %v9585_v51 = vld [vmem:[%s21845_s15 + $0x500] sm:$0xff] }
 0xae1   :  { %13067 = vmatpush3.bf16.xpose.msk.msra.mxu0 %vm18846_vm5, %v13065_v54  ;;  %v13121_v10 = vpack.c.bf16 %v9584_v37, %v9583_v42  ;;  %v9586_v35 = vld [vmem:[%s21845_s15 + $0x508] sm:$0xff]  ;;  %v9601_v41 = vld [vmem:[%s21845_s15 + $0x580] sm:$0xff]  ;;  %v9587_v60 = vld [vmem:[%s21845_s15 + $0x510] sm:$0xff] }
 0xae2   :  { %13099 = vmatpush3.bf16.xpose.msk.msra.mxu1 %vm18846_vm5, %v13097_v47  ;;  %13068 = vmatprep.subr.bf16.mxu0 %v21999_v12  ;;  %v9602_v46 = vld [vmem:[%s21845_s15 + $0x588] sm:$0xff]  ;;  %v13125_v58 = vpack.c.bf16 %v9586_v35, %v9585_v51  ;;  %v9588_v62 = vld [vmem:[%s21845_s15 + $0x518] sm:$0xff]  ;;  %v9603_v52 = vld [vmem:[%s21845_s15 + $0x590] sm:$0xff] }
 0xae3   :  { %13100 = vmatprep.subr.bf16.mxu1 %v21999_v12  ;;  %v13149_v59 = vpack.c.bf16 %v9602_v46, %v9601_v41  ;;  %v9604_v50 = vld [vmem:[%s21845_s15 + $0x598] sm:$0xff]  ;;  %v13128_v63 = vpack.c.bf16 %v9588_v62, %v9587_v60  ;;  %v9589_v44 = vld [vmem:[%s21845_s15 + $0x520] sm:$0xff]  ;;  %v9590_v28 = vld [vmem:[%s21845_s15 + $0x528] sm:$0xff] }
 0xae4   :  { %v13152_v0 = vpack.c.bf16 %v9604_v50, %v9603_v52  ;;  %v9605_v54 = vld [vmem:[%s21845_s15 + $0x5a0] sm:$0xff]  ;;  %v9606_v47 = vld [vmem:[%s21845_s15 + $0x5a8] sm:$0xff]  ;;  %v13131_v1 = vpack.c.bf16 %v9590_v28, %v9589_v44  ;;  %v9591_v27 = vld [vmem:[%s21845_s15 + $0x530] sm:$0xff] }
 0xae5   :  { %v13155_v3 = vpack.c.bf16 %v9606_v47, %v9605_v54  ;;  %v9592_v21 = vld [vmem:[%s21845_s15 + $0x538] sm:$0xff]  ;;  %v9593_v8 = vld [vmem:[%s21845_s15 + $0x540] sm:$0xff]  ;;  %v9594_v9 = vld [vmem:[%s21845_s15 + $0x548] sm:$0xff] }
 0xae6   :  { %v13134_v2 = vpack.c.bf16 %v9592_v21, %v9591_v27  ;;  %v13137_v36 = vpack.c.bf16 %v9594_v9, %v9593_v8  ;;  %v9595_v16 = vld [vmem:[%s21845_s15 + $0x550] sm:$0xff]  ;;  %v9596_v17 = vld [vmem:[%s21845_s15 + $0x558] sm:$0xff]  ;;  %v9597_v26 = vld [vmem:[%s21845_s15 + $0x560] sm:$0xff] }
 0xae7   :  { %v13140_v22 = vpack.c.bf16 %v9596_v17, %v9595_v16  ;;  %v9598_v29 = vld [vmem:[%s21845_s15 + $0x568] sm:$0xff]  ;;  %v9599_v34 = vld [vmem:[%s21845_s15 + $0x570] sm:$0xff]  ;;  %v9600_v38 = vld [vmem:[%s21845_s15 + $0x578] sm:$0xff] }
 0xae8   :  { %v13143_v32 = vpack.c.bf16 %v9598_v29, %v9597_v26  ;;  %v13146_v23 = vpack.c.bf16 %v9600_v38, %v9599_v34  ;;  %v9656_v50 = vld [vmem:[%s21834_s4 + $0x40] sm:$0xff]  ;;  %v9651_v44 = vld [vmem:[%s21836_s6 + $0x8] sm:$0xff]  ;;  %v9658_v47 = vld [vmem:[%s21834_s4 + $0x50] sm:$0xff] }
 0xae9   :  { %13071 = vmatpush3.bf16.xpose.msk.msra.mxu0 %vm18846_vm5, %v13069_v5  ;;  %v9607_v5 = vld [vmem:[%s21845_s15 + $0x5b0] sm:$0xff]  ;;  %v9665_v16 = vld [vmem:[%s21834_s4 + $0xc8] sm:$0xff]  ;;  %v9667_v29 = vld [vmem:[%s21834_s4 + $0xd8] sm:$0xff] }
 0xaea   :  { %13103 = vmatpush3.bf16.xpose.msk.msra.mxu1 %vm18846_vm5, %v13101_v6  ;;  %13072 = vmatprep.subr.bf16.mxu0 %v21999_v12  ;;  %v9608_v6 = vld [vmem:[%s21845_s15 + $0x5b8] sm:$0xff]  ;;  %v9674_v9 = vld [vmem:[%s21834_s4 + $0x150] sm:$0xff] }
 0xaeb   :  { %13104 = vmatprep.subr.bf16.mxu1 %v21999_v12  ;;  %v13158_v7 = vpack.c.bf16 %v9608_v6, %v9607_v5  ;;  %v9666_v26 = vld [vmem:[%s21834_s4 + $0xd0] sm:$0xff] }
 0xaf1   :  { %13075 = vmatpush3.bf16.xpose.msk.msra.mxu0 %vm18846_vm5, %v13073_v13  ;;  %v9609_v13 = vld [vmem:[%s21845_s15 + $0x5c0] sm:$0xff] }
 0xaf2   :  { %13107 = vmatpush3.bf16.xpose.msk.msra.mxu1 %vm18846_vm5, %v13105_v11  ;;  %13076 = vmatprep.subr.bf16.mxu0 %v21999_v12  ;;  %v9610_v11 = vld [vmem:[%s21845_s15 + $0x5c8] sm:$0xff] }
 0xaf3   :  { %13108 = vmatprep.subr.bf16.mxu1 %v21999_v12  ;;  %v13161_v14 = vpack.c.bf16 %v9610_v11, %v9609_v13  ;;  %v9675_v13 = vld [vmem:[%s21834_s4 + $0x158] sm:$0xff] }
 0xaf4   :  { %v13192_v11 = vpack.c.bf16 %v9675_v13, %v9674_v9 }
 0xaf9   :  { %13079 = vmatpush3.bf16.xpose.msk.msra.mxu0 %vm18846_vm5, %v13077_v19  ;;  %v9611_v19 = vld [vmem:[%s21845_s15 + $0x5d0] sm:$0xff] }
 0xafa   :  { %13111 = vmatpush3.bf16.xpose.msk.msra.mxu1 %vm18846_vm5, %v13109_v20  ;;  %13080 = vmatprep.subr.bf16.mxu0 %v21999_v12  ;;  %v9612_v20 = vld [vmem:[%s21845_s15 + $0x5d8] sm:$0xff] }
 0xafb   :  { %13112 = vmatprep.subr.bf16.mxu1 %v21999_v12  ;;  %v13164_v25 = vpack.c.bf16 %v9612_v20, %v9611_v19 }
 0xb01   :  { %13083 = vmatpush3.bf16.xpose.msk.msra.mxu0 %vm18846_vm5, %v13081_v30  ;;  %v9613_v30 = vld [vmem:[%s21845_s15 + $0x5e0] sm:$0xff] }
 0xb02   :  { %13115 = vmatpush3.bf16.xpose.msk.msra.mxu1 %vm18846_vm5, %v13113_v31  ;;  %13084 = vmatprep.subr.bf16.mxu0 %v21999_v12  ;;  %v9614_v31 = vld [vmem:[%s21845_s15 + $0x5e8] sm:$0xff] }
 0xb03   :  { %13116 = vmatprep.subr.bf16.mxu1 %v21999_v12  ;;  %v13167_v33 = vpack.c.bf16 %v9614_v31, %v9613_v30  ;;  %v13184_v30 = vpack.c.bf16 %v9667_v29, %v9666_v26 }
 0xb09   :  { %13087 = vmatpush3.bf16.xpose.msk.msra.mxu0 %vm18846_vm5, %v13085_v18  ;;  %v9615_v18 = vld [vmem:[%s21845_s15 + $0x5f0] sm:$0xff] }
 0xb0a   :  { %13119 = vmatpush3.bf16.xpose.msk.msra.mxu1 %vm18846_vm5, %v13117_v43  ;;  %13088 = vmatprep.subr.bf16.mxu0 %v21999_v12  ;;  %v9616_v43 = vld [vmem:[%s21845_s15 + $0x5f8] sm:$0xff] }
 0xb0b   :  { %13120 = vmatprep.subr.bf16.mxu1 %v21999_v12  ;;  %v13170_v48 = vpack.c.bf16 %v9616_v43, %v9615_v18  ;;  %v9669_v18 = vld [vmem:[%s21835_s5 + $0x6] ss:$0 sm:$0xff] }
 0xb11   :  { %13091 = vmatpush3.bf16.xpose.msk.msra.mxu0 %vm18846_vm5, %v13089_v53 }
 0xb12   :  { %13123 = vmatpush3.bf16.xpose.msk.msra.mxu1 %vm18846_vm5, %v13121_v10  ;;  %13124 = vmatprep.subr.bf16.mxu0 %v21999_v12 }
 0xb13   :  { %13148 = vmatprep.subr.bf16.mxu1 %v21999_v12 }
 0xb18   :  { %11559 = vmatmul.mubr.msk.f32.vlgmr.msra.gmra.mrb[12].mxu0 %vm578_vm1, %v2580_v56 }
 0xb19   :  { %11594 = vmatmul.mubr.msk.f32.vlgmr.msra.gmra.mrb[16].mxu1 %vm578_vm1, %v2585_v49  ;;  %13126 = vmatpush3.bf16.msra.mxu0 %v13125_v58 }
 0xb1a   :  { %13150 = vmatpush3.bf16.msra.mxu1 %v13149_v59  ;;  %13127 = vmatprep.subr.bf16.mxu0 %v21999_v12 }
 0xb1b   :  { %13151 = vmatprep.subr.bf16.mxu1 %v21999_v12  ;;  %11628 = vmatprep.mubr.msk.f32.mxu0 %vm14307_vm4, %v21996_v61 }
 0xb1c   :  { %11663 = vmatprep.mubr.msk.f32.mxu1 %vm14307_vm4, %v21996_v61 }
 0xb1d   :  { %13129 = vmatpush3.bf16.msra.mxu0 %v13128_v63  ;;  %v9657_v63 = vld [vmem:[%s21834_s4 + $0x48] sm:$0xff] }
 0xb1e   :  { %13153 = vmatpush3.bf16.msra.mxu1 %v13152_v0  ;;  %13130 = vmatprep.subr.bf16.mxu0 %v21999_v12  ;;  %v13172_v0 = vpack.c.bf16 %v9657_v63, %v9656_v50 }
 0xb1f   :  { %13154 = vmatprep.subr.bf16.mxu1 %v21999_v12 }
 0xb21   :  { %13132 = vmatpush3.bf16.msra.mxu0 %v13131_v1  ;;  %v9659_v1 = vld [vmem:[%s21834_s4 + $0x58] sm:$0xff] }
 0xb22   :  { %13156 = vmatpush3.bf16.msra.mxu1 %v13155_v3  ;;  %13133 = vmatprep.subr.bf16.mxu0 %v21999_v12  ;;  %v13176_v6 = vpack.c.bf16 %v9659_v1, %v9658_v47 }
 0xb23   :  { %13157 = vmatprep.subr.bf16.mxu1 %v21999_v12 }
 0xb25   :  { %13135 = vmatpush3.bf16.msra.mxu0 %v13134_v2  ;;  %v9672_v2 = vld [vmem:[%s21834_s4 + $0x140] sm:$0xff] }
 0xb26   :  { %13159 = vmatpush3.bf16.msra.mxu1 %v13158_v7  ;;  %13136 = vmatprep.subr.bf16.mxu0 %v21999_v12  ;;  %v9673_v7 = vld [vmem:[%s21834_s4 + $0x148] sm:$0xff] }
 0xb27   :  { %13160 = vmatprep.subr.bf16.mxu1 %v21999_v12  ;;  %v13188_v8 = vpack.c.bf16 %v9673_v7, %v9672_v2 }
 0xb29   :  { %13138 = vmatpush3.bf16.msra.mxu0 %v13137_v36  ;;  %v2499_v36 = vld [vmem:[%s21836_s6] sm:$0xff] }
 0xb2a   :  { %13162 = vmatpush3.bf16.msra.mxu1 %v13161_v14  ;;  %13139 = vmatprep.subr.bf16.mxu0 %v21999_v12  ;;  %v9664_v14 = vld [vmem:[%s21834_s4 + $0xc0] sm:$0xff] }
 0xb2b   :  { %13163 = vmatprep.subr.bf16.mxu1 %v21999_v12  ;;  %v13180_v19 = vpack.c.bf16 %v9665_v16, %v9664_v14 }
 0xb2d   :  { %13141 = vmatpush3.bf16.msra.mxu0 %v13140_v22 }
 0xb2e   :  { %13165 = vmatpush3.bf16.msra.mxu1 %v13164_v25  ;;  %13142 = vmatprep.subr.bf16.mxu0 %v21999_v12 }
 0xb2f   :  { %13166 = vmatprep.subr.bf16.mxu1 %v21999_v12 }
 0xb31   :  { %13144 = vmatpush3.bf16.msra.mxu0 %v13143_v32 }
 0xb32   :  { %13168 = vmatpush3.bf16.msra.mxu1 %v13167_v33  ;;  %13145 = vmatprep.subr.bf16.mxu0 %v21999_v12 }
 0xb33   :  { %13169 = vmatprep.subr.bf16.mxu1 %v21999_v12 }
 0xb35   :  { %13147 = vmatpush3.bf16.msra.mxu0 %v13146_v23 }
 0xb36   :  { %13171 = vmatpush3.bf16.msra.mxu1 %v13170_v48  ;;  %11666 = vmatprep.subr.mxu0 %v9651_v44 }
 0xb37   :  { %13173 = vmatprep.subr.bf16.mxu1 %v13172_v0 }
 0xbeb   :  { %v2959_v42 = vpop.f32.mrb[12].mxu0 }
 0xbec   :  { %v3084_v37 = vmul.f32 0.35355338, %v2959_v42  ;;  %v3080_v53 = vpop.f32.mrb[16].mxu1  ;;  %v11560_v10 = vpop.f32.mrb[13].mxu0 }
 0xbed   :  { %v3085_v55 = vmul.f32 0.35355338, %v3080_v53  ;;  %v11595_v51 = vpop.f32.mrb[17].mxu1 }
 0xbee   :  { %v3086_v35 = vadd.f32 %v3084_v37, %v19120_v57 }
 0xbef   :  { %v3087_v41 = vadd.f32 %v3085_v55, %v19120_v57 }
 0xbf0   :  { %3088 = vmax.xlane.f32.xlu1 %v3086_v35 }
 0xbf1   :  { %3090 = vmax.xlane.f32.xlu0 %v3087_v41 }
 0xc7d   :  { %v3089_v46 = vpop.xlane.xlu1 %3088 }
 0xc7e   :  { %v3091_v56 = vpop.xlane.xlu0 %3090  ;;  %v3092_v49 = vsub.f32 %v3086_v35, %v3089_v46 }
 0xc7f   :  { %v3093_v58 = vsub.f32 %v3087_v41, %v3091_v56 }
 0xc80   :  { %v3094_v59 = vmul.f32 1.442695, %v3092_v49 }
 0xc81   :  { %v3096_v60 = vmul.f32 1.442695, %v3093_v58 }
 0xc82   :  { %14144 = vpow2.f32 %v3094_v59 }
 0xc83   :  { %14146 = vpow2.f32 %v3096_v60 }
 0xc8c   :  { %v14145_v62 = vpop.eup %14144 }
 0xc8d   :  { %v14147_v52 = vpop.eup %14146  ;;  %3098 = vadd.xlane.f32.xlu1 %v14145_v62 }
 0xc8e   :  { %3100 = vadd.xlane.f32.xlu0 %v14147_v52 }
 0xd1a   :  { %v3099_v28 = vpop.xlane.xlu1 %3098 }
 0xd1b   :  { %v3101_v54 = vpop.xlane.xlu0 %3100  ;;  %14148 = vrcp.f32 %v3099_v28 }
 0xd1c   :  { %14150 = vrcp.f32 %v3101_v54 }
 0xd25   :  { %v14149_v3 = vpop.eup %14148 }
 0xd26   :  { %v14151_v27 = vpop.eup %14150  ;;  %v3104_v21 = vmul.f32 %v14149_v3, %v14145_v62 }
 0xd27   :  { %v3105_v5 = vmul.f32 %v14151_v27, %v14147_v52 }
 0xd28   :  { %11629 = vmatmul.mubr.f32.vlgmr.msra.gmra.mrb[14].mxu0 %v3104_v21 }
 0xd29   :  { %11664 = vmatmul.mubr.f32.vlgmr.msra.gmra.mrb[18].mxu1 %v3105_v5  ;;  %11667 = vmatpush3.msra.mxu0 %v9651_v44 }
 0xd2a   :  { %13175 = vmatpush3.bf16.msra.mxu1 %v13172_v0  ;;  %11684 = vmatprep.mubr.msk.f32.mxu1 %vm1473_vm0, %v22002_v15 }
 0xd2b   :  { %13177 = vmatprep.subr.bf16.mxu1 %v13176_v6  ;;  %11671 = vmatprep.subr.mxu0 %v2499_v36 }
 0xd2e   :  { %13179 = vmatpush3.bf16.msra.mxu1 %v13176_v6 }
 0xd2f   :  { %13189 = vmatprep.subr.bf16.mxu1 %v13188_v8 }
 0xd31   :  { %11685 = vmatmul.mubr.msk.f32.vlgmr.msra.gmra.mrb[20].mxu1 %vm1473_vm0, %v22003_v39 }
 0xd32   :  { %13191 = vmatpush3.bf16.msra.mxu1 %v13188_v8  ;;  %11706 = vmatprep.mubr.msk.f32.mxu1 %vm1473_vm0, %v22002_v15 }
 0xd33   :  { %13193 = vmatprep.subr.bf16.mxu1 %v13192_v11 }
 0xd36   :  { %13195 = vmatpush3.bf16.msra.mxu1 %v13192_v11 }
 0xd37   :  { %13228 = vmatprep.subr.bf16.mxu1 %v21999_v12 }
 0xd39   :  { %11707 = vmatmul.mubr.msk.f32.vlgmr.msra.gmra.mrb[22].mxu1 %vm1473_vm0, %v22003_v39 }
 0xd3a   :  { %11776 = vmatprep.mubr.msk.f32.mxu1 %vm14307_vm4, %v21996_v61 }
 0xdfb   :  { %v3172_v17 = vpop.f32.mrb[14].mxu0 }
 0xdfc   :  { %v3242_v20 = vpop.f32.mrb[18].mxu1  ;;  %v11630_v22 = vpop.f32.mrb[15].mxu0  ;;  %11668 = vmatprep.mubr.msk.f32.mxu0 %vm578_vm1, %v3172_v17 }
 0xdfd   :  { %v11665_v25 = vpop.f32.mrb[19].mxu1  ;;  %11669 = vmatmul.mubr.msk.f32.vlgmr.msra.gmra.mrb[16].mxu0 %vm578_vm1, %v3242_v20 }
 0xdfe   :  { %11672 = vmatpush3.msra.mxu0 %v2499_v36  ;;  %11673 = vmatprep.mubr.msk.f32.mxu0 %vm578_vm1, %v19178_v40  ;;  %v9677_v40 = vld [vmem:[%s21835_s5 + $0xa] ss:$0 sm:$0xff] }
 0xdff   :  { %13181 = vmatprep.subr.bf16.mxu0 %v13180_v19 }
 0xe04   :  { %v19524_v31 = vpop.f32.mrb[20].mxu1 }
 0xe05   :  { %v19526_v32 = vpop.f32.mrb[21].mxu1  ;;  %11674 = vmatmul.mubr.msk.f32.vlgmr.msra.gmra.mrb[16].mxu0 %vm578_vm1, %v19180_v24 }
 0xe06   :  { %13183 = vmatpush3.bf16.msra.mxu0 %v13180_v19  ;;  %11695 = vmatprep.mubr.msk.f32.mxu0 %vm1473_vm0, %v22002_v15 }
 0xe07   :  { %13185 = vmatprep.subr.bf16.mxu0 %v13184_v30 }
 0xe0a   :  { %13187 = vmatpush3.bf16.msra.mxu0 %v13184_v30 }
 0xe0b   :  { %13196 = vmatprep.subr.bf16.mxu0 %v21999_v12 }
 0xe0c   :  { %v11708_v33 = vpop.f32.mrb[22].mxu1 }
 0xe0d   :  { %v3671_v34 = vadd.f32 %v11708_v33, %v9677_v40  ;;  %v3665_v38 = vpop.f32.mrb[23].mxu1  ;;  %11696 = vmatmul.mubr.msk.f32.vlgmr.msra.gmra.mrb[18].mxu0 %vm1473_vm0, %v22003_v39 }
 0xe0e   :  { %v3666_v24 = vadd.f32 %v9677_v40, %v3665_v38  ;;  %11741 = vmatprep.mubr.msk.f32.mxu0 %vm14307_vm4, %v21996_v61  ;;  %v9661_v38 = vld [vmem:[%s21835_s5 + $0x2] ss:$0 sm:$0xff] }
 0xe0f   :  { %9683 = vst.msk [vmem:[%s18801_s22 + $0x680] sm:$0xff] %vm578_vm1, %v3671_v34 }
 0xe10   :  { %9681 = vst.msk [vmem:[%s18801_s22 + $0x600] sm:$0xff] %vm578_vm1, %v3666_v24 }
 0xee0   :  { %v11697_v43 = vpop.f32.mrb[18].mxu0 }
 0xee1   :  { %v3583_v23 = vadd.f32 %v11697_v43, %v9669_v18  ;;  %v3577_v48 = vpop.f32.mrb[19].mxu0 }
 0xee2   :  { %v3578_v42 = vadd.f32 %v9669_v18, %v3577_v48  ;;  %v3490_v48 = vadd.f32 %v9661_v38, %v19526_v32 }
 0xee3   :  { %9682 = vst.msk [vmem:[%s18801_s22 + $0x280] sm:$0xff] %vm578_vm1, %v3583_v23 }
 0xee4   :  { %9680 = vst.msk [vmem:[%s18801_s22 + $0x200] sm:$0xff] %vm578_vm1, %v3578_v42  ;;  %v3495_v42 = vadd.f32 %v19524_v31, %v9661_v38 }
 0xeeb   :  { %v9684_v37 = vld [vmem:[%s21845_s15 + $0x200] sm:$0xff]  ;;  %v9685_v53 = vld [vmem:[%s21845_s15 + $0x208] sm:$0xff]  ;;  %v9686_v41 = vld [vmem:[%s21845_s15 + $0x210] sm:$0xff] }
 0xeec   :  { %v9700_v10 = vld [vmem:[%s21845_s15 + $0x280] sm:$0xff]  ;;  %v13197_v55 = vpack.c.bf16 %v9685_v53, %v9684_v37  ;;  %v9701_v51 = vld [vmem:[%s21845_s15 + $0x288] sm:$0xff]  ;;  %v9687_v46 = vld [vmem:[%s21845_s15 + $0x218] sm:$0xff] }
 0xeed   :  { %v13229_v35 = vpack.c.bf16 %v9701_v51, %v9700_v10  ;;  %v9702_v56 = vld [vmem:[%s21845_s15 + $0x290] sm:$0xff]  ;;  %v9703_v49 = vld [vmem:[%s21845_s15 + $0x298] sm:$0xff]  ;;  %v13201_v58 = vpack.c.bf16 %v9687_v46, %v9686_v41  ;;  %v9688_v60 = vld [vmem:[%s21845_s15 + $0x220] sm:$0xff] }
 0xeee   :  { %13199 = vmatpush3.bf16.xpose.msk.msra.mxu0 %vm18846_vm5, %v13197_v55  ;;  %v13233_v59 = vpack.c.bf16 %v9703_v49, %v9702_v56  ;;  %v9689_v62 = vld [vmem:[%s21845_s15 + $0x228] sm:$0xff]  ;;  %v9704_v52 = vld [vmem:[%s21845_s15 + $0x2a0] sm:$0xff]  ;;  %v9690_v44 = vld [vmem:[%s21845_s15 + $0x230] sm:$0xff] }
 0xeef   :  { %13231 = vmatpush3.bf16.xpose.msk.msra.mxu1 %vm18846_vm5, %v13229_v35  ;;  %13200 = vmatprep.subr.bf16.mxu0 %v21999_v12  ;;  %v9705_v50 = vld [vmem:[%s21845_s15 + $0x2a8] sm:$0xff]  ;;  %v13205_v63 = vpack.c.bf16 %v9689_v62, %v9688_v60  ;;  %v9691_v28 = vld [vmem:[%s21845_s15 + $0x238] sm:$0xff]  ;;  %v9706_v54 = vld [vmem:[%s21845_s15 + $0x2b0] sm:$0xff] }
 0xef0   :  { %13232 = vmatprep.subr.bf16.mxu1 %v21999_v12  ;;  %v13237_v0 = vpack.c.bf16 %v9705_v50, %v9704_v52  ;;  %v9707_v47 = vld [vmem:[%s21845_s15 + $0x2b8] sm:$0xff]  ;;  %v13209_v1 = vpack.c.bf16 %v9691_v28, %v9690_v44  ;;  %v9692_v27 = vld [vmem:[%s21845_s15 + $0x240] sm:$0xff]  ;;  %v9693_v21 = vld [vmem:[%s21845_s15 + $0x248] sm:$0xff] }
 0xef1   :  { %v13241_v3 = vpack.c.bf16 %v9707_v47, %v9706_v54  ;;  %v9708_v5 = vld [vmem:[%s21845_s15 + $0x2c0] sm:$0xff]  ;;  %v9709_v6 = vld [vmem:[%s21845_s15 + $0x2c8] sm:$0xff]  ;;  %v13213_v2 = vpack.c.bf16 %v9693_v21, %v9692_v27  ;;  %v9694_v8 = vld [vmem:[%s21845_s15 + $0x250] sm:$0xff] }
 0xef2   :  { %v13245_v7 = vpack.c.bf16 %v9709_v6, %v9708_v5  ;;  %v9695_v9 = vld [vmem:[%s21845_s15 + $0x258] sm:$0xff]  ;;  %v9710_v13 = vld [vmem:[%s21845_s15 + $0x2d0] sm:$0xff]  ;;  %v9696_v16 = vld [vmem:[%s21845_s15 + $0x260] sm:$0xff] }
 0xef3   :  { %v9711_v11 = vld [vmem:[%s21845_s15 + $0x2d8] sm:$0xff]  ;;  %v13217_v36 = vpack.c.bf16 %v9695_v9, %v9694_v8  ;;  %v9697_v17 = vld [vmem:[%s21845_s15 + $0x268] sm:$0xff]  ;;  %v9712_v19 = vld [vmem:[%s21845_s15 + $0x2e0] sm:$0xff] }
 0xef4   :  { %v13249_v14 = vpack.c.bf16 %v9711_v11, %v9710_v13  ;;  %v9713_v20 = vld [vmem:[%s21845_s15 + $0x2e8] sm:$0xff]  ;;  %v13221_v22 = vpack.c.bf16 %v9697_v17, %v9696_v16  ;;  %v9698_v26 = vld [vmem:[%s21845_s15 + $0x270] sm:$0xff]  ;;  %v9699_v29 = vld [vmem:[%s21845_s15 + $0x278] sm:$0xff] }
 0xef5   :  { %v13253_v25 = vpack.c.bf16 %v9713_v20, %v9712_v19  ;;  %v9714_v30 = vld [vmem:[%s21845_s15 + $0x2f0] sm:$0xff]  ;;  %v9715_v40 = vld [vmem:[%s21845_s15 + $0x2f8] sm:$0xff]  ;;  %v13225_v33 = vpack.c.bf16 %v9699_v29, %v9698_v26  ;;  %v9716_v24 = vld [vmem:[%s21845_s15 + $0x600] sm:$0xff] }
 0xef6   :  { %13203 = vmatpush3.bf16.xpose.msk.msra.mxu0 %vm18846_vm5, %v13201_v58  ;;  %v13257_v34 = vpack.c.bf16 %v9715_v40, %v9714_v30  ;;  %v9717_v18 = vld [vmem:[%s21845_s15 + $0x608] sm:$0xff]  ;;  %v9732_v43 = vld [vmem:[%s21845_s15 + $0x680] sm:$0xff]  ;;  %v9718_v10 = vld [vmem:[%s21845_s15 + $0x610] sm:$0xff] }
 0xef7   :  { %13235 = vmatpush3.bf16.xpose.msk.msra.mxu1 %vm18846_vm5, %v13233_v59  ;;  %13204 = vmatprep.subr.bf16.mxu0 %v21999_v12  ;;  %v9733_v23 = vld [vmem:[%s21845_s15 + $0x688] sm:$0xff]  ;;  %v13261_v37 = vpack.c.bf16 %v9717_v18, %v9716_v24  ;;  %v9719_v55 = vld [vmem:[%s21845_s15 + $0x618] sm:$0xff]  ;;  %v9734_v32 = vld [vmem:[%s21845_s15 + $0x690] sm:$0xff] }
 0xef8   :  { %13236 = vmatprep.subr.bf16.mxu1 %v21999_v12  ;;  %v13285_v53 = vpack.c.bf16 %v9733_v23, %v9732_v43  ;;  %v9735_v31 = vld [vmem:[%s21845_s15 + $0x698] sm:$0xff]  ;;  %v13264_v51 = vpack.c.bf16 %v9719_v55, %v9718_v10  ;;  %v9720_v41 = vld [vmem:[%s21845_s15 + $0x620] sm:$0xff]  ;;  %v9721_v46 = vld [vmem:[%s21845_s15 + $0x628] sm:$0xff] }
 0xef9   :  { %v13288_v35 = vpack.c.bf16 %v9735_v31, %v9734_v32  ;;  %v9736_v56 = vld [vmem:[%s21845_s15 + $0x6a0] sm:$0xff]  ;;  %v9737_v49 = vld [vmem:[%s21845_s15 + $0x6a8] sm:$0xff]  ;;  %v13267_v58 = vpack.c.bf16 %v9721_v46, %v9720_v41  ;;  %v9722_v60 = vld [vmem:[%s21845_s15 + $0x630] sm:$0xff] }
 0xefa   :  { %v13291_v59 = vpack.c.bf16 %v9737_v49, %v9736_v56  ;;  %v9723_v62 = vld [vmem:[%s21845_s15 + $0x638] sm:$0xff]  ;;  %v9738_v52 = vld [vmem:[%s21845_s15 + $0x6b0] sm:$0xff]  ;;  %v9724_v44 = vld [vmem:[%s21845_s15 + $0x640] sm:$0xff] }
 0xefb   :  { %v9739_v50 = vld [vmem:[%s21845_s15 + $0x6b8] sm:$0xff]  ;;  %v9725_v28 = vld [vmem:[%s21845_s15 + $0x648] sm:$0xff]  ;;  %v9740_v54 = vld [vmem:[%s21845_s15 + $0x6c0] sm:$0xff] }
 0xefc   :  { %v9741_v47 = vld [vmem:[%s21845_s15 + $0x6c8] sm:$0xff]  ;;  %v9726_v27 = vld [vmem:[%s21845_s15 + $0x650] sm:$0xff]  ;;  %v9727_v21 = vld [vmem:[%s21845_s15 + $0x658] sm:$0xff] }
 0xefd   :  { %v9742_v5 = vld [vmem:[%s21845_s15 + $0x6d0] sm:$0xff]  ;;  %v9743_v6 = vld [vmem:[%s21845_s15 + $0x6d8] sm:$0xff]  ;;  %v9728_v8 = vld [vmem:[%s21845_s15 + $0x660] sm:$0xff] }
 0xefe   :  { %13207 = vmatpush3.bf16.xpose.msk.msra.mxu0 %vm18846_vm5, %v13205_v63  ;;  %v13270_v63 = vpack.c.bf16 %v9723_v62, %v9722_v60  ;;  %v9729_v9 = vld [vmem:[%s21845_s15 + $0x668] sm:$0xff]  ;;  %v9744_v13 = vld [vmem:[%s21845_s15 + $0x6e0] sm:$0xff]  ;;  %v9730_v16 = vld [vmem:[%s21845_s15 + $0x670] sm:$0xff] }
 0xeff   :  { %13239 = vmatpush3.bf16.xpose.msk.msra.mxu1 %vm18846_vm5, %v13237_v0  ;;  %13208 = vmatprep.subr.bf16.mxu0 %v21999_v12  ;;  %v13294_v0 = vpack.c.bf16 %v9739_v50, %v9738_v52  ;;  %v9745_v11 = vld [vmem:[%s21845_s15 + $0x6e8] sm:$0xff]  ;;  %v9731_v17 = vld [vmem:[%s21845_s15 + $0x678] sm:$0xff]  ;;  %v9746_v19 = vld [vmem:[%s21845_s15 + $0x6f0] sm:$0xff] }
 0xf00   :  { %13240 = vmatprep.subr.bf16.mxu1 %v21999_v12  ;;  %v9747_v20 = vld [vmem:[%s21845_s15 + $0x6f8] sm:$0xff]  ;;  %v9785_v55 = vld [vmem:[%s21834_s4 + $0x60] sm:$0xff]  ;;  %v9786_v32 = vld [vmem:[%s21834_s4 + $0x68] sm:$0xff] }
 0xf01   :  { %v13308_v31 = vpack.c.bf16 %v9786_v32, %v9785_v55  ;;  %v9787_v46 = vld [vmem:[%s21834_s4 + $0x70] sm:$0xff]  ;;  %v9788_v56 = vld [vmem:[%s21834_s4 + $0x78] sm:$0xff]  ;;  %v9801_v52 = vld [vmem:[%s21834_s4 + $0x160] sm:$0xff] }
 0xf02   :  { %v13312_v62 = vpack.c.bf16 %v9788_v56, %v9787_v46  ;;  %v9802_v50 = vld [vmem:[%s21834_s4 + $0x168] sm:$0xff] }
 0xf06   :  { %13211 = vmatpush3.bf16.xpose.msk.msra.mxu0 %vm18846_vm5, %v13209_v1  ;;  %v13273_v1 = vpack.c.bf16 %v9725_v28, %v9724_v44  ;;  %v9804_v44 = vld [vmem:[%s21834_s4 + $0x178] sm:$0xff] }
 0xf07   :  { %13243 = vmatpush3.bf16.xpose.msk.msra.mxu1 %vm18846_vm5, %v13241_v3  ;;  %13212 = vmatprep.subr.bf16.mxu0 %v21999_v12  ;;  %v13297_v3 = vpack.c.bf16 %v9741_v47, %v9740_v54  ;;  %v9793_v54 = vld [vmem:[%s21834_s4 + $0xe0] sm:$0xff]  ;;  %v9794_v47 = vld [vmem:[%s21834_s4 + $0xe8] sm:$0xff] }
 0xf08   :  { %13244 = vmatprep.subr.bf16.mxu1 %v21999_v12 }
 0xf0e   :  { %13215 = vmatpush3.bf16.xpose.msk.msra.mxu0 %vm18846_vm5, %v13213_v2  ;;  %v13276_v2 = vpack.c.bf16 %v9727_v21, %v9726_v27  ;;  %v9796_v27 = vld [vmem:[%s21834_s4 + $0xf8] sm:$0xff] }
 0xf0f   :  { %13247 = vmatpush3.bf16.xpose.msk.msra.mxu1 %vm18846_vm5, %v13245_v7  ;;  %13216 = vmatprep.subr.bf16.mxu0 %v21999_v12  ;;  %v13300_v7 = vpack.c.bf16 %v9743_v6, %v9742_v5 }
 0xf10   :  { %13248 = vmatprep.subr.bf16.mxu1 %v21999_v12 }
 0xf16   :  { %13219 = vmatpush3.bf16.xpose.msk.msra.mxu0 %vm18846_vm5, %v13217_v36  ;;  %v13279_v36 = vpack.c.bf16 %v9729_v9, %v9728_v8 }
 0xf17   :  { %13251 = vmatpush3.bf16.xpose.msk.msra.mxu1 %vm18846_vm5, %v13249_v14  ;;  %13220 = vmatprep.subr.bf16.mxu0 %v21999_v12  ;;  %v13303_v14 = vpack.c.bf16 %v9745_v11, %v9744_v13  ;;  %v9806_v13 = vld [vmem:[%s21835_s5 + $0xb] ss:$0 sm:$0xff] }
 0xf18   :  { %13252 = vmatprep.subr.bf16.mxu1 %v21999_v12 }
 0xf1e   :  { %13223 = vmatpush3.bf16.xpose.msk.msra.mxu0 %vm18846_vm5, %v13221_v22  ;;  %v13282_v22 = vpack.c.bf16 %v9731_v17, %v9730_v16  ;;  %v9798_v17 = vld [vmem:[%s21835_s5 + $0x7] ss:$0 sm:$0xff] }
 0xf1f   :  { %13255 = vmatpush3.bf16.xpose.msk.msra.mxu1 %vm18846_vm5, %v13253_v25  ;;  %13224 = vmatprep.subr.bf16.mxu0 %v21999_v12  ;;  %v13306_v25 = vpack.c.bf16 %v9747_v20, %v9746_v19 }
 0xf20   :  { %13256 = vmatprep.subr.bf16.mxu1 %v21999_v12 }
 0xf26   :  { %13227 = vmatpush3.bf16.xpose.msk.msra.mxu0 %vm18846_vm5, %v13225_v33 }
 0xf27   :  { %13259 = vmatpush3.bf16.xpose.msk.msra.mxu1 %vm18846_vm5, %v13257_v34  ;;  %13260 = vmatprep.subr.bf16.mxu0 %v21999_v12 }
 0xf28   :  { %13284 = vmatprep.subr.bf16.mxu1 %v21999_v12 }
 0xf2d   :  { %11742 = vmatmul.mubr.msk.f32.vlgmr.msra.gmra.mrb[20].mxu0 %vm578_vm1, %v3490_v48 }
 0xf2e   :  { %11777 = vmatmul.mubr.msk.f32.vlgmr.msra.gmra.mrb[24].mxu1 %vm578_vm1, %v3495_v42  ;;  %13262 = vmatpush3.bf16.msra.mxu0 %v13261_v37 }
 0xf2f   :  { %13286 = vmatpush3.bf16.msra.mxu1 %v13285_v53  ;;  %13263 = vmatprep.subr.bf16.mxu0 %v21999_v12 }
 0xf30   :  { %13287 = vmatprep.subr.bf16.mxu1 %v21999_v12  ;;  %11811 = vmatprep.mubr.msk.f32.mxu0 %vm14307_vm4, %v21996_v61 }
 0xf31   :  { %11846 = vmatprep.mubr.msk.f32.mxu1 %vm14307_vm4, %v21996_v61 }
 0xf32   :  { %13265 = vmatpush3.bf16.msra.mxu0 %v13264_v51  ;;  %v9782_v51 = vld [vmem:[%s21836_s6 + $0x10] sm:$0xff] }
 0xf33   :  { %13289 = vmatpush3.bf16.msra.mxu1 %v13288_v35  ;;  %13266 = vmatprep.subr.bf16.mxu0 %v21999_v12 }
 0xf34   :  { %13290 = vmatprep.subr.bf16.mxu1 %v21999_v12 }
 0xf36   :  { %13268 = vmatpush3.bf16.msra.mxu0 %v13267_v58 }
 0xf37   :  { %13292 = vmatpush3.bf16.msra.mxu1 %v13291_v59  ;;  %13269 = vmatprep.subr.bf16.mxu0 %v21999_v12 }
 0xf38   :  { %13293 = vmatprep.subr.bf16.mxu1 %v21999_v12 }
 0xf3a   :  { %13271 = vmatpush3.bf16.msra.mxu0 %v13270_v63  ;;  %v13324_v63 = vpack.c.bf16 %v9802_v50, %v9801_v52 }
 0xf3b   :  { %13295 = vmatpush3.bf16.msra.mxu1 %v13294_v0  ;;  %13272 = vmatprep.subr.bf16.mxu0 %v21999_v12  ;;  %v9803_v0 = vld [vmem:[%s21834_s4 + $0x170] sm:$0xff] }
 0xf3c   :  { %13296 = vmatprep.subr.bf16.mxu1 %v21999_v12  ;;  %v13328_v28 = vpack.c.bf16 %v9804_v44, %v9803_v0 }
 0xf3e   :  { %13274 = vmatpush3.bf16.msra.mxu0 %v13273_v1  ;;  %v13316_v1 = vpack.c.bf16 %v9794_v47, %v9793_v54 }
 0xf3f   :  { %13298 = vmatpush3.bf16.msra.mxu1 %v13297_v3  ;;  %13275 = vmatprep.subr.bf16.mxu0 %v21999_v12  ;;  %v9795_v3 = vld [vmem:[%s21834_s4 + $0xf0] sm:$0xff] }
 0xf40   :  { %13299 = vmatprep.subr.bf16.mxu1 %v21999_v12  ;;  %v13320_v5 = vpack.c.bf16 %v9796_v27, %v9795_v3 }
 0xf42   :  { %13277 = vmatpush3.bf16.msra.mxu0 %v13276_v2 }
 0xf43   :  { %13301 = vmatpush3.bf16.msra.mxu1 %v13300_v7  ;;  %13278 = vmatprep.subr.bf16.mxu0 %v21999_v12 }
 0xf44   :  { %13302 = vmatprep.subr.bf16.mxu1 %v21999_v12 }
 0xf46   :  { %13280 = vmatpush3.bf16.msra.mxu0 %v13279_v36 }
 0xf47   :  { %13304 = vmatpush3.bf16.msra.mxu1 %v13303_v14  ;;  %13281 = vmatprep.subr.bf16.mxu0 %v21999_v12 }
 0xf48   :  { %13305 = vmatprep.subr.bf16.mxu1 %v21999_v12 }
 0xf4a   :  { %13283 = vmatpush3.bf16.msra.mxu0 %v13282_v22 }
 0xf4b   :  { %13307 = vmatpush3.bf16.msra.mxu1 %v13306_v25  ;;  %11849 = vmatprep.subr.mxu0 %v9782_v51 }
 0xf4c   :  { %13309 = vmatprep.subr.bf16.mxu1 %v13308_v31 }
0x1000   :  { %v3869_v26 = vpop.f32.mrb[20].mxu0 }
0x1001   :  { %v3994_v29 = vmul.f32 0.35355338, %v3869_v26  ;;  %v3990_v30 = vpop.f32.mrb[24].mxu1  ;;  %v11743_v40 = vpop.f32.mrb[21].mxu0 }
0x1002   :  { %v3995_v33 = vmul.f32 0.35355338, %v3990_v30  ;;  %v11778_v34 = vpop.f32.mrb[25].mxu1 }
0x1003   :  { %v3996_v38 = vadd.f32 %v3994_v29, %v19120_v57 }
0x1004   :  { %v3997_v24 = vadd.f32 %v3995_v33, %v19120_v57 }
0x1005   :  { %3998 = vmax.xlane.f32.xlu1 %v3996_v38 }
0x1006   :  { %4000 = vmax.xlane.f32.xlu0 %v3997_v24 }
0x1092   :  { %v3999_v18 = vpop.xlane.xlu1 %3998 }
0x1093   :  { %v4001_v43 = vpop.xlane.xlu0 %4000  ;;  %v4002_v23 = vsub.f32 %v3996_v38, %v3999_v18 }
0x1094   :  { %v4003_v48 = vsub.f32 %v3997_v24, %v4001_v43 }
0x1095   :  { %v4004_v42 = vmul.f32 1.442695, %v4002_v23 }
0x1096   :  { %v4006_v37 = vmul.f32 1.442695, %v4003_v48 }
0x1097   :  { %14152 = vpow2.f32 %v4004_v42 }
0x1098   :  { %14154 = vpow2.f32 %v4006_v37 }
0x10a1   :  { %v14153_v53 = vpop.eup %14152 }
0x10a2   :  { %v14155_v10 = vpop.eup %14154  ;;  %4008 = vadd.xlane.f32.xlu1 %v14153_v53 }
0x10a3   :  { %4010 = vadd.xlane.f32.xlu0 %v14155_v10 }
0x112f   :  { %v4009_v35 = vpop.xlane.xlu1 %4008 }
0x1130   :  { %v4011_v41 = vpop.xlane.xlu0 %4010  ;;  %14156 = vrcp.f32 %v4009_v35 }
0x1131   :  { %14158 = vrcp.f32 %v4011_v41 }
0x113a   :  { %v14157_v49 = vpop.eup %14156 }
0x113b   :  { %v14159_v58 = vpop.eup %14158  ;;  %v4014_v59 = vmul.f32 %v14157_v49, %v14153_v53 }
0x113c   :  { %v4015_v60 = vmul.f32 %v14159_v58, %v14155_v10 }
0x113d   :  { %11812 = vmatmul.mubr.f32.vlgmr.msra.gmra.mrb[22].mxu0 %v4014_v59 }
0x113e   :  { %11847 = vmatmul.mubr.f32.vlgmr.msra.gmra.mrb[26].mxu1 %v4015_v60  ;;  %11850 = vmatpush3.msra.mxu0 %v9782_v51 }
0x113f   :  { %13311 = vmatpush3.bf16.msra.mxu1 %v13308_v31  ;;  %11862 = vmatprep.mubr.msk.f32.mxu1 %vm1473_vm0, %v22002_v15 }
0x1140   :  { %13313 = vmatprep.subr.bf16.mxu1 %v13312_v62  ;;  %13317 = vmatprep.subr.bf16.mxu0 %v13316_v1 }
0x1143   :  { %13315 = vmatpush3.bf16.msra.mxu1 %v13312_v62 }
0x1144   :  { %13325 = vmatprep.subr.bf16.mxu1 %v13324_v63 }
0x1146   :  { %11863 = vmatmul.mubr.msk.f32.vlgmr.msra.gmra.mrb[28].mxu1 %vm1473_vm0, %v22003_v39 }
0x1147   :  { %13327 = vmatpush3.bf16.msra.mxu1 %v13324_v63  ;;  %11884 = vmatprep.mubr.msk.f32.mxu1 %vm1473_vm0, %v22002_v15 }
0x1148   :  { %13329 = vmatprep.subr.bf16.mxu1 %v13328_v28 }
0x114b   :  { %13331 = vmatpush3.bf16.msra.mxu1 %v13328_v28 }
0x114c   :  { %13364 = vmatprep.subr.bf16.mxu1 %v21999_v12 }
0x114e   :  { %11885 = vmatmul.mubr.msk.f32.vlgmr.msra.gmra.mrb[30].mxu1 %vm1473_vm0, %v22003_v39 }
0x114f   :  { %11954 = vmatprep.mubr.msk.f32.mxu1 %vm14307_vm4, %v21996_v61 }
0x1210   :  { %v4082_v21 = vpop.f32.mrb[22].mxu0 }
0x1211   :  { %v4152_v6 = vpop.f32.mrb[26].mxu1  ;;  %v11813_v2 = vpop.f32.mrb[23].mxu0  ;;  %11851 = vmatprep.mubr.msk.f32.mxu0 %vm578_vm1, %v4082_v21 }
0x1212   :  { %v11848_v7 = vpop.f32.mrb[27].mxu1  ;;  %11852 = vmatmul.mubr.msk.f32.vlgmr.msra.gmra.mrb[16].mxu0 %vm578_vm1, %v4152_v6 }
0x1213   :  { %13319 = vmatpush3.bf16.msra.mxu0 %v13316_v1  ;;  %11873 = vmatprep.mubr.msk.f32.mxu0 %vm1473_vm0, %v22002_v15 }
0x1214   :  { %13321 = vmatprep.subr.bf16.mxu0 %v13320_v5 }
0x1217   :  { %13323 = vmatpush3.bf16.msra.mxu0 %v13320_v5 }
0x1218   :  { %13332 = vmatprep.subr.bf16.mxu0 %v21999_v12 }
0x1219   :  { %v19873_v8 = vpop.f32.mrb[28].mxu1 }
0x121a   :  { %v19875_v9 = vpop.f32.mrb[29].mxu1  ;;  %11874 = vmatmul.mubr.msk.f32.vlgmr.msra.gmra.mrb[24].mxu0 %vm1473_vm0, %v22003_v39 }
0x121b   :  { %11919 = vmatprep.mubr.msk.f32.mxu0 %vm14307_vm4, %v21996_v61 }
0x1221   :  { %v11886_v11 = vpop.f32.mrb[30].mxu1 }
0x1222   :  { %v4502_v36 = vadd.f32 %v11886_v11, %v9806_v13  ;;  %v4496_v14 = vpop.f32.mrb[31].mxu1 }
0x1223   :  { %v4497_v16 = vadd.f32 %v9806_v13, %v4496_v14  ;;  %v9790_v14 = vld [vmem:[%s21835_s5 + $0x3] ss:$0 sm:$0xff] }
0x1224   :  { %9812 = vst.msk [vmem:[%s18801_s22 + $0x780] sm:$0xff] %vm578_vm1, %v4502_v36 }
0x1225   :  { %9810 = vst.msk [vmem:[%s18801_s22 + $0x700] sm:$0xff] %vm578_vm1, %v4497_v16 }
0x12ed   :  { %v11875_v19 = vpop.f32.mrb[24].mxu0 }
0x12ee   :  { %v4414_v20 = vadd.f32 %v11875_v19, %v9798_v17  ;;  %v4408_v22 = vpop.f32.mrb[25].mxu0 }
0x12ef   :  { %v4409_v25 = vadd.f32 %v9798_v17, %v4408_v22  ;;  %v4321_v22 = vadd.f32 %v9790_v14, %v19875_v9 }
0x12f0   :  { %9811 = vst.msk [vmem:[%s18801_s22 + $0x380] sm:$0xff] %vm578_vm1, %v4414_v20 }
0x12f1   :  { %9809 = vst.msk [vmem:[%s18801_s22 + $0x300] sm:$0xff] %vm578_vm1, %v4409_v25  ;;  %v4326_v25 = vadd.f32 %v19873_v8, %v9790_v14 }
0x12f8   :  { %v9813_v26 = vld [vmem:[%s21845_s15 + $0x300] sm:$0xff]  ;;  %v9814_v29 = vld [vmem:[%s21845_s15 + $0x308] sm:$0xff]  ;;  %v9815_v38 = vld [vmem:[%s21845_s15 + $0x310] sm:$0xff] }
0x12f9   :  { %v9829_v30 = vld [vmem:[%s21845_s15 + $0x380] sm:$0xff]  ;;  %v13333_v40 = vpack.c.bf16 %v9814_v29, %v9813_v26  ;;  %v9830_v33 = vld [vmem:[%s21845_s15 + $0x388] sm:$0xff]  ;;  %v9816_v24 = vld [vmem:[%s21845_s15 + $0x318] sm:$0xff] }
0x12fa   :  { %v13365_v34 = vpack.c.bf16 %v9830_v33, %v9829_v30  ;;  %v9831_v18 = vld [vmem:[%s21845_s15 + $0x390] sm:$0xff]  ;;  %v9832_v43 = vld [vmem:[%s21845_s15 + $0x398] sm:$0xff]  ;;  %v13337_v23 = vpack.c.bf16 %v9816_v24, %v9815_v38  ;;  %v9817_v42 = vld [vmem:[%s21845_s15 + $0x320] sm:$0xff] }
0x12fb   :  { %13335 = vmatpush3.bf16.xpose.msk.msra.mxu0 %vm18846_vm5, %v13333_v40  ;;  %v13369_v48 = vpack.c.bf16 %v9832_v43, %v9831_v18  ;;  %v9818_v37 = vld [vmem:[%s21845_s15 + $0x328] sm:$0xff]  ;;  %v9833_v53 = vld [vmem:[%s21845_s15 + $0x3a0] sm:$0xff]  ;;  %v9819_v31 = vld [vmem:[%s21845_s15 + $0x330] sm:$0xff] }
0x12fc   :  { %13367 = vmatpush3.bf16.xpose.msk.msra.mxu1 %vm18846_vm5, %v13365_v34  ;;  %13336 = vmatprep.subr.bf16.mxu0 %v21999_v12  ;;  %v9834_v10 = vld [vmem:[%s21845_s15 + $0x3a8] sm:$0xff]  ;;  %v13341_v55 = vpack.c.bf16 %v9818_v37, %v9817_v42  ;;  %v9820_v51 = vld [vmem:[%s21845_s15 + $0x338] sm:$0xff]  ;;  %v9835_v35 = vld [vmem:[%s21845_s15 + $0x3b0] sm:$0xff] }
0x12fd   :  { %13368 = vmatprep.subr.bf16.mxu1 %v21999_v12  ;;  %v13373_v32 = vpack.c.bf16 %v9834_v10, %v9833_v53  ;;  %v9836_v41 = vld [vmem:[%s21845_s15 + $0x3b8] sm:$0xff]  ;;  %v13345_v46 = vpack.c.bf16 %v9820_v51, %v9819_v31  ;;  %v9821_v49 = vld [vmem:[%s21845_s15 + $0x340] sm:$0xff]  ;;  %v9822_v58 = vld [vmem:[%s21845_s15 + $0x348] sm:$0xff] }
0x12fe   :  { %v13377_v56 = vpack.c.bf16 %v9836_v41, %v9835_v35  ;;  %v9837_v59 = vld [vmem:[%s21845_s15 + $0x3c0] sm:$0xff]  ;;  %v9838_v60 = vld [vmem:[%s21845_s15 + $0x3c8] sm:$0xff]  ;;  %v13349_v62 = vpack.c.bf16 %v9822_v58, %v9821_v49  ;;  %v9823_v50 = vld [vmem:[%s21845_s15 + $0x350] sm:$0xff] }
0x12ff   :  { %v13381_v52 = vpack.c.bf16 %v9838_v60, %v9837_v59  ;;  %v9824_v63 = vld [vmem:[%s21845_s15 + $0x358] sm:$0xff]  ;;  %v9839_v0 = vld [vmem:[%s21845_s15 + $0x3d0] sm:$0xff]  ;;  %v9825_v47 = vld [vmem:[%s21845_s15 + $0x360] sm:$0xff] }
0x1300   :  { %v9840_v44 = vld [vmem:[%s21845_s15 + $0x3d8] sm:$0xff]  ;;  %v13353_v28 = vpack.c.bf16 %v9824_v63, %v9823_v50  ;;  %v9826_v1 = vld [vmem:[%s21845_s15 + $0x368] sm:$0xff]  ;;  %v9841_v3 = vld [vmem:[%s21845_s15 + $0x3e0] sm:$0xff] }
0x1301   :  { %v13385_v54 = vpack.c.bf16 %v9840_v44, %v9839_v0  ;;  %v9842_v27 = vld [vmem:[%s21845_s15 + $0x3e8] sm:$0xff]  ;;  %v13357_v21 = vpack.c.bf16 %v9826_v1, %v9825_v47  ;;  %v9827_v6 = vld [vmem:[%s21845_s15 + $0x370] sm:$0xff]  ;;  %v9828_v2 = vld [vmem:[%s21845_s15 + $0x378] sm:$0xff] }
0x1302   :  { %v13389_v5 = vpack.c.bf16 %v9842_v27, %v9841_v3  ;;  %v9843_v7 = vld [vmem:[%s21845_s15 + $0x3f0] sm:$0xff]  ;;  %v9844_v13 = vld [vmem:[%s21845_s15 + $0x3f8] sm:$0xff]  ;;  %v13361_v11 = vpack.c.bf16 %v9828_v2, %v9827_v6  ;;  %v9845_v16 = vld [vmem:[%s21845_s15 + $0x700] sm:$0xff] }
0x1303   :  { %13339 = vmatpush3.bf16.xpose.msk.msra.mxu0 %vm18846_vm5, %v13337_v23  ;;  %v13393_v36 = vpack.c.bf16 %v9844_v13, %v9843_v7  ;;  %v9846_v17 = vld [vmem:[%s21845_s15 + $0x708] sm:$0xff]  ;;  %v9861_v19 = vld [vmem:[%s21845_s15 + $0x780] sm:$0xff]  ;;  %v9847_v30 = vld [vmem:[%s21845_s15 + $0x710] sm:$0xff] }
0x1304   :  { %13371 = vmatpush3.bf16.xpose.msk.msra.mxu1 %vm18846_vm5, %v13369_v48  ;;  %13340 = vmatprep.subr.bf16.mxu0 %v21999_v12  ;;  %v9862_v20 = vld [vmem:[%s21845_s15 + $0x788] sm:$0xff]  ;;  %v13397_v26 = vpack.c.bf16 %v9846_v17, %v9845_v16  ;;  %v9848_v40 = vld [vmem:[%s21845_s15 + $0x718] sm:$0xff]  ;;  %v9863_v9 = vld [vmem:[%s21845_s15 + $0x790] sm:$0xff] }
0x1305   :  { %13372 = vmatprep.subr.bf16.mxu1 %v21999_v12  ;;  %v13421_v29 = vpack.c.bf16 %v9862_v20, %v9861_v19  ;;  %v9864_v8 = vld [vmem:[%s21845_s15 + $0x798] sm:$0xff]  ;;  %v13400_v33 = vpack.c.bf16 %v9848_v40, %v9847_v30  ;;  %v9849_v38 = vld [vmem:[%s21845_s15 + $0x720] sm:$0xff]  ;;  %v9850_v24 = vld [vmem:[%s21845_s15 + $0x728] sm:$0xff] }
0x1306   :  { %v13424_v34 = vpack.c.bf16 %v9864_v8, %v9863_v9  ;;  %v9865_v18 = vld [vmem:[%s21845_s15 + $0x7a0] sm:$0xff]  ;;  %v9866_v43 = vld [vmem:[%s21845_s15 + $0x7a8] sm:$0xff]  ;;  %v13403_v23 = vpack.c.bf16 %v9850_v24, %v9849_v38  ;;  %v9851_v42 = vld [vmem:[%s21845_s15 + $0x730] sm:$0xff] }
0x1307   :  { %v13427_v48 = vpack.c.bf16 %v9866_v43, %v9865_v18  ;;  %v9852_v37 = vld [vmem:[%s21845_s15 + $0x738] sm:$0xff]  ;;  %v9867_v53 = vld [vmem:[%s21845_s15 + $0x7b0] sm:$0xff]  ;;  %v9853_v31 = vld [vmem:[%s21845_s15 + $0x740] sm:$0xff] }
0x1308   :  { %v9868_v10 = vld [vmem:[%s21845_s15 + $0x7b8] sm:$0xff]  ;;  %v9854_v51 = vld [vmem:[%s21845_s15 + $0x748] sm:$0xff]  ;;  %v9869_v35 = vld [vmem:[%s21845_s15 + $0x7c0] sm:$0xff] }
0x1309   :  { %v9870_v41 = vld [vmem:[%s21845_s15 + $0x7c8] sm:$0xff]  ;;  %v9855_v49 = vld [vmem:[%s21845_s15 + $0x750] sm:$0xff]  ;;  %v9856_v58 = vld [vmem:[%s21845_s15 + $0x758] sm:$0xff] }
0x130a   :  { %v9871_v59 = vld [vmem:[%s21845_s15 + $0x7d0] sm:$0xff]  ;;  %v9872_v60 = vld [vmem:[%s21845_s15 + $0x7d8] sm:$0xff]  ;;  %v9857_v50 = vld [vmem:[%s21845_s15 + $0x760] sm:$0xff] }
0x130b   :  { %13343 = vmatpush3.bf16.xpose.msk.msra.mxu0 %vm18846_vm5, %v13341_v55  ;;  %v13406_v55 = vpack.c.bf16 %v9852_v37, %v9851_v42  ;;  %v9858_v63 = vld [vmem:[%s21845_s15 + $0x768] sm:$0xff]  ;;  %v9873_v0 = vld [vmem:[%s21845_s15 + $0x7e0] sm:$0xff]  ;;  %v9859_v47 = vld [vmem:[%s21845_s15 + $0x770] sm:$0xff] }
0x130c   :  { %13375 = vmatpush3.bf16.xpose.msk.msra.mxu1 %vm18846_vm5, %v13373_v32  ;;  %13344 = vmatprep.subr.bf16.mxu0 %v21999_v12  ;;  %v13430_v32 = vpack.c.bf16 %v9868_v10, %v9867_v53  ;;  %v9874_v44 = vld [vmem:[%s21845_s15 + $0x7e8] sm:$0xff]  ;;  %v9860_v1 = vld [vmem:[%s21845_s15 + $0x778] sm:$0xff]  ;;  %v9875_v3 = vld [vmem:[%s21845_s15 + $0x7f0] sm:$0xff] }
0x130d   :  { %13376 = vmatprep.subr.bf16.mxu1 %v21999_v12  ;;  %v9876_v27 = vld [vmem:[%s21845_s15 + $0x7f8] sm:$0xff]  ;;  %v9914_v42 = vld [vmem:[%s21840_s10] ss:$0 sm:$0xff] }
0x130e   :  { %v9911_v40 = vld [vmem:[%s21836_s6 + $0x18] sm:$0xff] }
0x1313   :  { %13347 = vmatpush3.bf16.xpose.msk.msra.mxu0 %vm18846_vm5, %v13345_v46  ;;  %v13409_v46 = vpack.c.bf16 %v9854_v51, %v9853_v31 }
0x1314   :  { %13379 = vmatpush3.bf16.xpose.msk.msra.mxu1 %vm18846_vm5, %v13377_v56  ;;  %13348 = vmatprep.subr.bf16.mxu0 %v21999_v12  ;;  %v13433_v56 = vpack.c.bf16 %v9870_v41, %v9869_v35 }
0x1315   :  { %13380 = vmatprep.subr.bf16.mxu1 %v21999_v12 }
0x131b   :  { %13351 = vmatpush3.bf16.xpose.msk.msra.mxu0 %vm18846_vm5, %v13349_v62  ;;  %v13412_v62 = vpack.c.bf16 %v9856_v58, %v9855_v49 }
0x131c   :  { %13383 = vmatpush3.bf16.xpose.msk.msra.mxu1 %vm18846_vm5, %v13381_v52  ;;  %13352 = vmatprep.subr.bf16.mxu0 %v21999_v12  ;;  %v13436_v52 = vpack.c.bf16 %v9872_v60, %v9871_v59 }
0x131d   :  { %13384 = vmatprep.subr.bf16.mxu1 %v21999_v12 }
0x1323   :  { %13355 = vmatpush3.bf16.xpose.msk.msra.mxu0 %vm18846_vm5, %v13353_v28  ;;  %v13415_v28 = vpack.c.bf16 %v9858_v63, %v9857_v50  ;;  %v5130_v50 = vld [vmem:[%s21837_s7 + $0x8] sm:$0xff]  ;;  %v5131_v63 = vld [vmem:[%s21837_s7 + $0x10] sm:$0xff] }
0x1324   :  { %13387 = vmatpush3.bf16.xpose.msk.msra.mxu1 %vm18846_vm5, %v13385_v54  ;;  %13356 = vmatprep.subr.bf16.mxu0 %v21999_v12  ;;  %v13439_v54 = vpack.c.bf16 %v9874_v44, %v9873_v0  ;;  %v5132_v44 = vld [vmem:[%s21837_s7 + $0x18] sm:$0xff] }
0x1325   :  { %13388 = vmatprep.subr.bf16.mxu1 %v21999_v12 }
0x132b   :  { %13359 = vmatpush3.bf16.xpose.msk.msra.mxu0 %vm18846_vm5, %v13357_v21  ;;  %v13418_v21 = vpack.c.bf16 %v9860_v1, %v9859_v47  ;;  %v5240_v47 = vld [vmem:[%s21839_s9 + $0x8] sm:$0xff] }
0x132c   :  { %13391 = vmatpush3.bf16.xpose.msk.msra.mxu1 %vm18846_vm5, %v13389_v5  ;;  %13360 = vmatprep.subr.bf16.mxu0 %v21999_v12  ;;  %v13442_v5 = vpack.c.bf16 %v9876_v27, %v9875_v3 }
0x132d   :  { %13392 = vmatprep.subr.bf16.mxu1 %v21999_v12 }
0x1333   :  { %13363 = vmatpush3.bf16.xpose.msk.msra.mxu0 %vm18846_vm5, %v13361_v11 }
0x1334   :  { %13395 = vmatpush3.bf16.xpose.msk.msra.mxu1 %vm18846_vm5, %v13393_v36  ;;  %13396 = vmatprep.subr.bf16.mxu0 %v21999_v12 }
0x1335   :  { %13420 = vmatprep.subr.bf16.mxu1 %v21999_v12 }
0x133a   :  { %11920 = vmatmul.mubr.msk.f32.vlgmr.msra.gmra.mrb[26].mxu0 %vm578_vm1, %v4321_v22 }
0x133b   :  { %11955 = vmatmul.mubr.msk.f32.vlgmr.msra.gmra.mrb[32].mxu1 %vm578_vm1, %v4326_v25  ;;  %13398 = vmatpush3.bf16.msra.mxu0 %v13397_v26 }
0x133c   :  { %13422 = vmatpush3.bf16.msra.mxu1 %v13421_v29  ;;  %13399 = vmatprep.subr.bf16.mxu0 %v21999_v12 }
0x133d   :  { %13423 = vmatprep.subr.bf16.mxu1 %v21999_v12  ;;  %11989 = vmatprep.mubr.msk.f32.mxu0 %vm14307_vm4, %v21996_v61 }
0x133e   :  { %12024 = vmatprep.mubr.msk.f32.mxu1 %vm14307_vm4, %v21996_v61 }
0x133f   :  { %13401 = vmatpush3.bf16.msra.mxu0 %v13400_v33 }
0x1340   :  { %13425 = vmatpush3.bf16.msra.mxu1 %v13424_v34  ;;  %13402 = vmatprep.subr.bf16.mxu0 %v21999_v12 }
0x1341   :  { %13426 = vmatprep.subr.bf16.mxu1 %v21999_v12 }
0x1343   :  { %13404 = vmatpush3.bf16.msra.mxu0 %v13403_v23 }
0x1344   :  { %13428 = vmatpush3.bf16.msra.mxu1 %v13427_v48  ;;  %13405 = vmatprep.subr.bf16.mxu0 %v21999_v12 }
0x1345   :  { %13429 = vmatprep.subr.bf16.mxu1 %v21999_v12 }
0x1347   :  { %13407 = vmatpush3.bf16.msra.mxu0 %v13406_v55 }
0x1348   :  { %13431 = vmatpush3.bf16.msra.mxu1 %v13430_v32  ;;  %13408 = vmatprep.subr.bf16.mxu0 %v21999_v12 }
0x1349   :  { %13432 = vmatprep.subr.bf16.mxu1 %v21999_v12 }
0x134b   :  { %13410 = vmatpush3.bf16.msra.mxu0 %v13409_v46 }
0x134c   :  { %13434 = vmatpush3.bf16.msra.mxu1 %v13433_v56  ;;  %13411 = vmatprep.subr.bf16.mxu0 %v21999_v12 }
0x134d   :  { %13435 = vmatprep.subr.bf16.mxu1 %v21999_v12 }
0x134f   :  { %13413 = vmatpush3.bf16.msra.mxu0 %v13412_v62 }
0x1350   :  { %13437 = vmatpush3.bf16.msra.mxu1 %v13436_v52  ;;  %13414 = vmatprep.subr.bf16.mxu0 %v21999_v12 }
0x1351   :  { %13438 = vmatprep.subr.bf16.mxu1 %v21999_v12 }
0x1353   :  { %13416 = vmatpush3.bf16.msra.mxu0 %v13415_v28  ;;  %v13448_v28 = vpack.c.bf16 %v5132_v44, %v5131_v63 }
0x1354   :  { %13440 = vmatpush3.bf16.msra.mxu1 %v13439_v54  ;;  %13417 = vmatprep.subr.bf16.mxu0 %v21999_v12  ;;  %v5239_v54 = vld [vmem:[%s21839_s9] sm:$0xff] }
0x1355   :  { %13441 = vmatprep.subr.bf16.mxu1 %v21999_v12  ;;  %v13452_v1 = vpack.c.bf16 %v5240_v47, %v5239_v54 }
0x1357   :  { %13419 = vmatpush3.bf16.msra.mxu0 %v13418_v21 }
0x1358   :  { %13443 = vmatpush3.bf16.msra.mxu1 %v13442_v5  ;;  %12027 = vmatprep.subr.mxu0 %v9911_v40 }
0x1359   :  { %13453 = vmatprep.subr.bf16.mxu1 %v13452_v1 }
0x140d   :  { %v4700_v6 = vpop.f32.mrb[26].mxu0 }
0x140e   :  { %v4825_v2 = vmul.f32 0.35355338, %v4700_v6  ;;  %v4821_v7 = vpop.f32.mrb[32].mxu1  ;;  %v11921_v13 = vpop.f32.mrb[27].mxu0 }
0x140f   :  { %v4826_v11 = vmul.f32 0.35355338, %v4821_v7  ;;  %v11956_v36 = vpop.f32.mrb[33].mxu1  ;;  %v9917_v13 = vld [vmem:[%s21840_s10 + $0x1] ss:$0 sm:$0xff] }
0x1410   :  { %v4827_v14 = vadd.f32 %v4825_v2, %v19120_v57 }
0x1411   :  { %v4828_v16 = vadd.f32 %v4826_v11, %v19120_v57 }
0x1412   :  { %4829 = vmax.xlane.f32.xlu1 %v4827_v14 }
0x1413   :  { %4831 = vmax.xlane.f32.xlu0 %v4828_v16 }
0x149f   :  { %v4830_v17 = vpop.xlane.xlu1 %4829 }
0x14a0   :  { %v4832_v19 = vpop.xlane.xlu0 %4831  ;;  %v4833_v20 = vsub.f32 %v4827_v14, %v4830_v17 }
0x14a1   :  { %v4834_v22 = vsub.f32 %v4828_v16, %v4832_v19  ;;  %v9918_v16 = vld [vmem:[%s21840_s10 + $0x2] ss:$0 sm:$0xff] }
0x14a2   :  { %v4835_v25 = vmul.f32 1.442695, %v4833_v20 }
0x14a3   :  { %v4837_v26 = vmul.f32 1.442695, %v4834_v22 }
0x14a4   :  { %14160 = vpow2.f32 %v4835_v25  ;;  %v5241_v25 = vld [vmem:[%s21839_s9 + $0x10] sm:$0xff] }
0x14a5   :  { %14162 = vpow2.f32 %v4837_v26  ;;  %v5242_v26 = vld [vmem:[%s21839_s9 + $0x18] sm:$0xff] }
0x14ae   :  { %v14161_v29 = vpop.eup %14160 }
0x14af   :  { %v14163_v30 = vpop.eup %14162  ;;  %4839 = vadd.xlane.f32.xlu1 %v14161_v29 }
0x14b0   :  { %4841 = vadd.xlane.f32.xlu0 %v14163_v30 }
0x153c   :  { %v4840_v9 = vpop.xlane.xlu1 %4839 }
0x153d   :  { %v4842_v8 = vpop.xlane.xlu0 %4841  ;;  %14164 = vrcp.f32 %v4840_v9 }
0x153e   :  { %14166 = vrcp.f32 %v4842_v8  ;;  %v5245_v8 = vld [vmem:[%s21839_s9 + $0x30] sm:$0xff] }
0x1547   :  { %v14165_v33 = vpop.eup %14164 }
0x1548   :  { %v14167_v34 = vpop.eup %14166  ;;  %v4845_v38 = vmul.f32 %v14165_v33, %v14161_v29  ;;  %v5243_v29 = vld [vmem:[%s21839_s9 + $0x20] sm:$0xff]  ;;  %v5246_v33 = vld [vmem:[%s21839_s9 + $0x38] sm:$0xff] }
0x1549   :  { %v4846_v24 = vmul.f32 %v14167_v34, %v14163_v30  ;;  %v13456_v30 = vpack.c.bf16 %v5242_v26, %v5241_v25  ;;  %v13464_v34 = vpack.c.bf16 %v5246_v33, %v5245_v8  ;;  %v9930_v8 = vld [vmem:[%s21834_s4 + $0x190] sm:$0xff] }
0x154a   :  { %11990 = vmatmul.mubr.f32.vlgmr.msra.gmra.mrb[28].mxu0 %v4845_v38  ;;  %v5247_v38 = vld [vmem:[%s21839_s9 + $0x40] sm:$0xff] }
0x154b   :  { %12025 = vmatmul.mubr.f32.vlgmr.msra.gmra.mrb[34].mxu1 %v4846_v24  ;;  %12028 = vmatpush3.msra.mxu0 %v9911_v40  ;;  %v5244_v40 = vld [vmem:[%s21839_s9 + $0x28] sm:$0xff] }
0x154c   :  { %13455 = vmatpush3.bf16.msra.mxu1 %v13452_v1  ;;  %v13460_v9 = vpack.c.bf16 %v5244_v40, %v5243_v29  ;;  %v5248_v24 = vld [vmem:[%s21839_s9 + $0x48] sm:$0xff] }
0x154d   :  { %13457 = vmatprep.subr.bf16.mxu1 %v13456_v30 }
0x1550   :  { %13459 = vmatpush3.bf16.msra.mxu1 %v13456_v30 }
0x1551   :  { %13461 = vmatprep.subr.bf16.mxu1 %v13460_v9 }
0x1554   :  { %13463 = vmatpush3.bf16.msra.mxu1 %v13460_v9  ;;  %v9929_v9 = vld [vmem:[%s21834_s4 + $0x188] sm:$0xff] }
0x1555   :  { %13465 = vmatprep.subr.bf16.mxu1 %v13464_v34 }
0x1558   :  { %13467 = vmatpush3.bf16.msra.mxu1 %v13464_v34  ;;  %v9931_v34 = vld [vmem:[%s21834_s4 + $0x198] sm:$0xff] }
0x161d   :  { %v4913_v18 = vpop.f32.mrb[28].mxu0 }
0x161e   :  { %v4983_v43 = vpop.f32.mrb[34].mxu1  ;;  %v11991_v23 = vpop.f32.mrb[29].mxu0  ;;  %12029 = vmatprep.mubr.msk.f32.mxu0 %vm578_vm1, %v4913_v18  ;;  %v13468_v18 = vpack.c.bf16 %v5248_v24, %v5247_v38  ;;  %v13488_v38 = vpack.c.bf16 %v9931_v34, %v9930_v8  ;;  %v9936_v24 = vld [vmem:[%s21834_s4 + $0x200] sm:$0xff] }
0x161f   :  { %v12026_v48 = vpop.f32.mrb[35].mxu1  ;;  %12030 = vmatmul.mubr.msk.f32.vlgmr.msra.gmra.mrb[16].mxu0 %vm578_vm1, %v4983_v43  ;;  %v5249_v43 = vld [vmem:[%s21839_s9 + $0x50] sm:$0xff]  ;;  %v5250_v23 = vld [vmem:[%s21839_s9 + $0x58] sm:$0xff] }
0x1620   :  { %13469 = vmatprep.subr.bf16.mxu1 %v13468_v18  ;;  %v13472_v48 = vpack.c.bf16 %v5250_v23, %v5249_v43 }
0x1621   :  { %13471 = vmatpush3.bf16.msra.mxu1 %v13468_v18  ;;  %v9937_v18 = vld [vmem:[%s21834_s4 + $0x208] sm:$0xff] }
0x1622   :  { %13473 = vmatprep.subr.bf16.mxu1 %v13472_v48  ;;  %v13492_v43 = vpack.c.bf16 %v9937_v18, %v9936_v24 }
0x1625   :  { %13475 = vmatpush3.bf16.msra.mxu1 %v13472_v48 }
0x16f2   :  { %v12031_v37 = vpop.f32.mrb[16].mxu0 }
0x16f3   :  { %v5080_v53 = vadd.f32 %v12031_v37, %v9914_v42  ;;  %v5061_v10 = vpop.f32.mrb[17].mxu0  ;;  %v5252_v37 = vld [vmem:[%s21839_s9 + $0x68] sm:$0xff] }
0x16f4   :  { %v5079_v55 = vadd.f32 %v9914_v42, %v5061_v10  ;;  %v5251_v42 = vld [vmem:[%s21839_s9 + $0x60] sm:$0xff]  ;;  %v5253_v10 = vld [vmem:[%s21839_s9 + $0x70] sm:$0xff] }
0x16f5   :  { %v5082_v32 = vadd.f32 %v5080_v53, %v22003_v39  ;;  %v13476_v53 = vpack.c.bf16 %v5252_v37, %v5251_v42 }
0x16f6   :  { %v5081_v31 = vadd.f32 %v5079_v55, %v22002_v15  ;;  %v5129_v15 = vld [vmem:[%s21837_s7] sm:$0xff]  ;;  %v5254_v55 = vld [vmem:[%s21839_s9 + $0x78] sm:$0xff] }
0x16f7   :  { %v5090_v51 = vsel %vm1473_vm0, %v5082_v32, 0.0  ;;  %v13444_v0 = vpack.c.bf16 %v5130_v50, %v5129_v15  ;;  %13477 = vmatprep.subr.bf16.mxu1 %v13476_v53 }
0x16f8   :  { %5091 = vadd.xlane.f32.xlu0 %v5090_v51  ;;  %v5087_v35 = vsel %vm1473_vm0, %v5081_v31, 0.0  ;;  %13479 = vmatpush3.bf16.msra.mxu1 %v13476_v53 }
0x16f9   :  { %5088 = vadd.xlane.f32.xlu1 %v5087_v35  ;;  %13445 = vmatprep.subr.bf16.mxu0 %v13444_v0 }
0x16fa   :  { %13447 = vmatpush3.bf16.msra.mxu0 %v13444_v0 }
0x16fb   :  { %13449 = vmatprep.subr.bf16.mxu0 %v13448_v28 }
0x16fe   :  { %13451 = vmatpush3.bf16.msra.mxu0 %v13448_v28 }
0x1785   :  { %v5092_v41 = vpop.xlane.xlu0 %5091 }
0x1786   :  { %v5094_v46 = vmul.f32 0.03125, %v5092_v41  ;;  %v5089_v56 = vpop.xlane.xlu1 %5088 }
0x1787   :  { %v5093_v49 = vmul.f32 0.03125, %v5089_v56 }
0x1788   :  { %v5096_v58 = vsub.f32 %v5082_v32, %v5094_v46  ;;  %v13480_v32 = vpack.c.bf16 %v5254_v55, %v5253_v10 }
0x1789   :  { %v5095_v59 = vsub.f32 %v5081_v31, %v5093_v49  ;;  %v9919_v31 = vld [vmem:[%s21838_s8] ss:$0 sm:$0xff] }
0x178a   :  { %v5098_v60 = vmul.f32 %v5096_v58, %v5096_v58  ;;  %13481 = vmatprep.subr.bf16.mxu1 %v13480_v32 }
0x178b   :  { %v5097_v62 = vmul.f32 %v5095_v59, %v5095_v59  ;;  %13483 = vmatpush3.bf16.msra.mxu1 %v13480_v32  ;;  %v9926_v32 = vld [vmem:[%s21840_s10 + $0x3] ss:$0 sm:$0xff] }
0x178c   :  { %v5102_v52 = vsel %vm1473_vm0, %v5098_v60, 0.0  ;;  %13540 = vmatprep.subr.bf16.mxu1 %v21999_v12 }
0x178d   :  { %5103 = vadd.xlane.f32.xlu0 %v5102_v52  ;;  %v5099_v39 = vsel %vm1473_vm0, %v5097_v62, 0.0 }
0x178e   :  { %5100 = vadd.xlane.f32.xlu1 %v5099_v39 }
0x181a   :  { %v5104_v3 = vpop.xlane.xlu0 %5103 }
0x181b   :  { %v5106_v27 = vmul.f32 0.03125, %v5104_v3  ;;  %v5101_v21 = vpop.xlane.xlu1 %5100 }
0x181c   :  { %v5105_v5 = vmul.f32 0.03125, %v5101_v21 }
0x181d   :  { %v5108_v6 = vadd.f32 1e-05, %v5106_v27  ;;  %v9923_v27 = vld [vmem:[%s21840_s10 + $0x5] ss:$0 sm:$0xff] }
0x181e   :  { %v5107_v2 = vadd.f32 1e-05, %v5105_v5 }
0x181f   :  { %14168 = vrsqrt.f32 %v5108_v6 }
0x1820   :  { %14170 = vrsqrt.f32 %v5107_v2 }
0x1829   :  { %v14169_v7 = vpop.eup %14168 }
0x182a   :  { %v14171_v11 = vpop.eup %14170  ;;  %v5112_v36 = vmul.f32 %v14169_v7, %v5096_v58 }
0x182b   :  { %v5111_v14 = vmul.f32 %v14171_v11, %v5095_v59 }
0x182c   :  { %v5120_v17 = vmul.f32 %v9917_v13, %v5112_v36 }
0x182d   :  { %v5119_v19 = vmul.f32 %v9917_v13, %v5111_v14 }
0x182e   :  { %v20202_v22 = vadd.f32 %v9918_v16, %v5120_v17 }
0x182f   :  { %v20200_v20 = vadd.f32 %v9918_v16, %v5119_v19 }
0x1831   :  { %12040 = vmatprep.mubr.msk.f32.mxu0 %vm1473_vm0, %v20200_v20 }
0x1832   :  { %12041 = vmatmul.mubr.msk.f32.vlgmr.msra.gmra.mrb[30].mxu0 %vm1473_vm0, %v20202_v22 }
0x1905   :  { %v12042_v51 = vpop.f32.mrb[30].mxu0 }
0x1906   :  { %v5218_v35 = vadd.f32 %v12042_v51, %v9919_v31  ;;  %v5212_v41 = vpop.f32.mrb[31].mxu0 }
0x1907   :  { %v5213_v46 = vadd.f32 %v9919_v31, %v5212_v41  ;;  %v9927_v41 = vld [vmem:[%s21840_s10 + $0x4] ss:$0 sm:$0xff] }
0x1908   :  { %v5224_v56 = vmul.f32 0.044715, %v5218_v35  ;;  %v5222_v47 = vmul.f32 0.5, %v5218_v35 }
0x1909   :  { %v5223_v49 = vmul.f32 0.044715, %v5213_v46  ;;  %v5221_v28 = vmul.f32 0.5, %v5213_v46 }
0x190a   :  { %v5226_v58 = vmul.f32 %v5224_v56, %v5218_v35 }
0x190b   :  { %v5225_v59 = vmul.f32 %v5223_v49, %v5213_v46  ;;  %v9938_v49 = vld [vmem:[%s21834_s4 + $0x210] sm:$0xff] }
0x190c   :  { %v5228_v60 = vmul.f32 %v5226_v58, %v5218_v35  ;;  %v9939_v58 = vld [vmem:[%s21834_s4 + $0x218] sm:$0xff] }
0x190d   :  { %v5227_v62 = vmul.f32 %v5225_v59, %v5213_v46 }
0x190e   :  { %v5230_v52 = vadd.f32 %v5228_v60, %v5218_v35 }
0x190f   :  { %v5229_v39 = vadd.f32 %v5227_v62, %v5213_v46  ;;  %v13496_v62 = vpack.c.bf16 %v9939_v58, %v9938_v49 }
0x1910   :  { %v5232_v15 = vmul.f32 0.7978846, %v5230_v52  ;;  %v9944_v52 = vld [vmem:[%s21834_s4 + $0x280] sm:$0xff] }
0x1911   :  { %v5231_v50 = vmul.f32 0.7978846, %v5229_v39  ;;  %v9945_v39 = vld [vmem:[%s21834_s4 + $0x288] sm:$0xff] }
0x1912   :  { %14172 = vtanh.f32 %v5232_v15  ;;  %v13500_v15 = vpack.c.bf16 %v9945_v39, %v9944_v52 }
0x1913   :  { %14174 = vtanh.f32 %v5231_v50  ;;  %v9946_v50 = vld [vmem:[%s21834_s4 + $0x290] sm:$0xff] }
0x191c   :  { %v14173_v63 = vpop.eup %14172 }
0x191d   :  { %v14175_v0 = vpop.eup %14174  ;;  %v5236_v44 = vadd.f32 1.0, %v14173_v63  ;;  %v9947_v63 = vld [vmem:[%s21834_s4 + $0x298] sm:$0xff] }
0x191e   :  { %v5235_v54 = vadd.f32 1.0, %v14175_v0  ;;  %v13504_v0 = vpack.c.bf16 %v9947_v63, %v9946_v50 }
0x191f   :  { %v5238_v3 = vmul.f32 %v5236_v44, %v5222_v47 }
0x1920   :  { %v5237_v1 = vmul.f32 %v5235_v54, %v5221_v28  ;;  %v9941_v54 = vld [vmem:[%s21835_s5 + $0x10] ss:$0 sm:$0xff] }
0x1922   :  { %12075 = vmatprep.mubr.f32.mxu1 %v5237_v1 }
0x1923   :  { %12076 = vmatmul.mubr.f32.vlgmr.msra.gmra.mrb[36].mxu1 %v5238_v3 }
0x1924   :  { %12178 = vmatprep.mubr.msk.f32.mxu1 %vm14307_vm4, %v21996_v61 }
0x19f6   :  { %v12077_v21 = vpop.f32.mrb[36].mxu1 }
0x19f7   :  { %v5335_v5 = vadd.f32 %v12077_v21, %v9923_v27  ;;  %v5329_v6 = vpop.f32.mrb[37].mxu1  ;;  %v9949_v21 = vld [vmem:[%s21835_s5 + $0x14] ss:$0 sm:$0xff] }
0x19f8   :  { %v5330_v2 = vadd.f32 %v9923_v27, %v5329_v6 }
0x19f9   :  { %v5339_v7 = vadd.f32 %v5335_v5, %v20202_v22 }
0x19fa   :  { %v5338_v13 = vadd.f32 %v5330_v2, %v20200_v20  ;;  %v9928_v20 = vld [vmem:[%s21834_s4 + $0x180] sm:$0xff] }
0x19fb   :  { %v5347_v11 = vsel %vm1473_vm0, %v5339_v7, 0.0  ;;  %v13484_v33 = vpack.c.bf16 %v9929_v9, %v9928_v20 }
0x19fc   :  { %5348 = vadd.xlane.f32.xlu0 %v5347_v11  ;;  %v5344_v36 = vsel %vm1473_vm0, %v5338_v13, 0.0 }
0x19fd   :  { %5345 = vadd.xlane.f32.xlu1 %v5344_v36  ;;  %13485 = vmatprep.subr.bf16.mxu0 %v13484_v33 }
0x19fe   :  { %13487 = vmatpush3.bf16.msra.mxu0 %v13484_v33 }
0x19ff   :  { %13489 = vmatprep.subr.bf16.mxu0 %v13488_v38 }
0x1a02   :  { %13491 = vmatpush3.bf16.msra.mxu0 %v13488_v38 }
0x1a03   :  { %13493 = vmatprep.subr.bf16.mxu0 %v13492_v43 }
0x1a89   :  { %v5349_v14 = vpop.xlane.xlu0 %5348 }
0x1a8a   :  { %v5351_v16 = vmul.f32 0.03125, %v5349_v14  ;;  %v5346_v17 = vpop.xlane.xlu1 %5345 }
0x1a8b   :  { %v5350_v19 = vmul.f32 0.03125, %v5346_v17 }
0x1a8c   :  { %v5353_v25 = vsub.f32 %v5339_v7, %v5351_v16 }
0x1a8d   :  { %v5352_v26 = vsub.f32 %v5338_v13, %v5350_v19 }
0x1a8e   :  { %v5355_v29 = vmul.f32 %v5353_v25, %v5353_v25 }
0x1a8f   :  { %v5354_v30 = vmul.f32 %v5352_v26, %v5352_v26 }
0x1a90   :  { %v5359_v40 = vsel %vm1473_vm0, %v5355_v29, 0.0 }
0x1a91   :  { %5360 = vadd.xlane.f32.xlu0 %v5359_v40  ;;  %v5356_v22 = vsel %vm1473_vm0, %v5354_v30, 0.0 }
0x1a92   :  { %5357 = vadd.xlane.f32.xlu1 %v5356_v22 }
0x1b1e   :  { %v5361_v23 = vpop.xlane.xlu0 %5360 }
0x1b1f   :  { %v5363_v48 = vmul.f32 0.03125, %v5361_v23  ;;  %v5358_v42 = vpop.xlane.xlu1 %5357 }
0x1b20   :  { %v5362_v37 = vmul.f32 0.03125, %v5358_v42 }
0x1b21   :  { %v5365_v53 = vadd.f32 1e-05, %v5363_v48 }
0x1b22   :  { %v5364_v10 = vadd.f32 1e-05, %v5362_v37 }
0x1b23   :  { %14176 = vrsqrt.f32 %v5365_v53 }
0x1b24   :  { %14178 = vrsqrt.f32 %v5364_v10 }
0x1b2d   :  { %v14177_v55 = vpop.eup %14176 }
0x1b2e   :  { %v14179_v31 = vpop.eup %14178  ;;  %v5369_v51 = vmul.f32 %v14177_v55, %v5353_v25 }
0x1b2f   :  { %v5368_v35 = vmul.f32 %v14179_v31, %v5352_v26 }
0x1b30   :  { %v5377_v46 = vmul.f32 %v9926_v32, %v5369_v51 }
0x1b31   :  { %v5376_v56 = vmul.f32 %v9926_v32, %v5368_v35 }
0x1b32   :  { %v20297_v60 = vadd.f32 %v9927_v41, %v5377_v46 }
0x1b33   :  { %v20295_v59 = vadd.f32 %v9927_v41, %v5376_v56 }
0x1b35   :  { %12086 = vmatprep.mubr.msk.f32.mxu0 %vm1473_vm0, %v20295_v59 }
0x1b36   :  { %12087 = vmatmul.mubr.msk.f32.vlgmr.msra.gmra.mrb[32].mxu0 %vm1473_vm0, %v20297_v60 }
0x1b37   :  { %13495 = vmatpush3.bf16.msra.mxu0 %v13492_v43  ;;  %12097 = vmatprep.mubr.msk.f32.mxu0 %vm1473_vm0, %v20295_v59 }
0x1b38   :  { %13497 = vmatprep.subr.bf16.mxu0 %v13496_v62 }
0x1b3b   :  { %13499 = vmatpush3.bf16.msra.mxu0 %v13496_v62 }
0x1b3c   :  { %13501 = vmatprep.subr.bf16.mxu0 %v13500_v15 }
0x1b3e   :  { %12098 = vmatmul.mubr.msk.f32.vlgmr.msra.gmra.mrb[34].mxu0 %vm1473_vm0, %v20297_v60 }
0x1b3f   :  { %13503 = vmatpush3.bf16.msra.mxu0 %v13500_v15  ;;  %12108 = vmatprep.mubr.msk.f32.mxu0 %vm1473_vm0, %v20295_v59 }
0x1b40   :  { %13505 = vmatprep.subr.bf16.mxu0 %v13504_v0 }
0x1b43   :  { %13507 = vmatpush3.bf16.msra.mxu0 %v13504_v0 }
0x1b44   :  { %13508 = vmatprep.subr.bf16.mxu0 %v21999_v12 }
0x1b46   :  { %12109 = vmatmul.mubr.msk.f32.vlgmr.msra.gmra.mrb[36].mxu0 %vm1473_vm0, %v20297_v60 }
0x1b47   :  { %12143 = vmatprep.mubr.msk.f32.mxu0 %vm14307_vm4, %v21996_v61 }
0x1c09   :  { %v20326_v44 = vpop.f32.mrb[32].mxu0 }
0x1c0a   :  { %v20328_v28 = vpop.f32.mrb[33].mxu0 }
0x1c11   :  { %v12099_v47 = vpop.f32.mrb[34].mxu0 }
0x1c12   :  { %v5565_v1 = vadd.f32 %v12099_v47, %v9941_v54  ;;  %v5559_v3 = vpop.f32.mrb[35].mxu0 }
0x1c13   :  { %v5560_v27 = vadd.f32 %v9941_v54, %v5559_v3  ;;  %v9933_v3 = vld [vmem:[%s21835_s5 + $0xc] ss:$0 sm:$0xff] }
0x1c14   :  { %9954 = vst.msk [vmem:[%s18801_s22 + $0x880] sm:$0xff] %vm578_vm1, %v5565_v1 }
0x1c15   :  { %9952 = vst.msk [vmem:[%s18801_s22 + $0x800] sm:$0xff] %vm578_vm1, %v5560_v27 }
0x1c19   :  { %v12110_v5 = vpop.f32.mrb[36].mxu0 }
0x1c1a   :  { %v5653_v6 = vadd.f32 %v12110_v5, %v9949_v21  ;;  %v5647_v2 = vpop.f32.mrb[37].mxu0 }
0x1c1b   :  { %v5648_v7 = vadd.f32 %v9949_v21, %v5647_v2  ;;  %v5472_v2 = vadd.f32 %v9933_v3, %v20328_v28 }
0x1c1c   :  { %9955 = vst.msk [vmem:[%s18801_s22 + $0xc80] sm:$0xff] %vm578_vm1, %v5653_v6 }
0x1c1d   :  { %9953 = vst.msk [vmem:[%s18801_s22 + $0xc00] sm:$0xff] %vm578_vm1, %v5648_v7  ;;  %v5477_v7 = vadd.f32 %v20326_v44, %v9933_v3 }
0x1c24   :  { %v9956_v13 = vld [vmem:[%s21845_s15 + $0x800] sm:$0xff]  ;;  %v9957_v11 = vld [vmem:[%s21845_s15 + $0x808] sm:$0xff]  ;;  %v9958_v19 = vld [vmem:[%s21845_s15 + $0x810] sm:$0xff] }
0x1c25   :  { %v9972_v36 = vld [vmem:[%s21845_s15 + $0x880] sm:$0xff]  ;;  %v13509_v14 = vpack.c.bf16 %v9957_v11, %v9956_v13  ;;  %v9973_v16 = vld [vmem:[%s21845_s15 + $0x888] sm:$0xff]  ;;  %v9959_v25 = vld [vmem:[%s21845_s15 + $0x818] sm:$0xff] }
0x1c26   :  { %v13541_v17 = vpack.c.bf16 %v9973_v16, %v9972_v36  ;;  %v9974_v26 = vld [vmem:[%s21845_s15 + $0x890] sm:$0xff]  ;;  %v9975_v29 = vld [vmem:[%s21845_s15 + $0x898] sm:$0xff]  ;;  %v13513_v30 = vpack.c.bf16 %v9959_v25, %v9958_v19  ;;  %v9960_v22 = vld [vmem:[%s21845_s15 + $0x820] sm:$0xff] }
0x1c27   :  { %13511 = vmatpush3.bf16.xpose.msk.msra.mxu0 %vm18846_vm5, %v13509_v14  ;;  %v13545_v40 = vpack.c.bf16 %v9975_v29, %v9974_v26  ;;  %v9961_v20 = vld [vmem:[%s21845_s15 + $0x828] sm:$0xff]  ;;  %v9976_v9 = vld [vmem:[%s21845_s15 + $0x8a0] sm:$0xff]  ;;  %v9962_v38 = vld [vmem:[%s21845_s15 + $0x830] sm:$0xff] }
0x1c28   :  { %13543 = vmatpush3.bf16.xpose.msk.msra.mxu1 %vm18846_vm5, %v13541_v17  ;;  %13512 = vmatprep.subr.bf16.mxu0 %v21999_v12  ;;  %v9977_v8 = vld [vmem:[%s21845_s15 + $0x8a8] sm:$0xff]  ;;  %v13517_v33 = vpack.c.bf16 %v9961_v20, %v9960_v22  ;;  %v9963_v24 = vld [vmem:[%s21845_s15 + $0x838] sm:$0xff]  ;;  %v9978_v18 = vld [vmem:[%s21845_s15 + $0x8b0] sm:$0xff] }
0x1c29   :  { %13544 = vmatprep.subr.bf16.mxu1 %v21999_v12  ;;  %v13549_v34 = vpack.c.bf16 %v9977_v8, %v9976_v9  ;;  %v9979_v43 = vld [vmem:[%s21845_s15 + $0x8b8] sm:$0xff]  ;;  %v13521_v23 = vpack.c.bf16 %v9963_v24, %v9962_v38  ;;  %v9964_v42 = vld [vmem:[%s21845_s15 + $0x840] sm:$0xff]  ;;  %v9965_v37 = vld [vmem:[%s21845_s15 + $0x848] sm:$0xff] }
0x1c2a   :  { %v13553_v48 = vpack.c.bf16 %v9979_v43, %v9978_v18  ;;  %v9980_v53 = vld [vmem:[%s21845_s15 + $0x8c0] sm:$0xff]  ;;  %v9981_v10 = vld [vmem:[%s21845_s15 + $0x8c8] sm:$0xff]  ;;  %v13525_v55 = vpack.c.bf16 %v9965_v37, %v9964_v42  ;;  %v9966_v31 = vld [vmem:[%s21845_s15 + $0x850] sm:$0xff] }
0x1c2b   :  { %v13557_v32 = vpack.c.bf16 %v9981_v10, %v9980_v53  ;;  %v9967_v51 = vld [vmem:[%s21845_s15 + $0x858] sm:$0xff]  ;;  %v9982_v35 = vld [vmem:[%s21845_s15 + $0x8d0] sm:$0xff]  ;;  %v9968_v49 = vld [vmem:[%s21845_s15 + $0x860] sm:$0xff] }
0x1c2c   :  { %v9983_v41 = vld [vmem:[%s21845_s15 + $0x8d8] sm:$0xff]  ;;  %v13529_v46 = vpack.c.bf16 %v9967_v51, %v9966_v31  ;;  %v9969_v58 = vld [vmem:[%s21845_s15 + $0x868] sm:$0xff]  ;;  %v9984_v62 = vld [vmem:[%s21845_s15 + $0x8e0] sm:$0xff] }
0x1c2d   :  { %v13561_v56 = vpack.c.bf16 %v9983_v41, %v9982_v35  ;;  %v9985_v52 = vld [vmem:[%s21845_s15 + $0x8e8] sm:$0xff]  ;;  %v13533_v39 = vpack.c.bf16 %v9969_v58, %v9968_v49  ;;  %v9970_v50 = vld [vmem:[%s21845_s15 + $0x870] sm:$0xff]  ;;  %v9971_v63 = vld [vmem:[%s21845_s15 + $0x878] sm:$0xff] }
0x1c2e   :  { %v13565_v15 = vpack.c.bf16 %v9985_v52, %v9984_v62  ;;  %v9986_v0 = vld [vmem:[%s21845_s15 + $0x8f0] sm:$0xff]  ;;  %v9987_v54 = vld [vmem:[%s21845_s15 + $0x8f8] sm:$0xff]  ;;  %v13537_v47 = vpack.c.bf16 %v9971_v63, %v9970_v50  ;;  %v9988_v27 = vld [vmem:[%s21845_s15 + $0xc00] sm:$0xff] }
0x1c2f   :  { %13515 = vmatpush3.bf16.xpose.msk.msra.mxu0 %vm18846_vm5, %v13513_v30  ;;  %v13569_v1 = vpack.c.bf16 %v9987_v54, %v9986_v0  ;;  %v9989_v21 = vld [vmem:[%s21845_s15 + $0xc08] sm:$0xff]  ;;  %v10004_v5 = vld [vmem:[%s21845_s15 + $0xc80] sm:$0xff]  ;;  %v9990_v36 = vld [vmem:[%s21845_s15 + $0xc10] sm:$0xff] }
0x1c30   :  { %13547 = vmatpush3.bf16.xpose.msk.msra.mxu1 %vm18846_vm5, %v13545_v40  ;;  %13516 = vmatprep.subr.bf16.mxu0 %v21999_v12  ;;  %v10005_v6 = vld [vmem:[%s21845_s15 + $0xc88] sm:$0xff]  ;;  %v13573_v13 = vpack.c.bf16 %v9989_v21, %v9988_v27  ;;  %v9991_v14 = vld [vmem:[%s21845_s15 + $0xc18] sm:$0xff]  ;;  %v10006_v28 = vld [vmem:[%s21845_s15 + $0xc90] sm:$0xff] }
0x1c31   :  { %13548 = vmatprep.subr.bf16.mxu1 %v21999_v12  ;;  %v13597_v11 = vpack.c.bf16 %v10005_v6, %v10004_v5  ;;  %v10007_v44 = vld [vmem:[%s21845_s15 + $0xc98] sm:$0xff]  ;;  %v13576_v16 = vpack.c.bf16 %v9991_v14, %v9990_v36  ;;  %v9992_v19 = vld [vmem:[%s21845_s15 + $0xc20] sm:$0xff]  ;;  %v9993_v25 = vld [vmem:[%s21845_s15 + $0xc28] sm:$0xff] }
0x1c32   :  { %v13600_v17 = vpack.c.bf16 %v10007_v44, %v10006_v28  ;;  %v10008_v26 = vld [vmem:[%s21845_s15 + $0xca0] sm:$0xff]  ;;  %v10009_v29 = vld [vmem:[%s21845_s15 + $0xca8] sm:$0xff]  ;;  %v13579_v30 = vpack.c.bf16 %v9993_v25, %v9992_v19  ;;  %v9994_v22 = vld [vmem:[%s21845_s15 + $0xc30] sm:$0xff] }
0x1c33   :  { %v13603_v40 = vpack.c.bf16 %v10009_v29, %v10008_v26  ;;  %v9995_v20 = vld [vmem:[%s21845_s15 + $0xc38] sm:$0xff]  ;;  %v10010_v9 = vld [vmem:[%s21845_s15 + $0xcb0] sm:$0xff]  ;;  %v9996_v38 = vld [vmem:[%s21845_s15 + $0xc40] sm:$0xff] }
0x1c34   :  { %v10011_v8 = vld [vmem:[%s21845_s15 + $0xcb8] sm:$0xff]  ;;  %v9997_v24 = vld [vmem:[%s21845_s15 + $0xc48] sm:$0xff]  ;;  %v10012_v18 = vld [vmem:[%s21845_s15 + $0xcc0] sm:$0xff] }
0x1c35   :  { %v10013_v43 = vld [vmem:[%s21845_s15 + $0xcc8] sm:$0xff]  ;;  %v9998_v42 = vld [vmem:[%s21845_s15 + $0xc50] sm:$0xff]  ;;  %v9999_v37 = vld [vmem:[%s21845_s15 + $0xc58] sm:$0xff] }
0x1c36   :  { %v10014_v53 = vld [vmem:[%s21845_s15 + $0xcd0] sm:$0xff]  ;;  %v10015_v10 = vld [vmem:[%s21845_s15 + $0xcd8] sm:$0xff]  ;;  %v10000_v31 = vld [vmem:[%s21845_s15 + $0xc60] sm:$0xff] }
0x1c37   :  { %13519 = vmatpush3.bf16.xpose.msk.msra.mxu0 %vm18846_vm5, %v13517_v33  ;;  %v13582_v33 = vpack.c.bf16 %v9995_v20, %v9994_v22  ;;  %v10001_v51 = vld [vmem:[%s21845_s15 + $0xc68] sm:$0xff]  ;;  %v10016_v35 = vld [vmem:[%s21845_s15 + $0xce0] sm:$0xff]  ;;  %v10002_v49 = vld [vmem:[%s21845_s15 + $0xc70] sm:$0xff] }
0x1c38   :  { %13551 = vmatpush3.bf16.xpose.msk.msra.mxu1 %vm18846_vm5, %v13549_v34  ;;  %13520 = vmatprep.subr.bf16.mxu0 %v21999_v12  ;;  %v13606_v34 = vpack.c.bf16 %v10011_v8, %v10010_v9  ;;  %v10017_v41 = vld [vmem:[%s21845_s15 + $0xce8] sm:$0xff]  ;;  %v10003_v58 = vld [vmem:[%s21845_s15 + $0xc78] sm:$0xff]  ;;  %v10018_v62 = vld [vmem:[%s21845_s15 + $0xcf0] sm:$0xff] }
0x1c39   :  { %13552 = vmatprep.subr.bf16.mxu1 %v21999_v12  ;;  %v10019_v52 = vld [vmem:[%s21845_s15 + $0xcf8] sm:$0xff]  ;;  %v10055_v14 = vld [vmem:[%s21834_s4 + $0x1a0] sm:$0xff]  ;;  %v10056_v28 = vld [vmem:[%s21834_s4 + $0x1a8] sm:$0xff] }
0x1c3a   :  { %v10063_v44 = vld [vmem:[%s21834_s4 + $0x220] sm:$0xff]  ;;  %v10057_v29 = vld [vmem:[%s21834_s4 + $0x1b0] sm:$0xff]  ;;  %v10066_v20 = vld [vmem:[%s21834_s4 + $0x238] sm:$0xff] }
0x1c3b   :  { %v10065_v22 = vld [vmem:[%s21834_s4 + $0x230] sm:$0xff] }
0x1c3f   :  { %13523 = vmatpush3.bf16.xpose.msk.msra.mxu0 %vm18846_vm5, %v13521_v23  ;;  %v13585_v23 = vpack.c.bf16 %v9997_v24, %v9996_v38  ;;  %v10071_v38 = vld [vmem:[%s21834_s4 + $0x2a0] sm:$0xff]  ;;  %v10072_v24 = vld [vmem:[%s21834_s4 + $0x2a8] sm:$0xff] }
0x1c40   :  { %13555 = vmatpush3.bf16.xpose.msk.msra.mxu1 %vm18846_vm5, %v13553_v48  ;;  %13524 = vmatprep.subr.bf16.mxu0 %v21999_v12  ;;  %v13609_v48 = vpack.c.bf16 %v10013_v43, %v10012_v18  ;;  %v13632_v18 = vpack.c.bf16 %v10066_v20, %v10065_v22  ;;  %v13636_v43 = vpack.c.bf16 %v10072_v24, %v10071_v38 }
0x1c41   :  { %13556 = vmatprep.subr.bf16.mxu1 %v21999_v12 }
0x1c47   :  { %13527 = vmatpush3.bf16.xpose.msk.msra.mxu0 %vm18846_vm5, %v13525_v55  ;;  %v13588_v55 = vpack.c.bf16 %v9999_v37, %v9998_v42 }
0x1c48   :  { %13559 = vmatpush3.bf16.xpose.msk.msra.mxu1 %vm18846_vm5, %v13557_v32  ;;  %13528 = vmatprep.subr.bf16.mxu0 %v21999_v12  ;;  %v13612_v32 = vpack.c.bf16 %v10015_v10, %v10014_v53 }
0x1c49   :  { %13560 = vmatprep.subr.bf16.mxu1 %v21999_v12 }
0x1c4f   :  { %13531 = vmatpush3.bf16.xpose.msk.msra.mxu0 %vm18846_vm5, %v13529_v46  ;;  %v13591_v46 = vpack.c.bf16 %v10001_v51, %v10000_v31 }
0x1c50   :  { %13563 = vmatpush3.bf16.xpose.msk.msra.mxu1 %vm18846_vm5, %v13561_v56  ;;  %13532 = vmatprep.subr.bf16.mxu0 %v21999_v12  ;;  %v13615_v56 = vpack.c.bf16 %v10017_v41, %v10016_v35 }
0x1c51   :  { %13564 = vmatprep.subr.bf16.mxu1 %v21999_v12 }
0x1c57   :  { %13535 = vmatpush3.bf16.xpose.msk.msra.mxu0 %vm18846_vm5, %v13533_v39  ;;  %v13594_v39 = vpack.c.bf16 %v10003_v58, %v10002_v49  ;;  %v10076_v49 = vld [vmem:[%s21835_s5 + $0x15] ss:$0 sm:$0xff] }
0x1c58   :  { %13567 = vmatpush3.bf16.xpose.msk.msra.mxu1 %vm18846_vm5, %v13565_v15  ;;  %13536 = vmatprep.subr.bf16.mxu0 %v21999_v12  ;;  %v13618_v15 = vpack.c.bf16 %v10019_v52, %v10018_v62 }
0x1c59   :  { %13568 = vmatprep.subr.bf16.mxu1 %v21999_v12 }
0x1c5f   :  { %13539 = vmatpush3.bf16.xpose.msk.msra.mxu0 %vm18846_vm5, %v13537_v47 }
0x1c60   :  { %13571 = vmatpush3.bf16.xpose.msk.msra.mxu1 %vm18846_vm5, %v13569_v1  ;;  %13572 = vmatprep.subr.bf16.mxu0 %v21999_v12 }
0x1c61   :  { %13596 = vmatprep.subr.bf16.mxu1 %v21999_v12 }
0x1c66   :  { %12144 = vmatmul.mubr.msk.f32.vlgmr.msra.gmra.mrb[38].mxu0 %vm578_vm1, %v5472_v2 }
0x1c67   :  { %12179 = vmatmul.mubr.msk.f32.vlgmr.msra.gmra.mrb[38].mxu1 %vm578_vm1, %v5477_v7  ;;  %13574 = vmatpush3.bf16.msra.mxu0 %v13573_v13 }
0x1c68   :  { %13598 = vmatpush3.bf16.msra.mxu1 %v13597_v11  ;;  %13575 = vmatprep.subr.bf16.mxu0 %v21999_v12 }
0x1c69   :  { %13599 = vmatprep.subr.bf16.mxu1 %v21999_v12  ;;  %12213 = vmatprep.mubr.msk.f32.mxu0 %vm14307_vm4, %v21996_v61 }
0x1c6a   :  { %12248 = vmatprep.mubr.msk.f32.mxu1 %vm14307_vm4, %v21996_v61 }
0x1c6b   :  { %13577 = vmatpush3.bf16.msra.mxu0 %v13576_v16  ;;  %v13620_v16 = vpack.c.bf16 %v10056_v28, %v10055_v14 }
0x1c6c   :  { %13601 = vmatpush3.bf16.msra.mxu1 %v13600_v17  ;;  %13578 = vmatprep.subr.bf16.mxu0 %v21999_v12  ;;  %v10064_v17 = vld [vmem:[%s21834_s4 + $0x228] sm:$0xff] }
0x1c6d   :  { %13602 = vmatprep.subr.bf16.mxu1 %v21999_v12  ;;  %v13628_v19 = vpack.c.bf16 %v10064_v17, %v10063_v44 }
0x1c6f   :  { %13580 = vmatpush3.bf16.msra.mxu0 %v13579_v30  ;;  %v10058_v30 = vld [vmem:[%s21834_s4 + $0x1b8] sm:$0xff] }
0x1c70   :  { %13604 = vmatpush3.bf16.msra.mxu1 %v13603_v40  ;;  %13581 = vmatprep.subr.bf16.mxu0 %v21999_v12 }
0x1c71   :  { %13605 = vmatprep.subr.bf16.mxu1 %v21999_v12 }
0x1c73   :  { %13583 = vmatpush3.bf16.msra.mxu0 %v13582_v33 }
0x1c74   :  { %13607 = vmatpush3.bf16.msra.mxu1 %v13606_v34  ;;  %13584 = vmatprep.subr.bf16.mxu0 %v21999_v12  ;;  %v13624_v34 = vpack.c.bf16 %v10058_v30, %v10057_v29 }
0x1c75   :  { %13608 = vmatprep.subr.bf16.mxu1 %v21999_v12 }
0x1c77   :  { %13586 = vmatpush3.bf16.msra.mxu0 %v13585_v23  ;;  %v10073_v23 = vld [vmem:[%s21834_s4 + $0x2b0] sm:$0xff] }
0x1c78   :  { %13610 = vmatpush3.bf16.msra.mxu1 %v13609_v48  ;;  %13587 = vmatprep.subr.bf16.mxu0 %v21999_v12  ;;  %v10074_v48 = vld [vmem:[%s21834_s4 + $0x2b8] sm:$0xff] }
0x1c79   :  { %13611 = vmatprep.subr.bf16.mxu1 %v21999_v12  ;;  %v13640_v42 = vpack.c.bf16 %v10074_v48, %v10073_v23 }
0x1c7b   :  { %13589 = vmatpush3.bf16.msra.mxu0 %v13588_v55 }
0x1c7c   :  { %13613 = vmatpush3.bf16.msra.mxu1 %v13612_v32  ;;  %13590 = vmatprep.subr.bf16.mxu0 %v21999_v12  ;;  %v10068_v32 = vld [vmem:[%s21835_s5 + $0x11] ss:$0 sm:$0xff] }
0x1c7d   :  { %13614 = vmatprep.subr.bf16.mxu1 %v21999_v12 }
0x1c7f   :  { %13592 = vmatpush3.bf16.msra.mxu0 %v13591_v46 }
0x1c80   :  { %13616 = vmatpush3.bf16.msra.mxu1 %v13615_v56  ;;  %13593 = vmatprep.subr.bf16.mxu0 %v21999_v12 }
0x1c81   :  { %13617 = vmatprep.subr.bf16.mxu1 %v21999_v12 }
0x1c83   :  { %13595 = vmatpush3.bf16.msra.mxu0 %v13594_v39 }
0x1c84   :  { %13619 = vmatpush3.bf16.msra.mxu1 %v13618_v15  ;;  %13621 = vmatprep.subr.bf16.mxu0 %v13620_v16 }
0x1c85   :  { %13629 = vmatprep.subr.bf16.mxu1 %v13628_v19 }
0x1d39   :  { %v5851_v50 = vpop.f32.mrb[38].mxu0 }
0x1d3a   :  { %v5976_v63 = vmul.f32 0.35355338, %v5851_v50  ;;  %v5972_v0 = vpop.f32.mrb[38].mxu1  ;;  %v12145_v54 = vpop.f32.mrb[39].mxu0 }
0x1d3b   :  { %v5977_v47 = vmul.f32 0.35355338, %v5972_v0  ;;  %v12180_v1 = vpop.f32.mrb[39].mxu1 }
0x1d3c   :  { %v5978_v3 = vadd.f32 %v5976_v63, %v19120_v57 }
0x1d3d   :  { %v5979_v27 = vadd.f32 %v5977_v47, %v19120_v57 }
0x1d3e   :  { %5980 = vmax.xlane.f32.xlu1 %v5978_v3 }
0x1d3f   :  { %5982 = vmax.xlane.f32.xlu0 %v5979_v27 }
0x1dcb   :  { %v5981_v21 = vpop.xlane.xlu1 %5980 }
0x1dcc   :  { %v5983_v5 = vpop.xlane.xlu0 %5982  ;;  %v5984_v6 = vsub.f32 %v5978_v3, %v5981_v21 }
0x1dcd   :  { %v5985_v2 = vsub.f32 %v5979_v27, %v5983_v5 }
0x1dce   :  { %v5986_v7 = vmul.f32 1.442695, %v5984_v6 }
0x1dcf   :  { %v5988_v13 = vmul.f32 1.442695, %v5985_v2 }
0x1dd0   :  { %14180 = vpow2.f32 %v5986_v7 }
0x1dd1   :  { %14182 = vpow2.f32 %v5988_v13 }
0x1dda   :  { %v14181_v11 = vpop.eup %14180 }
0x1ddb   :  { %v14183_v36 = vpop.eup %14182  ;;  %5990 = vadd.xlane.f32.xlu1 %v14181_v11 }
0x1ddc   :  { %5992 = vadd.xlane.f32.xlu0 %v14183_v36 }
0x1e68   :  { %v5991_v25 = vpop.xlane.xlu1 %5990 }
0x1e69   :  { %v5993_v26 = vpop.xlane.xlu0 %5992  ;;  %14184 = vrcp.f32 %v5991_v25 }
0x1e6a   :  { %14186 = vrcp.f32 %v5993_v26 }
0x1e73   :  { %v14185_v40 = vpop.eup %14184 }
0x1e74   :  { %v14187_v9 = vpop.eup %14186  ;;  %v5996_v8 = vmul.f32 %v14185_v40, %v14181_v11 }
0x1e75   :  { %v5997_v33 = vmul.f32 %v14187_v9, %v14183_v36 }
0x1e76   :  { %12214 = vmatmul.mubr.f32.vlgmr.msra.gmra.mrb[40].mxu0 %v5996_v8 }
0x1e77   :  { %12249 = vmatmul.mubr.f32.vlgmr.msra.gmra.mrb[40].mxu1 %v5997_v33  ;;  %13623 = vmatpush3.bf16.msra.mxu0 %v13620_v16 }
0x1e78   :  { %13631 = vmatpush3.bf16.msra.mxu1 %v13628_v19  ;;  %12259 = vmatprep.mubr.msk.f32.mxu0 %vm1473_vm0, %v20295_v59 }
0x1e79   :  { %12270 = vmatprep.mubr.msk.f32.mxu1 %vm1473_vm0, %v20295_v59  ;;  %13625 = vmatprep.subr.bf16.mxu0 %v13624_v34 }
0x1e7a   :  { %13633 = vmatprep.subr.bf16.mxu1 %v13632_v18 }
0x1e7b   :  { %13627 = vmatpush3.bf16.msra.mxu0 %v13624_v34 }
0x1e7c   :  { %13635 = vmatpush3.bf16.msra.mxu1 %v13632_v18  ;;  %13637 = vmatprep.subr.bf16.mxu0 %v13636_v43 }
0x1e7d   :  { %13644 = vmatprep.subr.bf16.mxu1 %v21999_v12 }
0x1e7e   :  { %12260 = vmatmul.mubr.msk.f32.vlgmr.msra.gmra.mrb[42].mxu0 %vm1473_vm0, %v20297_v60 }
0x1e7f   :  { %12271 = vmatmul.mubr.msk.f32.vlgmr.msra.gmra.mrb[42].mxu1 %vm1473_vm0, %v20297_v60  ;;  %13639 = vmatpush3.bf16.msra.mxu0 %v13636_v43 }
0x1e80   :  { %12281 = vmatprep.mubr.msk.f32.mxu0 %vm1473_vm0, %v20295_v59  ;;  %13641 = vmatprep.subr.bf16.mxu0 %v13640_v42 }
0x1e81   :  { %12316 = vmatprep.mubr.msk.f32.mxu1 %vm14307_vm4, %v21996_v61 }
0x1e83   :  { %13643 = vmatpush3.bf16.msra.mxu0 %v13640_v42 }
0x1e84   :  { %13676 = vmatprep.subr.bf16.mxu0 %v21999_v12 }
0x1e86   :  { %12282 = vmatmul.mubr.msk.f32.vlgmr.msra.gmra.mrb[44].mxu0 %vm1473_vm0, %v20297_v60 }
0x1e87   :  { %12351 = vmatprep.mubr.msk.f32.mxu0 %vm14307_vm4, %v21996_v61 }
0x1f49   :  { %v20665_v37 = vpop.f32.mrb[40].mxu0 }
0x1f4a   :  { %v20667_v53 = vpop.f32.mrb[40].mxu1  ;;  %v12215_v10 = vpop.f32.mrb[41].mxu0 }
0x1f4b   :  { %v12250_v55 = vpop.f32.mrb[41].mxu1 }
0x1f51   :  { %v20672_v31 = vpop.f32.mrb[42].mxu0 }
0x1f52   :  { %v12272_v51 = vpop.f32.mrb[42].mxu1  ;;  %v20674_v35 = vpop.f32.mrb[43].mxu0 }
0x1f53   :  { %v6313_v41 = vadd.f32 %v12272_v51, %v10068_v32  ;;  %v6307_v46 = vpop.f32.mrb[43].mxu1 }
0x1f54   :  { %v6308_v56 = vadd.f32 %v10068_v32, %v6307_v46 }
0x1f55   :  { %10081 = vst.msk [vmem:[%s18801_s22 + $0x980] sm:$0xff] %vm578_vm1, %v6313_v41 }
0x1f56   :  { %10079 = vst.msk [vmem:[%s18801_s22 + $0x900] sm:$0xff] %vm578_vm1, %v6308_v56 }
0x1f59   :  { %v12283_v58 = vpop.f32.mrb[44].mxu0 }
0x1f5a   :  { %v6401_v62 = vadd.f32 %v12283_v58, %v10076_v49  ;;  %v6395_v52 = vpop.f32.mrb[45].mxu0 }
0x1f5b   :  { %v6396_v39 = vadd.f32 %v10076_v49, %v6395_v52  ;;  %v10060_v49 = vld [vmem:[%s21835_s5 + $0xd] ss:$0 sm:$0xff] }
0x1f5c   :  { %10082 = vst.msk [vmem:[%s18801_s22 + $0xd80] sm:$0xff] %vm578_vm1, %v6401_v62 }
0x1f5d   :  { %10080 = vst.msk [vmem:[%s18801_s22 + $0xd00] sm:$0xff] %vm578_vm1, %v6396_v39 }
0x1f64   :  { %v10083_v15 = vld [vmem:[%s21845_s15 + $0x900] sm:$0xff]  ;;  %v10084_v50 = vld [vmem:[%s21845_s15 + $0x908] sm:$0xff]  ;;  %v10085_v1 = vld [vmem:[%s21845_s15 + $0x910] sm:$0xff] }
0x1f65   :  { %v10099_v63 = vld [vmem:[%s21845_s15 + $0x980] sm:$0xff]  ;;  %v13645_v0 = vpack.c.bf16 %v10084_v50, %v10083_v15  ;;  %v10100_v54 = vld [vmem:[%s21845_s15 + $0x988] sm:$0xff]  ;;  %v10086_v3 = vld [vmem:[%s21845_s15 + $0x918] sm:$0xff]  ;;  %v6220_v15 = vadd.f32 %v10060_v49, %v20674_v35  ;;  %v6225_v50 = vadd.f32 %v20672_v31, %v10060_v49 }
0x1f66   :  { %v13677_v47 = vpack.c.bf16 %v10100_v54, %v10099_v63  ;;  %v10101_v27 = vld [vmem:[%s21845_s15 + $0x990] sm:$0xff]  ;;  %v10102_v21 = vld [vmem:[%s21845_s15 + $0x998] sm:$0xff]  ;;  %v13649_v5 = vpack.c.bf16 %v10086_v3, %v10085_v1  ;;  %v10087_v2 = vld [vmem:[%s21845_s15 + $0x920] sm:$0xff] }
0x1f67   :  { %13647 = vmatpush3.bf16.xpose.msk.msra.mxu1 %vm18846_vm5, %v13645_v0  ;;  %v13681_v6 = vpack.c.bf16 %v10102_v21, %v10101_v27  ;;  %v10088_v7 = vld [vmem:[%s21845_s15 + $0x928] sm:$0xff]  ;;  %v10103_v13 = vld [vmem:[%s21845_s15 + $0x9a0] sm:$0xff]  ;;  %v10089_v28 = vld [vmem:[%s21845_s15 + $0x930] sm:$0xff] }
0x1f68   :  { %13679 = vmatpush3.bf16.xpose.msk.msra.mxu0 %vm18846_vm5, %v13677_v47  ;;  %13648 = vmatprep.subr.bf16.mxu1 %v21999_v12  ;;  %v10104_v11 = vld [vmem:[%s21845_s15 + $0x9a8] sm:$0xff]  ;;  %v13653_v36 = vpack.c.bf16 %v10088_v7, %v10087_v2  ;;  %v10090_v44 = vld [vmem:[%s21845_s15 + $0x938] sm:$0xff]  ;;  %v10105_v16 = vld [vmem:[%s21845_s15 + $0x9b0] sm:$0xff] }
0x1f69   :  { %13680 = vmatprep.subr.bf16.mxu0 %v21999_v12  ;;  %v13685_v14 = vpack.c.bf16 %v10104_v11, %v10103_v13  ;;  %v10106_v17 = vld [vmem:[%s21845_s15 + $0x9b8] sm:$0xff]  ;;  %v13657_v19 = vpack.c.bf16 %v10090_v44, %v10089_v28  ;;  %v10091_v26 = vld [vmem:[%s21845_s15 + $0x940] sm:$0xff]  ;;  %v10092_v29 = vld [vmem:[%s21845_s15 + $0x948] sm:$0xff] }
0x1f6a   :  { %v13689_v25 = vpack.c.bf16 %v10106_v17, %v10105_v16  ;;  %v10107_v30 = vld [vmem:[%s21845_s15 + $0x9c0] sm:$0xff]  ;;  %v10108_v40 = vld [vmem:[%s21845_s15 + $0x9c8] sm:$0xff]  ;;  %v13661_v22 = vpack.c.bf16 %v10092_v29, %v10091_v26  ;;  %v10093_v9 = vld [vmem:[%s21845_s15 + $0x950] sm:$0xff] }
0x1f6b   :  { %v13693_v20 = vpack.c.bf16 %v10108_v40, %v10107_v30  ;;  %v10094_v8 = vld [vmem:[%s21845_s15 + $0x958] sm:$0xff]  ;;  %v10109_v33 = vld [vmem:[%s21845_s15 + $0x9d0] sm:$0xff]  ;;  %v10095_v18 = vld [vmem:[%s21845_s15 + $0x960] sm:$0xff] }
0x1f6c   :  { %v10110_v34 = vld [vmem:[%s21845_s15 + $0x9d8] sm:$0xff]  ;;  %v13665_v38 = vpack.c.bf16 %v10094_v8, %v10093_v9  ;;  %v10096_v43 = vld [vmem:[%s21845_s15 + $0x968] sm:$0xff]  ;;  %v10111_v23 = vld [vmem:[%s21845_s15 + $0x9e0] sm:$0xff] }
0x1f6d   :  { %v13697_v24 = vpack.c.bf16 %v10110_v34, %v10109_v33  ;;  %v10112_v48 = vld [vmem:[%s21845_s15 + $0x9e8] sm:$0xff]  ;;  %v13669_v42 = vpack.c.bf16 %v10096_v43, %v10095_v18  ;;  %v10097_v55 = vld [vmem:[%s21845_s15 + $0x970] sm:$0xff]  ;;  %v10098_v32 = vld [vmem:[%s21845_s15 + $0x978] sm:$0xff] }
0x1f6e   :  { %v13701_v10 = vpack.c.bf16 %v10112_v48, %v10111_v23  ;;  %v10113_v51 = vld [vmem:[%s21845_s15 + $0x9f0] sm:$0xff]  ;;  %v10114_v41 = vld [vmem:[%s21845_s15 + $0x9f8] sm:$0xff]  ;;  %v13673_v46 = vpack.c.bf16 %v10098_v32, %v10097_v55  ;;  %v10115_v58 = vld [vmem:[%s21845_s15 + $0xd00] sm:$0xff] }
0x1f6f   :  { %13651 = vmatpush3.bf16.xpose.msk.msra.mxu1 %vm18846_vm5, %v13649_v5  ;;  %v13705_v56 = vpack.c.bf16 %v10114_v41, %v10113_v51  ;;  %v10116_v62 = vld [vmem:[%s21845_s15 + $0xd08] sm:$0xff]  ;;  %v10131_v52 = vld [vmem:[%s21845_s15 + $0xd80] sm:$0xff]  ;;  %v10117_v54 = vld [vmem:[%s21845_s15 + $0xd10] sm:$0xff] }
0x1f70   :  { %13683 = vmatpush3.bf16.xpose.msk.msra.mxu0 %vm18846_vm5, %v13681_v6  ;;  %13652 = vmatprep.subr.bf16.mxu1 %v21999_v12  ;;  %v10132_v39 = vld [vmem:[%s21845_s15 + $0xd88] sm:$0xff]  ;;  %v13709_v63 = vpack.c.bf16 %v10116_v62, %v10115_v58  ;;  %v10118_v47 = vld [vmem:[%s21845_s15 + $0xd18] sm:$0xff]  ;;  %v10133_v35 = vld [vmem:[%s21845_s15 + $0xd90] sm:$0xff] }
0x1f71   :  { %13684 = vmatprep.subr.bf16.mxu0 %v21999_v12  ;;  %v13733_v0 = vpack.c.bf16 %v10132_v39, %v10131_v52  ;;  %v10134_v31 = vld [vmem:[%s21845_s15 + $0xd98] sm:$0xff]  ;;  %v13712_v1 = vpack.c.bf16 %v10118_v47, %v10117_v54  ;;  %v10119_v27 = vld [vmem:[%s21845_s15 + $0xd20] sm:$0xff]  ;;  %v10120_v21 = vld [vmem:[%s21845_s15 + $0xd28] sm:$0xff] }
0x1f72   :  { %v13736_v3 = vpack.c.bf16 %v10134_v31, %v10133_v35  ;;  %v10135_v5 = vld [vmem:[%s21845_s15 + $0xda0] sm:$0xff]  ;;  %v10136_v6 = vld [vmem:[%s21845_s15 + $0xda8] sm:$0xff]  ;;  %v13715_v2 = vpack.c.bf16 %v10120_v21, %v10119_v27  ;;  %v10121_v13 = vld [vmem:[%s21845_s15 + $0xd30] sm:$0xff] }
0x1f73   :  { %v13739_v7 = vpack.c.bf16 %v10136_v6, %v10135_v5  ;;  %v10122_v11 = vld [vmem:[%s21845_s15 + $0xd38] sm:$0xff]  ;;  %v10123_v16 = vld [vmem:[%s21845_s15 + $0xd40] sm:$0xff]  ;;  %v10124_v17 = vld [vmem:[%s21845_s15 + $0xd48] sm:$0xff] }
0x1f74   :  { %v13718_v28 = vpack.c.bf16 %v10122_v11, %v10121_v13  ;;  %v13721_v26 = vpack.c.bf16 %v10124_v17, %v10123_v16  ;;  %v10125_v30 = vld [vmem:[%s21845_s15 + $0xd50] sm:$0xff]  ;;  %v10126_v40 = vld [vmem:[%s21845_s15 + $0xd58] sm:$0xff]  ;;  %v10127_v33 = vld [vmem:[%s21845_s15 + $0xd60] sm:$0xff] }
0x1f75   :  { %v13724_v9 = vpack.c.bf16 %v10126_v40, %v10125_v30  ;;  %v10128_v34 = vld [vmem:[%s21845_s15 + $0xd68] sm:$0xff]  ;;  %v10129_v23 = vld [vmem:[%s21845_s15 + $0xd70] sm:$0xff]  ;;  %v10130_v48 = vld [vmem:[%s21845_s15 + $0xd78] sm:$0xff] }
0x1f76   :  { %v13727_v18 = vpack.c.bf16 %v10128_v34, %v10127_v33  ;;  %v13730_v55 = vpack.c.bf16 %v10130_v48, %v10129_v23  ;;  %v10186_v31 = vld [vmem:[%s21834_s4 + $0x1c0] sm:$0xff]  ;;  %v10181_v27 = vld [vmem:[%s21836_s6 + $0x28] sm:$0xff]  ;;  %v10188_v6 = vld [vmem:[%s21834_s4 + $0x1d0] sm:$0xff] }
0x1f77   :  { %13655 = vmatpush3.bf16.xpose.msk.msra.mxu1 %vm18846_vm5, %v13653_v36  ;;  %v10137_v36 = vld [vmem:[%s21845_s15 + $0xdb0] sm:$0xff]  ;;  %v10195_v30 = vld [vmem:[%s21834_s4 + $0x248] sm:$0xff]  ;;  %v10197_v34 = vld [vmem:[%s21834_s4 + $0x258] sm:$0xff] }
0x1f78   :  { %13687 = vmatpush3.bf16.xpose.msk.msra.mxu0 %vm18846_vm5, %v13685_v14  ;;  %13656 = vmatprep.subr.bf16.mxu1 %v21999_v12  ;;  %v10138_v14 = vld [vmem:[%s21845_s15 + $0xdb8] sm:$0xff]  ;;  %v10204_v17 = vld [vmem:[%s21834_s4 + $0x2d0] sm:$0xff] }
0x1f79   :  { %13688 = vmatprep.subr.bf16.mxu0 %v21999_v12  ;;  %v13742_v44 = vpack.c.bf16 %v10138_v14, %v10137_v36  ;;  %v10196_v33 = vld [vmem:[%s21834_s4 + $0x250] sm:$0xff] }
0x1f7f   :  { %13659 = vmatpush3.bf16.xpose.msk.msra.mxu1 %vm18846_vm5, %v13657_v19  ;;  %v10139_v19 = vld [vmem:[%s21845_s15 + $0xdc0] sm:$0xff] }
0x1f80   :  { %13691 = vmatpush3.bf16.xpose.msk.msra.mxu0 %vm18846_vm5, %v13689_v25  ;;  %13660 = vmatprep.subr.bf16.mxu1 %v21999_v12  ;;  %v10140_v25 = vld [vmem:[%s21845_s15 + $0xdc8] sm:$0xff] }
0x1f81   :  { %13692 = vmatprep.subr.bf16.mxu0 %v21999_v12  ;;  %v13745_v29 = vpack.c.bf16 %v10140_v25, %v10139_v19  ;;  %v10205_v19 = vld [vmem:[%s21834_s4 + $0x2d8] sm:$0xff] }
0x1f82   :  { %v13776_v25 = vpack.c.bf16 %v10205_v19, %v10204_v17 }
0x1f87   :  { %13663 = vmatpush3.bf16.xpose.msk.msra.mxu1 %vm18846_vm5, %v13661_v22  ;;  %v10141_v22 = vld [vmem:[%s21845_s15 + $0xdd0] sm:$0xff] }
0x1f88   :  { %13695 = vmatpush3.bf16.xpose.msk.msra.mxu0 %vm18846_vm5, %v13693_v20  ;;  %13664 = vmatprep.subr.bf16.mxu1 %v21999_v12  ;;  %v10142_v20 = vld [vmem:[%s21845_s15 + $0xdd8] sm:$0xff] }
0x1f89   :  { %13696 = vmatprep.subr.bf16.mxu0 %v21999_v12  ;;  %v13748_v8 = vpack.c.bf16 %v10142_v20, %v10141_v22 }
0x1f8f   :  { %13667 = vmatpush3.bf16.xpose.msk.msra.mxu1 %vm18846_vm5, %v13665_v38  ;;  %v10143_v38 = vld [vmem:[%s21845_s15 + $0xde0] sm:$0xff] }
0x1f90   :  { %13699 = vmatpush3.bf16.xpose.msk.msra.mxu0 %vm18846_vm5, %v13697_v24  ;;  %13668 = vmatprep.subr.bf16.mxu1 %v21999_v12  ;;  %v10144_v24 = vld [vmem:[%s21845_s15 + $0xde8] sm:$0xff] }
0x1f91   :  { %13700 = vmatprep.subr.bf16.mxu0 %v21999_v12  ;;  %v13751_v43 = vpack.c.bf16 %v10144_v24, %v10143_v38  ;;  %v13768_v38 = vpack.c.bf16 %v10197_v34, %v10196_v33 }
0x1f97   :  { %13671 = vmatpush3.bf16.xpose.msk.msra.mxu1 %vm18846_vm5, %v13669_v42  ;;  %v10145_v42 = vld [vmem:[%s21845_s15 + $0xdf0] sm:$0xff] }
0x1f98   :  { %13703 = vmatpush3.bf16.xpose.msk.msra.mxu0 %vm18846_vm5, %v13701_v10  ;;  %13672 = vmatprep.subr.bf16.mxu1 %v21999_v12  ;;  %v10146_v10 = vld [vmem:[%s21845_s15 + $0xdf8] sm:$0xff] }
0x1f99   :  { %13704 = vmatprep.subr.bf16.mxu0 %v21999_v12  ;;  %v13754_v32 = vpack.c.bf16 %v10146_v10, %v10145_v42  ;;  %v10199_v42 = vld [vmem:[%s21835_s5 + $0x12] ss:$0 sm:$0xff] }
0x1f9f   :  { %13675 = vmatpush3.bf16.xpose.msk.msra.mxu1 %vm18846_vm5, %v13673_v46 }
0x1fa0   :  { %13707 = vmatpush3.bf16.xpose.msk.msra.mxu0 %vm18846_vm5, %v13705_v56  ;;  %13708 = vmatprep.subr.bf16.mxu1 %v21999_v12 }
0x1fa1   :  { %13732 = vmatprep.subr.bf16.mxu0 %v21999_v12 }
0x1fa6   :  { %12317 = vmatmul.mubr.msk.f32.vlgmr.msra.gmra.mrb[44].mxu1 %vm578_vm1, %v6220_v15 }
0x1fa7   :  { %12352 = vmatmul.mubr.msk.f32.vlgmr.msra.gmra.mrb[46].mxu0 %vm578_vm1, %v6225_v50  ;;  %13710 = vmatpush3.bf16.msra.mxu1 %v13709_v63 }
0x1fa8   :  { %13734 = vmatpush3.bf16.msra.mxu0 %v13733_v0  ;;  %13711 = vmatprep.subr.bf16.mxu1 %v21999_v12 }
0x1fa9   :  { %13735 = vmatprep.subr.bf16.mxu0 %v21999_v12  ;;  %12386 = vmatprep.mubr.msk.f32.mxu1 %vm14307_vm4, %v21996_v61 }
0x1faa   :  { %12421 = vmatprep.mubr.msk.f32.mxu0 %vm14307_vm4, %v21996_v61 }
0x1fab   :  { %13713 = vmatpush3.bf16.msra.mxu1 %v13712_v1  ;;  %v10187_v1 = vld [vmem:[%s21834_s4 + $0x1c8] sm:$0xff] }
0x1fac   :  { %13737 = vmatpush3.bf16.msra.mxu0 %v13736_v3  ;;  %13714 = vmatprep.subr.bf16.mxu1 %v21999_v12  ;;  %v13756_v3 = vpack.c.bf16 %v10187_v1, %v10186_v31 }
0x1fad   :  { %13738 = vmatprep.subr.bf16.mxu0 %v21999_v12 }
0x1faf   :  { %13716 = vmatpush3.bf16.msra.mxu1 %v13715_v2  ;;  %v10189_v2 = vld [vmem:[%s21834_s4 + $0x1d8] sm:$0xff] }
0x1fb0   :  { %13740 = vmatpush3.bf16.msra.mxu0 %v13739_v7  ;;  %13717 = vmatprep.subr.bf16.mxu1 %v21999_v12  ;;  %v13760_v14 = vpack.c.bf16 %v10189_v2, %v10188_v6 }
0x1fb1   :  { %13741 = vmatprep.subr.bf16.mxu0 %v21999_v12 }
0x1fb3   :  { %13719 = vmatpush3.bf16.msra.mxu1 %v13718_v28  ;;  %v10202_v28 = vld [vmem:[%s21834_s4 + $0x2c0] sm:$0xff] }
0x1fb4   :  { %13743 = vmatpush3.bf16.msra.mxu0 %v13742_v44  ;;  %13720 = vmatprep.subr.bf16.mxu1 %v21999_v12  ;;  %v10203_v44 = vld [vmem:[%s21834_s4 + $0x2c8] sm:$0xff] }
0x1fb5   :  { %13744 = vmatprep.subr.bf16.mxu0 %v21999_v12  ;;  %v13772_v16 = vpack.c.bf16 %v10203_v44, %v10202_v28 }
0x1fb7   :  { %13722 = vmatpush3.bf16.msra.mxu1 %v13721_v26  ;;  %v10054_v26 = vld [vmem:[%s21836_s6 + $0x20] sm:$0xff] }
0x1fb8   :  { %13746 = vmatpush3.bf16.msra.mxu0 %v13745_v29  ;;  %13723 = vmatprep.subr.bf16.mxu1 %v21999_v12  ;;  %v10194_v29 = vld [vmem:[%s21834_s4 + $0x240] sm:$0xff] }
0x1fb9   :  { %13747 = vmatprep.subr.bf16.mxu0 %v21999_v12  ;;  %v13764_v22 = vpack.c.bf16 %v10195_v30, %v10194_v29 }
0x1fbb   :  { %13725 = vmatpush3.bf16.msra.mxu1 %v13724_v9 }
0x1fbc   :  { %13749 = vmatpush3.bf16.msra.mxu0 %v13748_v8  ;;  %13726 = vmatprep.subr.bf16.mxu1 %v21999_v12 }
0x1fbd   :  { %13750 = vmatprep.subr.bf16.mxu0 %v21999_v12 }
0x1fbf   :  { %13728 = vmatpush3.bf16.msra.mxu1 %v13727_v18 }
0x1fc0   :  { %13752 = vmatpush3.bf16.msra.mxu0 %v13751_v43  ;;  %13729 = vmatprep.subr.bf16.mxu1 %v21999_v12 }
0x1fc1   :  { %13753 = vmatprep.subr.bf16.mxu0 %v21999_v12 }
0x1fc3   :  { %13731 = vmatpush3.bf16.msra.mxu1 %v13730_v55 }
0x1fc4   :  { %13755 = vmatpush3.bf16.msra.mxu0 %v13754_v32  ;;  %12424 = vmatprep.subr.mxu1 %v10181_v27 }
0x1fc5   :  { %13757 = vmatprep.subr.bf16.mxu0 %v13756_v3 }
0x2079   :  { %v6599_v51 = vpop.f32.mrb[44].mxu1 }
0x207a   :  { %v6724_v41 = vmul.f32 0.35355338, %v6599_v51  ;;  %v6720_v46 = vpop.f32.mrb[46].mxu0  ;;  %v12318_v56 = vpop.f32.mrb[45].mxu1 }
0x207b   :  { %v6725_v49 = vmul.f32 0.35355338, %v6720_v46  ;;  %v12353_v58 = vpop.f32.mrb[47].mxu0 }
0x207c   :  { %v6726_v62 = vadd.f32 %v6724_v41, %v19120_v57 }
0x207d   :  { %v6727_v52 = vadd.f32 %v6725_v49, %v19120_v57 }
0x207e   :  { %6728 = vmax.xlane.f32.xlu1 %v6726_v62 }
0x207f   :  { %6730 = vmax.xlane.f32.xlu0 %v6727_v52 }
0x210b   :  { %v6729_v39 = vpop.xlane.xlu1 %6728 }
0x210c   :  { %v6731_v15 = vpop.xlane.xlu0 %6730  ;;  %v6732_v50 = vsub.f32 %v6726_v62, %v6729_v39 }
0x210d   :  { %v6733_v63 = vsub.f32 %v6727_v52, %v6731_v15 }
0x210e   :  { %v6734_v0 = vmul.f32 1.442695, %v6732_v50 }
0x210f   :  { %v6736_v54 = vmul.f32 1.442695, %v6733_v63 }
0x2110   :  { %14188 = vpow2.f32 %v6734_v0 }
0x2111   :  { %14190 = vpow2.f32 %v6736_v54 }
0x211a   :  { %v14189_v47 = vpop.eup %14188 }
0x211b   :  { %v14191_v35 = vpop.eup %14190  ;;  %6738 = vadd.xlane.f32.xlu1 %v14189_v47 }
0x211c   :  { %6740 = vadd.xlane.f32.xlu0 %v14191_v35 }
0x21a8   :  { %v6739_v21 = vpop.xlane.xlu1 %6738 }
0x21a9   :  { %v6741_v5 = vpop.xlane.xlu0 %6740  ;;  %14192 = vrcp.f32 %v6739_v21 }
0x21aa   :  { %14194 = vrcp.f32 %v6741_v5 }
0x21b3   :  { %v14193_v7 = vpop.eup %14192 }
0x21b4   :  { %v14195_v13 = vpop.eup %14194  ;;  %v6744_v11 = vmul.f32 %v14193_v7, %v14189_v47 }
0x21b5   :  { %v6745_v36 = vmul.f32 %v14195_v13, %v14191_v35 }
0x21b6   :  { %12387 = vmatmul.mubr.f32.vlgmr.msra.gmra.mrb[46].mxu1 %v6744_v11 }
0x21b7   :  { %12422 = vmatmul.mubr.f32.vlgmr.msra.gmra.mrb[48].mxu0 %v6745_v36  ;;  %12425 = vmatpush3.msra.mxu1 %v10181_v27 }
0x21b8   :  { %13759 = vmatpush3.bf16.msra.mxu0 %v13756_v3  ;;  %12442 = vmatprep.mubr.msk.f32.mxu0 %vm1473_vm0, %v20295_v59 }
0x21b9   :  { %13761 = vmatprep.subr.bf16.mxu0 %v13760_v14  ;;  %12429 = vmatprep.subr.mxu1 %v10054_v26 }
0x21bc   :  { %13763 = vmatpush3.bf16.msra.mxu0 %v13760_v14 }
0x21bd   :  { %13773 = vmatprep.subr.bf16.mxu0 %v13772_v16 }
0x21bf   :  { %12443 = vmatmul.mubr.msk.f32.vlgmr.msra.gmra.mrb[50].mxu0 %vm1473_vm0, %v20297_v60 }
0x21c0   :  { %13775 = vmatpush3.bf16.msra.mxu0 %v13772_v16  ;;  %12464 = vmatprep.mubr.msk.f32.mxu0 %vm1473_vm0, %v20295_v59 }
0x21c1   :  { %13777 = vmatprep.subr.bf16.mxu0 %v13776_v25 }
0x21c4   :  { %13779 = vmatpush3.bf16.msra.mxu0 %v13776_v25 }
0x21c5   :  { %13812 = vmatprep.subr.bf16.mxu0 %v21999_v12 }
0x21c7   :  { %12465 = vmatmul.mubr.msk.f32.vlgmr.msra.gmra.mrb[52].mxu0 %vm1473_vm0, %v20297_v60 }
0x21c8   :  { %12534 = vmatprep.mubr.msk.f32.mxu0 %vm14307_vm4, %v21996_v61 }
0x2289   :  { %v6812_v40 = vpop.f32.mrb[46].mxu1 }
0x228a   :  { %v6882_v20 = vpop.f32.mrb[48].mxu0  ;;  %v12388_v9 = vpop.f32.mrb[47].mxu1  ;;  %12426 = vmatprep.mubr.msk.f32.mxu1 %vm578_vm1, %v6812_v40 }
0x228b   :  { %v12423_v8 = vpop.f32.mrb[49].mxu0  ;;  %12427 = vmatmul.mubr.msk.f32.vlgmr.msra.gmra.mrb[48].mxu1 %vm578_vm1, %v6882_v20 }
0x228c   :  { %12430 = vmatpush3.msra.mxu1 %v10054_v26  ;;  %12431 = vmatprep.mubr.msk.f32.mxu1 %vm578_vm1, %v20665_v37  ;;  %v10207_v37 = vld [vmem:[%s21835_s5 + $0x16] ss:$0 sm:$0xff] }
0x228d   :  { %13765 = vmatprep.subr.bf16.mxu1 %v13764_v22 }
0x2292   :  { %v21011_v24 = vpop.f32.mrb[50].mxu0 }
0x2293   :  { %v21013_v18 = vpop.f32.mrb[51].mxu0  ;;  %12432 = vmatmul.mubr.msk.f32.vlgmr.msra.gmra.mrb[48].mxu1 %vm578_vm1, %v20667_v53 }
0x2294   :  { %13767 = vmatpush3.bf16.msra.mxu1 %v13764_v22  ;;  %12453 = vmatprep.mubr.msk.f32.mxu1 %vm1473_vm0, %v20295_v59 }
0x2295   :  { %13769 = vmatprep.subr.bf16.mxu1 %v13768_v38 }
0x2298   :  { %13771 = vmatpush3.bf16.msra.mxu1 %v13768_v38 }
0x2299   :  { %13780 = vmatprep.subr.bf16.mxu1 %v21999_v12 }
0x229a   :  { %v12466_v43 = vpop.f32.mrb[52].mxu0 }
0x229b   :  { %v7311_v23 = vadd.f32 %v12466_v43, %v10207_v37  ;;  %v7305_v48 = vpop.f32.mrb[53].mxu0  ;;  %12454 = vmatmul.mubr.msk.f32.vlgmr.msra.gmra.mrb[50].mxu1 %vm1473_vm0, %v20297_v60 }
0x229c   :  { %v7306_v53 = vadd.f32 %v10207_v37, %v7305_v48  ;;  %12499 = vmatprep.mubr.msk.f32.mxu1 %vm14307_vm4, %v21996_v61  ;;  %v10191_v48 = vld [vmem:[%s21835_s5 + $0xe] ss:$0 sm:$0xff] }
0x229d   :  { %10213 = vst.msk [vmem:[%s18801_s22 + $0xe80] sm:$0xff] %vm578_vm1, %v7311_v23 }
0x229e   :  { %10211 = vst.msk [vmem:[%s18801_s22 + $0xe00] sm:$0xff] %vm578_vm1, %v7306_v53 }
0x236e   :  { %v12455_v10 = vpop.f32.mrb[50].mxu1 }
0x236f   :  { %v7223_v55 = vadd.f32 %v12455_v10, %v10199_v42  ;;  %v7217_v32 = vpop.f32.mrb[51].mxu1 }
0x2370   :  { %v7218_v51 = vadd.f32 %v10199_v42, %v7217_v32  ;;  %v7130_v32 = vadd.f32 %v10191_v48, %v21013_v18 }
0x2371   :  { %10212 = vst.msk [vmem:[%s18801_s22 + $0xa80] sm:$0xff] %vm578_vm1, %v7223_v55 }
0x2372   :  { %10210 = vst.msk [vmem:[%s18801_s22 + $0xa00] sm:$0xff] %vm578_vm1, %v7218_v51  ;;  %v7135_v51 = vadd.f32 %v21011_v24, %v10191_v48 }
0x2379   :  { %v10214_v41 = vld [vmem:[%s21845_s15 + $0xa00] sm:$0xff]  ;;  %v10215_v46 = vld [vmem:[%s21845_s15 + $0xa08] sm:$0xff]  ;;  %v10216_v52 = vld [vmem:[%s21845_s15 + $0xa10] sm:$0xff] }
0x237a   :  { %v10230_v56 = vld [vmem:[%s21845_s15 + $0xa80] sm:$0xff]  ;;  %v13781_v49 = vpack.c.bf16 %v10215_v46, %v10214_v41  ;;  %v10231_v58 = vld [vmem:[%s21845_s15 + $0xa88] sm:$0xff]  ;;  %v10217_v39 = vld [vmem:[%s21845_s15 + $0xa18] sm:$0xff] }
0x237b   :  { %v13813_v62 = vpack.c.bf16 %v10231_v58, %v10230_v56  ;;  %v10232_v15 = vld [vmem:[%s21845_s15 + $0xa90] sm:$0xff]  ;;  %v10233_v50 = vld [vmem:[%s21845_s15 + $0xa98] sm:$0xff]  ;;  %v13785_v63 = vpack.c.bf16 %v10217_v39, %v10216_v52  ;;  %v10218_v54 = vld [vmem:[%s21845_s15 + $0xa20] sm:$0xff] }
0x237c   :  { %13783 = vmatpush3.bf16.xpose.msk.msra.mxu1 %vm18846_vm5, %v13781_v49  ;;  %v13817_v0 = vpack.c.bf16 %v10233_v50, %v10232_v15  ;;  %v10219_v47 = vld [vmem:[%s21845_s15 + $0xa28] sm:$0xff]  ;;  %v10234_v35 = vld [vmem:[%s21845_s15 + $0xaa0] sm:$0xff]  ;;  %v10220_v27 = vld [vmem:[%s21845_s15 + $0xa30] sm:$0xff] }
0x237d   :  { %13815 = vmatpush3.bf16.xpose.msk.msra.mxu0 %vm18846_vm5, %v13813_v62  ;;  %13784 = vmatprep.subr.bf16.mxu1 %v21999_v12  ;;  %v10235_v31 = vld [vmem:[%s21845_s15 + $0xaa8] sm:$0xff]  ;;  %v13789_v1 = vpack.c.bf16 %v10219_v47, %v10218_v54  ;;  %v10221_v21 = vld [vmem:[%s21845_s15 + $0xa38] sm:$0xff]  ;;  %v10236_v5 = vld [vmem:[%s21845_s15 + $0xab0] sm:$0xff] }
0x237e   :  { %13816 = vmatprep.subr.bf16.mxu0 %v21999_v12  ;;  %v13821_v3 = vpack.c.bf16 %v10235_v31, %v10234_v35  ;;  %v10237_v6 = vld [vmem:[%s21845_s15 + $0xab8] sm:$0xff]  ;;  %v13793_v2 = vpack.c.bf16 %v10221_v21, %v10220_v27  ;;  %v10222_v13 = vld [vmem:[%s21845_s15 + $0xa40] sm:$0xff]  ;;  %v10223_v11 = vld [vmem:[%s21845_s15 + $0xa48] sm:$0xff] }
0x237f   :  { %v13825_v7 = vpack.c.bf16 %v10237_v6, %v10236_v5  ;;  %v10238_v36 = vld [vmem:[%s21845_s15 + $0xac0] sm:$0xff]  ;;  %v10239_v14 = vld [vmem:[%s21845_s15 + $0xac8] sm:$0xff]  ;;  %v13797_v28 = vpack.c.bf16 %v10223_v11, %v10222_v13  ;;  %v10224_v16 = vld [vmem:[%s21845_s15 + $0xa50] sm:$0xff] }
0x2380   :  { %v13829_v44 = vpack.c.bf16 %v10239_v14, %v10238_v36  ;;  %v10225_v17 = vld [vmem:[%s21845_s15 + $0xa58] sm:$0xff]  ;;  %v10240_v19 = vld [vmem:[%s21845_s15 + $0xad0] sm:$0xff]  ;;  %v10226_v30 = vld [vmem:[%s21845_s15 + $0xa60] sm:$0xff] }
0x2381   :  { %v10241_v25 = vld [vmem:[%s21845_s15 + $0xad8] sm:$0xff]  ;;  %v13801_v26 = vpack.c.bf16 %v10225_v17, %v10224_v16  ;;  %v10227_v40 = vld [vmem:[%s21845_s15 + $0xa68] sm:$0xff]  ;;  %v10242_v22 = vld [vmem:[%s21845_s15 + $0xae0] sm:$0xff] }
0x2382   :  { %v13833_v29 = vpack.c.bf16 %v10241_v25, %v10240_v19  ;;  %v10243_v20 = vld [vmem:[%s21845_s15 + $0xae8] sm:$0xff]  ;;  %v13805_v9 = vpack.c.bf16 %v10227_v40, %v10226_v30  ;;  %v10228_v33 = vld [vmem:[%s21845_s15 + $0xa70] sm:$0xff]  ;;  %v10229_v34 = vld [vmem:[%s21845_s15 + $0xa78] sm:$0xff] }
0x2383   :  { %v13837_v8 = vpack.c.bf16 %v10243_v20, %v10242_v22  ;;  %v10244_v38 = vld [vmem:[%s21845_s15 + $0xaf0] sm:$0xff]  ;;  %v10245_v37 = vld [vmem:[%s21845_s15 + $0xaf8] sm:$0xff]  ;;  %v13809_v43 = vpack.c.bf16 %v10229_v34, %v10228_v33  ;;  %v10246_v53 = vld [vmem:[%s21845_s15 + $0xe00] sm:$0xff] }
0x2384   :  { %13787 = vmatpush3.bf16.xpose.msk.msra.mxu1 %vm18846_vm5, %v13785_v63  ;;  %v13841_v23 = vpack.c.bf16 %v10245_v37, %v10244_v38  ;;  %v10247_v42 = vld [vmem:[%s21845_s15 + $0xe08] sm:$0xff]  ;;  %v10262_v10 = vld [vmem:[%s21845_s15 + $0xe80] sm:$0xff]  ;;  %v10248_v56 = vld [vmem:[%s21845_s15 + $0xe10] sm:$0xff] }
0x2385   :  { %13819 = vmatpush3.bf16.xpose.msk.msra.mxu0 %vm18846_vm5, %v13817_v0  ;;  %13788 = vmatprep.subr.bf16.mxu1 %v21999_v12  ;;  %v10263_v55 = vld [vmem:[%s21845_s15 + $0xe88] sm:$0xff]  ;;  %v13845_v41 = vpack.c.bf16 %v10247_v42, %v10246_v53  ;;  %v10249_v49 = vld [vmem:[%s21845_s15 + $0xe18] sm:$0xff]  ;;  %v10264_v18 = vld [vmem:[%s21845_s15 + $0xe90] sm:$0xff] }
0x2386   :  { %13820 = vmatprep.subr.bf16.mxu0 %v21999_v12  ;;  %v13869_v46 = vpack.c.bf16 %v10263_v55, %v10262_v10  ;;  %v10265_v24 = vld [vmem:[%s21845_s15 + $0xe98] sm:$0xff]  ;;  %v13848_v58 = vpack.c.bf16 %v10249_v49, %v10248_v56  ;;  %v10250_v52 = vld [vmem:[%s21845_s15 + $0xe20] sm:$0xff]  ;;  %v10251_v39 = vld [vmem:[%s21845_s15 + $0xe28] sm:$0xff] }
0x2387   :  { %v13872_v62 = vpack.c.bf16 %v10265_v24, %v10264_v18  ;;  %v10266_v15 = vld [vmem:[%s21845_s15 + $0xea0] sm:$0xff]  ;;  %v10267_v50 = vld [vmem:[%s21845_s15 + $0xea8] sm:$0xff]  ;;  %v13851_v63 = vpack.c.bf16 %v10251_v39, %v10250_v52  ;;  %v10252_v54 = vld [vmem:[%s21845_s15 + $0xe30] sm:$0xff] }
0x2388   :  { %v13875_v0 = vpack.c.bf16 %v10267_v50, %v10266_v15  ;;  %v10253_v47 = vld [vmem:[%s21845_s15 + $0xe38] sm:$0xff]  ;;  %v10268_v35 = vld [vmem:[%s21845_s15 + $0xeb0] sm:$0xff]  ;;  %v10254_v27 = vld [vmem:[%s21845_s15 + $0xe40] sm:$0xff] }
0x2389   :  { %v10269_v31 = vld [vmem:[%s21845_s15 + $0xeb8] sm:$0xff]  ;;  %v10255_v21 = vld [vmem:[%s21845_s15 + $0xe48] sm:$0xff]  ;;  %v10270_v5 = vld [vmem:[%s21845_s15 + $0xec0] sm:$0xff] }
0x238a   :  { %v10271_v6 = vld [vmem:[%s21845_s15 + $0xec8] sm:$0xff]  ;;  %v10256_v13 = vld [vmem:[%s21845_s15 + $0xe50] sm:$0xff]  ;;  %v10257_v11 = vld [vmem:[%s21845_s15 + $0xe58] sm:$0xff] }
0x238b   :  { %v10272_v36 = vld [vmem:[%s21845_s15 + $0xed0] sm:$0xff]  ;;  %v10273_v14 = vld [vmem:[%s21845_s15 + $0xed8] sm:$0xff]  ;;  %v10258_v16 = vld [vmem:[%s21845_s15 + $0xe60] sm:$0xff] }
0x238c   :  { %13791 = vmatpush3.bf16.xpose.msk.msra.mxu1 %vm18846_vm5, %v13789_v1  ;;  %v13854_v1 = vpack.c.bf16 %v10253_v47, %v10252_v54  ;;  %v10259_v17 = vld [vmem:[%s21845_s15 + $0xe68] sm:$0xff]  ;;  %v10274_v19 = vld [vmem:[%s21845_s15 + $0xee0] sm:$0xff]  ;;  %v10260_v30 = vld [vmem:[%s21845_s15 + $0xe70] sm:$0xff] }
0x238d   :  { %13823 = vmatpush3.bf16.xpose.msk.msra.mxu0 %vm18846_vm5, %v13821_v3  ;;  %13792 = vmatprep.subr.bf16.mxu1 %v21999_v12  ;;  %v13878_v3 = vpack.c.bf16 %v10269_v31, %v10268_v35  ;;  %v10275_v25 = vld [vmem:[%s21845_s15 + $0xee8] sm:$0xff]  ;;  %v10261_v40 = vld [vmem:[%s21845_s15 + $0xe78] sm:$0xff]  ;;  %v10276_v22 = vld [vmem:[%s21845_s15 + $0xef0] sm:$0xff] }
0x238e   :  { %13824 = vmatprep.subr.bf16.mxu0 %v21999_v12  ;;  %v10277_v20 = vld [vmem:[%s21845_s15 + $0xef8] sm:$0xff]  ;;  %v10323_v49 = vld [vmem:[%s21834_s4 + $0x260] sm:$0xff]  ;;  %v10324_v18 = vld [vmem:[%s21834_s4 + $0x268] sm:$0xff] }
0x238f   :  { %v13900_v24 = vpack.c.bf16 %v10324_v18, %v10323_v49  ;;  %v10325_v39 = vld [vmem:[%s21834_s4 + $0x270] sm:$0xff]  ;;  %v10326_v15 = vld [vmem:[%s21834_s4 + $0x278] sm:$0xff]  ;;  %v10315_v35 = vld [vmem:[%s21834_s4 + $0x1e0] sm:$0xff] }
0x2390   :  { %v13904_v47 = vpack.c.bf16 %v10326_v15, %v10325_v39  ;;  %v10316_v31 = vld [vmem:[%s21834_s4 + $0x1e8] sm:$0xff] }
0x2394   :  { %13795 = vmatpush3.bf16.xpose.msk.msra.mxu1 %vm18846_vm5, %v13793_v2  ;;  %v13857_v2 = vpack.c.bf16 %v10255_v21, %v10254_v27  ;;  %v10318_v27 = vld [vmem:[%s21834_s4 + $0x1f8] sm:$0xff] }
0x2395   :  { %13827 = vmatpush3.bf16.xpose.msk.msra.mxu0 %vm18846_vm5, %v13825_v7  ;;  %13796 = vmatprep.subr.bf16.mxu1 %v21999_v12  ;;  %v13881_v7 = vpack.c.bf16 %v10271_v6, %v10270_v5 }
0x2396   :  { %13828 = vmatprep.subr.bf16.mxu0 %v21999_v12 }
0x239c   :  { %13799 = vmatpush3.bf16.xpose.msk.msra.mxu1 %vm18846_vm5, %v13797_v28  ;;  %v13860_v28 = vpack.c.bf16 %v10257_v11, %v10256_v13  ;;  %v10332_v13 = vld [vmem:[%s21834_s4 + $0x2e8] sm:$0xff] }
0x239d   :  { %13831 = vmatpush3.bf16.xpose.msk.msra.mxu0 %vm18846_vm5, %v13829_v44  ;;  %13800 = vmatprep.subr.bf16.mxu1 %v21999_v12  ;;  %v13884_v44 = vpack.c.bf16 %v10273_v14, %v10272_v36  ;;  %v10333_v14 = vld [vmem:[%s21834_s4 + $0x2f0] sm:$0xff] }
0x239e   :  { %13832 = vmatprep.subr.bf16.mxu0 %v21999_v12 }
0x23a4   :  { %13803 = vmatpush3.bf16.xpose.msk.msra.mxu1 %vm18846_vm5, %v13801_v26  ;;  %v13863_v26 = vpack.c.bf16 %v10259_v17, %v10258_v16 }
0x23a5   :  { %13835 = vmatpush3.bf16.xpose.msk.msra.mxu0 %vm18846_vm5, %v13833_v29  ;;  %13804 = vmatprep.subr.bf16.mxu1 %v21999_v12  ;;  %v13887_v29 = vpack.c.bf16 %v10275_v25, %v10274_v19 }
0x23a6   :  { %13836 = vmatprep.subr.bf16.mxu0 %v21999_v12 }
0x23ac   :  { %13807 = vmatpush3.bf16.xpose.msk.msra.mxu1 %vm18846_vm5, %v13805_v9  ;;  %v13866_v9 = vpack.c.bf16 %v10261_v40, %v10260_v30  ;;  %v10336_v40 = vld [vmem:[%s21835_s5 + $0x17] ss:$0 sm:$0xff] }
0x23ad   :  { %13839 = vmatpush3.bf16.xpose.msk.msra.mxu0 %vm18846_vm5, %v13837_v8  ;;  %13808 = vmatprep.subr.bf16.mxu1 %v21999_v12  ;;  %v13890_v8 = vpack.c.bf16 %v10277_v20, %v10276_v22 }
0x23ae   :  { %13840 = vmatprep.subr.bf16.mxu0 %v21999_v12 }
0x23b4   :  { %13811 = vmatpush3.bf16.xpose.msk.msra.mxu1 %vm18846_vm5, %v13809_v43 }
0x23b5   :  { %13843 = vmatpush3.bf16.xpose.msk.msra.mxu0 %vm18846_vm5, %v13841_v23  ;;  %13844 = vmatprep.subr.bf16.mxu1 %v21999_v12 }
0x23b6   :  { %13868 = vmatprep.subr.bf16.mxu0 %v21999_v12 }
0x23bb   :  { %12500 = vmatmul.mubr.msk.f32.vlgmr.msra.gmra.mrb[52].mxu1 %vm578_vm1, %v7130_v32 }
0x23bc   :  { %12535 = vmatmul.mubr.msk.f32.vlgmr.msra.gmra.mrb[54].mxu0 %vm578_vm1, %v7135_v51  ;;  %13846 = vmatpush3.bf16.msra.mxu1 %v13845_v41 }
0x23bd   :  { %13870 = vmatpush3.bf16.msra.mxu0 %v13869_v46  ;;  %13847 = vmatprep.subr.bf16.mxu1 %v21999_v12 }
0x23be   :  { %13871 = vmatprep.subr.bf16.mxu0 %v21999_v12  ;;  %12569 = vmatprep.mubr.msk.f32.mxu1 %vm14307_vm4, %v21996_v61 }
0x23bf   :  { %12604 = vmatprep.mubr.msk.f32.mxu0 %vm14307_vm4, %v21996_v61 }
0x23c0   :  { %13849 = vmatpush3.bf16.msra.mxu1 %v13848_v58  ;;  %v10312_v58 = vld [vmem:[%s21836_s6 + $0x30] sm:$0xff] }
0x23c1   :  { %13873 = vmatpush3.bf16.msra.mxu0 %v13872_v62  ;;  %13850 = vmatprep.subr.bf16.mxu1 %v21999_v12 }
0x23c2   :  { %13874 = vmatprep.subr.bf16.mxu0 %v21999_v12 }
0x23c4   :  { %13852 = vmatpush3.bf16.msra.mxu1 %v13851_v63 }
0x23c5   :  { %13876 = vmatpush3.bf16.msra.mxu0 %v13875_v0  ;;  %13853 = vmatprep.subr.bf16.mxu1 %v21999_v12 }
0x23c6   :  { %13877 = vmatprep.subr.bf16.mxu0 %v21999_v12 }
0x23c8   :  { %13855 = vmatpush3.bf16.msra.mxu1 %v13854_v1  ;;  %v13892_v1 = vpack.c.bf16 %v10316_v31, %v10315_v35 }
0x23c9   :  { %13879 = vmatpush3.bf16.msra.mxu0 %v13878_v3  ;;  %13856 = vmatprep.subr.bf16.mxu1 %v21999_v12  ;;  %v10317_v3 = vld [vmem:[%s21834_s4 + $0x1f0] sm:$0xff] }
0x23ca   :  { %13880 = vmatprep.subr.bf16.mxu0 %v21999_v12  ;;  %v13896_v5 = vpack.c.bf16 %v10318_v27, %v10317_v3 }
0x23cc   :  { %13858 = vmatpush3.bf16.msra.mxu1 %v13857_v2 }
0x23cd   :  { %13882 = vmatpush3.bf16.msra.mxu0 %v13881_v7  ;;  %13859 = vmatprep.subr.bf16.mxu1 %v21999_v12  ;;  %v10331_v7 = vld [vmem:[%s21834_s4 + $0x2e0] sm:$0xff] }
0x23ce   :  { %13883 = vmatprep.subr.bf16.mxu0 %v21999_v12  ;;  %v13908_v36 = vpack.c.bf16 %v10332_v13, %v10331_v7 }
0x23d0   :  { %13861 = vmatpush3.bf16.msra.mxu1 %v13860_v28  ;;  %v10334_v28 = vld [vmem:[%s21834_s4 + $0x2f8] sm:$0xff] }
0x23d1   :  { %13885 = vmatpush3.bf16.msra.mxu0 %v13884_v44  ;;  %13862 = vmatprep.subr.bf16.mxu1 %v21999_v12  ;;  %v10328_v44 = vld [vmem:[%s21835_s5 + $0x13] ss:$0 sm:$0xff]  ;;  %v13912_v16 = vpack.c.bf16 %v10334_v28, %v10333_v14 }
0x23d2   :  { %13886 = vmatprep.subr.bf16.mxu0 %v21999_v12 }
0x23d4   :  { %13864 = vmatpush3.bf16.msra.mxu1 %v13863_v26 }
0x23d5   :  { %13888 = vmatpush3.bf16.msra.mxu0 %v13887_v29  ;;  %13865 = vmatprep.subr.bf16.mxu1 %v21999_v12 }
0x23d6   :  { %13889 = vmatprep.subr.bf16.mxu0 %v21999_v12 }
0x23d8   :  { %13867 = vmatpush3.bf16.msra.mxu1 %v13866_v9 }
0x23d9   :  { %13891 = vmatpush3.bf16.msra.mxu0 %v13890_v8  ;;  %12607 = vmatprep.subr.mxu1 %v10312_v58 }
0x23da   :  { %13901 = vmatprep.subr.bf16.mxu0 %v13900_v24 }
0x248e   :  { %v7509_v33 = vpop.f32.mrb[52].mxu1 }
0x248f   :  { %v7634_v34 = vmul.f32 0.35355338, %v7509_v33  ;;  %v7630_v38 = vpop.f32.mrb[54].mxu0  ;;  %v12501_v37 = vpop.f32.mrb[53].mxu1 }
0x2490   :  { %v7635_v43 = vmul.f32 0.35355338, %v7630_v38  ;;  %v12536_v23 = vpop.f32.mrb[55].mxu0 }
0x2491   :  { %v7636_v48 = vadd.f32 %v7634_v34, %v19120_v57 }
0x2492   :  { %v7637_v53 = vadd.f32 %v7635_v43, %v19120_v57 }
0x2493   :  { %7638 = vmax.xlane.f32.xlu1 %v7636_v48 }
0x2494   :  { %7640 = vmax.xlane.f32.xlu0 %v7637_v53 }
0x2520   :  { %v7639_v42 = vpop.xlane.xlu1 %7638 }
0x2521   :  { %v7641_v10 = vpop.xlane.xlu0 %7640  ;;  %v7642_v55 = vsub.f32 %v7636_v48, %v7639_v42 }
0x2522   :  { %v7643_v32 = vsub.f32 %v7637_v53, %v7641_v10 }
0x2523   :  { %v7644_v51 = vmul.f32 1.442695, %v7642_v55 }
0x2524   :  { %v7646_v41 = vmul.f32 1.442695, %v7643_v32 }
0x2525   :  { %14196 = vpow2.f32 %v7644_v51 }
0x2526   :  { %14198 = vpow2.f32 %v7646_v41 }
0x252f   :  { %v14197_v46 = vpop.eup %14196 }
0x2530   :  { %v14199_v56 = vpop.eup %14198  ;;  %7648 = vadd.xlane.f32.xlu1 %v14197_v46 }
0x2531   :  { %7650 = vadd.xlane.f32.xlu0 %v14199_v56 }
0x25bd   :  { %v7649_v62 = vpop.xlane.xlu1 %7648 }
0x25be   :  { %v7651_v52 = vpop.xlane.xlu0 %7650  ;;  %14200 = vrcp.f32 %v7649_v62 }
0x25bf   :  { %14202 = vrcp.f32 %v7651_v52 }
0x25c8   :  { %v14201_v50 = vpop.eup %14200 }
0x25c9   :  { %v14203_v63 = vpop.eup %14202  ;;  %v7654_v0 = vmul.f32 %v14201_v50, %v14197_v46 }
0x25ca   :  { %v7655_v54 = vmul.f32 %v14203_v63, %v14199_v56 }
0x25cb   :  { %12570 = vmatmul.mubr.f32.vlgmr.msra.gmra.mrb[54].mxu1 %v7654_v0 }
0x25cc   :  { %12605 = vmatmul.mubr.f32.vlgmr.msra.gmra.mrb[56].mxu0 %v7655_v54  ;;  %12608 = vmatpush3.msra.mxu1 %v10312_v58 }
0x25cd   :  { %13903 = vmatpush3.bf16.msra.mxu0 %v13900_v24  ;;  %12631 = vmatprep.mubr.msk.f32.mxu0 %vm1473_vm0, %v20295_v59 }
0x25ce   :  { %13905 = vmatprep.subr.bf16.mxu0 %v13904_v47  ;;  %13893 = vmatprep.subr.bf16.mxu1 %v13892_v1 }
0x25d1   :  { %13907 = vmatpush3.bf16.msra.mxu0 %v13904_v47 }
0x25d2   :  { %13916 = vmatprep.subr.bf16.mxu0 %v21999_v12 }
0x25d4   :  { %12632 = vmatmul.mubr.msk.f32.vlgmr.msra.gmra.mrb[58].mxu0 %vm1473_vm0, %v20297_v60 }
0x25d5   :  { %12677 = vmatprep.mubr.msk.f32.mxu0 %vm14307_vm4, %v21996_v61 }
0x269e   :  { %v7722_v21 = vpop.f32.mrb[54].mxu1 }
0x269f   :  { %v7792_v6 = vpop.f32.mrb[56].mxu0  ;;  %v12571_v2 = vpop.f32.mrb[55].mxu1  ;;  %12609 = vmatprep.mubr.msk.f32.mxu1 %vm578_vm1, %v7722_v21 }
0x26a0   :  { %v12606_v11 = vpop.f32.mrb[57].mxu0  ;;  %12610 = vmatmul.mubr.msk.f32.vlgmr.msra.gmra.mrb[48].mxu1 %vm578_vm1, %v7792_v6 }
0x26a1   :  { %13895 = vmatpush3.bf16.msra.mxu1 %v13892_v1  ;;  %12620 = vmatprep.mubr.msk.f32.mxu1 %vm1473_vm0, %v20295_v59 }
0x26a2   :  { %13897 = vmatprep.subr.bf16.mxu1 %v13896_v5 }
0x26a5   :  { %13899 = vmatpush3.bf16.msra.mxu1 %v13896_v5 }
0x26a6   :  { %13909 = vmatprep.subr.bf16.mxu1 %v13908_v36 }
0x26a7   :  { %v12633_v17 = vpop.f32.mrb[58].mxu0 }
0x26a8   :  { %v8054_v19 = vadd.f32 %v12633_v17, %v10328_v44  ;;  %v8048_v25 = vpop.f32.mrb[59].mxu0  ;;  %12621 = vmatmul.mubr.msk.f32.vlgmr.msra.gmra.mrb[56].mxu1 %vm1473_vm0, %v20297_v60 }
0x26a9   :  { %v8049_v26 = vadd.f32 %v10328_v44, %v8048_v25  ;;  %13911 = vmatpush3.bf16.msra.mxu1 %v13908_v36  ;;  %12642 = vmatprep.mubr.msk.f32.mxu1 %vm1473_vm0, %v20295_v59  ;;  %v10320_v25 = vld [vmem:[%s21835_s5 + $0xf] ss:$0 sm:$0xff] }
0x26aa   :  { %10341 = vst.msk [vmem:[%s18801_s22 + $0xb80] sm:$0xff] %vm578_vm1, %v8054_v19  ;;  %13913 = vmatprep.subr.bf16.mxu1 %v13912_v16 }
0x26ab   :  { %10339 = vst.msk [vmem:[%s18801_s22 + $0xb00] sm:$0xff] %vm578_vm1, %v8049_v26 }
0x26ad   :  { %13915 = vmatpush3.bf16.msra.mxu1 %v13912_v16 }
0x26ae   :  { %13948 = vmatprep.subr.bf16.mxu1 %v21999_v12 }
0x26b0   :  { %12643 = vmatmul.mubr.msk.f32.vlgmr.msra.gmra.mrb[58].mxu1 %vm1473_vm0, %v20297_v60 }
0x26b1   :  { %12712 = vmatprep.mubr.msk.f32.mxu1 %vm14307_vm4, %v21996_v61 }
0x277b   :  { %v21371_v29 = vpop.f32.mrb[56].mxu1 }
0x277c   :  { %v21373_v30 = vpop.f32.mrb[57].mxu1 }
0x2783   :  { %v12644_v22 = vpop.f32.mrb[58].mxu1 }
0x2784   :  { %v8142_v20 = vadd.f32 %v12644_v22, %v10336_v40  ;;  %v8136_v9 = vpop.f32.mrb[59].mxu1 }
0x2785   :  { %v8137_v8 = vadd.f32 %v10336_v40, %v8136_v9  ;;  %v7966_v9 = vadd.f32 %v21371_v29, %v10320_v25 }
0x2786   :  { %10342 = vst.msk [vmem:[%s18801_s22 + $0xf80] sm:$0xff] %vm578_vm1, %v8142_v20  ;;  %v7961_v20 = vadd.f32 %v10320_v25, %v21373_v30 }
0x2787   :  { %10340 = vst.msk [vmem:[%s18801_s22 + $0xf00] sm:$0xff] %vm578_vm1, %v8137_v8 }
0x278e   :  { %v10343_v33 = vld [vmem:[%s21845_s15 + $0xb00] sm:$0xff]  ;;  %v10344_v34 = vld [vmem:[%s21845_s15 + $0xb08] sm:$0xff]  ;;  %v10345_v48 = vld [vmem:[%s21845_s15 + $0xb10] sm:$0xff] }
0x278f   :  { %v10359_v38 = vld [vmem:[%s21845_s15 + $0xb80] sm:$0xff]  ;;  %v13917_v37 = vpack.c.bf16 %v10344_v34, %v10343_v33  ;;  %v10360_v43 = vld [vmem:[%s21845_s15 + $0xb88] sm:$0xff]  ;;  %v10346_v53 = vld [vmem:[%s21845_s15 + $0xb18] sm:$0xff] }
0x2790   :  { %v13949_v23 = vpack.c.bf16 %v10360_v43, %v10359_v38  ;;  %v10361_v42 = vld [vmem:[%s21845_s15 + $0xb90] sm:$0xff]  ;;  %v10362_v10 = vld [vmem:[%s21845_s15 + $0xb98] sm:$0xff]  ;;  %v13921_v55 = vpack.c.bf16 %v10346_v53, %v10345_v48  ;;  %v10347_v51 = vld [vmem:[%s21845_s15 + $0xb20] sm:$0xff] }
0x2791   :  { %13919 = vmatpush3.bf16.xpose.msk.msra.mxu0 %vm18846_vm5, %v13917_v37  ;;  %v13953_v32 = vpack.c.bf16 %v10362_v10, %v10361_v42  ;;  %v10348_v41 = vld [vmem:[%s21845_s15 + $0xb28] sm:$0xff]  ;;  %v10363_v46 = vld [vmem:[%s21845_s15 + $0xba0] sm:$0xff]  ;;  %v10349_v24 = vld [vmem:[%s21845_s15 + $0xb30] sm:$0xff] }
0x2792   :  { %13951 = vmatpush3.bf16.xpose.msk.msra.mxu1 %vm18846_vm5, %v13949_v23  ;;  %13920 = vmatprep.subr.bf16.mxu0 %v21999_v12  ;;  %v10364_v56 = vld [vmem:[%s21845_s15 + $0xba8] sm:$0xff]  ;;  %v13925_v49 = vpack.c.bf16 %v10348_v41, %v10347_v51  ;;  %v10350_v58 = vld [vmem:[%s21845_s15 + $0xb38] sm:$0xff]  ;;  %v10365_v62 = vld [vmem:[%s21845_s15 + $0xbb0] sm:$0xff] }
0x2793   :  { %13952 = vmatprep.subr.bf16.mxu1 %v21999_v12  ;;  %v13957_v18 = vpack.c.bf16 %v10364_v56, %v10363_v46  ;;  %v10366_v52 = vld [vmem:[%s21845_s15 + $0xbb8] sm:$0xff]  ;;  %v13929_v39 = vpack.c.bf16 %v10350_v58, %v10349_v24  ;;  %v10351_v50 = vld [vmem:[%s21845_s15 + $0xb40] sm:$0xff]  ;;  %v10352_v63 = vld [vmem:[%s21845_s15 + $0xb48] sm:$0xff] }
0x2794   :  { %v13961_v15 = vpack.c.bf16 %v10366_v52, %v10365_v62  ;;  %v10367_v0 = vld [vmem:[%s21845_s15 + $0xbc0] sm:$0xff]  ;;  %v10368_v54 = vld [vmem:[%s21845_s15 + $0xbc8] sm:$0xff]  ;;  %v13933_v47 = vpack.c.bf16 %v10352_v63, %v10351_v50  ;;  %v10353_v31 = vld [vmem:[%s21845_s15 + $0xb50] sm:$0xff] }
0x2795   :  { %v13965_v35 = vpack.c.bf16 %v10368_v54, %v10367_v0  ;;  %v10354_v1 = vld [vmem:[%s21845_s15 + $0xb58] sm:$0xff]  ;;  %v10369_v3 = vld [vmem:[%s21845_s15 + $0xbd0] sm:$0xff]  ;;  %v10355_v6 = vld [vmem:[%s21845_s15 + $0xb60] sm:$0xff] }
0x2796   :  { %v10370_v27 = vld [vmem:[%s21845_s15 + $0xbd8] sm:$0xff]  ;;  %v13937_v21 = vpack.c.bf16 %v10354_v1, %v10353_v31  ;;  %v10356_v2 = vld [vmem:[%s21845_s15 + $0xb68] sm:$0xff]  ;;  %v10371_v7 = vld [vmem:[%s21845_s15 + $0xbe0] sm:$0xff] }
0x2797   :  { %v13969_v5 = vpack.c.bf16 %v10370_v27, %v10369_v3  ;;  %v10372_v13 = vld [vmem:[%s21845_s15 + $0xbe8] sm:$0xff]  ;;  %v13941_v11 = vpack.c.bf16 %v10356_v2, %v10355_v6  ;;  %v10357_v14 = vld [vmem:[%s21845_s15 + $0xb70] sm:$0xff]  ;;  %v10358_v28 = vld [vmem:[%s21845_s15 + $0xb78] sm:$0xff] }
0x2798   :  { %v13973_v36 = vpack.c.bf16 %v10372_v13, %v10371_v7  ;;  %v10373_v44 = vld [vmem:[%s21845_s15 + $0xbf0] sm:$0xff]  ;;  %v10374_v16 = vld [vmem:[%s21845_s15 + $0xbf8] sm:$0xff]  ;;  %v13945_v17 = vpack.c.bf16 %v10358_v28, %v10357_v14  ;;  %v10375_v26 = vld [vmem:[%s21845_s15 + $0xf00] sm:$0xff] }
0x2799   :  { %13923 = vmatpush3.bf16.xpose.msk.msra.mxu0 %vm18846_vm5, %v13921_v55  ;;  %v13977_v19 = vpack.c.bf16 %v10374_v16, %v10373_v44  ;;  %v10376_v40 = vld [vmem:[%s21845_s15 + $0xf08] sm:$0xff]  ;;  %v10391_v4 = vld [vmem:[%s21845_s15 + $0xf80] sm:$0xff]  ;;  %v10377_v34 = vld [vmem:[%s21845_s15 + $0xf10] sm:$0xff] }
0x279a   :  { %13955 = vmatpush3.bf16.xpose.msk.msra.mxu1 %vm18846_vm5, %v13953_v32  ;;  %13924 = vmatprep.subr.bf16.mxu0 %v21999_v12  ;;  %v10392_v22 = vld [vmem:[%s21845_s15 + $0xf88] sm:$0xff]  ;;  %v13981_v8 = vpack.c.bf16 %v10376_v40, %v10375_v26  ;;  %v10378_v38 = vld [vmem:[%s21845_s15 + $0xf18] sm:$0xff]  ;;  %v10393_v30 = vld [vmem:[%s21845_s15 + $0xf90] sm:$0xff] }
0x279b   :  { %13956 = vmatprep.subr.bf16.mxu1 %v21999_v12  ;;  %v14005_v33 = vpack.c.bf16 %v10392_v22, %v10391_v4  ;;  %v10394_v29 = vld [vmem:[%s21845_s15 + $0xf98] sm:$0xff]  ;;  %v13984_v37 = vpack.c.bf16 %v10378_v38, %v10377_v34  ;;  %v10379_v23 = vld [vmem:[%s21845_s15 + $0xf20] sm:$0xff]  ;;  %v10380_v48 = vld [vmem:[%s21845_s15 + $0xf28] sm:$0xff] }
0x279c   :  { %v14008_v43 = vpack.c.bf16 %v10394_v29, %v10393_v30  ;;  %v10395_v53 = vld [vmem:[%s21845_s15 + $0xfa0] sm:$0xff]  ;;  %v10396_v42 = vld [vmem:[%s21845_s15 + $0xfa8] sm:$0xff]  ;;  %v13987_v10 = vpack.c.bf16 %v10380_v48, %v10379_v23  ;;  %v10381_v32 = vld [vmem:[%s21845_s15 + $0xf30] sm:$0xff] }
0x279d   :  { %v14011_v55 = vpack.c.bf16 %v10396_v42, %v10395_v53  ;;  %v10382_v51 = vld [vmem:[%s21845_s15 + $0xf38] sm:$0xff]  ;;  %v10397_v41 = vld [vmem:[%s21845_s15 + $0xfb0] sm:$0xff]  ;;  %v10384_v24 = vld [vmem:[%s21845_s15 + $0xf48] sm:$0xff] }
0x279e   :  { %v10398_v46 = vld [vmem:[%s21845_s15 + $0xfb8] sm:$0xff]  ;;  %v13990_v56 = vpack.c.bf16 %v10382_v51, %v10381_v32  ;;  %v10399_v58 = vld [vmem:[%s21845_s15 + $0xfc0] sm:$0xff]  ;;  %v10400_v62 = vld [vmem:[%s21845_s15 + $0xfc8] sm:$0xff] }
0x279f   :  { %v10386_v50 = vld [vmem:[%s21845_s15 + $0xf58] sm:$0xff]  ;;  %v10401_v63 = vld [vmem:[%s21845_s15 + $0xfd0] sm:$0xff]  ;;  %v10388_v31 = vld [vmem:[%s21845_s15 + $0xf68] sm:$0xff] }
0x27a0   :  { %v10402_v0 = vld [vmem:[%s21845_s15 + $0xfd8] sm:$0xff]  ;;  %v10403_v1 = vld [vmem:[%s21845_s15 + $0xfe0] sm:$0xff]  ;;  %v10404_v3 = vld [vmem:[%s21845_s15 + $0xfe8] sm:$0xff] }
0x27a1   :  { %13927 = vmatpush3.bf16.xpose.msk.msra.mxu0 %vm18846_vm5, %v13925_v49  ;;  %v14014_v49 = vpack.c.bf16 %v10398_v46, %v10397_v41  ;;  %v10390_v6 = vld [vmem:[%s21845_s15 + $0xf78] sm:$0xff]  ;;  %v10405_v2 = vld [vmem:[%s21845_s15 + $0xff0] sm:$0xff]  ;;  %v10445_v42 = vld [vmem:[%s21840_s10 + $0x6] ss:$0 sm:$0xff] }
0x27a2   :  { %13959 = vmatpush3.bf16.xpose.msk.msra.mxu1 %vm18846_vm5, %v13957_v18  ;;  %13928 = vmatprep.subr.bf16.mxu0 %v21999_v12  ;;  %v10383_v18 = vld [vmem:[%s21845_s15 + $0xf40] sm:$0xff]  ;;  %v10406_v7 = vld [vmem:[%s21845_s15 + $0xff8] sm:$0xff] }
0x27a3   :  { %13960 = vmatprep.subr.bf16.mxu1 %v21999_v12  ;;  %v13993_v52 = vpack.c.bf16 %v10384_v24, %v10383_v18 }
0x27a9   :  { %13931 = vmatpush3.bf16.xpose.msk.msra.mxu0 %vm18846_vm5, %v13929_v39  ;;  %v14017_v39 = vpack.c.bf16 %v10400_v62, %v10399_v58 }
0x27aa   :  { %13963 = vmatpush3.bf16.xpose.msk.msra.mxu1 %vm18846_vm5, %v13961_v15  ;;  %13932 = vmatprep.subr.bf16.mxu0 %v21999_v12  ;;  %v10385_v15 = vld [vmem:[%s21845_s15 + $0xf50] sm:$0xff] }
0x27ab   :  { %13964 = vmatprep.subr.bf16.mxu1 %v21999_v12  ;;  %v13996_v54 = vpack.c.bf16 %v10386_v50, %v10385_v15 }
0x27b1   :  { %13935 = vmatpush3.bf16.xpose.msk.msra.mxu0 %vm18846_vm5, %v13933_v47  ;;  %v14020_v47 = vpack.c.bf16 %v10402_v0, %v10401_v63  ;;  %v10451_v0 = vld [vmem:[%s21837_s7 + $0x28] sm:$0xff] }
0x27b2   :  { %13967 = vmatpush3.bf16.xpose.msk.msra.mxu1 %vm18846_vm5, %v13965_v35  ;;  %13936 = vmatprep.subr.bf16.mxu0 %v21999_v12  ;;  %v10387_v35 = vld [vmem:[%s21845_s15 + $0xf60] sm:$0xff] }
0x27b3   :  { %13968 = vmatprep.subr.bf16.mxu1 %v21999_v12  ;;  %v13999_v27 = vpack.c.bf16 %v10388_v31, %v10387_v35  ;;  %v10453_v35 = vld [vmem:[%s21837_s7 + $0x38] sm:$0xff] }
0x27b9   :  { %13939 = vmatpush3.bf16.xpose.msk.msra.mxu0 %vm18846_vm5, %v13937_v21  ;;  %v14023_v21 = vpack.c.bf16 %v10404_v3, %v10403_v1  ;;  %v10458_v1 = vld [vmem:[%s21839_s9 + $0x80] sm:$0xff]  ;;  %v10459_v3 = vld [vmem:[%s21839_s9 + $0x88] sm:$0xff] }
0x27ba   :  { %13971 = vmatpush3.bf16.xpose.msk.msra.mxu1 %vm18846_vm5, %v13969_v5  ;;  %13940 = vmatprep.subr.bf16.mxu0 %v21999_v12  ;;  %v10389_v5 = vld [vmem:[%s21845_s15 + $0xf70] sm:$0xff] }
0x27bb   :  { %13972 = vmatprep.subr.bf16.mxu1 %v21999_v12  ;;  %v14002_v13 = vpack.c.bf16 %v10390_v6, %v10389_v5 }
0x27c1   :  { %13943 = vmatpush3.bf16.xpose.msk.msra.mxu0 %vm18846_vm5, %v13941_v11  ;;  %v14026_v11 = vpack.c.bf16 %v10406_v7, %v10405_v2 }
0x27c2   :  { %13975 = vmatpush3.bf16.xpose.msk.msra.mxu1 %vm18846_vm5, %v13973_v36  ;;  %13944 = vmatprep.subr.bf16.mxu0 %v21999_v12 }
0x27c3   :  { %13976 = vmatprep.subr.bf16.mxu1 %v21999_v12 }
0x27c9   :  { %13947 = vmatpush3.bf16.xpose.msk.msra.mxu0 %vm18846_vm5, %v13945_v17 }
0x27ca   :  { %13979 = vmatpush3.bf16.xpose.msk.msra.mxu1 %vm18846_vm5, %v13977_v19  ;;  %13980 = vmatprep.subr.bf16.mxu0 %v21999_v12 }
0x27cb   :  { %14004 = vmatprep.subr.bf16.mxu1 %v21999_v12 }
0x27d0   :  { %12678 = vmatmul.mubr.msk.f32.vlgmr.msra.gmra.mrb[60].mxu0 %vm578_vm1, %v7961_v20 }
0x27d1   :  { %12713 = vmatmul.mubr.msk.f32.vlgmr.msra.gmra.mrb[60].mxu1 %vm578_vm1, %v7966_v9  ;;  %13982 = vmatpush3.bf16.msra.mxu0 %v13981_v8 }
0x27d2   :  { %14006 = vmatpush3.bf16.msra.mxu1 %v14005_v33  ;;  %13983 = vmatprep.subr.bf16.mxu0 %v21999_v12  ;;  %v10441_v33 = vld [vmem:[%s21836_s6 + $0x38] sm:$0xff] }
0x27d3   :  { %14007 = vmatprep.subr.bf16.mxu1 %v21999_v12  ;;  %12747 = vmatprep.mubr.msk.f32.mxu0 %vm14307_vm4, %v21996_v61 }
0x27d4   :  { %12782 = vmatprep.mubr.msk.f32.mxu1 %vm14307_vm4, %v21996_v61 }
0x27d5   :  { %13985 = vmatpush3.bf16.msra.mxu0 %v13984_v37 }
0x27d6   :  { %14009 = vmatpush3.bf16.msra.mxu1 %v14008_v43  ;;  %13986 = vmatprep.subr.bf16.mxu0 %v21999_v12 }
0x27d7   :  { %14010 = vmatprep.subr.bf16.mxu1 %v21999_v12 }
0x27d9   :  { %13988 = vmatpush3.bf16.msra.mxu0 %v13987_v10 }
0x27da   :  { %14012 = vmatpush3.bf16.msra.mxu1 %v14011_v55  ;;  %13989 = vmatprep.subr.bf16.mxu0 %v21999_v12 }
0x27db   :  { %14013 = vmatprep.subr.bf16.mxu1 %v21999_v12 }
0x27dd   :  { %13991 = vmatpush3.bf16.msra.mxu0 %v13990_v56 }
0x27de   :  { %14015 = vmatpush3.bf16.msra.mxu1 %v14014_v49  ;;  %13992 = vmatprep.subr.bf16.mxu0 %v21999_v12 }
0x27df   :  { %14016 = vmatprep.subr.bf16.mxu1 %v21999_v12 }
0x27e1   :  { %13994 = vmatpush3.bf16.msra.mxu0 %v13993_v52 }
0x27e2   :  { %14018 = vmatpush3.bf16.msra.mxu1 %v14017_v39  ;;  %13995 = vmatprep.subr.bf16.mxu0 %v21999_v12 }
0x27e3   :  { %14019 = vmatprep.subr.bf16.mxu1 %v21999_v12 }
0x27e5   :  { %13997 = vmatpush3.bf16.msra.mxu0 %v13996_v54  ;;  %v10452_v54 = vld [vmem:[%s21837_s7 + $0x30] sm:$0xff] }
0x27e6   :  { %14021 = vmatpush3.bf16.msra.mxu1 %v14020_v47  ;;  %13998 = vmatprep.subr.bf16.mxu0 %v21999_v12  ;;  %v14032_v31 = vpack.c.bf16 %v10453_v35, %v10452_v54 }
0x27e7   :  { %14022 = vmatprep.subr.bf16.mxu1 %v21999_v12 }
0x27e9   :  { %14000 = vmatpush3.bf16.msra.mxu0 %v13999_v27  ;;  %v14036_v27 = vpack.c.bf16 %v10459_v3, %v10458_v1  ;;  %v10475_v3 = vld [vmem:[%s21840_s10 + $0xb] ss:$0 sm:$0xff] }
0x27ea   :  { %14024 = vmatpush3.bf16.msra.mxu1 %v14023_v21  ;;  %14001 = vmatprep.subr.bf16.mxu0 %v21999_v12 }
0x27eb   :  { %14025 = vmatprep.subr.bf16.mxu1 %v21999_v12 }
0x27ed   :  { %14003 = vmatpush3.bf16.msra.mxu0 %v14002_v13 }
0x27ee   :  { %14027 = vmatpush3.bf16.msra.mxu1 %v14026_v11 }
0x27ef   :  { %12785 = vmatprep.subr.mxu1 %v10441_v33 }
0x28a3   :  { %v8340_v36 = vpop.f32.mrb[60].mxu0 }
0x28a4   :  { %v8465_v14 = vmul.f32 0.35355338, %v8340_v36  ;;  %v8461_v28 = vpop.f32.mrb[60].mxu1  ;;  %v12679_v44 = vpop.f32.mrb[61].mxu0  ;;  %v10448_v36 = vld [vmem:[%s21840_s10 + $0x7] ss:$0 sm:$0xff] }
0x28a5   :  { %v8466_v16 = vmul.f32 0.35355338, %v8461_v28  ;;  %v12714_v17 = vpop.f32.mrb[61].mxu1 }
0x28a6   :  { %v8467_v19 = vadd.f32 %v8465_v14, %v19120_v57 }
0x28a7   :  { %v8468_v25 = vadd.f32 %v8466_v16, %v19120_v57  ;;  %v10449_v16 = vld [vmem:[%s21840_s10 + $0x8] ss:$0 sm:$0xff] }
0x28a8   :  { %8469 = vmax.xlane.f32.xlu1 %v8467_v19 }
0x28a9   :  { %8471 = vmax.xlane.f32.xlu0 %v8468_v25 }
0x2935   :  { %v8470_v26 = vpop.xlane.xlu1 %8469 }
0x2936   :  { %v8472_v40 = vpop.xlane.xlu0 %8471  ;;  %v8473_v4 = vsub.f32 %v8467_v19, %v8470_v26 }
0x2937   :  { %v8474_v12 = vsub.f32 %v8468_v25, %v8472_v40  ;;  %v10460_v40 = vld [vmem:[%s21839_s9 + $0x90] sm:$0xff] }
0x2938   :  { %v8475_v22 = vmul.f32 1.442695, %v8473_v4  ;;  %v10461_v4 = vld [vmem:[%s21839_s9 + $0x98] sm:$0xff] }
0x2939   :  { %v8477_v20 = vmul.f32 1.442695, %v8474_v12  ;;  %v10462_v12 = vld [vmem:[%s21839_s9 + $0xa0] sm:$0xff] }
0x293a   :  { %14204 = vpow2.f32 %v8475_v22  ;;  %v14040_v22 = vpack.c.bf16 %v10461_v4, %v10460_v40 }
0x293b   :  { %14206 = vpow2.f32 %v8477_v20  ;;  %v10463_v20 = vld [vmem:[%s21839_s9 + $0xa8] sm:$0xff] }
0x2944   :  { %v14205_v9 = vpop.eup %14204 }
0x2945   :  { %v14207_v8 = vpop.eup %14206  ;;  %8479 = vadd.xlane.f32.xlu1 %v14205_v9 }
0x2946   :  { %8481 = vadd.xlane.f32.xlu0 %v14207_v8 }
0x29d2   :  { %v8480_v57 = vpop.xlane.xlu1 %8479 }
0x29d3   :  { %v8482_v34 = vpop.xlane.xlu0 %8481  ;;  %14208 = vrcp.f32 %v8480_v57 }
0x29d4   :  { %14210 = vrcp.f32 %v8482_v34  ;;  %v10466_v34 = vld [vmem:[%s21839_s9 + $0xc0] sm:$0xff] }
0x29dd   :  { %v14209_v38 = vpop.eup %14208 }
0x29de   :  { %v14211_v30 = vpop.eup %14210  ;;  %v8485_v29 = vmul.f32 %v14209_v38, %v14205_v9  ;;  %v14044_v9 = vpack.c.bf16 %v10463_v20, %v10462_v12  ;;  %v10467_v38 = vld [vmem:[%s21839_s9 + $0xc8] sm:$0xff] }
0x29df   :  { %v8486_v37 = vmul.f32 %v14211_v30, %v14207_v8  ;;  %v10464_v8 = vld [vmem:[%s21839_s9 + $0xb0] sm:$0xff]  ;;  %v14052_v30 = vpack.c.bf16 %v10467_v38, %v10466_v34  ;;  %v9035_v12 = vld [vmem:[%s21841_s11 + $0x28] sm:$0xff]  ;;  %v9038_v38 = vld [vmem:[%s21841_s11 + $0x40] sm:$0xff] }
0x29e0   :  { %12748 = vmatmul.mubr.f32.vlgmr.msra.gmra.mrb[62].mxu0 %v8485_v29  ;;  %v10468_v29 = vld [vmem:[%s21839_s9 + $0xd0] sm:$0xff] }
0x29e1   :  { %12783 = vmatmul.mubr.f32.vlgmr.msra.gmra.mrb[62].mxu1 %v8486_v37  ;;  %v10469_v37 = vld [vmem:[%s21839_s9 + $0xd8] sm:$0xff] }
0x29e2   :  { %12786 = vmatpush3.msra.mxu1 %v10441_v33  ;;  %v10465_v33 = vld [vmem:[%s21839_s9 + $0xb8] sm:$0xff] }
0x29e3   :  { %v14048_v57 = vpack.c.bf16 %v10465_v33, %v10464_v8  ;;  %v9039_v8 = vld [vmem:[%s21841_s11 + $0x48] sm:$0xff] }
0x29e4   :  { %v9043_v33 = vld [vmem:[%s21841_s11 + $0x68] sm:$0xff] }
0x29e5   :  { %v14072_v34 = vpack.c.bf16 %v9043_v33, %v9039_v8 }
0x2ab3   :  { %v8553_v43 = vpop.f32.mrb[62].mxu0 }
0x2ab4   :  { %v8623_v23 = vpop.f32.mrb[62].mxu1  ;;  %v12749_v48 = vpop.f32.mrb[63].mxu0  ;;  %12787 = vmatprep.mubr.msk.f32.mxu1 %vm578_vm1, %v8553_v43  ;;  %v14056_v43 = vpack.c.bf16 %v10469_v37, %v10468_v29  ;;  %v9033_v29 = vld [vmem:[%s21841_s11 + $0x18] sm:$0xff] }
0x2ab5   :  { %v12784_v53 = vpop.f32.mrb[63].mxu1  ;;  %12788 = vmatmul.mubr.msk.f32.vlgmr.msra.gmra.mrb[48].mxu1 %vm578_vm1, %v8623_v23  ;;  %v10470_v23 = vld [vmem:[%s21839_s9 + $0xe0] sm:$0xff]  ;;  %v10471_v48 = vld [vmem:[%s21839_s9 + $0xe8] sm:$0xff]  ;;  %v9037_v37 = vld [vmem:[%s21841_s11 + $0x38] sm:$0xff] }
0x2ab6   :  { %9138 = vmatprep.mubr.f32.mxu1 %v21996_v61  ;;  %v14060_v53 = vpack.c.bf16 %v10471_v48, %v10470_v23  ;;  %v14076_v23 = vpack.c.bf16 %v9037_v37, %v9033_v29 }
0x2b88   :  { %v12789_v10 = vpop.f32.mrb[48].mxu1 }
0x2b89   :  { %v8721_v55 = vadd.f32 %v12789_v10, %v10445_v42  ;;  %v8701_v32 = vpop.f32.mrb[49].mxu1  ;;  %v10473_v10 = vld [vmem:[%s21839_s9 + $0xf8] sm:$0xff] }
0x2b8a   :  { %v8720_v51 = vadd.f32 %v10445_v42, %v8701_v32  ;;  %v10472_v42 = vld [vmem:[%s21839_s9 + $0xf0] sm:$0xff]  ;;  %v10455_v32 = vld [vmem:[%s21838_s8 + $0x1] ss:$0 sm:$0xff] }
0x2b8b   :  { %v8723_v41 = vadd.f32 %v8721_v55, %v20297_v60  ;;  %v14064_v55 = vpack.c.bf16 %v10473_v10, %v10472_v42 }
0x2b8c   :  { %v8722_v46 = vadd.f32 %v8720_v51, %v20295_v59  ;;  %v10450_v59 = vld [vmem:[%s21837_s7 + $0x20] sm:$0xff] }
0x2b8d   :  { %v8731_v56 = vsel %vm1473_vm0, %v8723_v41, 0.0  ;;  %v14028_v47 = vpack.c.bf16 %v10451_v0, %v10450_v59 }
0x2b8e   :  { %8732 = vadd.xlane.f32.xlu0 %v8731_v56  ;;  %v8728_v49 = vsel %vm1473_vm0, %v8722_v46, 0.0 }
0x2b8f   :  { %8729 = vadd.xlane.f32.xlu1 %v8728_v49  ;;  %14029 = vmatprep.subr.bf16.mxu0 %v14028_v47 }
0x2b90   :  { %14031 = vmatpush3.bf16.msra.mxu0 %v14028_v47 }
0x2b91   :  { %14033 = vmatprep.subr.bf16.mxu0 %v14032_v31 }
0x2b94   :  { %14035 = vmatpush3.bf16.msra.mxu0 %v14032_v31 }
0x2b95   :  { %14037 = vmatprep.subr.bf16.mxu0 %v14036_v27 }
0x2c1b   :  { %v8733_v18 = vpop.xlane.xlu0 %8732 }
0x2c1c   :  { %v8735_v24 = vmul.f32 0.03125, %v8733_v18  ;;  %v8730_v58 = vpop.xlane.xlu1 %8729 }
0x2c1d   :  { %v8734_v62 = vmul.f32 0.03125, %v8730_v58 }
0x2c1e   :  { %v8737_v52 = vsub.f32 %v8723_v41, %v8735_v24 }
0x2c1f   :  { %v8736_v39 = vsub.f32 %v8722_v46, %v8734_v62 }
0x2c20   :  { %v8739_v15 = vmul.f32 %v8737_v52, %v8737_v52 }
0x2c21   :  { %v8738_v50 = vmul.f32 %v8736_v39, %v8736_v39 }
0x2c22   :  { %v8743_v63 = vsel %vm1473_vm0, %v8739_v15, 0.0 }
0x2c23   :  { %8744 = vadd.xlane.f32.xlu0 %v8743_v63  ;;  %v8740_v60 = vsel %vm1473_vm0, %v8738_v50, 0.0 }
0x2c24   :  { %8741 = vadd.xlane.f32.xlu1 %v8740_v60 }
0x2cb0   :  { %v8745_v21 = vpop.xlane.xlu0 %8744 }
0x2cb1   :  { %v8747_v5 = vmul.f32 0.03125, %v8745_v21  ;;  %v8742_v6 = vpop.xlane.xlu1 %8741 }
0x2cb2   :  { %v8746_v2 = vmul.f32 0.03125, %v8742_v6 }
0x2cb3   :  { %v8749_v7 = vadd.f32 1e-05, %v8747_v5 }
0x2cb4   :  { %v8748_v13 = vadd.f32 1e-05, %v8746_v2 }
0x2cb5   :  { %14212 = vrsqrt.f32 %v8749_v7 }
0x2cb6   :  { %14214 = vrsqrt.f32 %v8748_v13 }
0x2cbf   :  { %v14213_v11 = vpop.eup %14212 }
0x2cc0   :  { %v14215_v14 = vpop.eup %14214  ;;  %v8753_v28 = vmul.f32 %v14213_v11, %v8737_v52 }
0x2cc1   :  { %v8752_v44 = vmul.f32 %v14215_v14, %v8736_v39 }
0x2cc2   :  { %v8761_v17 = vmul.f32 %v10448_v36, %v8753_v28 }
0x2cc3   :  { %v8760_v19 = vmul.f32 %v10448_v36, %v8752_v44 }
0x2cc4   :  { %v21690_v26 = vadd.f32 %v10449_v16, %v8761_v17 }
0x2cc5   :  { %v21688_v25 = vadd.f32 %v10449_v16, %v8760_v19 }
0x2cc7   :  { %12798 = vmatprep.mubr.msk.f32.mxu0 %vm1473_vm0, %v21688_v25 }
0x2cc8   :  { %12799 = vmatmul.mubr.msk.f32.vlgmr.msra.gmra.mrb[64].mxu0 %vm1473_vm0, %v21690_v26 }
0x2cc9   :  { %14039 = vmatpush3.bf16.msra.mxu0 %v14036_v27 }
0x2cca   :  { %14041 = vmatprep.subr.bf16.mxu0 %v14040_v22 }
0x2ccd   :  { %14043 = vmatpush3.bf16.msra.mxu0 %v14040_v22  ;;  %v9030_v22 = vld [vmem:[%s21841_s11] sm:$0xff] }
0x2cce   :  { %14045 = vmatprep.subr.bf16.mxu0 %v14044_v9 }
0x2cd1   :  { %14047 = vmatpush3.bf16.msra.mxu0 %v14044_v9  ;;  %v9034_v9 = vld [vmem:[%s21841_s11 + $0x20] sm:$0xff] }
0x2cd2   :  { %14049 = vmatprep.subr.bf16.mxu0 %v14048_v57 }
0x2cd5   :  { %14051 = vmatpush3.bf16.msra.mxu0 %v14048_v57  ;;  %v14070_v57 = vpack.c.bf16 %v9034_v9, %v9030_v22 }
0x2cd6   :  { %14053 = vmatprep.subr.bf16.mxu0 %v14052_v30 }
0x2cd9   :  { %14055 = vmatpush3.bf16.msra.mxu0 %v14052_v30  ;;  %v9042_v30 = vld [vmem:[%s21841_s11 + $0x60] sm:$0xff] }
0x2cda   :  { %14057 = vmatprep.subr.bf16.mxu0 %v14056_v43 }
0x2cdd   :  { %14059 = vmatpush3.bf16.msra.mxu0 %v14056_v43  ;;  %v14074_v43 = vpack.c.bf16 %v9042_v30, %v9038_v38 }
0x2cde   :  { %14061 = vmatprep.subr.bf16.mxu0 %v14060_v53 }
0x2ce1   :  { %14063 = vmatpush3.bf16.msra.mxu0 %v14060_v53 }
0x2ce2   :  { %14065 = vmatprep.subr.bf16.mxu0 %v14064_v55 }
0x2ce5   :  { %14067 = vmatpush3.bf16.msra.mxu0 %v14064_v55 }
0x2d9b   :  { %v12800_v51 = vpop.f32.mrb[64].mxu0 }
0x2d9c   :  { %v8861_v41 = vadd.f32 %v12800_v51, %v10455_v32  ;;  %v8855_v46 = vpop.f32.mrb[65].mxu0 }
0x2d9d   :  { %v8856_v56 = vadd.f32 %v10455_v32, %v8855_v46  ;;  %v10478_v46 = vld [vmem:[%s21840_s10 + $0x9] ss:$0 sm:$0xff] }
0x2d9e   :  { %v8867_v49 = vmul.f32 0.044715, %v8861_v41  ;;  %v8865_v35 = vmul.f32 0.5, %v8861_v41 }
0x2d9f   :  { %v8866_v18 = vmul.f32 0.044715, %v8856_v56  ;;  %v8864_v54 = vmul.f32 0.5, %v8856_v56 }
0x2da0   :  { %v8869_v24 = vmul.f32 %v8867_v49, %v8861_v41  ;;  %v9032_v49 = vld [vmem:[%s21841_s11 + $0x10] sm:$0xff] }
0x2da1   :  { %v8868_v58 = vmul.f32 %v8866_v18, %v8856_v56  ;;  %v9036_v18 = vld [vmem:[%s21841_s11 + $0x30] sm:$0xff] }
0x2da2   :  { %v8871_v62 = vmul.f32 %v8869_v24, %v8861_v41 }
0x2da3   :  { %v8870_v52 = vmul.f32 %v8868_v58, %v8856_v56  ;;  %v10479_v58 = vld [vmem:[%s21840_s10 + $0xa] ss:$0 sm:$0xff] }
0x2da4   :  { %v8873_v39 = vadd.f32 %v8871_v62, %v8861_v41  ;;  %v9041_v62 = vld [vmem:[%s21841_s11 + $0x58] sm:$0xff] }
0x2da5   :  { %v8872_v15 = vadd.f32 %v8870_v52, %v8856_v56  ;;  %v9045_v52 = vld [vmem:[%s21841_s11 + $0x78] sm:$0xff] }
0x2da6   :  { %v8875_v50 = vmul.f32 0.7978846, %v8873_v39 }
0x2da7   :  { %v8874_v63 = vmul.f32 0.7978846, %v8872_v15  ;;  %v14078_v15 = vpack.c.bf16 %v9036_v18, %v9032_v49 }
0x2da8   :  { %14216 = vtanh.f32 %v8875_v50 }
0x2da9   :  { %14218 = vtanh.f32 %v8874_v63  ;;  %v14080_v63 = vpack.c.bf16 %v9045_v52, %v9041_v62 }
0x2db2   :  { %v14217_v60 = vpop.eup %14216 }
0x2db3   :  { %v14219_v59 = vpop.eup %14218  ;;  %v8879_v0 = vadd.f32 1.0, %v14217_v60 }
0x2db4   :  { %v8878_v47 = vadd.f32 1.0, %v14219_v59  ;;  %v9040_v59 = vld [vmem:[%s21841_s11 + $0x50] sm:$0xff] }
0x2db5   :  { %v8881_v1 = vmul.f32 %v8879_v0, %v8865_v35  ;;  %v9044_v0 = vld [vmem:[%s21841_s11 + $0x70] sm:$0xff]  ;;  %v9050_v35 = vsub.s32 0, %v22000_v45 }
0x2db6   :  { %v8880_v31 = vmul.f32 %v8878_v47, %v8864_v54  ;;  %v14082_v54 = vpack.c.bf16 %v9044_v0, %v9040_v59 }
0x2db8   :  { %12833 = vmatprep.mubr.f32.mxu0 %v8880_v31  ;;  %v9046_v31 = vld [vmem:[%s21842_s12] sm:$0xf]  ;;  %s14309_s12 = smov [#allocation5]  }
0x2db9   :  { %12834 = vmatmul.mubr.f32.vlgmr.msra.gmra.mrb[66].mxu0 %v8881_v1  ;;  %v9051_v1 = vrot.slane %v9046_v31, %v9050_v35  ;;  %s9313_s22 = sshll.u32 %s14309_s12, 4  ;;  %s9314_s22 = int_to_ptr.vmem [resolvable:$true] %s9313_s22 }
0x2dba   :  { %s14268_s30 = scalar_lea.vmem %s9314_s22, 1024  ;;  %p14273_p6 = scmp.lt.s32.totalorder %s9314_s22, %s9314_s22 }
0x2dbb   :  { %p14269_p5 = scmp.ne.s32.totalorder %s9314_s22, %s14268_s30  ;;  %p14274_p7 = scmp.lt.s32.totalorder %s14268_s30, %s14268_s30 }
0x2dbd   :  { %p14275_p8 = por %p14274_p7, %p14273_p6 }
0x2dbf   :  { %p14276_p9 = pnand %p14275_p8, %p14269_p5 }
0x2e8c   :  { %v12835_v27 = vpop.f32.mrb[66].mxu0 }
0x2e8d   :  { %v8979_v21 = vadd.f32 %v12835_v27, %v10475_v3  ;;  %v8973_v5 = vpop.f32.mrb[67].mxu0 }
0x2e8e   :  { %v8974_v6 = vadd.f32 %v10475_v3, %v8973_v5  ;;  %v9054_v3 = vsub.s32 1, %v22000_v45 }
0x2e8f   :  { %v8983_v2 = vadd.f32 %v8979_v21, %v21690_v26 }
0x2e90   :  { %v8982_v7 = vadd.f32 %v8974_v6, %v21688_v25  ;;  %v9031_v25 = vld [vmem:[%s21841_s11 + $0x8] sm:$0xff]  ;;  %v9055_v5 = vrot.slane %v9046_v31, %v9054_v3 }
0x2e91   :  { %v8991_v13 = vsel %vm1473_vm0, %v8983_v2, 0.0  ;;  %v14068_v20 = vpack.c.bf16 %v9035_v12, %v9031_v25 }
0x2e92   :  { %8992 = vadd.xlane.f32.xlu0 %v8991_v13  ;;  %v8988_v11 = vsel %vm1473_vm0, %v8982_v7, 0.0 }
0x2e93   :  { %8989 = vadd.xlane.f32.xlu1 %v8988_v11  ;;  %14069 = vmatprep.subr.bf16.mxu1 %v14068_v20 }
0x2e94   :  { %14071 = vmatpush1.bf16.msra.mxu1 %v14070_v57 }
0x2e95   :  { %14073 = vmatprep.subr.bf16.mxu1 %v14072_v34 }
0x2e98   :  { %14075 = vmatpush1.bf16.msra.mxu1 %v14074_v43 }
0x2e99   :  { %14077 = vmatprep.subr.bf16.mxu1 %v14076_v23 }
0x2f1f   :  { %v8993_v36 = vpop.xlane.xlu0 %8992 }
0x2f20   :  { %v8995_v14 = vmul.f32 0.03125, %v8993_v36  ;;  %v8990_v28 = vpop.xlane.xlu1 %8989 }
0x2f21   :  { %v8994_v44 = vmul.f32 0.03125, %v8990_v28 }
0x2f22   :  { %v8997_v16 = vsub.f32 %v8983_v2, %v8995_v14  ;;  %v9058_v2 = vsub.s32 2, %v22000_v45  ;;  %v9062_v14 = vsub.s32 3, %v22000_v45 }
0x2f23   :  { %v8996_v17 = vsub.f32 %v8982_v7, %v8994_v44 }
0x2f24   :  { %v8999_v19 = vmul.f32 %v8997_v16, %v8997_v16  ;;  %v9059_v36 = vrot.slane %v9046_v31, %v9058_v2 }
0x2f25   :  { %v8998_v40 = vmul.f32 %v8996_v17, %v8996_v17 }
0x2f26   :  { %v9003_v4 = vsel %vm1473_vm0, %v8999_v19, 0.0 }
0x2f27   :  { %9004 = vadd.xlane.f32.xlu0 %v9003_v4  ;;  %v9000_v26 = vsel %vm1473_vm0, %v8998_v40, 0.0 }
0x2f28   :  { %9001 = vadd.xlane.f32.xlu1 %v9000_v26 }
0x2fb4   :  { %v9005_v48 = vpop.xlane.xlu0 %9004 }
0x2fb5   :  { %v9007_v53 = vmul.f32 0.03125, %v9005_v48  ;;  %v9002_v42 = vpop.xlane.xlu1 %9001 }
0x2fb6   :  { %v9006_v10 = vmul.f32 0.03125, %v9002_v42 }
0x2fb7   :  { %v9009_v55 = vadd.f32 1e-05, %v9007_v53 }
0x2fb8   :  { %v9008_v32 = vadd.f32 1e-05, %v9006_v10 }
0x2fb9   :  { %14220 = vrsqrt.f32 %v9009_v55 }
0x2fba   :  { %14222 = vrsqrt.f32 %v9008_v32 }
0x2fc3   :  { %v14221_v51 = vpop.eup %14220 }
0x2fc4   :  { %v14223_v41 = vpop.eup %14222  ;;  %v9013_v24 = vmul.f32 %v14221_v51, %v8997_v16 }
0x2fc5   :  { %v9012_v56 = vmul.f32 %v14223_v41, %v8996_v17  ;;  %v9063_v17 = vrot.slane %v9046_v31, %v9062_v14 }
0x2fc6   :  { %v9021_v60 = vmul.f32 %v10478_v46, %v9013_v24 }
0x2fc7   :  { %v9020_v39 = vmul.f32 %v10478_v46, %v9012_v56 }
0x2fc8   :  { %v9029_v47 = vadd.f32 %v10479_v58, %v9021_v60 }
0x2fc9   :  { %v9028_v50 = vadd.f32 %v10479_v58, %v9020_v39 }
0x2fcb   :  { %10480 = vmatmul.mubr.msk.f32.vlgmr.msra.gmra.mrb[64].mxu1 %vm1473_vm0, %v9028_v50 }
0x2fcc   :  { %14079 = vmatpush1.bf16.msra.mxu1 %v14078_v15  ;;  %9144 = vmatprep.mubr.f32.mxu1 %v21996_v61 }
0x2fcd   :  { %14081 = vmatprep.subr.bf16.mxu1 %v14080_v63 }
0x2fcf   :  { %10481 = vmatmul.mubr.msk.f32.gmra.mrb[66].mxu1 %vm1473_vm0, %v9029_v47 }
0x2fd0   :  { %14083 = vmatpush1.bf16.msra.mxu1 %v14082_v54  ;;  %9215 = vmatprep.mubr.f32.mxu1 %v21996_v61 }
0x2fd3   :  { %10482 = vmatmul.mubr.msk.f32.vlgmr.msra.gmra.mrb[68].mxu1 %vm1473_vm0, %v9028_v50 }
0x2fd4   :  { %9221 = vmatprep.mubr.f32.mxu1 %v21996_v61 }
0x2fd7   :  { %10483 = vmatmul.mubr.msk.f32.gmra.mrb[70].mxu1 %vm1473_vm0, %v9029_v47 }
0x309e   :  { %v9140_v27 = vpop.f32.mrb[64].mxu1 }
0x309f   :  { %v9141_v21 = vadd.f32 %v9140_v27, %v9051_v1  ;;  %v9142_v6 = vpop.f32.mrb[65].mxu1 }
0x30a0   :  { %v9143_v61 = vadd.f32 %v9142_v6, %v9055_v5 }
0x30a1   :  { %9228 = vmax.xlane.f32.xlu1 %v9141_v21 }
0x30a2   :  { %v9146_v7 = vpop.f32.mrb[66].mxu1 }
0x30a3   :  { %v9147_v13 = vadd.f32 %v9146_v7, %v9051_v1  ;;  %v9148_v11 = vpop.f32.mrb[67].mxu1 }
0x30a4   :  { %v9149_v44 = vadd.f32 %v9148_v11, %v9055_v5 }
0x30a5   :  { %9230 = vmax.xlane.f32.xlu0 %v9147_v13  ;;  %9248 = vmax.xlane.f32.xlu1 %v9143_v61 }
0x30a6   :  { %v9217_v28 = vpop.f32.mrb[68].mxu1 }
0x30a7   :  { %v9218_v16 = vadd.f32 %v9217_v28, %v9059_v36  ;;  %v9219_v19 = vpop.f32.mrb[69].mxu1 }
0x30a8   :  { %v9220_v4 = vadd.f32 %v9219_v19, %v9063_v17 }
0x30a9   :  { %9250 = vmax.xlane.f32.xlu0 %v9149_v44  ;;  %9268 = vmax.xlane.f32.xlu1 %v9218_v16 }
0x30aa   :  { %v9223_v40 = vpop.f32.mrb[70].mxu1 }
0x30ab   :  { %v9224_v26 = vadd.f32 %v9223_v40, %v9059_v36  ;;  %v9225_v25 = vpop.f32.mrb[71].mxu1 }
0x30ac   :  { %v9226_v12 = vadd.f32 %v9225_v25, %v9063_v17 }
0x30ad   :  { %9270 = vmax.xlane.f32.xlu0 %v9224_v26  ;;  %9288 = vmax.xlane.f32.xlu1 %v9220_v4 }
0x30b1   :  { %9290 = vmax.xlane.f32.xlu0 %v9226_v12 }
0x312e   :  { %v9229_v22 = vpop.xlane.xlu1 %9228 }
0x312f   :  { %v9232_v20 = vsub.f32 %v9141_v21, %v9229_v22 }
0x3131   :  { %v9234_v45 = vmul.f32 1.442695, %v9232_v20 }
0x3132   :  { %v9231_v9 = vpop.xlane.xlu0 %9230  ;;  %v9249_v8 = vpop.xlane.xlu1 %9248 }
0x3133   :  { %14224 = vpow2.f32 %v9234_v45  ;;  %v9233_v33 = vsub.f32 %v9147_v13, %v9231_v9  ;;  %v9252_v57 = vsub.f32 %v9143_v61, %v9249_v8 }
0x3135   :  { %v9236_v34 = vmul.f32 1.442695, %v9233_v33  ;;  %v9254_v38 = vmul.f32 1.442695, %v9252_v57 }
0x3136   :  { %v9251_v30 = vpop.xlane.xlu0 %9250  ;;  %v9269_v29 = vpop.xlane.xlu1 %9268 }
0x3137   :  { %14226 = vpow2.f32 %v9236_v34  ;;  %v9253_v37 = vsub.f32 %v9149_v44, %v9251_v30  ;;  %v9272_v43 = vsub.f32 %v9218_v16, %v9269_v29 }
0x3138   :  { %14228 = vpow2.f32 %v9254_v38 }
0x3139   :  { %v9256_v23 = vmul.f32 1.442695, %v9253_v37  ;;  %v9274_v48 = vmul.f32 1.442695, %v9272_v43 }
0x313a   :  { %v9271_v53 = vpop.xlane.xlu0 %9270  ;;  %v9289_v42 = vpop.xlane.xlu1 %9288 }
0x313b   :  { %14230 = vpow2.f32 %v9256_v23  ;;  %v9273_v10 = vsub.f32 %v9224_v26, %v9271_v53  ;;  %v9292_v55 = vsub.f32 %v9220_v4, %v9289_v42 }
0x313c   :  { %14232 = vpow2.f32 %v9274_v48 }
0x313d   :  { %v14225_v32 = vpop.eup %14224  ;;  %v9276_v51 = vmul.f32 1.442695, %v9273_v10  ;;  %v9294_v41 = vmul.f32 1.442695, %v9292_v55 }
0x313e   :  { %v9291_v46 = vpop.xlane.xlu0 %9290  ;;  %9238 = vadd.xlane.f32.xlu1 %v14225_v32 }
0x313f   :  { %14234 = vpow2.f32 %v9276_v51  ;;  %v9293_v56 = vsub.f32 %v9226_v12, %v9291_v46 }
0x3140   :  { %14236 = vpow2.f32 %v9294_v41 }
0x3141   :  { %v14227_v49 = vpop.eup %14226  ;;  %v9296_v18 = vmul.f32 1.442695, %v9293_v56 }
0x3142   :  { %v14229_v24 = vpop.eup %14228  ;;  %9240 = vadd.xlane.f32.xlu0 %v14227_v49 }
0x3143   :  { %14238 = vpow2.f32 %v9296_v18  ;;  %9258 = vadd.xlane.f32.xlu1 %v14229_v24 }
0x3145   :  { %v14231_v58 = vpop.eup %14230 }
0x3146   :  { %v14233_v62 = vpop.eup %14232  ;;  %9260 = vadd.xlane.f32.xlu0 %v14231_v58 }
0x3147   :  { %9278 = vadd.xlane.f32.xlu1 %v14233_v62 }
0x3149   :  { %v14235_v52 = vpop.eup %14234 }
0x314a   :  { %v14237_v39 = vpop.eup %14236  ;;  %9280 = vadd.xlane.f32.xlu0 %v14235_v52 }
0x314b   :  { %9298 = vadd.xlane.f32.xlu1 %v14237_v39 }
0x314d   :  { %v14239_v15 = vpop.eup %14238 }
0x314e   :  { %9300 = vadd.xlane.f32.xlu0 %v14239_v15 }
0x31cb   :  { %v9239_v50 = vpop.xlane.xlu1 %9238 }
0x31cc   :  { %14240 = vrcp.f32 %v9239_v50 }
0x31cf   :  { %v9241_v63 = vpop.xlane.xlu0 %9240 }
0x31d0   :  { %14242 = vrcp.f32 %v9241_v63  ;;  %v9259_v60 = vpop.xlane.xlu1 %9258 }
0x31d1   :  { %14244 = vrcp.f32 %v9259_v60 }
0x31d3   :  { %v9261_v59 = vpop.xlane.xlu0 %9260 }
0x31d4   :  { %14246 = vrcp.f32 %v9261_v59  ;;  %v9279_v0 = vpop.xlane.xlu1 %9278 }
0x31d5   :  { %14248 = vrcp.f32 %v9279_v0 }
0x31d6   :  { %v14241_v54 = vpop.eup %14240 }
0x31d7   :  { %v9243_v47 = vmul.f32 %v14241_v54, %v14225_v32  ;;  %v9281_v35 = vpop.xlane.xlu0 %9280 }
0x31d8   :  { %14250 = vrcp.f32 %v9281_v35  ;;  %v9299_v31 = vpop.xlane.xlu1 %9298 }
0x31d9   :  { %9246 = vst [vmem:[#allocation5] sm:$0xff] %v9243_v47  ;;  %14252 = vrcp.f32 %v9299_v31 }
0x31da   :  { %v14243_v1 = vpop.eup %14242 }
0x31db   :  { %v14245_v3 = vpop.eup %14244  ;;  %v9245_v27 = vmul.f32 %v14243_v1, %v14227_v49  ;;  %v9301_v21 = vpop.xlane.xlu0 %9300 }
0x31dc   :  { %v9263_v5 = vmul.f32 %v14245_v3, %v14229_v24  ;;  %14254 = vrcp.f32 %v9301_v21 }
0x31dd   :  { %9247 = vst [vmem:[#allocation5 + $0x20] sm:$0xff] %v9245_v27 }
0x31de   :  { %v14247_v6 = vpop.eup %14246  ;;  %9266 = vst [vmem:[#allocation5 + $0x8] sm:$0xff] %v9263_v5 }
0x31df   :  { %v14249_v2 = vpop.eup %14248  ;;  %v9265_v7 = vmul.f32 %v14247_v6, %v14231_v58 }
0x31e0   :  { %v9283_v61 = vmul.f32 %v14249_v2, %v14233_v62 }
0x31e1   :  { %9267 = vst [vmem:[#allocation5 + $0x28] sm:$0xff] %v9265_v7 }
0x31e2   :  { %v14251_v13 = vpop.eup %14250  ;;  %9286 = vst [vmem:[#allocation5 + $0x10] sm:$0xff] %v9283_v61 }
0x31e3   :  { %v14253_v11 = vpop.eup %14252  ;;  %v9285_v36 = vmul.f32 %v14251_v13, %v14235_v52 }
0x31e4   :  { %v9303_v14 = vmul.f32 %v14253_v11, %v14237_v39 }
0x31e5   :  { %9287 = vst [vmem:[#allocation5 + $0x30] sm:$0xff] %v9285_v36 }
0x31e6   :  { %v14255_v28 = vpop.eup %14254  ;;  %9306 = vst [vmem:[#allocation5 + $0x18] sm:$0xff] %v9303_v14 }
0x31e7   :  { %v9305_v44 = vmul.f32 %v14255_v28, %v14239_v15 }
0x31e9   :  { %9307 = vst [vmem:[#allocation5 + $0x38] sm:$0xff] %v9305_v44 }
0x31ea   :  { %14279 = shalt.err (!%p14276_p9)
}
0x31eb   :  { %s14280_s18 = scalar_lea.hbm %s21844_s14, 1024 }
0x31ec   :  { %p14281_p10 = scmp.ne.s32.totalorder %s21844_s14, %s14280_s18  ;;  %p14284_p11 = scmp.lt.u32.totalorder %s14280_s18, %s21844_s14 }
0x31ee   :  { %p14286_p12 = pnand %p14284_p11, %p14281_p10 }
0x31f0   :  { %14289 = shalt.err (!%p14286_p12)
}
0x31f1   :  { %s14310_s20 = smov 512   ;;  %s14311_s21 = smov 32  }
0x31f2   :  { %9319 = dma.vmem_to_hbm [thread:$0]  %s9314_s22, 1024, %s21844_s14, [#allocation3], %s14310_s20, %s14310_s20, %s14311_s21  }
0x31f3   :  { %14292 = dma.done.wait [#allocation3], 1024  }
0x31f4   :  { %14293 = vsyncadd [#allocation3], 4294966272 }
0x31f5   :  { %9327 = vsyncpa [#allocation3], 1 }
0x31f6   :  { %9328 = vsyncpa [#allocation4], 1 }

</bundles_post_ra>
